<compile_context>
chip_gen: v7x
topology: tpu7x:2x2x1
jax: 0.10.0
libtpu: 0.0.40
codegen_flags: <defaults>
</compile_context>

<pallas_src>
import jax
import jax.numpy as jnp
from jax.experimental import pallas as pl
from jax.experimental.pallas import tpu as pltpu


# ----------------------------- config (small, lane-dense) -----------------------------
BATCH = 2
SEQ = 32
HIDDEN = 128            # lane-dense (multiple of 128)
NUM_HEADS = 4
HEAD_DIM = HIDDEN // NUM_HEADS
FILTER = 512
NUM_LAYERS = 2
VOCAB = 256
LN_EPS = 1e-5
M = BATCH * SEQ         # flattened token rows


# ----------------------------- fused kernel -----------------------------
def _layer_norm_f32(x, g, b, eps):
    mu = jnp.mean(x, axis=-1, keepdims=True)
    xc = x - mu
    var = jnp.mean(xc * xc, axis=-1, keepdims=True)
    return xc * jax.lax.rsqrt(var + eps) * g + b


def gpt2_fused_kernel(ids_ref, labels_ref, maskrow_ref, keymask_ref,
                      wte_ref, wpe_ref,
                      ln1g_ref, ln1b_ref, wqkv_ref, bqkv_ref, wo_ref, bo_ref,
                      ln2g_ref, ln2b_ref, w1_ref, b1_ref, w2_ref, b2_ref,
                      lnfg_ref, lnfb_ref,
                      logits_ref, loss_ref):
    f32 = jnp.float32
    bf16 = jnp.bfloat16
    D = HIDDEN
    scale = 1.0 / (HEAD_DIM ** 0.5)

    # ---- embeddings: one-hot @ wte on the MXU (no gather), + learned pos-emb ----
    vocab_iota = jax.lax.broadcasted_iota(jnp.int32, (M, VOCAB), 1)
    tok_onehot = (vocab_iota == ids_ref[...]).astype(bf16)            # (M, V)
    x = jnp.dot(tok_onehot, wte_ref[...], preferred_element_type=f32)  # (M, D) f32
    x = x + wpe_ref[...].astype(f32)     # embeddings_scale = 1.0, offset = 0

    # ---- block-diagonal(batch) x causal x key-padding mask, built once in-kernel ----
    row = jax.lax.broadcasted_iota(jnp.int32, (M, M), 0)
    col = jax.lax.broadcasted_iota(jnp.int32, (M, M), 1)
    same_batch = None
    for b in range(BATCH):               # static, fully unrolled (no int division needed)
        rb = (row >= b * SEQ) & (row < (b + 1) * SEQ)
        cb = (col >= b * SEQ) & (col < (b + 1) * SEQ)
        blk = rb & cb
        same_batch = blk if same_batch is None else (same_batch | blk)
    km = keymask_ref[...]                # (1, M) int32 key-padding mask
    allowed = same_batch & (row >= col) & (km > 0)

    # ---- transformer layers (static unrolled) ----
    for l in range(NUM_LAYERS):
        # pre-LN self-attention: LN1 + fused QKV projection
        y = _layer_norm_f32(x, ln1g_ref[l], ln1b_ref[l], LN_EPS)
        qkv = jnp.dot(y.astype(bf16), wqkv_ref[l], preferred_element_type=f32)
        qkv = (qkv + bqkv_ref[l]).astype(bf16)                         # (M, 3D)

        head_outs = []
        for h in range(NUM_HEADS):       # static, fully unrolled
            q_h = qkv[:, h * HEAD_DIM:(h + 1) * HEAD_DIM]
            k_h = qkv[:, D + h * HEAD_DIM: D + (h + 1) * HEAD_DIM]
            v_h = qkv[:, 2 * D + h * HEAD_DIM: 2 * D + (h + 1) * HEAD_DIM]
            # q @ k^T via dot_general contraction (K^T never materialized)
            s = jax.lax.dot_general(q_h, k_h, (((1,), (1,)), ((), ())),
                                    preferred_element_type=f32) * scale
            s = jnp.where(allowed, s, -1e9)                            # softmax in f32
            mx = jnp.max(s, axis=-1, keepdims=True)
            p = jnp.exp(s - mx)
            denom = jnp.sum(p, axis=-1, keepdims=True)
            p = p * pl.reciprocal(denom, approx=True)                  # EUP slot
            head_outs.append(jnp.dot(p.astype(bf16), v_h,
                                     preferred_element_type=f32))      # (M, Dh)
        attn = jnp.concatenate(head_outs, axis=-1)                     # (M, D) f32

        # O-proj + bias + residual
        x = x + jnp.dot(attn.astype(bf16), wo_ref[l],
                        preferred_element_type=f32) + bo_ref[l]

        # pre-LN GELU FFN
        y = _layer_norm_f32(x, ln2g_ref[l], ln2b_ref[l], LN_EPS)
        h1 = jnp.dot(y.astype(bf16), w1_ref[l], preferred_element_type=f32) + b1_ref[l]
        h1 = jax.nn.gelu(h1, approximate=True)                         # GPT-2 tanh GELU
        x = x + jnp.dot(h1.astype(bf16), w2_ref[l],
                        preferred_element_type=f32) + b2_ref[l]

    # ---- final LN + tied-embedding LM head (no output bias) + masked xent ----
    y = _layer_norm_f32(x, lnfg_ref[...], lnfb_ref[...], LN_EPS)
    logits = jax.lax.dot_general(y.astype(bf16), wte_ref[...],
                                 (((1,), (1,)), ((), ())),
                                 preferred_element_type=f32)           # (M, V)
    mx = jnp.max(logits, axis=-1, keepdims=True)
    lse = mx + jnp.log(jnp.sum(jnp.exp(logits - mx), axis=-1, keepdims=True))
    lbl_onehot = (vocab_iota == labels_ref[...]).astype(f32)
    picked = jnp.sum(logits * lbl_onehot, axis=-1, keepdims=True)
    ce = lse - picked                                                   # (M, 1)
    msk = maskrow_ref[...].astype(f32)
    total = jnp.sum(ce * msk)
    denom = jnp.maximum(jnp.sum(msk), 1.0)       # guard all-padding batch
    loss_ref[...] = jnp.reshape(total / denom, (1, 1))
    logits_ref[...] = logits


def _full_spec(shape):
    zeros = (0,) * len(shape)
    return pl.BlockSpec(shape, lambda i, _z=zeros: _z)


# ----------------------------- parameters -----------------------------
def init_params(key):
    std = 0.02
    keys = iter(jax.random.split(key, 8))

    def nrm(shape):
        return (std * jax.random.normal(next(keys), shape)).astype(jnp.bfloat16)

    L, D, F, V, S = NUM_LAYERS, HIDDEN, FILTER, VOCAB, SEQ
    return {
        "wte": nrm((V, D)),                       # token embedding (tied LM head)
        "wpe": nrm((S, D)),                       # learned position embedding
        "lnf_g": jnp.ones((1, D), jnp.float32),
        "lnf_b": jnp.zeros((1, D), jnp.float32),
        # per-layer weights stacked on a leading L axis (static-indexed in-kernel)
        "ln1_g": jnp.ones((L, 1, D), jnp.float32),
        "ln1_b": jnp.zeros((L, 1, D), jnp.float32),
        "wqkv": nrm((L, D, 3 * D)),
        "bqkv": jnp.zeros((L, 1, 3 * D), jnp.float32),
        "wo": nrm((L, D, D)),
        "bo": jnp.zeros((L, 1, D), jnp.float32),
        "ln2_g": jnp.ones((L, 1, D), jnp.float32),
        "ln2_b": jnp.zeros((L, 1, D), jnp.float32),
        "w1": nrm((L, D, F)),
        "b1": jnp.zeros((L, 1, F), jnp.float32),
        "w2": nrm((L, F, D)),
        "b2": jnp.zeros((L, 1, D), jnp.float32),
    }


# ----------------------------- forward pass -----------------------------
@jax.jit
def gpt2_training_step(params, input_ids, attention_mask, labels):
    ids = input_ids.reshape(M, 1).astype(jnp.int32)
    lbl = labels.reshape(M, 1).astype(jnp.int32)
    mrow = attention_mask.reshape(M, 1).astype(jnp.int32)
    kmask = attention_mask.reshape(1, M).astype(jnp.int32)
    wpe_tiled = jnp.tile(params["wpe"], (BATCH, 1))          # (M, D) bf16, constant plumbing

    inputs = (ids, lbl, mrow, kmask,
              params["wte"], wpe_tiled,
              params["ln1_g"], params["ln1_b"], params["wqkv"], params["bqkv"],
              params["wo"], params["bo"], params["ln2_g"], params["ln2_b"],
              params["w1"], params["b1"], params["w2"], params["b2"],
              params["lnf_g"], params["lnf_b"])

    logits, loss = pl.pallas_call(
        gpt2_fused_kernel,
        grid=(1,),
        out_shape=(jax.ShapeDtypeStruct((M, VOCAB), jnp.float32),
                   jax.ShapeDtypeStruct((1, 1), jnp.float32)),
        in_specs=[_full_spec(a.shape) for a in inputs],
        out_specs=(_full_spec((M, VOCAB)), _full_spec((1, 1))),
        compiler_params=pltpu.CompilerParams(dimension_semantics=("arbitrary",)),
    )(*inputs)

    return loss[0, 0], logits.reshape(BATCH, SEQ, VOCAB)


# ----------------------------- main -----------------------------
if __name__ == "__main__":
    key = jax.random.PRNGKey(0)
    pkey, ikey, lkey = jax.random.split(key, 3)

    params = init_params(pkey)

    # Gpt2Model.training_step expects int32 input_ids / attention_mask / labels.
    input_ids = jax.random.randint(ikey, (BATCH, SEQ), 0, VOCAB, dtype=jnp.int32)
    labels = jax.random.randint(lkey, (BATCH, SEQ), 0, VOCAB, dtype=jnp.int32)
    attention_mask = jnp.ones((BATCH, SEQ), dtype=jnp.int32)

    loss, lm_logits = gpt2_training_step(params, input_ids, attention_mask, labels)
    jax.block_until_ready((loss, lm_logits))

    assert lm_logits.shape == (BATCH, SEQ, VOCAB)
    assert jnp.isfinite(loss)
    print("KERNEL_OK")
</pallas_src>

<mosaic_0001>
module attributes {stable_mosaic.version = 11 : i64} {
  func.func @gpt2_fused_kernel(%arg0: i32, %arg1: memref<64x1xi32, #tpu.memory_space<vmem>>, %arg2: memref<64x1xi32, #tpu.memory_space<vmem>>, %arg3: memref<64x1xi32, #tpu.memory_space<vmem>>, %arg4: memref<1x64xi32, #tpu.memory_space<vmem>>, %arg5: memref<256x128xbf16, #tpu.memory_space<vmem>>, %arg6: memref<64x128xbf16, #tpu.memory_space<vmem>>, %arg7: memref<2x1x128xf32, #tpu.memory_space<vmem>>, %arg8: memref<2x1x128xf32, #tpu.memory_space<vmem>>, %arg9: memref<2x128x384xbf16, #tpu.memory_space<vmem>>, %arg10: memref<2x1x384xf32, #tpu.memory_space<vmem>>, %arg11: memref<2x128x128xbf16, #tpu.memory_space<vmem>>, %arg12: memref<2x1x128xf32, #tpu.memory_space<vmem>>, %arg13: memref<2x1x128xf32, #tpu.memory_space<vmem>>, %arg14: memref<2x1x128xf32, #tpu.memory_space<vmem>>, %arg15: memref<2x128x512xbf16, #tpu.memory_space<vmem>>, %arg16: memref<2x1x512xf32, #tpu.memory_space<vmem>>, %arg17: memref<2x512x128xbf16, #tpu.memory_space<vmem>>, %arg18: memref<2x1x128xf32, #tpu.memory_space<vmem>>, %arg19: memref<1x128xf32, #tpu.memory_space<vmem>>, %arg20: memref<1x128xf32, #tpu.memory_space<vmem>>, %arg21: memref<64x256xf32, #tpu.memory_space<vmem>>, %arg22: memref<1x1xf32, #tpu.memory_space<vmem>>) attributes {dimension_semantics = [#tpu.dimension_semantics<arbitrary>], iteration_bounds = array<i64: 1>, scalar_prefetch = 0 : i64, scratch_operands = 0 : i64, tpu.core_type = #tpu.core_type<tc>, window_params = [{pipeline_mode = #tpu.pipeline_mode<synchronous>, transform_indices = @transform_0, window_bounds = array<i64: 64, 1>}, {pipeline_mode = #tpu.pipeline_mode<synchronous>, transform_indices = @transform_1, window_bounds = array<i64: 64, 1>}, {pipeline_mode = #tpu.pipeline_mode<synchronous>, transform_indices = @transform_2, window_bounds = array<i64: 64, 1>}, {pipeline_mode = #tpu.pipeline_mode<synchronous>, transform_indices = @transform_3, window_bounds = array<i64: 1, 64>}, {pipeline_mode = #tpu.pipeline_mode<synchronous>, transform_indices = @transform_4, window_bounds = array<i64: 256, 128>}, {pipeline_mode = #tpu.pipeline_mode<synchronous>, transform_indices = @transform_5, window_bounds = array<i64: 64, 128>}, {pipeline_mode = #tpu.pipeline_mode<synchronous>, transform_indices = @transform_6, window_bounds = array<i64: 2, 1, 128>}, {pipeline_mode = #tpu.pipeline_mode<synchronous>, transform_indices = @transform_7, window_bounds = array<i64: 2, 1, 128>}, {pipeline_mode = #tpu.pipeline_mode<synchronous>, transform_indices = @transform_8, window_bounds = array<i64: 2, 128, 384>}, {pipeline_mode = #tpu.pipeline_mode<synchronous>, transform_indices = @transform_9, window_bounds = array<i64: 2, 1, 384>}, {pipeline_mode = #tpu.pipeline_mode<synchronous>, transform_indices = @transform_10, window_bounds = array<i64: 2, 128, 128>}, {pipeline_mode = #tpu.pipeline_mode<synchronous>, transform_indices = @transform_11, window_bounds = array<i64: 2, 1, 128>}, {pipeline_mode = #tpu.pipeline_mode<synchronous>, transform_indices = @transform_12, window_bounds = array<i64: 2, 1, 128>}, {pipeline_mode = #tpu.pipeline_mode<synchronous>, transform_indices = @transform_13, window_bounds = array<i64: 2, 1, 128>}, {pipeline_mode = #tpu.pipeline_mode<synchronous>, transform_indices = @transform_14, window_bounds = array<i64: 2, 128, 512>}, {pipeline_mode = #tpu.pipeline_mode<synchronous>, transform_indices = @transform_15, window_bounds = array<i64: 2, 1, 512>}, {pipeline_mode = #tpu.pipeline_mode<synchronous>, transform_indices = @transform_16, window_bounds = array<i64: 2, 512, 128>}, {pipeline_mode = #tpu.pipeline_mode<synchronous>, transform_indices = @transform_17, window_bounds = array<i64: 2, 1, 128>}, {pipeline_mode = #tpu.pipeline_mode<synchronous>, transform_indices = @transform_18, window_bounds = array<i64: 1, 128>}, {pipeline_mode = #tpu.pipeline_mode<synchronous>, transform_indices = @transform_19, window_bounds = array<i64: 1, 128>}, {pipeline_mode = #tpu.pipeline_mode<synchronous>, transform_indices = @transform_20, window_bounds = array<i64: 64, 256>}, {pipeline_mode = #tpu.pipeline_mode<synchronous>, transform_indices = @transform_21, window_bounds = array<i64: 1, 1>}]} {
    %0 = tpu.iota {dimensions = array<i32: 1>} : vector<64x256xi32>
    %c0 = arith.constant 0 : index
    %c0_0 = arith.constant 0 : index
    %1 = vector.load %arg1[%c0, %c0_0] : memref<64x1xi32, #tpu.memory_space<vmem>>, vector<64x1xi32>
    %2 = vector.broadcast %1 : vector<64x1xi32> to vector<64x256xi32>
    %3 = arith.cmpi eq, %0, %2 : vector<64x256xi32>
    %4 = arith.extui %3 : vector<64x256xi1> to vector<64x256xi32>
    %5 = arith.sitofp %4 : vector<64x256xi32> to vector<64x256xf32>
    %6 = arith.truncf %5 : vector<64x256xf32> to vector<64x256xbf16>
    %c0_1 = arith.constant 0 : index
    %c0_2 = arith.constant 0 : index
    %7 = vector.load %arg5[%c0_1, %c0_2] : memref<256x128xbf16, #tpu.memory_space<vmem>>, vector<256x128xbf16>
    %cst = arith.constant dense<0.000000e+00> : vector<64x128xf32>
    %8 = tpu.matmul %6, %7, %cst {dimension_numbers = #tpu.dot_dimension_numbers<[1], [0], [0], [1], [0, 0, 1, 1], [], []>} : vector<64x256xbf16>, vector<256x128xbf16>, vector<64x128xf32> -> vector<64x128xf32>
    %c0_3 = arith.constant 0 : index
    %c0_4 = arith.constant 0 : index
    %9 = vector.load %arg6[%c0_3, %c0_4] : memref<64x128xbf16, #tpu.memory_space<vmem>>, vector<64x128xbf16>
    %10 = arith.extf %9 : vector<64x128xbf16> to vector<64x128xf32>
    %11 = arith.addf %8, %10 : vector<64x128xf32>
    %12 = tpu.iota {dimensions = array<i32: 0>} : vector<64x64xi32>
    %13 = tpu.iota {dimensions = array<i32: 1>} : vector<64x64xi32>
    %c0_i32 = arith.constant 0 : i32
    %14 = vector.broadcast %c0_i32 : i32 to vector<64x64xi32>
    %15 = arith.cmpi sge, %12, %14 : vector<64x64xi32>
    %c32_i32 = arith.constant 32 : i32
    %16 = vector.broadcast %c32_i32 : i32 to vector<64x64xi32>
    %17 = arith.cmpi slt, %12, %16 : vector<64x64xi32>
    %18 = arith.andi %15, %17 : vector<64x64xi1>
    %c0_i32_5 = arith.constant 0 : i32
    %19 = vector.broadcast %c0_i32_5 : i32 to vector<64x64xi32>
    %20 = arith.cmpi sge, %13, %19 : vector<64x64xi32>
    %c32_i32_6 = arith.constant 32 : i32
    %21 = vector.broadcast %c32_i32_6 : i32 to vector<64x64xi32>
    %22 = arith.cmpi slt, %13, %21 : vector<64x64xi32>
    %23 = arith.andi %20, %22 : vector<64x64xi1>
    %24 = arith.andi %18, %23 : vector<64x64xi1>
    %c32_i32_7 = arith.constant 32 : i32
    %25 = vector.broadcast %c32_i32_7 : i32 to vector<64x64xi32>
    %26 = arith.cmpi sge, %12, %25 : vector<64x64xi32>
    %c64_i32 = arith.constant 64 : i32
    %27 = vector.broadcast %c64_i32 : i32 to vector<64x64xi32>
    %28 = arith.cmpi slt, %12, %27 : vector<64x64xi32>
    %29 = arith.andi %26, %28 : vector<64x64xi1>
    %c32_i32_8 = arith.constant 32 : i32
    %30 = vector.broadcast %c32_i32_8 : i32 to vector<64x64xi32>
    %31 = arith.cmpi sge, %13, %30 : vector<64x64xi32>
    %c64_i32_9 = arith.constant 64 : i32
    %32 = vector.broadcast %c64_i32_9 : i32 to vector<64x64xi32>
    %33 = arith.cmpi slt, %13, %32 : vector<64x64xi32>
    %34 = arith.andi %31, %33 : vector<64x64xi1>
    %35 = arith.andi %29, %34 : vector<64x64xi1>
    %36 = arith.ori %24, %35 : vector<64x64xi1>
    %c0_10 = arith.constant 0 : index
    %c0_11 = arith.constant 0 : index
    %37 = vector.load %arg4[%c0_10, %c0_11] : memref<1x64xi32, #tpu.memory_space<vmem>>, vector<1x64xi32>
    %38 = arith.cmpi sge, %12, %13 : vector<64x64xi32>
    %39 = arith.andi %36, %38 : vector<64x64xi1>
    %c0_i32_12 = arith.constant 0 : i32
    %40 = vector.broadcast %c0_i32_12 : i32 to vector<1x64xi32>
    %41 = arith.cmpi sgt, %37, %40 : vector<1x64xi32>
    %42 = vector.broadcast %41 : vector<1x64xi1> to vector<64x64xi1>
    %43 = arith.andi %39, %42 : vector<64x64xi1>
    %c0_13 = arith.constant 0 : index
    %c0_14 = arith.constant 0 : index
    %c0_15 = arith.constant 0 : index
    %44 = vector.load %arg7[%c0_13, %c0_14, %c0_15] : memref<2x1x128xf32, #tpu.memory_space<vmem>>, vector<1x1x128xf32>
    %45 = vector.shape_cast %44 : vector<1x1x128xf32> to vector<1x128xf32>
    %c0_16 = arith.constant 0 : index
    %c0_17 = arith.constant 0 : index
    %c0_18 = arith.constant 0 : index
    %46 = vector.load %arg8[%c0_16, %c0_17, %c0_18] : memref<2x1x128xf32, #tpu.memory_space<vmem>>, vector<1x1x128xf32>
    %47 = vector.shape_cast %46 : vector<1x1x128xf32> to vector<1x128xf32>
    %cst_19 = arith.constant dense<0.000000e+00> : vector<64xf32>
    %48 = vector.multi_reduction <add>, %11, %cst_19 [1] : vector<64x128xf32> to vector<64xf32>
    %49 = vector.shape_cast %48 : vector<64xf32> to vector<64x1xf32>
    %cst_20 = arith.constant 1.280000e+02 : f32
    %50 = vector.broadcast %cst_20 : f32 to vector<64x1xf32>
    %51 = arith.divf %49, %50 : vector<64x1xf32>
    %52 = vector.broadcast %51 : vector<64x1xf32> to vector<64x128xf32>
    %53 = arith.subf %11, %52 : vector<64x128xf32>
    %54 = arith.mulf %53, %53 : vector<64x128xf32>
    %cst_21 = arith.constant dense<0.000000e+00> : vector<64xf32>
    %55 = vector.multi_reduction <add>, %54, %cst_21 [1] : vector<64x128xf32> to vector<64xf32>
    %56 = vector.shape_cast %55 : vector<64xf32> to vector<64x1xf32>
    %cst_22 = arith.constant 1.280000e+02 : f32
    %57 = vector.broadcast %cst_22 : f32 to vector<64x1xf32>
    %58 = arith.divf %56, %57 : vector<64x1xf32>
    %cst_23 = arith.constant 9.99999974E-6 : f32
    %59 = vector.broadcast %cst_23 : f32 to vector<64x1xf32>
    %60 = arith.addf %58, %59 : vector<64x1xf32>
    %61 = math.rsqrt %60 : vector<64x1xf32>
    %62 = vector.broadcast %61 : vector<64x1xf32> to vector<64x128xf32>
    %63 = arith.mulf %53, %62 : vector<64x128xf32>
    %64 = vector.broadcast %45 : vector<1x128xf32> to vector<64x128xf32>
    %65 = arith.mulf %63, %64 : vector<64x128xf32>
    %66 = vector.broadcast %47 : vector<1x128xf32> to vector<64x128xf32>
    %67 = arith.addf %65, %66 : vector<64x128xf32>
    %68 = arith.truncf %67 : vector<64x128xf32> to vector<64x128xbf16>
    %c0_24 = arith.constant 0 : index
    %c0_25 = arith.constant 0 : index
    %c0_26 = arith.constant 0 : index
    %69 = vector.load %arg9[%c0_24, %c0_25, %c0_26] : memref<2x128x384xbf16, #tpu.memory_space<vmem>>, vector<1x128x384xbf16>
    %70 = vector.shape_cast %69 : vector<1x128x384xbf16> to vector<128x384xbf16>
    %cst_27 = arith.constant dense<0.000000e+00> : vector<64x384xf32>
    %71 = tpu.matmul %68, %70, %cst_27 {dimension_numbers = #tpu.dot_dimension_numbers<[1], [0], [0], [1], [0, 0, 1, 1], [], []>} : vector<64x128xbf16>, vector<128x384xbf16>, vector<64x384xf32> -> vector<64x384xf32>
    %c0_28 = arith.constant 0 : index
    %c0_29 = arith.constant 0 : index
    %c0_30 = arith.constant 0 : index
    %72 = vector.load %arg10[%c0_28, %c0_29, %c0_30] : memref<2x1x384xf32, #tpu.memory_space<vmem>>, vector<1x1x384xf32>
    %73 = vector.shape_cast %72 : vector<1x1x384xf32> to vector<1x384xf32>
    %74 = vector.broadcast %73 : vector<1x384xf32> to vector<64x384xf32>
    %75 = arith.addf %71, %74 : vector<64x384xf32>
    %76 = arith.truncf %75 : vector<64x384xf32> to vector<64x384xbf16>
    %77 = vector.extract_strided_slice %76 {offsets = [0, 0], sizes = [64, 32], strides = [1, 1]} : vector<64x384xbf16> to vector<64x32xbf16>
    %78 = vector.extract_strided_slice %76 {offsets = [0, 128], sizes = [64, 32], strides = [1, 1]} : vector<64x384xbf16> to vector<64x32xbf16>
    %79 = vector.extract_strided_slice %76 {offsets = [0, 256], sizes = [64, 32], strides = [1, 1]} : vector<64x384xbf16> to vector<64x32xbf16>
    %cst_31 = arith.constant dense<0.000000e+00> : vector<64x64xf32>
    %80 = tpu.matmul %77, %78, %cst_31 {dimension_numbers = #tpu.dot_dimension_numbers<[1], [1], [0], [0], [0, 0, 1, 0], [], []>} : vector<64x32xbf16>, vector<64x32xbf16>, vector<64x64xf32> -> vector<64x64xf32>
    %cst_32 = arith.constant 0.176776692 : f32
    %81 = vector.broadcast %cst_32 : f32 to vector<64x64xf32>
    %82 = arith.mulf %80, %81 : vector<64x64xf32>
    %cst_33 = arith.constant -1.000000e+09 : f32
    %83 = vector.broadcast %cst_33 : f32 to vector<64x64xf32>
    %84 = arith.select %43, %82, %83 : vector<64x64xi1>, vector<64x64xf32>
    %cst_34 = arith.constant dense<0xFF800000> : vector<64xf32>
    %85 = vector.multi_reduction <maximumf>, %84, %cst_34 [1] : vector<64x64xf32> to vector<64xf32>
    %86 = vector.shape_cast %85 : vector<64xf32> to vector<64x1xf32>
    %87 = vector.broadcast %86 : vector<64x1xf32> to vector<64x64xf32>
    %88 = arith.subf %84, %87 : vector<64x64xf32>
    %89 = math.exp %88 : vector<64x64xf32>
    %cst_35 = arith.constant dense<0.000000e+00> : vector<64xf32>
    %90 = vector.multi_reduction <add>, %89, %cst_35 [1] : vector<64x64xf32> to vector<64xf32>
    %91 = vector.shape_cast %90 : vector<64xf32> to vector<64x1xf32>
    %92 = tpu.reciprocal %91 {approx = true} : vector<64x1xf32> -> vector<64x1xf32>
    %93 = vector.broadcast %92 : vector<64x1xf32> to vector<64x64xf32>
    %94 = arith.mulf %89, %93 : vector<64x64xf32>
    %95 = arith.truncf %94 : vector<64x64xf32> to vector<64x64xbf16>
    %cst_36 = arith.constant dense<0.000000e+00> : vector<64x32xf32>
    %96 = tpu.matmul %95, %79, %cst_36 {dimension_numbers = #tpu.dot_dimension_numbers<[1], [0], [0], [1], [0, 0, 1, 1], [], []>} : vector<64x64xbf16>, vector<64x32xbf16>, vector<64x32xf32> -> vector<64x32xf32>
    %97 = vector.extract_strided_slice %76 {offsets = [0, 32], sizes = [64, 32], strides = [1, 1]} : vector<64x384xbf16> to vector<64x32xbf16>
    %98 = vector.extract_strided_slice %76 {offsets = [0, 160], sizes = [64, 32], strides = [1, 1]} : vector<64x384xbf16> to vector<64x32xbf16>
    %99 = vector.extract_strided_slice %76 {offsets = [0, 288], sizes = [64, 32], strides = [1, 1]} : vector<64x384xbf16> to vector<64x32xbf16>
    %cst_37 = arith.constant dense<0.000000e+00> : vector<64x64xf32>
    %100 = tpu.matmul %97, %98, %cst_37 {dimension_numbers = #tpu.dot_dimension_numbers<[1], [1], [0], [0], [0, 0, 1, 0], [], []>} : vector<64x32xbf16>, vector<64x32xbf16>, vector<64x64xf32> -> vector<64x64xf32>
    %cst_38 = arith.constant 0.176776692 : f32
    %101 = vector.broadcast %cst_38 : f32 to vector<64x64xf32>
    %102 = arith.mulf %100, %101 : vector<64x64xf32>
    %cst_39 = arith.constant -1.000000e+09 : f32
    %103 = vector.broadcast %cst_39 : f32 to vector<64x64xf32>
    %104 = arith.select %43, %102, %103 : vector<64x64xi1>, vector<64x64xf32>
    %cst_40 = arith.constant dense<0xFF800000> : vector<64xf32>
    %105 = vector.multi_reduction <maximumf>, %104, %cst_40 [1] : vector<64x64xf32> to vector<64xf32>
    %106 = vector.shape_cast %105 : vector<64xf32> to vector<64x1xf32>
    %107 = vector.broadcast %106 : vector<64x1xf32> to vector<64x64xf32>
    %108 = arith.subf %104, %107 : vector<64x64xf32>
    %109 = math.exp %108 : vector<64x64xf32>
    %cst_41 = arith.constant dense<0.000000e+00> : vector<64xf32>
    %110 = vector.multi_reduction <add>, %109, %cst_41 [1] : vector<64x64xf32> to vector<64xf32>
    %111 = vector.shape_cast %110 : vector<64xf32> to vector<64x1xf32>
    %112 = tpu.reciprocal %111 {approx = true} : vector<64x1xf32> -> vector<64x1xf32>
    %113 = vector.broadcast %112 : vector<64x1xf32> to vector<64x64xf32>
    %114 = arith.mulf %109, %113 : vector<64x64xf32>
    %115 = arith.truncf %114 : vector<64x64xf32> to vector<64x64xbf16>
    %cst_42 = arith.constant dense<0.000000e+00> : vector<64x32xf32>
    %116 = tpu.matmul %115, %99, %cst_42 {dimension_numbers = #tpu.dot_dimension_numbers<[1], [0], [0], [1], [0, 0, 1, 1], [], []>} : vector<64x64xbf16>, vector<64x32xbf16>, vector<64x32xf32> -> vector<64x32xf32>
    %117 = vector.extract_strided_slice %76 {offsets = [0, 64], sizes = [64, 32], strides = [1, 1]} : vector<64x384xbf16> to vector<64x32xbf16>
    %118 = vector.extract_strided_slice %76 {offsets = [0, 192], sizes = [64, 32], strides = [1, 1]} : vector<64x384xbf16> to vector<64x32xbf16>
    %119 = vector.extract_strided_slice %76 {offsets = [0, 320], sizes = [64, 32], strides = [1, 1]} : vector<64x384xbf16> to vector<64x32xbf16>
    %cst_43 = arith.constant dense<0.000000e+00> : vector<64x64xf32>
    %120 = tpu.matmul %117, %118, %cst_43 {dimension_numbers = #tpu.dot_dimension_numbers<[1], [1], [0], [0], [0, 0, 1, 0], [], []>} : vector<64x32xbf16>, vector<64x32xbf16>, vector<64x64xf32> -> vector<64x64xf32>
    %cst_44 = arith.constant 0.176776692 : f32
    %121 = vector.broadcast %cst_44 : f32 to vector<64x64xf32>
    %122 = arith.mulf %120, %121 : vector<64x64xf32>
    %cst_45 = arith.constant -1.000000e+09 : f32
    %123 = vector.broadcast %cst_45 : f32 to vector<64x64xf32>
    %124 = arith.select %43, %122, %123 : vector<64x64xi1>, vector<64x64xf32>
    %cst_46 = arith.constant dense<0xFF800000> : vector<64xf32>
    %125 = vector.multi_reduction <maximumf>, %124, %cst_46 [1] : vector<64x64xf32> to vector<64xf32>
    %126 = vector.shape_cast %125 : vector<64xf32> to vector<64x1xf32>
    %127 = vector.broadcast %126 : vector<64x1xf32> to vector<64x64xf32>
    %128 = arith.subf %124, %127 : vector<64x64xf32>
    %129 = math.exp %128 : vector<64x64xf32>
    %cst_47 = arith.constant dense<0.000000e+00> : vector<64xf32>
    %130 = vector.multi_reduction <add>, %129, %cst_47 [1] : vector<64x64xf32> to vector<64xf32>
    %131 = vector.shape_cast %130 : vector<64xf32> to vector<64x1xf32>
    %132 = tpu.reciprocal %131 {approx = true} : vector<64x1xf32> -> vector<64x1xf32>
    %133 = vector.broadcast %132 : vector<64x1xf32> to vector<64x64xf32>
    %134 = arith.mulf %129, %133 : vector<64x64xf32>
    %135 = arith.truncf %134 : vector<64x64xf32> to vector<64x64xbf16>
    %cst_48 = arith.constant dense<0.000000e+00> : vector<64x32xf32>
    %136 = tpu.matmul %135, %119, %cst_48 {dimension_numbers = #tpu.dot_dimension_numbers<[1], [0], [0], [1], [0, 0, 1, 1], [], []>} : vector<64x64xbf16>, vector<64x32xbf16>, vector<64x32xf32> -> vector<64x32xf32>
    %137 = vector.extract_strided_slice %76 {offsets = [0, 96], sizes = [64, 32], strides = [1, 1]} : vector<64x384xbf16> to vector<64x32xbf16>
    %138 = vector.extract_strided_slice %76 {offsets = [0, 224], sizes = [64, 32], strides = [1, 1]} : vector<64x384xbf16> to vector<64x32xbf16>
    %139 = vector.extract_strided_slice %76 {offsets = [0, 352], sizes = [64, 32], strides = [1, 1]} : vector<64x384xbf16> to vector<64x32xbf16>
    %cst_49 = arith.constant dense<0.000000e+00> : vector<64x64xf32>
    %140 = tpu.matmul %137, %138, %cst_49 {dimension_numbers = #tpu.dot_dimension_numbers<[1], [1], [0], [0], [0, 0, 1, 0], [], []>} : vector<64x32xbf16>, vector<64x32xbf16>, vector<64x64xf32> -> vector<64x64xf32>
    %cst_50 = arith.constant 0.176776692 : f32
    %141 = vector.broadcast %cst_50 : f32 to vector<64x64xf32>
    %142 = arith.mulf %140, %141 : vector<64x64xf32>
    %cst_51 = arith.constant -1.000000e+09 : f32
    %143 = vector.broadcast %cst_51 : f32 to vector<64x64xf32>
    %144 = arith.select %43, %142, %143 : vector<64x64xi1>, vector<64x64xf32>
    %cst_52 = arith.constant dense<0xFF800000> : vector<64xf32>
    %145 = vector.multi_reduction <maximumf>, %144, %cst_52 [1] : vector<64x64xf32> to vector<64xf32>
    %146 = vector.shape_cast %145 : vector<64xf32> to vector<64x1xf32>
    %147 = vector.broadcast %146 : vector<64x1xf32> to vector<64x64xf32>
    %148 = arith.subf %144, %147 : vector<64x64xf32>
    %149 = math.exp %148 : vector<64x64xf32>
    %cst_53 = arith.constant dense<0.000000e+00> : vector<64xf32>
    %150 = vector.multi_reduction <add>, %149, %cst_53 [1] : vector<64x64xf32> to vector<64xf32>
    %151 = vector.shape_cast %150 : vector<64xf32> to vector<64x1xf32>
    %152 = tpu.reciprocal %151 {approx = true} : vector<64x1xf32> -> vector<64x1xf32>
    %153 = vector.broadcast %152 : vector<64x1xf32> to vector<64x64xf32>
    %154 = arith.mulf %149, %153 : vector<64x64xf32>
    %155 = arith.truncf %154 : vector<64x64xf32> to vector<64x64xbf16>
    %cst_54 = arith.constant dense<0.000000e+00> : vector<64x32xf32>
    %156 = tpu.matmul %155, %139, %cst_54 {dimension_numbers = #tpu.dot_dimension_numbers<[1], [0], [0], [1], [0, 0, 1, 1], [], []>} : vector<64x64xbf16>, vector<64x32xbf16>, vector<64x32xf32> -> vector<64x32xf32>
    %157 = tpu.concatenate %96, %116, %136, %156 in 1 : vector<64x32xf32>, vector<64x32xf32>, vector<64x32xf32>, vector<64x32xf32> -> vector<64x128xf32>
    %158 = arith.truncf %157 : vector<64x128xf32> to vector<64x128xbf16>
    %c0_55 = arith.constant 0 : index
    %c0_56 = arith.constant 0 : index
    %c0_57 = arith.constant 0 : index
    %159 = vector.load %arg11[%c0_55, %c0_56, %c0_57] : memref<2x128x128xbf16, #tpu.memory_space<vmem>>, vector<1x128x128xbf16>
    %160 = vector.shape_cast %159 : vector<1x128x128xbf16> to vector<128x128xbf16>
    %cst_58 = arith.constant dense<0.000000e+00> : vector<64x128xf32>
    %161 = tpu.matmul %158, %160, %cst_58 {dimension_numbers = #tpu.dot_dimension_numbers<[1], [0], [0], [1], [0, 0, 1, 1], [], []>} : vector<64x128xbf16>, vector<128x128xbf16>, vector<64x128xf32> -> vector<64x128xf32>
    %162 = arith.addf %11, %161 : vector<64x128xf32>
    %c0_59 = arith.constant 0 : index
    %c0_60 = arith.constant 0 : index
    %c0_61 = arith.constant 0 : index
    %163 = vector.load %arg12[%c0_59, %c0_60, %c0_61] : memref<2x1x128xf32, #tpu.memory_space<vmem>>, vector<1x1x128xf32>
    %164 = vector.shape_cast %163 : vector<1x1x128xf32> to vector<1x128xf32>
    %165 = vector.broadcast %164 : vector<1x128xf32> to vector<64x128xf32>
    %166 = arith.addf %162, %165 : vector<64x128xf32>
    %c0_62 = arith.constant 0 : index
    %c0_63 = arith.constant 0 : index
    %c0_64 = arith.constant 0 : index
    %167 = vector.load %arg13[%c0_62, %c0_63, %c0_64] : memref<2x1x128xf32, #tpu.memory_space<vmem>>, vector<1x1x128xf32>
    %168 = vector.shape_cast %167 : vector<1x1x128xf32> to vector<1x128xf32>
    %c0_65 = arith.constant 0 : index
    %c0_66 = arith.constant 0 : index
    %c0_67 = arith.constant 0 : index
    %169 = vector.load %arg14[%c0_65, %c0_66, %c0_67] : memref<2x1x128xf32, #tpu.memory_space<vmem>>, vector<1x1x128xf32>
    %170 = vector.shape_cast %169 : vector<1x1x128xf32> to vector<1x128xf32>
    %cst_68 = arith.constant dense<0.000000e+00> : vector<64xf32>
    %171 = vector.multi_reduction <add>, %166, %cst_68 [1] : vector<64x128xf32> to vector<64xf32>
    %172 = vector.shape_cast %171 : vector<64xf32> to vector<64x1xf32>
    %cst_69 = arith.constant 1.280000e+02 : f32
    %173 = vector.broadcast %cst_69 : f32 to vector<64x1xf32>
    %174 = arith.divf %172, %173 : vector<64x1xf32>
    %175 = vector.broadcast %174 : vector<64x1xf32> to vector<64x128xf32>
    %176 = arith.subf %166, %175 : vector<64x128xf32>
    %177 = arith.mulf %176, %176 : vector<64x128xf32>
    %cst_70 = arith.constant dense<0.000000e+00> : vector<64xf32>
    %178 = vector.multi_reduction <add>, %177, %cst_70 [1] : vector<64x128xf32> to vector<64xf32>
    %179 = vector.shape_cast %178 : vector<64xf32> to vector<64x1xf32>
    %cst_71 = arith.constant 1.280000e+02 : f32
    %180 = vector.broadcast %cst_71 : f32 to vector<64x1xf32>
    %181 = arith.divf %179, %180 : vector<64x1xf32>
    %cst_72 = arith.constant 9.99999974E-6 : f32
    %182 = vector.broadcast %cst_72 : f32 to vector<64x1xf32>
    %183 = arith.addf %181, %182 : vector<64x1xf32>
    %184 = math.rsqrt %183 : vector<64x1xf32>
    %185 = vector.broadcast %184 : vector<64x1xf32> to vector<64x128xf32>
    %186 = arith.mulf %176, %185 : vector<64x128xf32>
    %187 = vector.broadcast %168 : vector<1x128xf32> to vector<64x128xf32>
    %188 = arith.mulf %186, %187 : vector<64x128xf32>
    %189 = vector.broadcast %170 : vector<1x128xf32> to vector<64x128xf32>
    %190 = arith.addf %188, %189 : vector<64x128xf32>
    %191 = arith.truncf %190 : vector<64x128xf32> to vector<64x128xbf16>
    %c0_73 = arith.constant 0 : index
    %c0_74 = arith.constant 0 : index
    %c0_75 = arith.constant 0 : index
    %192 = vector.load %arg15[%c0_73, %c0_74, %c0_75] : memref<2x128x512xbf16, #tpu.memory_space<vmem>>, vector<1x128x512xbf16>
    %193 = vector.shape_cast %192 : vector<1x128x512xbf16> to vector<128x512xbf16>
    %cst_76 = arith.constant dense<0.000000e+00> : vector<64x512xf32>
    %194 = tpu.matmul %191, %193, %cst_76 {dimension_numbers = #tpu.dot_dimension_numbers<[1], [0], [0], [1], [0, 0, 1, 1], [], []>} : vector<64x128xbf16>, vector<128x512xbf16>, vector<64x512xf32> -> vector<64x512xf32>
    %c0_77 = arith.constant 0 : index
    %c0_78 = arith.constant 0 : index
    %c0_79 = arith.constant 0 : index
    %195 = vector.load %arg16[%c0_77, %c0_78, %c0_79] : memref<2x1x512xf32, #tpu.memory_space<vmem>>, vector<1x1x512xf32>
    %196 = vector.shape_cast %195 : vector<1x1x512xf32> to vector<1x512xf32>
    %197 = vector.broadcast %196 : vector<1x512xf32> to vector<64x512xf32>
    %198 = arith.addf %194, %197 : vector<64x512xf32>
    %199 = arith.mulf %198, %198 : vector<64x512xf32>
    %200 = arith.mulf %198, %199 : vector<64x512xf32>
    %cst_80 = arith.constant 4.471500e-02 : f32
    %201 = vector.broadcast %cst_80 : f32 to vector<64x512xf32>
    %202 = arith.mulf %201, %200 : vector<64x512xf32>
    %203 = arith.addf %198, %202 : vector<64x512xf32>
    %cst_81 = arith.constant 0.797884583 : f32
    %204 = vector.broadcast %cst_81 : f32 to vector<64x512xf32>
    %205 = arith.mulf %204, %203 : vector<64x512xf32>
    %206 = math.tanh %205 : vector<64x512xf32>
    %cst_82 = arith.constant 1.000000e+00 : f32
    %207 = vector.broadcast %cst_82 : f32 to vector<64x512xf32>
    %208 = arith.addf %207, %206 : vector<64x512xf32>
    %cst_83 = arith.constant 5.000000e-01 : f32
    %209 = vector.broadcast %cst_83 : f32 to vector<64x512xf32>
    %210 = arith.mulf %209, %208 : vector<64x512xf32>
    %211 = arith.mulf %198, %210 : vector<64x512xf32>
    %212 = arith.truncf %211 : vector<64x512xf32> to vector<64x512xbf16>
    %c0_84 = arith.constant 0 : index
    %c0_85 = arith.constant 0 : index
    %c0_86 = arith.constant 0 : index
    %213 = vector.load %arg17[%c0_84, %c0_85, %c0_86] : memref<2x512x128xbf16, #tpu.memory_space<vmem>>, vector<1x512x128xbf16>
    %214 = vector.shape_cast %213 : vector<1x512x128xbf16> to vector<512x128xbf16>
    %cst_87 = arith.constant dense<0.000000e+00> : vector<64x128xf32>
    %215 = tpu.matmul %212, %214, %cst_87 {dimension_numbers = #tpu.dot_dimension_numbers<[1], [0], [0], [1], [0, 0, 1, 1], [], []>} : vector<64x512xbf16>, vector<512x128xbf16>, vector<64x128xf32> -> vector<64x128xf32>
    %216 = arith.addf %166, %215 : vector<64x128xf32>
    %c0_88 = arith.constant 0 : index
    %c0_89 = arith.constant 0 : index
    %c0_90 = arith.constant 0 : index
    %217 = vector.load %arg18[%c0_88, %c0_89, %c0_90] : memref<2x1x128xf32, #tpu.memory_space<vmem>>, vector<1x1x128xf32>
    %218 = vector.shape_cast %217 : vector<1x1x128xf32> to vector<1x128xf32>
    %219 = vector.broadcast %218 : vector<1x128xf32> to vector<64x128xf32>
    %220 = arith.addf %216, %219 : vector<64x128xf32>
    %c1 = arith.constant 1 : index
    %c0_91 = arith.constant 0 : index
    %c0_92 = arith.constant 0 : index
    %221 = vector.load %arg7[%c1, %c0_91, %c0_92] : memref<2x1x128xf32, #tpu.memory_space<vmem>>, vector<1x1x128xf32>
    %222 = vector.shape_cast %221 : vector<1x1x128xf32> to vector<1x128xf32>
    %c1_93 = arith.constant 1 : index
    %c0_94 = arith.constant 0 : index
    %c0_95 = arith.constant 0 : index
    %223 = vector.load %arg8[%c1_93, %c0_94, %c0_95] : memref<2x1x128xf32, #tpu.memory_space<vmem>>, vector<1x1x128xf32>
    %224 = vector.shape_cast %223 : vector<1x1x128xf32> to vector<1x128xf32>
    %cst_96 = arith.constant dense<0.000000e+00> : vector<64xf32>
    %225 = vector.multi_reduction <add>, %220, %cst_96 [1] : vector<64x128xf32> to vector<64xf32>
    %226 = vector.shape_cast %225 : vector<64xf32> to vector<64x1xf32>
    %cst_97 = arith.constant 1.280000e+02 : f32
    %227 = vector.broadcast %cst_97 : f32 to vector<64x1xf32>
    %228 = arith.divf %226, %227 : vector<64x1xf32>
    %229 = vector.broadcast %228 : vector<64x1xf32> to vector<64x128xf32>
    %230 = arith.subf %220, %229 : vector<64x128xf32>
    %231 = arith.mulf %230, %230 : vector<64x128xf32>
    %cst_98 = arith.constant dense<0.000000e+00> : vector<64xf32>
    %232 = vector.multi_reduction <add>, %231, %cst_98 [1] : vector<64x128xf32> to vector<64xf32>
    %233 = vector.shape_cast %232 : vector<64xf32> to vector<64x1xf32>
    %cst_99 = arith.constant 1.280000e+02 : f32
    %234 = vector.broadcast %cst_99 : f32 to vector<64x1xf32>
    %235 = arith.divf %233, %234 : vector<64x1xf32>
    %cst_100 = arith.constant 9.99999974E-6 : f32
    %236 = vector.broadcast %cst_100 : f32 to vector<64x1xf32>
    %237 = arith.addf %235, %236 : vector<64x1xf32>
    %238 = math.rsqrt %237 : vector<64x1xf32>
    %239 = vector.broadcast %238 : vector<64x1xf32> to vector<64x128xf32>
    %240 = arith.mulf %230, %239 : vector<64x128xf32>
    %241 = vector.broadcast %222 : vector<1x128xf32> to vector<64x128xf32>
    %242 = arith.mulf %240, %241 : vector<64x128xf32>
    %243 = vector.broadcast %224 : vector<1x128xf32> to vector<64x128xf32>
    %244 = arith.addf %242, %243 : vector<64x128xf32>
    %245 = arith.truncf %244 : vector<64x128xf32> to vector<64x128xbf16>
    %c1_101 = arith.constant 1 : index
    %c0_102 = arith.constant 0 : index
    %c0_103 = arith.constant 0 : index
    %246 = vector.load %arg9[%c1_101, %c0_102, %c0_103] : memref<2x128x384xbf16, #tpu.memory_space<vmem>>, vector<1x128x384xbf16>
    %247 = vector.shape_cast %246 : vector<1x128x384xbf16> to vector<128x384xbf16>
    %cst_104 = arith.constant dense<0.000000e+00> : vector<64x384xf32>
    %248 = tpu.matmul %245, %247, %cst_104 {dimension_numbers = #tpu.dot_dimension_numbers<[1], [0], [0], [1], [0, 0, 1, 1], [], []>} : vector<64x128xbf16>, vector<128x384xbf16>, vector<64x384xf32> -> vector<64x384xf32>
    %c1_105 = arith.constant 1 : index
    %c0_106 = arith.constant 0 : index
    %c0_107 = arith.constant 0 : index
    %249 = vector.load %arg10[%c1_105, %c0_106, %c0_107] : memref<2x1x384xf32, #tpu.memory_space<vmem>>, vector<1x1x384xf32>
    %250 = vector.shape_cast %249 : vector<1x1x384xf32> to vector<1x384xf32>
    %251 = vector.broadcast %250 : vector<1x384xf32> to vector<64x384xf32>
    %252 = arith.addf %248, %251 : vector<64x384xf32>
    %253 = arith.truncf %252 : vector<64x384xf32> to vector<64x384xbf16>
    %254 = vector.extract_strided_slice %253 {offsets = [0, 0], sizes = [64, 32], strides = [1, 1]} : vector<64x384xbf16> to vector<64x32xbf16>
    %255 = vector.extract_strided_slice %253 {offsets = [0, 128], sizes = [64, 32], strides = [1, 1]} : vector<64x384xbf16> to vector<64x32xbf16>
    %256 = vector.extract_strided_slice %253 {offsets = [0, 256], sizes = [64, 32], strides = [1, 1]} : vector<64x384xbf16> to vector<64x32xbf16>
    %cst_108 = arith.constant dense<0.000000e+00> : vector<64x64xf32>
    %257 = tpu.matmul %254, %255, %cst_108 {dimension_numbers = #tpu.dot_dimension_numbers<[1], [1], [0], [0], [0, 0, 1, 0], [], []>} : vector<64x32xbf16>, vector<64x32xbf16>, vector<64x64xf32> -> vector<64x64xf32>
    %cst_109 = arith.constant 0.176776692 : f32
    %258 = vector.broadcast %cst_109 : f32 to vector<64x64xf32>
    %259 = arith.mulf %257, %258 : vector<64x64xf32>
    %cst_110 = arith.constant -1.000000e+09 : f32
    %260 = vector.broadcast %cst_110 : f32 to vector<64x64xf32>
    %261 = arith.select %43, %259, %260 : vector<64x64xi1>, vector<64x64xf32>
    %cst_111 = arith.constant dense<0xFF800000> : vector<64xf32>
    %262 = vector.multi_reduction <maximumf>, %261, %cst_111 [1] : vector<64x64xf32> to vector<64xf32>
    %263 = vector.shape_cast %262 : vector<64xf32> to vector<64x1xf32>
    %264 = vector.broadcast %263 : vector<64x1xf32> to vector<64x64xf32>
    %265 = arith.subf %261, %264 : vector<64x64xf32>
    %266 = math.exp %265 : vector<64x64xf32>
    %cst_112 = arith.constant dense<0.000000e+00> : vector<64xf32>
    %267 = vector.multi_reduction <add>, %266, %cst_112 [1] : vector<64x64xf32> to vector<64xf32>
    %268 = vector.shape_cast %267 : vector<64xf32> to vector<64x1xf32>
    %269 = tpu.reciprocal %268 {approx = true} : vector<64x1xf32> -> vector<64x1xf32>
    %270 = vector.broadcast %269 : vector<64x1xf32> to vector<64x64xf32>
    %271 = arith.mulf %266, %270 : vector<64x64xf32>
    %272 = arith.truncf %271 : vector<64x64xf32> to vector<64x64xbf16>
    %cst_113 = arith.constant dense<0.000000e+00> : vector<64x32xf32>
    %273 = tpu.matmul %272, %256, %cst_113 {dimension_numbers = #tpu.dot_dimension_numbers<[1], [0], [0], [1], [0, 0, 1, 1], [], []>} : vector<64x64xbf16>, vector<64x32xbf16>, vector<64x32xf32> -> vector<64x32xf32>
    %274 = vector.extract_strided_slice %253 {offsets = [0, 32], sizes = [64, 32], strides = [1, 1]} : vector<64x384xbf16> to vector<64x32xbf16>
    %275 = vector.extract_strided_slice %253 {offsets = [0, 160], sizes = [64, 32], strides = [1, 1]} : vector<64x384xbf16> to vector<64x32xbf16>
    %276 = vector.extract_strided_slice %253 {offsets = [0, 288], sizes = [64, 32], strides = [1, 1]} : vector<64x384xbf16> to vector<64x32xbf16>
    %cst_114 = arith.constant dense<0.000000e+00> : vector<64x64xf32>
    %277 = tpu.matmul %274, %275, %cst_114 {dimension_numbers = #tpu.dot_dimension_numbers<[1], [1], [0], [0], [0, 0, 1, 0], [], []>} : vector<64x32xbf16>, vector<64x32xbf16>, vector<64x64xf32> -> vector<64x64xf32>
    %cst_115 = arith.constant 0.176776692 : f32
    %278 = vector.broadcast %cst_115 : f32 to vector<64x64xf32>
    %279 = arith.mulf %277, %278 : vector<64x64xf32>
    %cst_116 = arith.constant -1.000000e+09 : f32
    %280 = vector.broadcast %cst_116 : f32 to vector<64x64xf32>
    %281 = arith.select %43, %279, %280 : vector<64x64xi1>, vector<64x64xf32>
    %cst_117 = arith.constant dense<0xFF800000> : vector<64xf32>
    %282 = vector.multi_reduction <maximumf>, %281, %cst_117 [1] : vector<64x64xf32> to vector<64xf32>
    %283 = vector.shape_cast %282 : vector<64xf32> to vector<64x1xf32>
    %284 = vector.broadcast %283 : vector<64x1xf32> to vector<64x64xf32>
    %285 = arith.subf %281, %284 : vector<64x64xf32>
    %286 = math.exp %285 : vector<64x64xf32>
    %cst_118 = arith.constant dense<0.000000e+00> : vector<64xf32>
    %287 = vector.multi_reduction <add>, %286, %cst_118 [1] : vector<64x64xf32> to vector<64xf32>
    %288 = vector.shape_cast %287 : vector<64xf32> to vector<64x1xf32>
    %289 = tpu.reciprocal %288 {approx = true} : vector<64x1xf32> -> vector<64x1xf32>
    %290 = vector.broadcast %289 : vector<64x1xf32> to vector<64x64xf32>
    %291 = arith.mulf %286, %290 : vector<64x64xf32>
    %292 = arith.truncf %291 : vector<64x64xf32> to vector<64x64xbf16>
    %cst_119 = arith.constant dense<0.000000e+00> : vector<64x32xf32>
    %293 = tpu.matmul %292, %276, %cst_119 {dimension_numbers = #tpu.dot_dimension_numbers<[1], [0], [0], [1], [0, 0, 1, 1], [], []>} : vector<64x64xbf16>, vector<64x32xbf16>, vector<64x32xf32> -> vector<64x32xf32>
    %294 = vector.extract_strided_slice %253 {offsets = [0, 64], sizes = [64, 32], strides = [1, 1]} : vector<64x384xbf16> to vector<64x32xbf16>
    %295 = vector.extract_strided_slice %253 {offsets = [0, 192], sizes = [64, 32], strides = [1, 1]} : vector<64x384xbf16> to vector<64x32xbf16>
    %296 = vector.extract_strided_slice %253 {offsets = [0, 320], sizes = [64, 32], strides = [1, 1]} : vector<64x384xbf16> to vector<64x32xbf16>
    %cst_120 = arith.constant dense<0.000000e+00> : vector<64x64xf32>
    %297 = tpu.matmul %294, %295, %cst_120 {dimension_numbers = #tpu.dot_dimension_numbers<[1], [1], [0], [0], [0, 0, 1, 0], [], []>} : vector<64x32xbf16>, vector<64x32xbf16>, vector<64x64xf32> -> vector<64x64xf32>
    %cst_121 = arith.constant 0.176776692 : f32
    %298 = vector.broadcast %cst_121 : f32 to vector<64x64xf32>
    %299 = arith.mulf %297, %298 : vector<64x64xf32>
    %cst_122 = arith.constant -1.000000e+09 : f32
    %300 = vector.broadcast %cst_122 : f32 to vector<64x64xf32>
    %301 = arith.select %43, %299, %300 : vector<64x64xi1>, vector<64x64xf32>
    %cst_123 = arith.constant dense<0xFF800000> : vector<64xf32>
    %302 = vector.multi_reduction <maximumf>, %301, %cst_123 [1] : vector<64x64xf32> to vector<64xf32>
    %303 = vector.shape_cast %302 : vector<64xf32> to vector<64x1xf32>
    %304 = vector.broadcast %303 : vector<64x1xf32> to vector<64x64xf32>
    %305 = arith.subf %301, %304 : vector<64x64xf32>
    %306 = math.exp %305 : vector<64x64xf32>
    %cst_124 = arith.constant dense<0.000000e+00> : vector<64xf32>
    %307 = vector.multi_reduction <add>, %306, %cst_124 [1] : vector<64x64xf32> to vector<64xf32>
    %308 = vector.shape_cast %307 : vector<64xf32> to vector<64x1xf32>
    %309 = tpu.reciprocal %308 {approx = true} : vector<64x1xf32> -> vector<64x1xf32>
    %310 = vector.broadcast %309 : vector<64x1xf32> to vector<64x64xf32>
    %311 = arith.mulf %306, %310 : vector<64x64xf32>
    %312 = arith.truncf %311 : vector<64x64xf32> to vector<64x64xbf16>
    %cst_125 = arith.constant dense<0.000000e+00> : vector<64x32xf32>
    %313 = tpu.matmul %312, %296, %cst_125 {dimension_numbers = #tpu.dot_dimension_numbers<[1], [0], [0], [1], [0, 0, 1, 1], [], []>} : vector<64x64xbf16>, vector<64x32xbf16>, vector<64x32xf32> -> vector<64x32xf32>
    %314 = vector.extract_strided_slice %253 {offsets = [0, 96], sizes = [64, 32], strides = [1, 1]} : vector<64x384xbf16> to vector<64x32xbf16>
    %315 = vector.extract_strided_slice %253 {offsets = [0, 224], sizes = [64, 32], strides = [1, 1]} : vector<64x384xbf16> to vector<64x32xbf16>
    %316 = vector.extract_strided_slice %253 {offsets = [0, 352], sizes = [64, 32], strides = [1, 1]} : vector<64x384xbf16> to vector<64x32xbf16>
    %cst_126 = arith.constant dense<0.000000e+00> : vector<64x64xf32>
    %317 = tpu.matmul %314, %315, %cst_126 {dimension_numbers = #tpu.dot_dimension_numbers<[1], [1], [0], [0], [0, 0, 1, 0], [], []>} : vector<64x32xbf16>, vector<64x32xbf16>, vector<64x64xf32> -> vector<64x64xf32>
    %cst_127 = arith.constant 0.176776692 : f32
    %318 = vector.broadcast %cst_127 : f32 to vector<64x64xf32>
    %319 = arith.mulf %317, %318 : vector<64x64xf32>
    %cst_128 = arith.constant -1.000000e+09 : f32
    %320 = vector.broadcast %cst_128 : f32 to vector<64x64xf32>
    %321 = arith.select %43, %319, %320 : vector<64x64xi1>, vector<64x64xf32>
    %cst_129 = arith.constant dense<0xFF800000> : vector<64xf32>
    %322 = vector.multi_reduction <maximumf>, %321, %cst_129 [1] : vector<64x64xf32> to vector<64xf32>
    %323 = vector.shape_cast %322 : vector<64xf32> to vector<64x1xf32>
    %324 = vector.broadcast %323 : vector<64x1xf32> to vector<64x64xf32>
    %325 = arith.subf %321, %324 : vector<64x64xf32>
    %326 = math.exp %325 : vector<64x64xf32>
    %cst_130 = arith.constant dense<0.000000e+00> : vector<64xf32>
    %327 = vector.multi_reduction <add>, %326, %cst_130 [1] : vector<64x64xf32> to vector<64xf32>
    %328 = vector.shape_cast %327 : vector<64xf32> to vector<64x1xf32>
    %329 = tpu.reciprocal %328 {approx = true} : vector<64x1xf32> -> vector<64x1xf32>
    %330 = vector.broadcast %329 : vector<64x1xf32> to vector<64x64xf32>
    %331 = arith.mulf %326, %330 : vector<64x64xf32>
    %332 = arith.truncf %331 : vector<64x64xf32> to vector<64x64xbf16>
    %cst_131 = arith.constant dense<0.000000e+00> : vector<64x32xf32>
    %333 = tpu.matmul %332, %316, %cst_131 {dimension_numbers = #tpu.dot_dimension_numbers<[1], [0], [0], [1], [0, 0, 1, 1], [], []>} : vector<64x64xbf16>, vector<64x32xbf16>, vector<64x32xf32> -> vector<64x32xf32>
    %334 = tpu.concatenate %273, %293, %313, %333 in 1 : vector<64x32xf32>, vector<64x32xf32>, vector<64x32xf32>, vector<64x32xf32> -> vector<64x128xf32>
    %335 = arith.truncf %334 : vector<64x128xf32> to vector<64x128xbf16>
    %c1_132 = arith.constant 1 : index
    %c0_133 = arith.constant 0 : index
    %c0_134 = arith.constant 0 : index
    %336 = vector.load %arg11[%c1_132, %c0_133, %c0_134] : memref<2x128x128xbf16, #tpu.memory_space<vmem>>, vector<1x128x128xbf16>
    %337 = vector.shape_cast %336 : vector<1x128x128xbf16> to vector<128x128xbf16>
    %cst_135 = arith.constant dense<0.000000e+00> : vector<64x128xf32>
    %338 = tpu.matmul %335, %337, %cst_135 {dimension_numbers = #tpu.dot_dimension_numbers<[1], [0], [0], [1], [0, 0, 1, 1], [], []>} : vector<64x128xbf16>, vector<128x128xbf16>, vector<64x128xf32> -> vector<64x128xf32>
    %339 = arith.addf %220, %338 : vector<64x128xf32>
    %c1_136 = arith.constant 1 : index
    %c0_137 = arith.constant 0 : index
    %c0_138 = arith.constant 0 : index
    %340 = vector.load %arg12[%c1_136, %c0_137, %c0_138] : memref<2x1x128xf32, #tpu.memory_space<vmem>>, vector<1x1x128xf32>
    %341 = vector.shape_cast %340 : vector<1x1x128xf32> to vector<1x128xf32>
    %342 = vector.broadcast %341 : vector<1x128xf32> to vector<64x128xf32>
    %343 = arith.addf %339, %342 : vector<64x128xf32>
    %c1_139 = arith.constant 1 : index
    %c0_140 = arith.constant 0 : index
    %c0_141 = arith.constant 0 : index
    %344 = vector.load %arg13[%c1_139, %c0_140, %c0_141] : memref<2x1x128xf32, #tpu.memory_space<vmem>>, vector<1x1x128xf32>
    %345 = vector.shape_cast %344 : vector<1x1x128xf32> to vector<1x128xf32>
    %c1_142 = arith.constant 1 : index
    %c0_143 = arith.constant 0 : index
    %c0_144 = arith.constant 0 : index
    %346 = vector.load %arg14[%c1_142, %c0_143, %c0_144] : memref<2x1x128xf32, #tpu.memory_space<vmem>>, vector<1x1x128xf32>
    %347 = vector.shape_cast %346 : vector<1x1x128xf32> to vector<1x128xf32>
    %cst_145 = arith.constant dense<0.000000e+00> : vector<64xf32>
    %348 = vector.multi_reduction <add>, %343, %cst_145 [1] : vector<64x128xf32> to vector<64xf32>
    %349 = vector.shape_cast %348 : vector<64xf32> to vector<64x1xf32>
    %cst_146 = arith.constant 1.280000e+02 : f32
    %350 = vector.broadcast %cst_146 : f32 to vector<64x1xf32>
    %351 = arith.divf %349, %350 : vector<64x1xf32>
    %352 = vector.broadcast %351 : vector<64x1xf32> to vector<64x128xf32>
    %353 = arith.subf %343, %352 : vector<64x128xf32>
    %354 = arith.mulf %353, %353 : vector<64x128xf32>
    %cst_147 = arith.constant dense<0.000000e+00> : vector<64xf32>
    %355 = vector.multi_reduction <add>, %354, %cst_147 [1] : vector<64x128xf32> to vector<64xf32>
    %356 = vector.shape_cast %355 : vector<64xf32> to vector<64x1xf32>
    %cst_148 = arith.constant 1.280000e+02 : f32
    %357 = vector.broadcast %cst_148 : f32 to vector<64x1xf32>
    %358 = arith.divf %356, %357 : vector<64x1xf32>
    %cst_149 = arith.constant 9.99999974E-6 : f32
    %359 = vector.broadcast %cst_149 : f32 to vector<64x1xf32>
    %360 = arith.addf %358, %359 : vector<64x1xf32>
    %361 = math.rsqrt %360 : vector<64x1xf32>
    %362 = vector.broadcast %361 : vector<64x1xf32> to vector<64x128xf32>
    %363 = arith.mulf %353, %362 : vector<64x128xf32>
    %364 = vector.broadcast %345 : vector<1x128xf32> to vector<64x128xf32>
    %365 = arith.mulf %363, %364 : vector<64x128xf32>
    %366 = vector.broadcast %347 : vector<1x128xf32> to vector<64x128xf32>
    %367 = arith.addf %365, %366 : vector<64x128xf32>
    %368 = arith.truncf %367 : vector<64x128xf32> to vector<64x128xbf16>
    %c1_150 = arith.constant 1 : index
    %c0_151 = arith.constant 0 : index
    %c0_152 = arith.constant 0 : index
    %369 = vector.load %arg15[%c1_150, %c0_151, %c0_152] : memref<2x128x512xbf16, #tpu.memory_space<vmem>>, vector<1x128x512xbf16>
    %370 = vector.shape_cast %369 : vector<1x128x512xbf16> to vector<128x512xbf16>
    %cst_153 = arith.constant dense<0.000000e+00> : vector<64x512xf32>
    %371 = tpu.matmul %368, %370, %cst_153 {dimension_numbers = #tpu.dot_dimension_numbers<[1], [0], [0], [1], [0, 0, 1, 1], [], []>} : vector<64x128xbf16>, vector<128x512xbf16>, vector<64x512xf32> -> vector<64x512xf32>
    %c1_154 = arith.constant 1 : index
    %c0_155 = arith.constant 0 : index
    %c0_156 = arith.constant 0 : index
    %372 = vector.load %arg16[%c1_154, %c0_155, %c0_156] : memref<2x1x512xf32, #tpu.memory_space<vmem>>, vector<1x1x512xf32>
    %373 = vector.shape_cast %372 : vector<1x1x512xf32> to vector<1x512xf32>
    %374 = vector.broadcast %373 : vector<1x512xf32> to vector<64x512xf32>
    %375 = arith.addf %371, %374 : vector<64x512xf32>
    %376 = arith.mulf %375, %375 : vector<64x512xf32>
    %377 = arith.mulf %375, %376 : vector<64x512xf32>
    %cst_157 = arith.constant 4.471500e-02 : f32
    %378 = vector.broadcast %cst_157 : f32 to vector<64x512xf32>
    %379 = arith.mulf %378, %377 : vector<64x512xf32>
    %380 = arith.addf %375, %379 : vector<64x512xf32>
    %cst_158 = arith.constant 0.797884583 : f32
    %381 = vector.broadcast %cst_158 : f32 to vector<64x512xf32>
    %382 = arith.mulf %381, %380 : vector<64x512xf32>
    %383 = math.tanh %382 : vector<64x512xf32>
    %cst_159 = arith.constant 1.000000e+00 : f32
    %384 = vector.broadcast %cst_159 : f32 to vector<64x512xf32>
    %385 = arith.addf %384, %383 : vector<64x512xf32>
    %cst_160 = arith.constant 5.000000e-01 : f32
    %386 = vector.broadcast %cst_160 : f32 to vector<64x512xf32>
    %387 = arith.mulf %386, %385 : vector<64x512xf32>
    %388 = arith.mulf %375, %387 : vector<64x512xf32>
    %389 = arith.truncf %388 : vector<64x512xf32> to vector<64x512xbf16>
    %c1_161 = arith.constant 1 : index
    %c0_162 = arith.constant 0 : index
    %c0_163 = arith.constant 0 : index
    %390 = vector.load %arg17[%c1_161, %c0_162, %c0_163] : memref<2x512x128xbf16, #tpu.memory_space<vmem>>, vector<1x512x128xbf16>
    %391 = vector.shape_cast %390 : vector<1x512x128xbf16> to vector<512x128xbf16>
    %cst_164 = arith.constant dense<0.000000e+00> : vector<64x128xf32>
    %392 = tpu.matmul %389, %391, %cst_164 {dimension_numbers = #tpu.dot_dimension_numbers<[1], [0], [0], [1], [0, 0, 1, 1], [], []>} : vector<64x512xbf16>, vector<512x128xbf16>, vector<64x128xf32> -> vector<64x128xf32>
    %393 = arith.addf %343, %392 : vector<64x128xf32>
    %c1_165 = arith.constant 1 : index
    %c0_166 = arith.constant 0 : index
    %c0_167 = arith.constant 0 : index
    %394 = vector.load %arg18[%c1_165, %c0_166, %c0_167] : memref<2x1x128xf32, #tpu.memory_space<vmem>>, vector<1x1x128xf32>
    %395 = vector.shape_cast %394 : vector<1x1x128xf32> to vector<1x128xf32>
    %396 = vector.broadcast %395 : vector<1x128xf32> to vector<64x128xf32>
    %397 = arith.addf %393, %396 : vector<64x128xf32>
    %c0_168 = arith.constant 0 : index
    %c0_169 = arith.constant 0 : index
    %398 = vector.load %arg19[%c0_168, %c0_169] : memref<1x128xf32, #tpu.memory_space<vmem>>, vector<1x128xf32>
    %c0_170 = arith.constant 0 : index
    %c0_171 = arith.constant 0 : index
    %399 = vector.load %arg20[%c0_170, %c0_171] : memref<1x128xf32, #tpu.memory_space<vmem>>, vector<1x128xf32>
    %cst_172 = arith.constant dense<0.000000e+00> : vector<64xf32>
    %400 = vector.multi_reduction <add>, %397, %cst_172 [1] : vector<64x128xf32> to vector<64xf32>
    %401 = vector.shape_cast %400 : vector<64xf32> to vector<64x1xf32>
    %cst_173 = arith.constant 1.280000e+02 : f32
    %402 = vector.broadcast %cst_173 : f32 to vector<64x1xf32>
    %403 = arith.divf %401, %402 : vector<64x1xf32>
    %404 = vector.broadcast %403 : vector<64x1xf32> to vector<64x128xf32>
    %405 = arith.subf %397, %404 : vector<64x128xf32>
    %406 = arith.mulf %405, %405 : vector<64x128xf32>
    %cst_174 = arith.constant dense<0.000000e+00> : vector<64xf32>
    %407 = vector.multi_reduction <add>, %406, %cst_174 [1] : vector<64x128xf32> to vector<64xf32>
    %408 = vector.shape_cast %407 : vector<64xf32> to vector<64x1xf32>
    %cst_175 = arith.constant 1.280000e+02 : f32
    %409 = vector.broadcast %cst_175 : f32 to vector<64x1xf32>
    %410 = arith.divf %408, %409 : vector<64x1xf32>
    %cst_176 = arith.constant 9.99999974E-6 : f32
    %411 = vector.broadcast %cst_176 : f32 to vector<64x1xf32>
    %412 = arith.addf %410, %411 : vector<64x1xf32>
    %413 = math.rsqrt %412 : vector<64x1xf32>
    %414 = vector.broadcast %413 : vector<64x1xf32> to vector<64x128xf32>
    %415 = arith.mulf %405, %414 : vector<64x128xf32>
    %416 = vector.broadcast %398 : vector<1x128xf32> to vector<64x128xf32>
    %417 = arith.mulf %415, %416 : vector<64x128xf32>
    %418 = vector.broadcast %399 : vector<1x128xf32> to vector<64x128xf32>
    %419 = arith.addf %417, %418 : vector<64x128xf32>
    %420 = arith.truncf %419 : vector<64x128xf32> to vector<64x128xbf16>
    %c0_177 = arith.constant 0 : index
    %c0_178 = arith.constant 0 : index
    %421 = vector.load %arg5[%c0_177, %c0_178] : memref<256x128xbf16, #tpu.memory_space<vmem>>, vector<256x128xbf16>
    %cst_179 = arith.constant dense<0.000000e+00> : vector<64x256xf32>
    %422 = tpu.matmul %420, %421, %cst_179 {dimension_numbers = #tpu.dot_dimension_numbers<[1], [1], [0], [0], [0, 0, 1, 0], [], []>} : vector<64x128xbf16>, vector<256x128xbf16>, vector<64x256xf32> -> vector<64x256xf32>
    %cst_180 = arith.constant dense<0xFF800000> : vector<64xf32>
    %423 = vector.multi_reduction <maximumf>, %422, %cst_180 [1] : vector<64x256xf32> to vector<64xf32>
    %424 = vector.shape_cast %423 : vector<64xf32> to vector<64x1xf32>
    %425 = vector.broadcast %424 : vector<64x1xf32> to vector<64x256xf32>
    %426 = arith.subf %422, %425 : vector<64x256xf32>
    %427 = math.exp %426 : vector<64x256xf32>
    %cst_181 = arith.constant dense<0.000000e+00> : vector<64xf32>
    %428 = vector.multi_reduction <add>, %427, %cst_181 [1] : vector<64x256xf32> to vector<64xf32>
    %429 = vector.shape_cast %428 : vector<64xf32> to vector<64x1xf32>
    %430 = math.log %429 : vector<64x1xf32>
    %431 = arith.addf %424, %430 : vector<64x1xf32>
    %c0_182 = arith.constant 0 : index
    %c0_183 = arith.constant 0 : index
    %432 = vector.load %arg2[%c0_182, %c0_183] : memref<64x1xi32, #tpu.memory_space<vmem>>, vector<64x1xi32>
    %433 = vector.broadcast %432 : vector<64x1xi32> to vector<64x256xi32>
    %434 = arith.cmpi eq, %0, %433 : vector<64x256xi32>
    %435 = arith.extui %434 : vector<64x256xi1> to vector<64x256xi32>
    %436 = arith.sitofp %435 : vector<64x256xi32> to vector<64x256xf32>
    %437 = arith.mulf %422, %436 : vector<64x256xf32>
    %cst_184 = arith.constant dense<0.000000e+00> : vector<64xf32>
    %438 = vector.multi_reduction <add>, %437, %cst_184 [1] : vector<64x256xf32> to vector<64xf32>
    %439 = vector.shape_cast %438 : vector<64xf32> to vector<64x1xf32>
    %440 = arith.subf %431, %439 : vector<64x1xf32>
    %c0_185 = arith.constant 0 : index
    %c0_186 = arith.constant 0 : index
    %441 = vector.load %arg3[%c0_185, %c0_186] : memref<64x1xi32, #tpu.memory_space<vmem>>, vector<64x1xi32>
    %442 = arith.sitofp %441 : vector<64x1xi32> to vector<64x1xf32>
    %443 = arith.mulf %440, %442 : vector<64x1xf32>
    %444 = vector.shape_cast %443 : vector<64x1xf32> to vector<1x64x1xf32>
    %cst_187 = arith.constant dense<0.000000e+00> : vector<1xf32>
    %445 = vector.multi_reduction <add>, %444, %cst_187 [1, 2] : vector<1x64x1xf32> to vector<1xf32>
    %446 = vector.shape_cast %445 : vector<1xf32> to vector<1x1x1xf32>
    %447 = vector.extract %446[0, 0, 0] : f32 from vector<1x1x1xf32>
    %448 = vector.shape_cast %442 : vector<64x1xf32> to vector<1x64x1xf32>
    %cst_188 = arith.constant dense<0.000000e+00> : vector<1xf32>
    %449 = vector.multi_reduction <add>, %448, %cst_188 [1, 2] : vector<1x64x1xf32> to vector<1xf32>
    %450 = vector.shape_cast %449 : vector<1xf32> to vector<1x1x1xf32>
    %451 = vector.extract %450[0, 0, 0] : f32 from vector<1x1x1xf32>
    %cst_189 = arith.constant 1.000000e+00 : f32
    %452 = arith.maximumf %451, %cst_189 : f32
    %453 = arith.divf %447, %452 : f32
    %454 = vector.broadcast %453 : f32 to vector<1x1xf32>
    %c0_190 = arith.constant 0 : index
    %c0_191 = arith.constant 0 : index
    %455 = vector.load %arg22[%c0_190, %c0_191] : memref<1x1xf32, #tpu.memory_space<vmem>>, vector<1x1xf32>
    tpu.vector_store %arg22[%c0_190, %c0_191], %454 {strides = array<i32>} : memref<1x1xf32, #tpu.memory_space<vmem>>, vector<1x1xf32>,
    %c0_192 = arith.constant 0 : index
    %c0_193 = arith.constant 0 : index
    %456 = vector.load %arg21[%c0_192, %c0_193] : memref<64x256xf32, #tpu.memory_space<vmem>>, vector<64x256xf32>
    tpu.vector_store %arg21[%c0_192, %c0_193], %422 {strides = array<i32>} : memref<64x256xf32, #tpu.memory_space<vmem>>, vector<64x256xf32>,
    return
  }
  func.func @transform_0(%arg0: i32) -> (i32, i32) {
    %c0_i32 = arith.constant 0 : i32
    %c0_i32_0 = arith.constant 0 : i32
    %c0_i32_1 = arith.constant 0 : i32
    return %c0_i32, %c0_i32_0 : i32, i32
  }
  func.func @transform_1(%arg0: i32) -> (i32, i32) {
    %c0_i32 = arith.constant 0 : i32
    %c0_i32_0 = arith.constant 0 : i32
    %c0_i32_1 = arith.constant 0 : i32
    return %c0_i32, %c0_i32_0 : i32, i32
  }
  func.func @transform_2(%arg0: i32) -> (i32, i32) {
    %c0_i32 = arith.constant 0 : i32
    %c0_i32_0 = arith.constant 0 : i32
    %c0_i32_1 = arith.constant 0 : i32
    return %c0_i32, %c0_i32_0 : i32, i32
  }
  func.func @transform_3(%arg0: i32) -> (i32, i32) {
    %c0_i32 = arith.constant 0 : i32
    %c0_i32_0 = arith.constant 0 : i32
    %c0_i32_1 = arith.constant 0 : i32
    return %c0_i32, %c0_i32_0 : i32, i32
  }
  func.func @transform_4(%arg0: i32) -> (i32, i32) {
    %c0_i32 = arith.constant 0 : i32
    %c0_i32_0 = arith.constant 0 : i32
    %c0_i32_1 = arith.constant 0 : i32
    return %c0_i32, %c0_i32_0 : i32, i32
  }
  func.func @transform_5(%arg0: i32) -> (i32, i32) {
    %c0_i32 = arith.constant 0 : i32
    %c0_i32_0 = arith.constant 0 : i32
    %c0_i32_1 = arith.constant 0 : i32
    return %c0_i32, %c0_i32_0 : i32, i32
  }
  func.func @transform_6(%arg0: i32) -> (i32, i32, i32) {
    %c0_i32 = arith.constant 0 : i32
    %c0_i32_0 = arith.constant 0 : i32
    %c0_i32_1 = arith.constant 0 : i32
    %c0_i32_2 = arith.constant 0 : i32
    return %c0_i32, %c0_i32_0, %c0_i32_1 : i32, i32, i32
  }
  func.func @transform_7(%arg0: i32) -> (i32, i32, i32) {
    %c0_i32 = arith.constant 0 : i32
    %c0_i32_0 = arith.constant 0 : i32
    %c0_i32_1 = arith.constant 0 : i32
    %c0_i32_2 = arith.constant 0 : i32
    return %c0_i32, %c0_i32_0, %c0_i32_1 : i32, i32, i32
  }
  func.func @transform_8(%arg0: i32) -> (i32, i32, i32) {
    %c0_i32 = arith.constant 0 : i32
    %c0_i32_0 = arith.constant 0 : i32
    %c0_i32_1 = arith.constant 0 : i32
    %c0_i32_2 = arith.constant 0 : i32
    return %c0_i32, %c0_i32_0, %c0_i32_1 : i32, i32, i32
  }
  func.func @transform_9(%arg0: i32) -> (i32, i32, i32) {
    %c0_i32 = arith.constant 0 : i32
    %c0_i32_0 = arith.constant 0 : i32
    %c0_i32_1 = arith.constant 0 : i32
    %c0_i32_2 = arith.constant 0 : i32
    return %c0_i32, %c0_i32_0, %c0_i32_1 : i32, i32, i32
  }
  func.func @transform_10(%arg0: i32) -> (i32, i32, i32) {
    %c0_i32 = arith.constant 0 : i32
    %c0_i32_0 = arith.constant 0 : i32
    %c0_i32_1 = arith.constant 0 : i32
    %c0_i32_2 = arith.constant 0 : i32
    return %c0_i32, %c0_i32_0, %c0_i32_1 : i32, i32, i32
  }
  func.func @transform_11(%arg0: i32) -> (i32, i32, i32) {
    %c0_i32 = arith.constant 0 : i32
    %c0_i32_0 = arith.constant 0 : i32
    %c0_i32_1 = arith.constant 0 : i32
    %c0_i32_2 = arith.constant 0 : i32
    return %c0_i32, %c0_i32_0, %c0_i32_1 : i32, i32, i32
  }
  func.func @transform_12(%arg0: i32) -> (i32, i32, i32) {
    %c0_i32 = arith.constant 0 : i32
    %c0_i32_0 = arith.constant 0 : i32
    %c0_i32_1 = arith.constant 0 : i32
    %c0_i32_2 = arith.constant 0 : i32
    return %c0_i32, %c0_i32_0, %c0_i32_1 : i32, i32, i32
  }
  func.func @transform_13(%arg0: i32) -> (i32, i32, i32) {
    %c0_i32 = arith.constant 0 : i32
    %c0_i32_0 = arith.constant 0 : i32
    %c0_i32_1 = arith.constant 0 : i32
    %c0_i32_2 = arith.constant 0 : i32
    return %c0_i32, %c0_i32_0, %c0_i32_1 : i32, i32, i32
  }
  func.func @transform_14(%arg0: i32) -> (i32, i32, i32) {
    %c0_i32 = arith.constant 0 : i32
    %c0_i32_0 = arith.constant 0 : i32
    %c0_i32_1 = arith.constant 0 : i32
    %c0_i32_2 = arith.constant 0 : i32
    return %c0_i32, %c0_i32_0, %c0_i32_1 : i32, i32, i32
  }
  func.func @transform_15(%arg0: i32) -> (i32, i32, i32) {
    %c0_i32 = arith.constant 0 : i32
    %c0_i32_0 = arith.constant 0 : i32
    %c0_i32_1 = arith.constant 0 : i32
    %c0_i32_2 = arith.constant 0 : i32
    return %c0_i32, %c0_i32_0, %c0_i32_1 : i32, i32, i32
  }
  func.func @transform_16(%arg0: i32) -> (i32, i32, i32) {
    %c0_i32 = arith.constant 0 : i32
    %c0_i32_0 = arith.constant 0 : i32
    %c0_i32_1 = arith.constant 0 : i32
    %c0_i32_2 = arith.constant 0 : i32
    return %c0_i32, %c0_i32_0, %c0_i32_1 : i32, i32, i32
  }
  func.func @transform_17(%arg0: i32) -> (i32, i32, i32) {
    %c0_i32 = arith.constant 0 : i32
    %c0_i32_0 = arith.constant 0 : i32
    %c0_i32_1 = arith.constant 0 : i32
    %c0_i32_2 = arith.constant 0 : i32
    return %c0_i32, %c0_i32_0, %c0_i32_1 : i32, i32, i32
  }
  func.func @transform_18(%arg0: i32) -> (i32, i32) {
    %c0_i32 = arith.constant 0 : i32
    %c0_i32_0 = arith.constant 0 : i32
    %c0_i32_1 = arith.constant 0 : i32
    return %c0_i32, %c0_i32_0 : i32, i32
  }
  func.func @transform_19(%arg0: i32) -> (i32, i32) {
    %c0_i32 = arith.constant 0 : i32
    %c0_i32_0 = arith.constant 0 : i32
    %c0_i32_1 = arith.constant 0 : i32
    return %c0_i32, %c0_i32_0 : i32, i32
  }
  func.func @transform_20(%arg0: i32) -> (i32, i32) {
    %c0_i32 = arith.constant 0 : i32
    %c0_i32_0 = arith.constant 0 : i32
    %c0_i32_1 = arith.constant 0 : i32
    return %c0_i32, %c0_i32_0 : i32, i32
  }
  func.func @transform_21(%arg0: i32) -> (i32, i32) {
    %c0_i32 = arith.constant 0 : i32
    %c0_i32_0 = arith.constant 0 : i32
    %c0_i32_1 = arith.constant 0 : i32
    return %c0_i32, %c0_i32_0 : i32, i32
  }
}

</mosaic_0001>

<bundles_post_ra>
// kernel: gpt2_training_step.1
= control target key start
LH: loop header
LB: loop body
LE: loop exit
PB: predicated region body
PF: predicated region fallthrough
CT: control target
= control target key end

     0   :  { %s13309_s0 = inlined_call_operand.vmem [shape: s32[64,1], index: 0, kind: input, shape index: {}]   ;;  %s13310_s1 = inlined_call_operand.vmem [shape: s32[64,1], index: 1, kind: input, shape index: {}]   ;;  %s13311_s2 = inlined_call_operand.vmem [shape: s32[64,1], index: 2, kind: input, shape index: {}]   ;;  %s13312_s3 = inlined_call_operand.vmem [shape: s32[1,64], index: 3, kind: input, shape index: {}]   ;;  %s13313_s4 = inlined_call_operand.vmem [shape: bf16[256,128], index: 4, kind: input, shape index: {}]   ;;  %s13314_s5 = inlined_call_operand.vmem [shape: bf16[64,128], index: 5, kind: input, shape index: {}]   ;;  %s13315_s6 = inlined_call_operand.vmem [shape: f32[2,1,128], index: 6, kind: input, shape index: {}]   ;;  %s13316_s7 = inlined_call_operand.hbm [shape: f32[2,1,128], index: 7, kind: input, shape index: {}]   ;;  %s13317_s8 = inlined_call_operand.hbm [shape: bf16[2,128,384], index: 8, kind: input, shape index: {}]   ;;  %s13318_s9 = inlined_call_operand.vmem [shape: f32[2,1,384], index: 9, kind: input, shape index: {}]   ;;  %s13319_s10 = inlined_call_operand.vmem [shape: bf16[2,128,128], index: 10, kind: input, shape index: {}]   ;;  %s13320_s11 = inlined_call_operand.hbm [shape: f32[2,1,128], index: 11, kind: input, shape index: {}]   ;;  %s13321_s12 = inlined_call_operand.hbm [shape: f32[2,1,128], index: 12, kind: input, shape index: {}]   ;;  %s13322_s13 = inlined_call_operand.hbm [shape: f32[2,1,128], index: 13, kind: input, shape index: {}]   ;;  %s13323_s14 = inlined_call_operand.hbm [shape: bf16[2,128,512], index: 14, kind: input, shape index: {}]   ;;  %s13324_s15 = inlined_call_operand.hbm [shape: f32[2,1,512], index: 15, kind: input, shape index: {}]   ;;  %s13325_s16 = inlined_call_operand.hbm [shape: bf16[2,512,128], index: 16, kind: input, shape index: {}]   ;;  %s13326_s17 = inlined_call_operand.hbm [shape: f32[2,1,128], index: 17, kind: input, shape index: {}]   ;;  %s13327_s18 = inlined_call_operand.vmem [shape: f32[1,128], index: 18, kind: input, shape index: {}]   ;;  %s13328_s19 = inlined_call_operand.hbm [shape: f32[1,128], index: 19, kind: input, shape index: {}]   ;;  %s13329_s20 = inlined_call_operand.hbm [shape: f32[64,256], index: 20, kind: output, shape index: {0}]   ;;  %s13330_s21 = inlined_call_operand.hbm [shape: f32[1,1], index: 21, kind: output, shape index: {1}]  }
   0x1   :  { %13395 = sst [smem:[#allocation55_spill]] %s13309_s0 }
   0x2   :  { %13396 = sst [smem:[#allocation56_spill]] %s13310_s1 }
   0x3   :  { %13397 = sst [smem:[#allocation57_spill]] %s13311_s2 }
   0x4   :  { %13398 = sst [smem:[#allocation58_spill]] %s13312_s3 }
   0x5   :  { %13399 = sst [smem:[#allocation59_spill]] %s13313_s4 }
   0x6   :  { %13400 = sst [smem:[#allocation60_spill]] %s13314_s5 }
   0x7   :  { %13401 = sst [smem:[#allocation61_spill]] %s13330_s21 }
   0x8   :  { %27 = vsyncpa [#allocation3], 0 }
   0x9   :  { %28 = vsyncpa [#allocation6], 0 }
   0xa   :  { %29 = vsyncpa [#allocation9], 0 }
   0xb   :  { %30 = vsyncpa [#allocation12], 0 }
   0xc   :  { %31 = vsyncpa [#allocation15], 0 }
   0xd   :  { %32 = vsyncpa [#allocation18], 0 }
   0xe   :  { %33 = vsyncpa [#allocation4], 0 }
   0xf   :  { %34 = vsyncpa [#allocation21], 0  ;;  %s9813_s2 = smov [#allocation5]   ;;  %s9533_s3 = scalar_lea.hbm %s13317_s8, 6144 }
  0x10   :  { %s66_s25 = sshll.u32 %s9813_s2, 4  ;;  %p9534_p0 = scmp.ne.s32.totalorder %s13317_s8, %s9533_s3  ;;  %s67_s25 = int_to_ptr.vmem [resolvable:$true] %s66_s25 }
  0x11   :  { %p9537_p1 = scmp.lt.u32.totalorder %s9533_s3, %s13317_s8 }
  0x13   :  { %p9539_p2 = pnand %p9537_p1, %p9534_p0 }
  0x15   :  { %9542 = shalt.err (!%p9539_p2)
}
  0x16   :  { %s9543_s30 = scalar_lea.vmem %s67_s25, 6144  ;;  %p9548_p4 = scmp.lt.s32.totalorder %s67_s25, %s67_s25 }
  0x17   :  { %p9544_p3 = scmp.ne.s32.totalorder %s67_s25, %s9543_s30  ;;  %p9549_p5 = scmp.lt.s32.totalorder %s9543_s30, %s9543_s30 }
  0x19   :  { %p9550_p6 = por %p9549_p5, %p9548_p4 }
  0x1b   :  { %p9551_p7 = pnand %p9550_p6, %p9544_p3 }
  0x1d   :  { %9554 = shalt.err (!%p9551_p7)
}
  0x1e   :  { %s9814_s5 = smov 192   ;;  %s9815_s22 = smov 12  }
  0x1f   :  { %72 = dma.hbm_to_vmem [thread:$0]  %s13317_s8, 6144, %s67_s25, [#allocation6], %s9814_s5, %s9814_s5, %s9815_s22  }
  0x20   :  { %s9816_s24 = smov [#allocation8]   ;;  %s9817_s26 = smov [#allocation11]  }
  0x21   :  { %s94_s2 = sshll.u32 %s9816_s24, 4  ;;  %s118_s27 = sshll.u32 %s9817_s26, 4  ;;  %s95_s2 = int_to_ptr.vmem [resolvable:$true] %s94_s2  ;;  %s119_s27 = int_to_ptr.vmem [resolvable:$true] %s118_s27 }
  0x22   :  { %s9555_s29 = scalar_lea.hbm %s13321_s12, 32 }
  0x23   :  { %p9556_p8 = scmp.ne.s32.totalorder %s13321_s12, %s9555_s29  ;;  %p9559_p9 = scmp.lt.u32.totalorder %s9555_s29, %s13321_s12 }
  0x25   :  { %p9561_p10 = pnand %p9559_p9, %p9556_p8 }
  0x27   :  { %9564 = shalt.err (!%p9561_p10)
}
  0x28   :  { %s9565_s8 = scalar_lea.vmem %s95_s2, 32  ;;  %p9570_p12 = scmp.lt.s32.totalorder %s95_s2, %s95_s2 }
  0x29   :  { %p9566_p11 = scmp.ne.s32.totalorder %s95_s2, %s9565_s8  ;;  %p9571_p13 = scmp.lt.s32.totalorder %s9565_s8, %s9565_s8 }
  0x2b   :  { %p9572_p0 = por %p9571_p13, %p9570_p12 }
  0x2d   :  { %p9573_p1 = pnand %p9572_p0, %p9566_p11 }
  0x2f   :  { %9576 = shalt.err (!%p9573_p1)
}
  0x30   :  { %s9818_s25 = smov 16   ;;  %s9819_s5 = smov 1  }
  0x31   :  { %100 = dma.hbm_to_vmem [thread:$0]  %s13321_s12, 32, %s95_s2, [#allocation9], %s9818_s25, %s9818_s25, %s9819_s5  }
  0x32   :  { %s9577_s24 = scalar_lea.hbm %s13323_s14, 8192 }
  0x33   :  { %p9578_p2 = scmp.ne.s32.totalorder %s13323_s14, %s9577_s24  ;;  %p9581_p3 = scmp.lt.u32.totalorder %s9577_s24, %s13323_s14 }
  0x35   :  { %p9583_p4 = pnand %p9581_p3, %p9578_p2 }
  0x37   :  { %9586 = shalt.err (!%p9583_p4)
}
  0x38   :  { %s9587_s0 = scalar_lea.vmem %s119_s27, 8192  ;;  %p9592_p6 = scmp.lt.s32.totalorder %s119_s27, %s119_s27 }
  0x39   :  { %p9588_p5 = scmp.ne.s32.totalorder %s119_s27, %s9587_s0  ;;  %p9593_p7 = scmp.lt.s32.totalorder %s9587_s0, %s9587_s0 }
  0x3b   :  { %p9594_p8 = por %p9593_p7, %p9592_p6 }
  0x3d   :  { %p9595_p9 = pnand %p9594_p8, %p9588_p5 }
  0x3f   :  { %9598 = shalt.err (!%p9595_p9)
}
  0x40   :  { %s9820_s12 = smov 256   ;;  %s9821_s30 = smov [#allocation14]  }
  0x41   :  { %124 = dma.hbm_to_vmem [thread:$0]  %s13323_s14, 8192, %s119_s27, [#allocation12], %s9820_s12, %s9820_s12, %s9818_s25  }
  0x42   :  { %s142_s8 = sshll.u32 %s9821_s30, 4  ;;  %s9822_s22 = smov [#allocation2]   ;;  %s143_s8 = int_to_ptr.vmem [resolvable:$true] %s142_s8 }
  0x43   :  { %s54_s23 = sshll.u32 %s9822_s22, 4  ;;  %s9599_s24 = scalar_lea.hbm %s13325_s16, 8192  ;;  %s9990_s23 = int_to_ptr.vmem [resolvable:$true] %s54_s23 }
  0x44   :  { %p9600_p10 = scmp.ne.s32.totalorder %s13325_s16, %s9599_s24  ;;  %p9603_p11 = scmp.lt.u32.totalorder %s9599_s24, %s13325_s16 }
  0x46   :  { %p9605_p12 = pnand %p9603_p11, %p9600_p10 }
  0x48   :  { %9608 = shalt.err (!%p9605_p12)
}
  0x49   :  { %s9609_s14 = scalar_lea.vmem %s143_s8, 8192  ;;  %p9614_p0 = scmp.lt.s32.totalorder %s143_s8, %s143_s8 }
  0x4a   :  { %p9610_p13 = scmp.ne.s32.totalorder %s143_s8, %s9609_s14  ;;  %p9615_p1 = scmp.lt.s32.totalorder %s9609_s14, %s9609_s14 }
  0x4c   :  { %p9616_p2 = por %p9615_p1, %p9614_p0 }
  0x4e   :  { %p9617_p3 = pnand %p9616_p2, %p9610_p13 }
  0x50   :  { %9620 = shalt.err (!%p9617_p3)
}
  0x51   :  { %s9823_s27 = smov 64   ;;  %s9824_s0 = smov 4  }
  0x52   :  { %148 = dma.hbm_to_vmem [thread:$0]  %s13325_s16, 8192, %s143_s8, [#allocation15], %s9823_s27, %s9823_s27, %s9824_s0  }
  0x53   :  { %s9621_s21 = scalar_lea.hbm %s13316_s7, 32 }
  0x54   :  { %p9622_p4 = scmp.ne.s32.totalorder %s13316_s7, %s9621_s21  ;;  %p9625_p5 = scmp.lt.u32.totalorder %s9621_s21, %s13316_s7 }
  0x56   :  { %p9627_p6 = pnand %p9625_p5, %p9622_p4 }
  0x58   :  { %9630 = shalt.err (!%p9627_p6)
}
  0x59   :  { %s9631_s28 = scalar_lea.vmem %s9990_s23, 32  ;;  %p9636_p8 = scmp.lt.s32.totalorder %s9990_s23, %s9990_s23 }
  0x5a   :  { %p9632_p7 = scmp.ne.s32.totalorder %s9990_s23, %s9631_s28  ;;  %p9637_p9 = scmp.lt.s32.totalorder %s9631_s28, %s9631_s28 }
  0x5c   :  { %p9638_p10 = por %p9637_p9, %p9636_p8 }
  0x5e   :  { %p9639_p11 = pnand %p9638_p10, %p9632_p7 }
  0x60   :  { %9642 = shalt.err (!%p9639_p11)
}
  0x61   :  { %60 = dma.hbm_to_vmem [thread:$0]  %s13316_s7, 32, %s9990_s23, [#allocation3], %s9818_s25, %s9818_s25, %s9819_s5  }
  0x62   :  { %s9825_s29 = smov [#allocation7]   ;;  %s9826_s2 = smov [#allocation10]  }
  0x63   :  { %s82_s14 = sshll.u32 %s9825_s29, 4  ;;  %s106_s4 = sshll.u32 %s9826_s2, 4  ;;  %s83_s14 = int_to_ptr.vmem [resolvable:$true] %s82_s14  ;;  %s10027_s4 = int_to_ptr.vmem [resolvable:$true] %s106_s4 }
  0x64   :  { %s9643_s21 = scalar_lea.hbm %s13320_s11, 32 }
  0x65   :  { %p9644_p12 = scmp.ne.s32.totalorder %s13320_s11, %s9643_s21  ;;  %p9647_p13 = scmp.lt.u32.totalorder %s9643_s21, %s13320_s11 }
  0x67   :  { %p9649_p0 = pnand %p9647_p13, %p9644_p12 }
  0x69   :  { %9652 = shalt.err (!%p9649_p0)
}
  0x6a   :  { %s9653_s7 = scalar_lea.vmem %s83_s14, 32  ;;  %p9658_p2 = scmp.lt.s32.totalorder %s83_s14, %s83_s14 }
  0x6b   :  { %p9654_p1 = scmp.ne.s32.totalorder %s83_s14, %s9653_s7  ;;  %p9659_p3 = scmp.lt.s32.totalorder %s9653_s7, %s9653_s7 }
  0x6d   :  { %p9660_p4 = por %p9659_p3, %p9658_p2 }
  0x6f   :  { %p9661_p5 = pnand %p9660_p4, %p9654_p1 }
  0x71   :  { %9664 = shalt.err (!%p9661_p5)
}
  0x72   :  { %88 = dma.hbm_to_vmem [thread:$0]  %s13320_s11, 32, %s83_s14, [#allocation6], %s9818_s25, %s9818_s25, %s9819_s5  }
  0x73   :  { %s9665_s29 = scalar_lea.hbm %s13322_s13, 32 }
  0x74   :  { %p9666_p6 = scmp.ne.s32.totalorder %s13322_s13, %s9665_s29  ;;  %p9669_p7 = scmp.lt.u32.totalorder %s9665_s29, %s13322_s13 }
  0x76   :  { %p9671_p8 = pnand %p9669_p7, %p9666_p6 }
  0x78   :  { %9674 = shalt.err (!%p9671_p8)
}
  0x79   :  { %s9675_s1 = scalar_lea.vmem %s10027_s4, 32  ;;  %p9680_p10 = scmp.lt.s32.totalorder %s10027_s4, %s10027_s4 }
  0x7a   :  { %p9676_p9 = scmp.ne.s32.totalorder %s10027_s4, %s9675_s1  ;;  %p9681_p11 = scmp.lt.s32.totalorder %s9675_s1, %s9675_s1 }
  0x7c   :  { %p9682_p12 = por %p9681_p11, %p9680_p10 }
  0x7e   :  { %p9683_p13 = pnand %p9682_p12, %p9676_p9 }
  0x80   :  { %9686 = shalt.err (!%p9683_p13)
}
  0x81   :  { %112 = dma.hbm_to_vmem [thread:$0]  %s13322_s13, 32, %s10027_s4, [#allocation9], %s9818_s25, %s9818_s25, %s9819_s5  }
  0x82   :  { %s9827_s24 = smov [#allocation13]   ;;  %s9828_s3 = smov [#allocation16]  }
  0x83   :  { %s130_s26 = sshll.u32 %s9827_s24, 4  ;;  %s154_s7 = sshll.u32 %s9828_s3, 4  ;;  %s131_s26 = int_to_ptr.vmem [resolvable:$true] %s130_s26  ;;  %s10064_s7 = int_to_ptr.vmem [resolvable:$true] %s154_s7 }
  0x84   :  { %s9687_s16 = scalar_lea.hbm %s13324_s15, 128 }
  0x85   :  { %p9688_p0 = scmp.ne.s32.totalorder %s13324_s15, %s9687_s16  ;;  %p9691_p1 = scmp.lt.u32.totalorder %s9687_s16, %s13324_s15 }
  0x87   :  { %p9693_p2 = pnand %p9691_p1, %p9688_p0 }
  0x89   :  { %9696 = shalt.err (!%p9693_p2)
}
  0x8a   :  { %s9697_s13 = scalar_lea.vmem %s131_s26, 128  ;;  %p9702_p4 = scmp.lt.s32.totalorder %s131_s26, %s131_s26 }
  0x8b   :  { %p9698_p3 = scmp.ne.s32.totalorder %s131_s26, %s9697_s13  ;;  %p9703_p5 = scmp.lt.s32.totalorder %s9697_s13, %s9697_s13 }
  0x8d   :  { %p9704_p6 = por %p9703_p5, %p9702_p4 }
  0x8f   :  { %p9705_p7 = pnand %p9704_p6, %p9698_p3 }
  0x91   :  { %9708 = shalt.err (!%p9705_p7)
}
  0x92   :  { %136 = dma.hbm_to_vmem [thread:$0]  %s13324_s15, 128, %s131_s26, [#allocation12], %s9823_s27, %s9823_s27, %s9824_s0  }
  0x93   :  { %s9709_s11 = scalar_lea.hbm %s13326_s17, 32 }
  0x94   :  { %p9710_p8 = scmp.ne.s32.totalorder %s13326_s17, %s9709_s11  ;;  %p9713_p9 = scmp.lt.u32.totalorder %s9709_s11, %s13326_s17 }
  0x96   :  { %p9715_p10 = pnand %p9713_p9, %p9710_p8 }
  0x98   :  { %9718 = shalt.err (!%p9715_p10)
}
  0x99   :  { %s9719_s28 = scalar_lea.vmem %s10064_s7, 32  ;;  %p9724_p12 = scmp.lt.s32.totalorder %s10064_s7, %s10064_s7 }
  0x9a   :  { %p9720_p11 = scmp.ne.s32.totalorder %s10064_s7, %s9719_s28  ;;  %p9725_p13 = scmp.lt.s32.totalorder %s9719_s28, %s9719_s28 }
  0x9c   :  { %p9726_p0 = por %p9725_p13, %p9724_p12 }
  0x9e   :  { %p9727_p1 = pnand %p9726_p0, %p9720_p11 }
  0xa0   :  { %9730 = shalt.err (!%p9727_p1)
}
  0xa1   :  { %160 = dma.hbm_to_vmem [thread:$0]  %s13326_s17, 32, %s10064_s7, [#allocation15], %s9818_s25, %s9818_s25, %s9819_s5  }
  0xa2   :  { %s9829_s26 = smov [#allocation17]   ;;  %s9731_s2 = scalar_lea.hbm %s13328_s19, 16 }
  0xa3   :  { %s169_s16 = sshll.u32 %s9829_s26, 4  ;;  %p9732_p2 = scmp.ne.s32.totalorder %s13328_s19, %s9731_s2  ;;  %s170_s16 = int_to_ptr.vmem [resolvable:$true] %s169_s16 }
  0xa4   :  { %p9735_p3 = scmp.lt.u32.totalorder %s9731_s2, %s13328_s19 }
  0xa6   :  { %p9737_p4 = pnand %p9735_p3, %p9732_p2 }
  0xa8   :  { %9740 = shalt.err (!%p9737_p4)
}
  0xa9   :  { %s9741_s21 = scalar_lea.vmem %s170_s16, 16  ;;  %s9745_s17 = scalar_lea.vmem %s170_s16, 32 }
  0xaa   :  { %p9742_p5 = scmp.ne.s32.totalorder %s170_s16, %s9741_s21  ;;  %p9746_p6 = scmp.lt.s32.totalorder %s170_s16, %s170_s16 }
  0xab   :  { %p9747_p7 = scmp.lt.s32.totalorder %s9745_s17, %s9741_s21 }
  0xad   :  { %p9748_p8 = por %p9747_p7, %p9746_p6 }
  0xaf   :  { %p9749_p9 = pnand %p9748_p8, %p9742_p5 }
  0xb1   :  { %9752 = shalt.err (!%p9749_p9)
}
  0xb2   :  { %172 = dma.hbm_to_vmem [thread:$0]  %s13328_s19, 16, %s170_s16, [#allocation18]  }
  0xb3   :  { %9797 = dma.done.wait [#allocation3], 32  }
  0xb4   :  { %9798 = vsyncadd [#allocation3], 4294967264 }
  0xb5   :  { %9799 = dma.done.wait [#allocation6], 6176  }
  0xb6   :  { %9800 = vsyncadd [#allocation6], 4294961120 }
  0xb7   :  { %9801 = dma.done.wait [#allocation9], 64  }
  0xb8   :  { %9802 = vsyncadd [#allocation9], 4294967232 }
  0xb9   :  { %9803 = dma.done.wait [#allocation12], 8320  }
  0xba   :  { %9804 = vsyncadd [#allocation12], 4294958976 }
  0xbb   :  { %9805 = dma.done.wait [#allocation15], 8224  }
  0xbc   :  { %9806 = vsyncadd [#allocation15], 4294959072 }
  0xbd   :  { %9807 = dma.done.wait [#allocation18], 16  }
  0xbe   :  { %9808 = vsyncadd [#allocation18], 4294967280  ;;  %v13337_v0 = vmov 0   ;;  %s13402_s11 = sld [smem:[#allocation55_spill]]  ;;  %s13403_s16 = sld [smem:[#allocation59_spill]]  ;;  %v204_v25 = vlaneseq }
  0xbf   :  { %8626 = vset.pattern.permute.xlu1 %v13337_v0  ;;  %8625 = vset.pattern.permute.xlu0 %v13337_v0  ;;  %v9831_v32 = vmov 1.0|1.0   ;;  %s13406_s15 = sld [smem:[#allocation60_spill]]  ;;  %s9832_s21 = smov 96  }
  0xc0   :  { %955 = vmatprep.mubr.bf16.mxu1 %v13337_v0  ;;  %v10189_v26 = vand.u32 127, %v204_v25  ;;  %s13411_s7 = sld [smem:[#allocation58_spill]]  ;;  %s9833_s19 = smov 32  }
  0xc1   :  { %s13529_s17 = sld [smem:[#allocation56_spill]]  ;;  %s13532_s30 = sld [smem:[#allocation57_spill]] }
  0xc2   :  { %13404 = vst [vmem:[#allocation30_spill] sm:$0xff] %v10189_v26  ;;  %v10192_v29 = vadd.s32 128, %v10189_v26  ;;  %s9835_s14 = smov [#allocation19]  }
  0xc3   :  { %s7408_s24 = sshll.u32 %s9835_s14, 4  ;;  %s7409_s24 = int_to_ptr.vmem [resolvable:$true] %s7408_s24 }
  0xc4   :  { %v209_v1 = vld [vmem:[%s13402_s11 + $0x10] sm:$0xff]  ;;  %v207_v2 = vld [vmem:[%s13402_s11] sm:$0xff]  ;;  %v210_v3 = vld [vmem:[%s13402_s11 + $0x18] sm:$0xff]  ;;  %13405 = vst [vmem:[#allocation31_spill] sm:$0xff] %v10192_v29  ;;  %s9753_s3 = scalar_lea.vmem %s7409_s24, 2048  ;;  %p9758_p11 = scmp.lt.s32.totalorder %s7409_s24, %s7409_s24 }
  0xc5   :  { %222 = vperm.xlu1 %8626, %v209_v1   ;;  %216 = vperm.xlu0 %8625, %v207_v2   ;;  %v208_v4 = vld [vmem:[%s13402_s11 + $0x8] sm:$0xff]  ;;  %v8747_v5 = vld [vmem:[%s13403_s16 + $0x40] sm:$0xff]   ;;  %v8751_v11 = vld [vmem:[%s13403_s16 + $0x50] sm:$0xff]   ;;  %p9754_p10 = scmp.ne.s32.totalorder %s7409_s24, %s9753_s3  ;;  %p9759_p12 = scmp.lt.s32.totalorder %s9753_s3, %s9753_s3 }
  0xc6   :  { %v212_v6 = vld [vmem:[%s13402_s11 + $0x28] sm:$0xff]  ;;  %v8748_v7 = vld [vmem:[%s13403_s16] sm:$0xff]   ;;  %7810 = vmatprep.subr.bf16.mxu0 %v8747_v5  ;;  %v214_v12 = vld [vmem:[%s13402_s11 + $0x38] sm:$0xff] }
  0xc7   :  { %v8749_v8 = vld [vmem:[%s13403_s16 + $0x48] sm:$0xff]   ;;  %v211_v9 = vld [vmem:[%s13402_s11 + $0x20] sm:$0xff]  ;;  %7811 = vmatpush3.bf16.msra.mxu0 %v8748_v7  ;;  %v213_v13 = vld [vmem:[%s13402_s11 + $0x30] sm:$0xff]  ;;  %p9760_p13 = por %p9759_p12, %p9758_p11 }
  0xc8   :  { %v8750_v10 = vld [vmem:[%s13403_s16 + $0x8] sm:$0xff]   ;;  %7812 = vmatprep.subr.bf16.mxu0 %v8749_v8  ;;  %v8752_v14 = vld [vmem:[%s13403_s16 + $0x10] sm:$0xff]   ;;  %v8753_v15 = vld [vmem:[%s13403_s16 + $0x58] sm:$0xff]  }
  0xc9   :  { %225 = vperm.xlu1 %8626, %v210_v3   ;;  %219 = vperm.xlu0 %8625, %v208_v4   ;;  %v8754_v16 = vld [vmem:[%s13403_s16 + $0x18] sm:$0xff]   ;;  %v8755_v17 = vld [vmem:[%s13403_s16 + $0x60] sm:$0xff]   ;;  %v8757_v19 = vld [vmem:[%s13403_s16 + $0x68] sm:$0xff]   ;;  %p9761_p0 = pnand %p9760_p13, %p9754_p10 }
  0xca   :  { %v8756_v18 = vld [vmem:[%s13403_s16 + $0x20] sm:$0xff]   ;;  %v8758_v20 = vld [vmem:[%s13403_s16 + $0x28] sm:$0xff]   ;;  %v8759_v21 = vld [vmem:[%s13403_s16 + $0x70] sm:$0xff]  }
  0xcb   :  { %7813 = vmatpush3.bf16.msra.mxu0 %v8750_v10  ;;  %v8760_v22 = vld [vmem:[%s13403_s16 + $0x30] sm:$0xff]   ;;  %v8761_v23 = vld [vmem:[%s13403_s16 + $0x78] sm:$0xff]   ;;  %v7792_v37 = vld [vmem:[%s13406_s15] sm:$0xff]  }
  0xcc   :  { %7814 = vmatprep.subr.bf16.mxu0 %v8751_v11  ;;  %v8762_v24 = vld [vmem:[%s13403_s16 + $0x38] sm:$0xff]   ;;  %v7793_v39 = vunpack.c.l.bf16 %v7792_v37  ;;  %v7794_v43 = vunpack.c.h.bf16 %v7792_v37  ;;  %v7807_v47 = vld [vmem:[%s13406_s15 + $0x8] sm:$0xff]   ;;  %v7808_v58 = vld [vmem:[%s13406_s15 + $0x10] sm:$0xff]  }
  0xcd   :  { %231 = vperm.xlu1 %8626, %v212_v6   ;;  %228 = vperm.xlu0 %8625, %v211_v9   ;;  %v7797_v50 = vunpack.c.l.bf16 %v7807_v47  ;;  %v7798_v56 = vunpack.c.h.bf16 %v7807_v47  ;;  %v7801_v61 = vunpack.c.l.bf16 %v7808_v58  ;;  %v7802_v2 = vunpack.c.h.bf16 %v7808_v58  ;;  %v7809_v6 = vld [vmem:[%s13406_s15 + $0x18] sm:$0xff]  }
  0xce   :  { %v7805_v9 = vunpack.c.l.bf16 %v7809_v6 }
  0xcf   :  { %7815 = vmatpush3.bf16.msra.mxu0 %v8752_v14 }
  0xd0   :  { %7816 = vmatprep.subr.bf16.mxu0 %v8753_v15 }
  0xd1   :  { %237 = vperm.xlu1 %8626, %v214_v12   ;;  %234 = vperm.xlu0 %8625, %v213_v13   ;;  %v7806_v13 = vunpack.c.h.bf16 %v7809_v6 }
  0xd3   :  { %7817 = vmatpush3.bf16.msra.mxu0 %v8754_v16 }
  0xd4   :  { %7818 = vmatprep.subr.bf16.mxu0 %v8755_v17 }
  0xd7   :  { %7819 = vmatpush3.bf16.msra.mxu0 %v8756_v18  ;;  %v8763_v18 = vld [vmem:[#allocation5 + $0x4] ss:$12 sps:$4 sm:$0xff]  }
  0xd8   :  { %7820 = vmatprep.subr.bf16.mxu0 %v8757_v19  ;;  %v8765_v19 = vld [vmem:[#allocation5] ss:$12 sps:$4 sm:$0xff]   ;;  %923 = vmatprep.subr.bf16.mxu1 %v8763_v18  ;;  %v8791_v18 = vld [vmem:[#allocation5 + $0xa8] ss:$12 sps:$4 sm:$0xff]  }
  0xd9   :  { %924 = vmatpush1.bf16.msra.mxu1 %v8765_v19  ;;  %v8792_v19 = vld [vmem:[#allocation5 + $0x80] ss:$12 sps:$4 sm:$0xff]  }
  0xdb   :  { %7821 = vmatpush3.bf16.msra.mxu0 %v8758_v20  ;;  %v8766_v20 = vld [vmem:[#allocation5 + $0x1c] ss:$12 sps:$4 sm:$0xff]  }
  0xdc   :  { %7822 = vmatprep.subr.bf16.mxu0 %v8759_v21  ;;  %v8768_v21 = vld [vmem:[#allocation5 + $0x18] ss:$12 sps:$4 sm:$0xff]   ;;  %925 = vmatprep.subr.bf16.mxu1 %v8766_v20 }
  0xdd   :  { %926 = vmatpush1.bf16.msra.mxu1 %v8768_v21  ;;  %v8793_v20 = vld [vmem:[#allocation5 + $0x98] ss:$12 sps:$4 sm:$0xff]   ;;  %v8794_v21 = vld [vmem:[#allocation5 + $0xb0] ss:$12 sps:$4 sm:$0xff]  }
  0xdf   :  { %7823 = vmatpush3.bf16.msra.mxu0 %v8760_v22 }
  0xe0   :  { %7824 = vmatprep.subr.bf16.mxu0 %v8761_v23 }
  0xe3   :  { %7825 = vmatpush3.bf16.msra.mxu0 %v8762_v24 }
 0x144   :  { %v223_v27 = vpop.permute.xlu1 %222  ;;  %v217_v28 = vpop.permute.xlu0 %216 }
 0x145   :  { %vm244_vm0 = vcmp.eq.s32.totalorder %v10192_v29, %v223_v27  ;;  %vm240_vm3 = vcmp.eq.s32.totalorder %v10192_v29, %v217_v28  ;;  %vm239_vm5 = vcmp.eq.s32.totalorder %v10189_v26, %v217_v28  ;;  %vm243_vm9 = vcmp.eq.s32.totalorder %v10189_v26, %v223_v27 }
 0x148   :  { %v226_v30 = vpop.permute.xlu1 %225  ;;  %v220_v31 = vpop.permute.xlu0 %219 }
 0x149   :  { %vm246_vm1 = vcmp.eq.s32.totalorder %v10192_v29, %v226_v30  ;;  %vm241_vm2 = vcmp.eq.s32.totalorder %v10189_v26, %v220_v31  ;;  %vm242_vm4 = vcmp.eq.s32.totalorder %v10192_v29, %v220_v31  ;;  %vm245_vm10 = vcmp.eq.s32.totalorder %v10189_v26, %v226_v30 }
 0x14a   :  { %vm7471_vm6 = vmpackc.low %vm242_vm4, %vm240_vm3 }
 0x14b   :  { %7472 = vmatprep.mubr.msk.bf16.mxu0 %vm7471_vm6, %v9831_v32  ;;  %vm7473_vm7 = vmpackc.low %vm241_vm2, %vm239_vm5 }
 0x14c   :  { %7474 = vmatmul.mubr.msk.bf16.vlgmr.msra.gmra.mrb[0].mxu0 %vm7473_vm7, %v9831_v32  ;;  %vm7475_vm8 = vmpackc.low %vm246_vm1, %vm244_vm0  ;;  %v232_v33 = vpop.permute.xlu1 %231  ;;  %v229_v34 = vpop.permute.xlu0 %228 }
 0x14d   :  { %7476 = vmatprep.mubr.msk.bf16.mxu0 %vm7475_vm8, %v9831_v32  ;;  %vm250_vm11 = vcmp.eq.s32.totalorder %v10192_v29, %v232_v33  ;;  %vm248_vm12 = vcmp.eq.s32.totalorder %v10192_v29, %v229_v34  ;;  %vm7477_vm13 = vmpackc.low %vm245_vm10, %vm243_vm9  ;;  %vm249_vm15 = vcmp.eq.s32.totalorder %v10189_v26, %v232_v33  ;;  %vm247_vm0 = vcmp.eq.s32.totalorder %v10189_v26, %v229_v34 }
 0x14e   :  { %vm7479_vm14 = vmpackc.low %vm250_vm11, %vm248_vm12  ;;  %vm1073_vm8 = vcmask 261120   ;;  %vm538_vm10 = vcmp.lt.s32.totalorder %v10189_v26, 32 }
 0x14f   :  { %vm7481_vm3 = vmpackc.low %vm249_vm15, %vm247_vm0 }
 0x150   :  { %v238_v35 = vpop.permute.xlu1 %237  ;;  %v235_v36 = vpop.permute.xlu0 %234 }
 0x151   :  { %vm254_vm1 = vcmp.eq.s32.totalorder %v10192_v29, %v238_v35  ;;  %vm252_vm2 = vcmp.eq.s32.totalorder %v10192_v29, %v235_v36  ;;  %vm253_vm5 = vcmp.eq.s32.totalorder %v10189_v26, %v238_v35  ;;  %vm251_vm6 = vcmp.eq.s32.totalorder %v10189_v26, %v235_v36 }
 0x152   :  { %vm7483_vm4 = vmpackc.low %vm254_vm1, %vm252_vm2 }
 0x153   :  { %vm7485_vm7 = vmpackc.low %vm253_vm5, %vm251_vm6  ;;  %vm573_vm5 = vcmp.lt.s32.totalorder %v10189_v26, 64 }
 0x154   :  { %7478 = vmatmul.mubr.msk.bf16.gmra.mrb[4].mxu0 %vm7477_vm13, %v9831_v32 }
 0x155   :  { %7480 = vmatprep.mubr.msk.bf16.mxu0 %vm7479_vm14, %v9831_v32 }
 0x15c   :  { %7482 = vmatmul.mubr.msk.bf16.gmra.mrb[8].mxu0 %vm7481_vm3, %v9831_v32 }
 0x15d   :  { %7484 = vmatprep.mubr.msk.bf16.mxu0 %vm7483_vm4, %v9831_v32  ;;  %vm572_vm4 = vcmp.ge.s32.totalorder %v10189_v26, 32 }
 0x164   :  { %7486 = vmatmul.mubr.msk.bf16.gmra.mrb[12].mxu0 %vm7485_vm7, %v9831_v32  ;;  %vm1179_vm7 = vcmask 523264  }
 0x21f   :  { %v7826_v38 = vpop.f32.mrb[0].mxu0 }
 0x220   :  { %v7827_v40 = vpop.f32.mrb[1].mxu0 }
 0x221   :  { %v7828_v41 = vadd.f32 %v7827_v40, %v7826_v38  ;;  %v7829_v42 = vpop.f32.mrb[2].mxu0 }
 0x222   :  { %v7830_v44 = vpop.f32.mrb[3].mxu0 }
 0x223   :  { %v10213_v45 = vadd.f32 %v7828_v41, %v7793_v39  ;;  %v7831_v46 = vadd.f32 %v7830_v44, %v7829_v42 }
 0x225   :  { %v10218_v48 = vadd.f32 %v7831_v46, %v7794_v43  ;;  %625 = vadd.xlane.f32.xlu0 %v10213_v45 }
 0x227   :  { %v7832_v49 = vpop.f32.mrb[4].mxu0  ;;  %627 = vadd.xlane.f32.xlu1 %v10218_v48 }
 0x228   :  { %v7833_v51 = vpop.f32.mrb[5].mxu0 }
 0x229   :  { %v7834_v52 = vadd.f32 %v7833_v51, %v7832_v49  ;;  %v7835_v53 = vpop.f32.mrb[6].mxu0  ;;  %v8771_v51 = vld [vmem:[#allocation5 + $0x30] ss:$12 sps:$4 sm:$0xff]  }
 0x22a   :  { %v7836_v54 = vpop.f32.mrb[7].mxu0 }
 0x22b   :  { %v10222_v55 = vadd.f32 %v7834_v52, %v7797_v50  ;;  %v7837_v57 = vadd.f32 %v7836_v54, %v7835_v53  ;;  %v8769_v50 = vld [vmem:[#allocation5 + $0x34] ss:$12 sps:$4 sm:$0xff]  }
 0x22c   :  { %927 = vmatprep.subr.bf16.mxu1 %v8769_v50  ;;  %v8772_v53 = vld [vmem:[#allocation5 + $0x8] ss:$12 sps:$4 sm:$0xff]  }
 0x22d   :  { %629 = vadd.xlane.f32.xlu0 %v10222_v55  ;;  %v10228_v59 = vadd.f32 %v7837_v57, %v7798_v56  ;;  %928 = vmatpush1.bf16.msra.mxu1 %v8771_v51  ;;  %v8773_v57 = vld [vmem:[#allocation5 + $0x4c] ss:$12 sps:$4 sm:$0xff]  }
 0x22e   :  { %8210 = vmatprep.subr.bf16.mxu0 %v8772_v53  ;;  %929 = vmatprep.subr.bf16.mxu1 %v8773_v57  ;;  %v7488_v57 = vld [vmem:[#allocation2] ss:$0 sm:$0xff] }
 0x22f   :  { %v7838_v60 = vpop.f32.mrb[8].mxu0  ;;  %8211 = vmatpush3.bf16.msra.mxu0 %v8772_v53 }
 0x230   :  { %v7839_v62 = vpop.f32.mrb[9].mxu0 }
 0x231   :  { %v7840_v63 = vadd.f32 %v7839_v62, %v7838_v60  ;;  %631 = vadd.xlane.f32.xlu0 %v10228_v59  ;;  %v7841_v1 = vpop.f32.mrb[10].mxu0  ;;  %v8775_v60 = vld [vmem:[#allocation5 + $0x48] ss:$12 sps:$4 sm:$0xff]  }
 0x232   :  { %v7842_v3 = vpop.f32.mrb[11].mxu0  ;;  %930 = vmatpush1.bf16.msra.mxu1 %v8775_v60 }
 0x233   :  { %v10231_v4 = vadd.f32 %v7840_v63, %v7801_v61  ;;  %v7843_v5 = vadd.f32 %v7842_v3, %v7841_v1  ;;  %v8776_v63 = vld [vmem:[#allocation5 + $0x20] ss:$12 sps:$4 sm:$0xff]   ;;  %v8777_v3 = vld [vmem:[#allocation5 + $0x64] ss:$12 sps:$4 sm:$0xff]  }
 0x234   :  { %8212 = vmatprep.subr.bf16.mxu0 %v8776_v63  ;;  %931 = vmatprep.subr.bf16.mxu1 %v8777_v3 }
 0x235   :  { %v10236_v7 = vadd.f32 %v7843_v5, %v7802_v2  ;;  %633 = vadd.xlane.f32.xlu1 %v10231_v4  ;;  %8213 = vmatpush3.bf16.msra.mxu0 %v8776_v63  ;;  %v8779_v5 = vld [vmem:[#allocation5 + $0x60] ss:$12 sps:$4 sm:$0xff]  }
 0x236   :  { %932 = vmatpush1.bf16.msra.mxu1 %v8779_v5 }
 0x237   :  { %635 = vadd.xlane.f32.xlu0 %v10236_v7  ;;  %v7844_v8 = vpop.f32.mrb[12].mxu0 }
 0x238   :  { %v7845_v10 = vpop.f32.mrb[13].mxu0 }
 0x239   :  { %v7846_v11 = vadd.f32 %v7845_v10, %v7844_v8  ;;  %v7847_v12 = vpop.f32.mrb[14].mxu0  ;;  %v8780_v8 = vld [vmem:[#allocation5 + $0x38] ss:$12 sps:$4 sm:$0xff]  }
 0x23a   :  { %v7848_v14 = vpop.f32.mrb[15].mxu0  ;;  %8214 = vmatprep.subr.bf16.mxu0 %v8780_v8  ;;  %v8783_v10 = vld [vmem:[#allocation5 + $0x78] ss:$12 sps:$4 sm:$0xff]  }
 0x23b   :  { %v10240_v15 = vadd.f32 %v7846_v11, %v7805_v9  ;;  %v7849_v16 = vadd.f32 %v7848_v14, %v7847_v12  ;;  %v8781_v9 = vld [vmem:[#allocation5 + $0x7c] ss:$12 sps:$4 sm:$0xff]   ;;  %8215 = vmatpush3.bf16.msra.mxu0 %v8780_v8  ;;  %v8785_v12 = vld [vmem:[#allocation5 + $0x94] ss:$12 sps:$4 sm:$0xff]  }
 0x23c   :  { %933 = vmatprep.subr.bf16.mxu1 %v8781_v9  ;;  %v8784_v11 = vld [vmem:[#allocation5 + $0x50] ss:$12 sps:$4 sm:$0xff]   ;;  %v8788_v14 = vld [vmem:[#allocation5 + $0x68] ss:$12 sps:$4 sm:$0xff]  }
 0x23d   :  { %v10242_v17 = vadd.f32 %v7849_v16, %v7806_v13  ;;  %637 = vadd.xlane.f32.xlu1 %v10240_v15  ;;  %934 = vmatpush1.bf16.msra.mxu1 %v8783_v10  ;;  %v8787_v13 = vld [vmem:[#allocation5 + $0x90] ss:$12 sps:$4 sm:$0xff]   ;;  %v8789_v16 = vld [vmem:[#allocation5 + $0xac] ss:$12 sps:$4 sm:$0xff]  }
 0x23e   :  { %8216 = vmatprep.subr.bf16.mxu0 %v8784_v11  ;;  %935 = vmatprep.subr.bf16.mxu1 %v8785_v12 }
 0x23f   :  { %639 = vadd.xlane.f32.xlu0 %v10242_v17  ;;  %8217 = vmatpush3.bf16.msra.mxu0 %v8784_v11 }
 0x240   :  { %8218 = vmatprep.subr.bf16.mxu0 %v8788_v14 }
 0x241   :  { %936 = vmatpush1.bf16.msra.mxu1 %v8787_v13 }
 0x242   :  { %937 = vmatprep.subr.bf16.mxu1 %v8789_v16 }
 0x243   :  { %8219 = vmatpush3.bf16.msra.mxu0 %v8788_v14 }
 0x244   :  { %8220 = vmatprep.subr.bf16.mxu0 %v8792_v19 }
 0x245   :  { %938 = vmatpush1.bf16.msra.mxu1 %v8791_v18 }
 0x247   :  { %8221 = vmatpush3.bf16.msra.mxu0 %v8792_v19 }
 0x248   :  { %8222 = vmatprep.subr.bf16.mxu0 %v8793_v20 }
 0x24b   :  { %8223 = vmatpush3.bf16.msra.mxu0 %v8793_v20 }
 0x24c   :  { %8224 = vmatprep.subr.bf16.mxu0 %v8794_v21 }
 0x24f   :  { %8225 = vmatpush3.bf16.msra.mxu0 %v8794_v21 }
 0x2b2   :  { %v626_v22 = vpop.xlane.xlu0 %625 }
 0x2b3   :  { %v642_v23 = vmul.f32 0.0078125, %v626_v22 }
 0x2b4   :  { %v628_v24 = vpop.xlane.xlu1 %627 }
 0x2b5   :  { %v643_v27 = vmul.f32 0.0078125, %v628_v24  ;;  %v10247_v28 = vsub.f32 %v10213_v45, %v642_v23 }
 0x2b7   :  { %v658_v30 = vmul.f32 %v10247_v28, %v10247_v28  ;;  %v10252_v31 = vsub.f32 %v10218_v48, %v643_v27 }
 0x2b9   :  { %666 = vadd.xlane.f32.xlu1 %v658_v30  ;;  %v659_v32 = vmul.f32 %v10252_v31, %v10252_v31 }
 0x2ba   :  { %v630_v33 = vpop.xlane.xlu0 %629 }
 0x2bb   :  { %v644_v34 = vmul.f32 0.0078125, %v630_v33  ;;  %668 = vadd.xlane.f32.xlu0 %v659_v32 }
 0x2bd   :  { %v10257_v35 = vsub.f32 %v10222_v55, %v644_v34 }
 0x2be   :  { %v632_v36 = vpop.xlane.xlu0 %631 }
 0x2bf   :  { %v645_v37 = vmul.f32 0.0078125, %v632_v36  ;;  %v660_v38 = vmul.f32 %v10257_v35, %v10257_v35 }
 0x2c1   :  { %670 = vadd.xlane.f32.xlu1 %v660_v38  ;;  %v10262_v39 = vsub.f32 %v10228_v59, %v645_v37 }
 0x2c2   :  { %v634_v40 = vpop.xlane.xlu1 %633 }
 0x2c3   :  { %v646_v41 = vmul.f32 0.0078125, %v634_v40  ;;  %v661_v42 = vmul.f32 %v10262_v39, %v10262_v39 }
 0x2c4   :  { %v636_v43 = vpop.xlane.xlu0 %635 }
 0x2c5   :  { %v647_v44 = vmul.f32 0.0078125, %v636_v43  ;;  %672 = vadd.xlane.f32.xlu0 %v661_v42  ;;  %v10267_v46 = vsub.f32 %v10231_v4, %v646_v41  ;;  %v7487_v42 = vld [vmem:[%s13315_s6] ss:$0 sm:$0xff] }
 0x2c7   :  { %v662_v47 = vmul.f32 %v10267_v46, %v10267_v46  ;;  %v10272_v49 = vsub.f32 %v10236_v7, %v647_v44 }
 0x2c9   :  { %674 = vadd.xlane.f32.xlu1 %v662_v47  ;;  %v663_v52 = vmul.f32 %v10272_v49, %v10272_v49 }
 0x2ca   :  { %v638_v54 = vpop.xlane.xlu1 %637 }
 0x2cb   :  { %v648_v56 = vmul.f32 0.0078125, %v638_v54  ;;  %676 = vadd.xlane.f32.xlu0 %v663_v52 }
 0x2cc   :  { %v640_v58 = vpop.xlane.xlu0 %639 }
 0x2cd   :  { %v649_v61 = vmul.f32 0.0078125, %v640_v58  ;;  %v10277_v62 = vsub.f32 %v10240_v15, %v648_v56 }
 0x2cf   :  { %v664_v1 = vmul.f32 %v10277_v62, %v10277_v62  ;;  %v10282_v2 = vsub.f32 %v10242_v17, %v649_v61 }
 0x2d1   :  { %678 = vadd.xlane.f32.xlu1 %v664_v1  ;;  %v665_v6 = vmul.f32 %v10282_v2, %v10282_v2 }
 0x2d3   :  { %680 = vadd.xlane.f32.xlu0 %v665_v6 }
 0x346   :  { %v667_v22 = vpop.xlane.xlu1 %666 }
 0x347   :  { %v682_v23 = vmul.f32 0.0078125, %v667_v22 }
 0x348   :  { %v669_v24 = vpop.xlane.xlu0 %668 }
 0x349   :  { %v690_v27 = vadd.f32 1e-05, %v682_v23  ;;  %v683_v30 = vmul.f32 0.0078125, %v669_v24 }
 0x34b   :  { %9003 = vrsqrt.f32 %v690_v27  ;;  %v691_v32 = vadd.f32 1e-05, %v683_v30 }
 0x34d   :  { %9005 = vrsqrt.f32 %v691_v32 }
 0x34e   :  { %v671_v33 = vpop.xlane.xlu1 %670 }
 0x34f   :  { %v684_v34 = vmul.f32 0.0078125, %v671_v33 }
 0x351   :  { %v692_v36 = vadd.f32 1e-05, %v684_v34 }
 0x352   :  { %v673_v37 = vpop.xlane.xlu0 %672 }
 0x353   :  { %9007 = vrsqrt.f32 %v692_v36  ;;  %v685_v38 = vmul.f32 0.0078125, %v673_v37 }
 0x355   :  { %v9004_v40 = vpop.eup %9003  ;;  %v693_v41 = vadd.f32 1e-05, %v685_v38 }
 0x356   :  { %v675_v43 = vpop.xlane.xlu1 %674  ;;  %v706_v44 = vmul.f32 %v9004_v40, %v10247_v28 }
 0x357   :  { %v9006_v47 = vpop.eup %9005  ;;  %9009 = vrsqrt.f32 %v693_v41  ;;  %v686_v50 = vmul.f32 0.0078125, %v675_v43  ;;  %v10301_v41 = vshrl.u32 %v204_v25, 7 }
 0x358   :  { %v677_v51 = vpop.xlane.xlu0 %676  ;;  %v707_v52 = vmul.f32 %v9006_v47, %v10252_v31  ;;  %v720_v53 = vmul.f32 %v7487_v42, %v706_v44 }
 0x359   :  { %v694_v54 = vadd.f32 1e-05, %v686_v50  ;;  %v687_v56 = vmul.f32 0.0078125, %v677_v51  ;;  %13407 = vst [vmem:[#allocation32_spill] sm:$0xff] %v10301_v41  ;;  %v10304_v43 = vsub.s32 0, %v10301_v41  ;;  %vm592_vm12 = vcmp.ge.s32.totalorder %v10301_v41, %v10189_v26 }
 0x35a   :  { %v721_v58 = vmul.f32 %v7487_v42, %v707_v52  ;;  %v734_v61 = vadd.f32 %v7488_v57, %v720_v53  ;;  %vm600_vm0 = vmand %vm538_vm10, %vm592_vm12 }
 0x35b   :  { %9011 = vrsqrt.f32 %v694_v54  ;;  %v695_v60 = vadd.f32 1e-05, %v687_v56  ;;  %13408 = vst [vmem:[#allocation33_spill] sm:$0xff] %v10304_v43 }
 0x35c   :  { %v735_v63 = vadd.f32 %v7488_v57, %v721_v58  ;;  %v10325_v58 = vsub.s32 2, %v10301_v41 }
 0x35d   :  { %v9008_v1 = vpop.eup %9007  ;;  %9013 = vrsqrt.f32 %v695_v60 }
 0x35e   :  { %v679_v3 = vpop.xlane.xlu1 %678  ;;  %v742_v5 = vpack.c.bf16 %v735_v63, %v734_v61  ;;  %v708_v28 = vmul.f32 %v9008_v1, %v10257_v35  ;;  %13410 = vst [vmem:[#allocation35_spill] sm:$0xff] %v10325_v58 }
 0x35f   :  { %v688_v6 = vmul.f32 0.0078125, %v679_v3 }
 0x360   :  { %956 = vmatmul.mubr.bf16.vlgmr.msra.gmra.mrb[0].mxu1 %v742_v5  ;;  %8226 = vmatprep.mubr.bf16.mxu0 %v742_v5  ;;  %v681_v8 = vpop.xlane.xlu0 %680  ;;  %v722_v12 = vmul.f32 %v7487_v42, %v708_v28 }
 0x361   :  { %v9010_v31 = vpop.eup %9009  ;;  %v696_v9 = vadd.f32 1e-05, %v688_v6  ;;  %v689_v10 = vmul.f32 0.0078125, %v681_v8  ;;  %965 = vmatprep.mubr.bf16.mxu1 %v13337_v0 }
 0x362   :  { %v709_v11 = vmul.f32 %v9010_v31, %v10262_v39  ;;  %v736_v18 = vadd.f32 %v7488_v57, %v722_v12 }
 0x363   :  { %9015 = vrsqrt.f32 %v696_v9  ;;  %v697_v13 = vadd.f32 1e-05, %v689_v10 }
 0x364   :  { %v723_v14 = vmul.f32 %v7487_v42, %v709_v11 }
 0x365   :  { %v9012_v16 = vpop.eup %9011  ;;  %9017 = vrsqrt.f32 %v697_v13 }
 0x366   :  { %v737_v19 = vadd.f32 %v7488_v57, %v723_v14  ;;  %v710_v35 = vmul.f32 %v9012_v16, %v10267_v46 }
 0x367   :  { %v9014_v20 = vpop.eup %9013 }
 0x368   :  { %v743_v21 = vpack.c.bf16 %v737_v19, %v736_v18  ;;  %v711_v22 = vmul.f32 %v9014_v20, %v10272_v49  ;;  %v724_v23 = vmul.f32 %v7487_v42, %v710_v35 }
 0x36a   :  { %966 = vmatmul.mubr.bf16.gmra.mrb[4].mxu1 %v743_v21  ;;  %8227 = vmatmul.mubr.bf16.vlgmr.msra.gmra.mrb[16].mxu0 %v743_v21  ;;  %v725_v24 = vmul.f32 %v7487_v42, %v711_v22  ;;  %v738_v39 = vadd.f32 %v7488_v57, %v724_v23 }
 0x36b   :  { %975 = vmatprep.mubr.bf16.mxu1 %v13337_v0 }
 0x36c   :  { %v739_v27 = vadd.f32 %v7488_v57, %v725_v24 }
 0x36d   :  { %v9016_v30 = vpop.eup %9015 }
 0x36e   :  { %v744_v32 = vpack.c.bf16 %v739_v27, %v738_v39  ;;  %v712_v33 = vmul.f32 %v9016_v30, %v10277_v62  ;;  %v778_v62 = vld [vmem:[%s13318_s9] sm:$0x7] }
 0x36f   :  { %v9018_v34 = vpop.eup %9017  ;;  %v791_v63 = vrot.slane %v778_v62, %v10325_v58 }
 0x370   :  { %8230 = vmatprep.mubr.bf16.mxu0 %v744_v32  ;;  %v713_v46 = vmul.f32 %v9018_v34, %v10282_v2  ;;  %v726_v36 = vmul.f32 %v7487_v42, %v712_v33  ;;  %v10310_v2 = vsub.s32 1, %v10301_v41 }
 0x372   :  { %976 = vmatmul.mubr.bf16.gmra.mrb[8].mxu1 %v744_v32  ;;  %v727_v37 = vmul.f32 %v7487_v42, %v713_v46  ;;  %v740_v49 = vadd.f32 %v7488_v57, %v726_v36  ;;  %13409 = vst [vmem:[#allocation34_spill] sm:$0xff] %v10310_v2  ;;  %v10313_v42 = vrot.slane %v778_v62, %v10304_v43 }
 0x373   :  { %985 = vmatprep.mubr.bf16.mxu1 %v13337_v0  ;;  %v10316_v47 = vrot.slane %v778_v62, %v10310_v2 }
 0x374   :  { %v741_v38 = vadd.f32 %v7488_v57, %v727_v37 }
 0x376   :  { %v745_v40 = vpack.c.bf16 %v741_v38, %v740_v49 }
 0x378   :  { %8231 = vmatmul.mubr.bf16.gmra.mrb[20].mxu0 %v745_v40 }
 0x37a   :  { %986 = vmatmul.mubr.bf16.gmra.mrb[12].mxu1 %v745_v40 }
 0x433   :  { %v957_v44 = vpop.f32.mrb[0].mxu1 }
 0x434   :  { %v959_v50 = vpop.f32.mrb[1].mxu1  ;;  %v958_v51 = vadd.f32 %v957_v44, %v10313_v42 }
 0x435   :  { %v961_v25 = vpop.f32.mrb[2].mxu1  ;;  %v960_v54 = vadd.f32 %v959_v50, %v10316_v47 }
 0x436   :  { %v962_v52 = vadd.f32 %v961_v25, %v10313_v42  ;;  %v963_v53 = vpop.f32.mrb[3].mxu1 }
 0x437   :  { %v964_v56 = vadd.f32 %v963_v53, %v10316_v47 }
 0x438   :  { %v10322_v57 = vpack.c.bf16 %v962_v52, %v958_v51 }
 0x439   :  { %v10327_v60 = vpack.c.bf16 %v964_v56, %v960_v54 }
 0x43a   :  { %8242 = vmatprep.mubr.msk.bf16.mxu1 %vm1073_vm8, %v10322_v57 }
 0x43b   :  { %1365 = vrot.lane.b32.xlu1 %v10327_v60, %s9832_s21  ;;  %8562 = vmatprep.subr.msk.bf16.mxu1 %vm1073_vm8, %v10327_v60  ;;  %v1087_v61 = vsel %vm1073_vm8, %v10327_v60, 0 }
 0x43c   :  { %8235 = vmatpush3.bf16.xpose.msra.mxu1 %v1087_v61 }
 0x43d   :  { %v967_v1 = vpop.f32.mrb[4].mxu1  ;;  %v8228_v3 = vpop.f32.mrb[16].mxu0 }
 0x43e   :  { %v969_v5 = vpop.f32.mrb[5].mxu1  ;;  %v1030_v28 = vpop.f32.mrb[17].mxu0  ;;  %v968_v31 = vadd.f32 %v967_v1, %v10313_v42  ;;  %v1039_v9 = vadd.f32 %v8228_v3, %v791_v63 }
 0x43f   :  { %v971_v6 = vpop.f32.mrb[6].mxu1  ;;  %v8229_v8 = vpop.f32.mrb[18].mxu0  ;;  %v970_v14 = vadd.f32 %v969_v5, %v10316_v47  ;;  %v1031_v16 = vadd.f32 %v1030_v28, %v791_v63 }
 0x440   :  { %v972_v10 = vadd.f32 %v971_v6, %v10313_v42  ;;  %v1042_v11 = vadd.f32 %v8229_v8, %v791_v63  ;;  %v973_v12 = vpop.f32.mrb[7].mxu1  ;;  %v1033_v13 = vpop.f32.mrb[19].mxu0 }
 0x441   :  { %v974_v18 = vadd.f32 %v973_v12, %v10316_v47  ;;  %v1034_v19 = vadd.f32 %v1033_v13, %v791_v63 }
 0x442   :  { %v10342_v35 = vpack.c.bf16 %v972_v10, %v968_v31  ;;  %v10344_v20 = vpack.c.bf16 %v1042_v11, %v1039_v9 }
 0x443   :  { %v10346_v21 = vpack.c.bf16 %v974_v18, %v970_v14  ;;  %v10348_v22 = vpack.c.bf16 %v1034_v19, %v1031_v16 }
 0x445   :  { %8250 = vmatprep.subr.bf16.mxu0 %v10348_v22  ;;  %1367 = vrot.lane.b32.xlu0 %v10346_v21, %s9832_s21  ;;  %v977_v23 = vpop.f32.mrb[8].mxu1  ;;  %v1090_v24 = vsel %vm1073_vm8, %v10346_v21, 0 }
 0x446   :  { %8563 = vmatprep.subr.msk.bf16.mxu1 %vm1073_vm8, %v10346_v21  ;;  %v979_v39 = vpop.f32.mrb[9].mxu1  ;;  %8251 = vmatpush3.bf16.msra.mxu0 %v10348_v22  ;;  %v978_v30 = vadd.f32 %v977_v23, %v10313_v42 }
 0x447   :  { %8237 = vmatpush3.bf16.xpose.msra.mxu1 %v1090_v24  ;;  %v981_v27 = vpop.f32.mrb[10].mxu1  ;;  %8252 = vmatprep.subr.bf16.mxu0 %v10344_v20  ;;  %v980_v34 = vadd.f32 %v979_v39, %v10316_v47 }
 0x448   :  { %v982_v32 = vadd.f32 %v981_v27, %v10313_v42  ;;  %v983_v33 = vpop.f32.mrb[11].mxu1  ;;  %v591_v27 = vld [vmem:[%s13411_s7] sm:$0x1] }
 0x449   :  { %v984_v46 = vadd.f32 %v983_v33, %v10316_v47  ;;  %1353 = vrot.lane.b32.xlu0 %v10322_v57, %s9832_s21  ;;  %vm608_vm9 = vcmp.gt.s32.totalorder %v591_v27, 0  ;;  %v13433_v27 = vmov 0 }
 0x44a   :  { %v10365_v36 = vpack.c.bf16 %v982_v32, %v978_v30  ;;  %8253 = vmatpush3.bf16.msra.mxu0 %v10344_v20  ;;  %v507_v30 = vadd.s32 16, %v10301_v41  ;;  %v609_v32 = vsel %vm608_vm9, 1, %v13337_v0 }
 0x44b   :  { %v10368_v37 = vpack.c.bf16 %v984_v46, %v980_v34  ;;  %v8232_v49 = vpop.f32.mrb[20].mxu0  ;;  %v613_v33 = vrot.slane %v609_v32, %v10304_v43  ;;  %v506_v34 = vadd.s32 8, %v10301_v41  ;;  %v508_v46 = vadd.s32 24, %v10301_v41 }
 0x44c   :  { %v1046_v38 = vpop.f32.mrb[21].mxu0  ;;  %v1055_v50 = vadd.f32 %v8232_v49, %v791_v63  ;;  %vm594_vm11 = vcmp.ge.s32.totalorder %v507_v30, %v10189_v26 }
 0x44d   :  { %1369 = vrot.lane.b32.xlu1 %v10368_v37, %s9832_s21  ;;  %8564 = vmatprep.subr.msk.bf16.mxu1 %vm1073_vm8, %v10368_v37  ;;  %v987_v40 = vpop.f32.mrb[12].mxu1  ;;  %v8233_v62 = vpop.f32.mrb[22].mxu0  ;;  %v1093_v44 = vsel %vm1073_vm8, %v10368_v37, 0  ;;  %v1047_v53 = vadd.f32 %v1046_v38, %v791_v63  ;;  %vm602_vm13 = vmand %vm538_vm10, %vm594_vm11  ;;  %vm10441_vm14 = vcmp.eq.s32.totalorder %v613_v33, 1  ;;  %vm593_vm15 = vcmp.ge.s32.totalorder %v506_v34, %v10189_v26 }
 0x44e   :  { %1357 = vrot.lane.b32.xlu0 %v10365_v36, %s9832_s21  ;;  %v1058_v25 = vadd.f32 %v8233_v62, %v791_v63  ;;  %v989_v51 = vpop.f32.mrb[13].mxu1  ;;  %v1049_v52 = vpop.f32.mrb[23].mxu0  ;;  %v988_v61 = vadd.f32 %v987_v40, %v10313_v42  ;;  %vm10450_vm1 = vmand %vm602_vm13, %vm10441_vm14  ;;  %v13414_v38 = vmov 0  ;;  %vm595_vm2 = vcmp.ge.s32.totalorder %v508_v46, %v10189_v26 }
 0x44f   :  { %v1050_v54 = vadd.f32 %v1049_v52, %v791_v63  ;;  %8239 = vmatpush3.bf16.xpose.msra.mxu1 %v1093_v44  ;;  %v991_v56 = vpop.f32.mrb[14].mxu1  ;;  %v990_v28 = vadd.f32 %v989_v51, %v10316_v47  ;;  %v13415_v38 = vsel %vm10450_vm1, 4294967295, %v13414_v38  ;;  %v511_v40 = vadd.s32 48, %v10301_v41  ;;  %vm10458_vm3 = vmand %vm538_vm10, %vm593_vm15 }
 0x450   :  { %v10379_v1 = vpack.c.bf16 %v1058_v25, %v1055_v50  ;;  %v992_v3 = vadd.f32 %v991_v56, %v10313_v42  ;;  %v993_v5 = vpop.f32.mrb[15].mxu1  ;;  %13416 = vst [vmem:[#allocation36_spill] sm:$0xff] %v13415_v38  ;;  %v509_v44 = vadd.s32 32, %v10301_v41  ;;  %vm10467_vm6 = vmand %vm600_vm0, %vm10441_vm14  ;;  %v13419_v25 = vmov 0 }
 0x451   :  { %v10383_v6 = vpack.c.bf16 %v1050_v54, %v1047_v53  ;;  %v994_v8 = vadd.f32 %v993_v5, %v10316_v47  ;;  %v13420_v25 = vsel %vm10467_vm6, 4294967295, %v13419_v25  ;;  %v512_v51 = vadd.s32 56, %v10301_v41  ;;  %vm603_vm9 = vmand %vm538_vm10, %vm595_vm2 }
 0x452   :  { %v10386_v31 = vpack.c.bf16 %v992_v3, %v988_v61  ;;  %13421 = vst [vmem:[#allocation37_spill] sm:$0xff] %v13420_v25  ;;  %vm10474_vm11 = vmand %vm572_vm4, %vm573_vm5  ;;  %vm598_vm12 = vcmp.ge.s32.totalorder %v511_v40, %v10189_v26  ;;  %vm596_vm10 = vcmp.ge.s32.totalorder %v509_v44, %v10189_v26  ;;  %v13436_v33 = vmov 0 }
 0x453   :  { %v10388_v9 = vpack.c.bf16 %v994_v8, %v990_v28  ;;  %8254 = vmatprep.subr.bf16.mxu0 %v10383_v6  ;;  %vm10487_vm13 = vmand %vm10458_vm3, %vm10441_vm14  ;;  %v13424_v28 = vmov 0  ;;  %vm599_vm0 = vcmp.ge.s32.totalorder %v512_v51, %v10189_v26 }
 0x454   :  { %8255 = vmatpush3.bf16.msra.mxu0 %v10383_v6  ;;  %v13425_v28 = vsel %vm10487_vm13, 4294967295, %v13424_v28  ;;  %vm10496_vm15 = vmand %vm603_vm9, %vm10441_vm14 }
 0x455   :  { %8256 = vmatprep.subr.bf16.mxu0 %v10379_v1  ;;  %1371 = vrot.lane.b32.xlu1 %v10388_v9, %s9832_s21  ;;  %v1096_v42 = vsel %vm1073_vm8, %v10388_v9, 0  ;;  %13426 = vst [vmem:[#allocation38_spill] sm:$0xff] %v13425_v28  ;;  %vm606_vm2 = vmand %vm10474_vm11, %vm598_vm12 }
 0x456   :  { %8565 = vmatprep.subr.msk.bf16.mxu1 %vm1073_vm8, %v10388_v9  ;;  %vm604_vm3 = vmand %vm10474_vm11, %vm596_vm10 }
 0x457   :  { %8241 = vmatpush3.bf16.xpose.msra.mxu1 %v1096_v42  ;;  %vm607_vm4 = vmand %vm10474_vm11, %vm599_vm0 }
 0x458   :  { %8257 = vmatpush3.bf16.msra.mxu0 %v10379_v1  ;;  %vm10522_vm5 = vmand %vm606_vm2, %vm10441_vm14 }
 0x459   :  { %1355 = vrot.lane.b32.xlu1 %v10342_v35, %s9832_s21  ;;  %vm10533_vm12 = vmand %vm604_vm3, %vm10441_vm14 }
 0x45a   :  { %v13434_v27 = vsel %vm10533_vm12, 4294967295, %v13433_v27  ;;  %vm10539_vm10 = vmand %vm607_vm4, %vm10441_vm14 }
 0x45b   :  { %13435 = vst [vmem:[#allocation41_spill] sm:$0xff] %v13434_v27  ;;  %v13437_v33 = vsel %vm10539_vm10, 4294967295, %v13436_v33 }
 0x45c   :  { %13438 = vst [vmem:[#allocation42_spill] sm:$0xff] %v13437_v33 }
 0x45d   :  { %1359 = vrot.lane.b32.xlu1 %v10386_v31, %s9832_s21 }
 0x45e   :  { %8243 = vmatmul.mubr.msk.bf16.vlgmr.msra.gmra.mrb[16].mxu1 %vm1073_vm8, %v10342_v35 }
 0x45f   :  { %8246 = vmatprep.mubr.msk.bf16.mxu1 %vm1073_vm8, %v10365_v36 }
 0x461   :  { %1574 = vrot.lane.b32.xlu1 %v10348_v22, %s9832_s21 }
 0x466   :  { %8247 = vmatmul.mubr.msk.bf16.gmra.mrb[20].mxu1 %vm1073_vm8, %v10386_v31 }
 0x4ad   :  { %v1366_v47 = vpop.permute.xlu1 %1365 }
 0x4ae   :  { %8566 = vmatprep.subr.msk.bf16.mxu1 %vm1073_vm8, %v1366_v47  ;;  %v1386_v63 = vsel %vm1073_vm8, %v1366_v47, 0  ;;  %v13427_v47 = vmov 0 }
 0x4af   :  { %8267 = vmatpush3.bf16.xpose.msra.mxu1 %v1386_v63  ;;  %v13428_v47 = vsel %vm10496_vm15, 4294967295, %v13427_v47  ;;  %v510_v63 = vadd.s32 40, %v10301_v41 }
 0x4b0   :  { %13429 = vst [vmem:[#allocation39_spill] sm:$0xff] %v13428_v47 }
 0x4b1   :  { %vm597_vm9 = vcmp.ge.s32.totalorder %v510_v63, %v10189_v26 }
 0x4b2   :  { %vm605_vm0 = vmand %vm10474_vm11, %vm597_vm9 }
 0x4b3   :  { %vm10563_vm11 = vmand %vm605_vm0, %vm10441_vm14  ;;  %vm2379_vm14 = vcmask 785408  }
 0x4b7   :  { %v1368_v10 = vpop.permute.xlu0 %1367 }
 0x4b8   :  { %8567 = vmatprep.subr.msk.bf16.mxu1 %vm1073_vm8, %v1368_v10  ;;  %v1389_v11 = vsel %vm1073_vm8, %v1368_v10, 0 }
 0x4b9   :  { %8269 = vmatpush3.bf16.xpose.msra.mxu1 %v1389_v11 }
 0x4bb   :  { %v1354_v12 = vpop.permute.xlu0 %1353 }
 0x4bc   :  { %8274 = vmatprep.mubr.msk.bf16.mxu1 %vm1073_vm8, %v1354_v12 }
 0x4bf   :  { %v1370_v13 = vpop.permute.xlu1 %1369 }
 0x4c0   :  { %8568 = vmatprep.subr.msk.bf16.mxu1 %vm1073_vm8, %v1370_v13  ;;  %v1392_v14 = vsel %vm1073_vm8, %v1370_v13, 0  ;;  %v1358_v24 = vpop.permute.xlu0 %1357 }
 0x4c1   :  { %8271 = vmatpush3.bf16.xpose.msra.mxu1 %v1392_v14 }
 0x4c7   :  { %v1372_v16 = vpop.permute.xlu1 %1371 }
 0x4c8   :  { %8569 = vmatprep.subr.msk.bf16.mxu1 %vm1073_vm8, %v1372_v16  ;;  %v1395_v18 = vsel %vm1073_vm8, %v1372_v16, 0 }
 0x4c9   :  { %8273 = vmatpush3.bf16.xpose.msra.mxu1 %v1395_v18  ;;  %v13430_v18 = vmov 0 }
 0x4ca   :  { %v13431_v18 = vsel %vm10522_vm5, 4294967295, %v13430_v18 }
 0x4cb   :  { %v1356_v19 = vpop.permute.xlu1 %1355  ;;  %13432 = vst [vmem:[#allocation40_spill] sm:$0xff] %v13431_v18 }
 0x4cf   :  { %v1360_v23 = vpop.permute.xlu1 %1359 }
 0x4d0   :  { %8275 = vmatmul.mubr.msk.bf16.vlgmr.msra.gmra.mrb[24].mxu1 %vm1073_vm8, %v1356_v19 }
 0x4d1   :  { %8278 = vmatprep.mubr.msk.bf16.mxu1 %vm1073_vm8, %v1358_v24 }
 0x4d3   :  { %v10423_v39 = vpop.permute.xlu1 %1574 }
 0x4d4   :  { %8282 = vmatprep.subr.bf16.mxu0 %v10423_v39 }
 0x4d8   :  { %8279 = vmatmul.mubr.msk.bf16.gmra.mrb[28].mxu1 %vm1073_vm8, %v1360_v23 }
 0x531   :  { %v8244_v50 = vpop.f32.mrb[16].mxu1 }
 0x532   :  { %v1165_v52 = vmul.f32 0.17677669, %v8244_v50  ;;  %v1132_v53 = vpop.f32.mrb[17].mxu1 }
 0x533   :  { %v1163_v54 = vmul.f32 0.17677669, %v1132_v53  ;;  %v8245_v56 = vpop.f32.mrb[18].mxu1  ;;  %v13439_v53 = vmov 0 }
 0x534   :  { %v1135_v3 = vpop.f32.mrb[19].mxu1  ;;  %v10481_v5 = vsel %vm10450_vm1, %v1165_v52, -1e+09  ;;  %v1166_v10 = vmul.f32 0.17677669, %v8245_v56  ;;  %v13440_v53 = vsel %vm10563_vm11, 4294967295, %v13439_v53 }
 0x535   :  { %v1164_v8 = vmul.f32 0.17677669, %v1135_v3  ;;  %v1186_v42 = vsel %vm1179_vm7, %v10481_v5, -inf  ;;  %v10504_v11 = vsel %vm10467_vm6, %v1163_v54, -1e+09  ;;  %13441 = vst [vmem:[#allocation43_spill] sm:$0xff] %v13440_v53 }
 0x536   :  { %1187 = vmax.xlane.f32.xlu0 %v1186_v42  ;;  %v1180_v16 = vsel %vm1179_vm7, %v10504_v11, -inf  ;;  %v10529_v24 = vsel %vm10496_vm15, %v1166_v10, -1e+09 }
 0x537   :  { %v10510_v12 = vsel %vm10487_vm13, %v1164_v8, -1e+09  ;;  %v1189_v62 = vsel %vm1179_vm7, %v10529_v24, -inf }
 0x538   :  { %v1183_v13 = vsel %vm1179_vm7, %v10510_v12, -inf }
 0x539   :  { %1184 = vmax.xlane.f32.xlu1 %v1183_v13  ;;  %v8248_v14 = vpop.f32.mrb[20].mxu1 }
 0x53a   :  { %v1169_v19 = vmul.f32 0.17677669, %v8248_v14  ;;  %1181 = vmax.xlane.f32.xlu0 %v1180_v16  ;;  %v1148_v23 = vpop.f32.mrb[21].mxu1 }
 0x53b   :  { %v1167_v30 = vmul.f32 0.17677669, %v1148_v23  ;;  %v8249_v32 = vpop.f32.mrb[22].mxu1 }
 0x53c   :  { %v1170_v34 = vmul.f32 0.17677669, %v8249_v32  ;;  %v1151_v46 = vpop.f32.mrb[23].mxu1  ;;  %v10545_v40 = vsel %vm10522_vm5, %v1169_v19, -1e+09 }
 0x53d   :  { %v1198_v44 = vsel %vm1179_vm7, %v10545_v40, -inf  ;;  %v1168_v50 = vmul.f32 0.17677669, %v1151_v46  ;;  %v10555_v51 = vsel %vm10533_vm12, %v1167_v30, -1e+09 }
 0x53e   :  { %1190 = vmax.xlane.f32.xlu0 %v1189_v62  ;;  %1199 = vmax.xlane.f32.xlu1 %v1198_v44  ;;  %v10559_v52 = vsel %vm10539_vm10, %v1170_v34, -1e+09  ;;  %v1192_v54 = vsel %vm1179_vm7, %v10555_v51, -inf }
 0x53f   :  { %v1201_v56 = vsel %vm1179_vm7, %v10559_v52, -inf  ;;  %v10573_v61 = vsel %vm10563_vm11, %v1168_v50, -1e+09 }
 0x540   :  { %v1195_v3 = vsel %vm1179_vm7, %v10573_v61, -inf }
 0x542   :  { %1193 = vmax.xlane.f32.xlu1 %v1192_v54  ;;  %1202 = vmax.xlane.f32.xlu0 %v1201_v56 }
 0x546   :  { %1196 = vmax.xlane.f32.xlu0 %v1195_v3 }
 0x5a3   :  { %v8276_v49 = vpop.f32.mrb[24].mxu1 }
 0x5a4   :  { %v1464_v8 = vmul.f32 0.17677669, %v8276_v49  ;;  %v1431_v42 = vpop.f32.mrb[25].mxu1 }
 0x5a5   :  { %v1462_v63 = vmul.f32 0.17677669, %v1431_v42  ;;  %v8277_v10 = vpop.f32.mrb[26].mxu1 }
 0x5a6   :  { %v1465_v13 = vmul.f32 0.17677669, %v8277_v10  ;;  %v1434_v14 = vpop.f32.mrb[27].mxu1  ;;  %v10579_v16 = vsel %vm10450_vm1, %v1464_v8, -1e+09 }
 0x5a7   :  { %v1463_v19 = vmul.f32 0.17677669, %v1434_v14  ;;  %v1484_v23 = vsel %vm1179_vm7, %v10579_v16, -inf  ;;  %v10589_v32 = vsel %vm10467_vm6, %v1462_v63, -1e+09 }
 0x5a8   :  { %1485 = vmax.xlane.f32.xlu1 %v1484_v23  ;;  %v10585_v30 = vsel %vm10496_vm15, %v1465_v13, -1e+09  ;;  %v1478_v44 = vsel %vm1179_vm7, %v10589_v32, -inf }
 0x5a9   :  { %v1487_v34 = vsel %vm1179_vm7, %v10585_v30, -inf  ;;  %v10595_v46 = vsel %vm10487_vm13, %v1463_v19, -1e+09 }
 0x5aa   :  { %1488 = vmax.xlane.f32.xlu0 %v1487_v34  ;;  %v1481_v49 = vsel %vm1179_vm7, %v10595_v46, -inf }
 0x5ab   :  { %v8280_v62 = vpop.f32.mrb[28].mxu1 }
 0x5ac   :  { %v1468_v50 = vmul.f32 0.17677669, %v8280_v62  ;;  %1479 = vmax.xlane.f32.xlu1 %v1478_v44  ;;  %v1447_v54 = vpop.f32.mrb[29].mxu1 }
 0x5ad   :  { %v1466_v56 = vmul.f32 0.17677669, %v1447_v54  ;;  %v8281_v3 = vpop.f32.mrb[30].mxu1 }
 0x5ae   :  { %v1469_v8 = vmul.f32 0.17677669, %v8281_v3  ;;  %1482 = vmax.xlane.f32.xlu0 %v1481_v49  ;;  %v1450_v42 = vpop.f32.mrb[31].mxu1  ;;  %v10603_v63 = vsel %vm10522_vm5, %v1468_v50, -1e+09 }
 0x5af   :  { %v1467_v10 = vmul.f32 0.17677669, %v1450_v42  ;;  %v1496_v13 = vsel %vm1179_vm7, %v10603_v63, -inf  ;;  %v10613_v19 = vsel %vm10533_vm12, %v1466_v56, -1e+09 }
 0x5b0   :  { %1497 = vmax.xlane.f32.xlu1 %v1496_v13  ;;  %v10609_v14 = vsel %vm10539_vm10, %v1469_v8, -1e+09  ;;  %v1490_v62 = vsel %vm1179_vm7, %v10613_v19, -inf }
 0x5b1   :  { %v1499_v23 = vsel %vm1179_vm7, %v10609_v14, -inf  ;;  %v10619_v34 = vsel %vm10563_vm11, %v1467_v10, -1e+09 }
 0x5b2   :  { %1500 = vmax.xlane.f32.xlu0 %v1499_v23  ;;  %v1493_v44 = vsel %vm1179_vm7, %v10619_v34, -inf }
 0x5b4   :  { %1491 = vmax.xlane.f32.xlu1 %v1490_v62 }
 0x5b6   :  { %1494 = vmax.xlane.f32.xlu0 %v1493_v44 }
 0x5c3   :  { %v1188_v50 = vpop.xlane.xlu0 %1187 }
 0x5c4   :  { %v1206_v13 = vsub.f32 %v10481_v5, %v1188_v50 }
 0x5c5   :  { %1578 = vrot.lane.b32.xlu1 %v10383_v6, %s9832_s21 }
 0x5c6   :  { %v1185_v49 = vpop.xlane.xlu1 %1184  ;;  %v1216_v29 = vmul.f32 1.442695, %v1206_v13 }
 0x5c7   :  { %v1182_v54 = vpop.xlane.xlu0 %1181  ;;  %v1205_v42 = vsub.f32 %v10510_v12, %v1185_v49 }
 0x5c8   :  { %v1204_v26 = vsub.f32 %v10504_v11, %v1182_v54 }
 0x5c9   :  { %1580 = vrot.lane.b32.xlu1 %v10379_v1, %s9832_s21  ;;  %v1214_v23 = vmul.f32 1.442695, %v1205_v42 }
 0x5cb   :  { %v1191_v56 = vpop.xlane.xlu0 %1190  ;;  %v1200_v44 = vpop.xlane.xlu1 %1199 }
 0x5cc   :  { %1576 = vrot.lane.b32.xlu0 %v10344_v20, %s9832_s21  ;;  %v1207_v3 = vsub.f32 %v10529_v24, %v1191_v56  ;;  %v1212_v56 = vmul.f32 1.442695, %v1204_v26  ;;  %v1210_v12 = vsub.f32 %v10545_v40, %v1200_v44 }
 0x5cd   :  { %1671 = vrot.lane.b32.xlu1 %v10327_v60, %s9823_s27 }
 0x5ce   :  { %v1218_v10 = vmul.f32 1.442695, %v1207_v3 }
 0x5cf   :  { %v1203_v8 = vpop.xlane.xlu0 %1202  ;;  %v1194_v3 = vpop.xlane.xlu1 %1193 }
 0x5d0   :  { %9019 = vpow2.f32 %v1218_v10  ;;  %v1211_v62 = vsub.f32 %v10559_v52, %v1203_v8  ;;  %v1224_v52 = vmul.f32 1.442695, %v1210_v12  ;;  %v1208_v49 = vsub.f32 %v10555_v51, %v1194_v3 }
 0x5d1   :  { %9021 = vpow2.f32 %v1214_v23 }
 0x5d2   :  { %v1226_v2 = vmul.f32 1.442695, %v1211_v62  ;;  %9023 = vpow2.f32 %v1216_v29 }
 0x5d3   :  { %v1197_v0 = vpop.xlane.xlu0 %1196 }
 0x5d4   :  { %v1209_v24 = vsub.f32 %v10573_v61, %v1197_v0  ;;  %9025 = vpow2.f32 %v1226_v2  ;;  %v1220_v0 = vmul.f32 1.442695, %v1208_v49 }
 0x5d5   :  { %9027 = vpow2.f32 %v1212_v56 }
 0x5d6   :  { %v1222_v5 = vmul.f32 1.442695, %v1209_v24 }
 0x5d8   :  { %9029 = vpow2.f32 %v1222_v5 }
 0x5d9   :  { %9031 = vpow2.f32 %v1224_v52 }
 0x5da   :  { %v10640_v50 = vpop.eup %9019  ;;  %9033 = vpow2.f32 %v1220_v0 }
 0x5db   :  { %v1237_v11 = vsel %vm1179_vm7, %v10640_v50, 0.0  ;;  %v10645_v54 = vpop.eup %9021 }
 0x5dc   :  { %v10647_v26 = vpop.eup %9023  ;;  %v1231_v29 = vsel %vm1179_vm7, %v10645_v54, 0.0 }
 0x5dd   :  { %v1234_v40 = vsel %vm1179_vm7, %v10647_v26, 0.0 }
 0x5de   :  { %v10651_v2 = vpop.eup %9025 }
 0x5df   :  { %v10655_v51 = vpop.eup %9027  ;;  %v1249_v61 = vsel %vm1179_vm7, %v10651_v2, 0.0 }
 0x5e0   :  { %v1228_v42 = vsel %vm1179_vm7, %v10655_v51, 0.0 }
 0x5e2   :  { %v10659_v8 = vpop.eup %9029 }
 0x5e3   :  { %v10663_v10 = vpop.eup %9031  ;;  %v1243_v13 = vsel %vm1179_vm7, %v10659_v8, 0.0 }
 0x5e4   :  { %v1246_v23 = vsel %vm1179_vm7, %v10663_v10, 0.0  ;;  %v10669_v62 = vpop.eup %9033 }
 0x5e5   :  { %v1240_v44 = vsel %vm1179_vm7, %v10669_v62, 0.0 }
 0x5eb   :  { %1238 = vadd.xlane.f32.xlu0 %v1237_v11 }
 0x5ef   :  { %1232 = vadd.xlane.f32.xlu0 %v1231_v29 }
 0x5f1   :  { %1235 = vadd.xlane.f32.xlu1 %v1234_v40 }
 0x5f3   :  { %1250 = vadd.xlane.f32.xlu0 %v1249_v61 }
 0x5f5   :  { %1229 = vadd.xlane.f32.xlu1 %v1228_v42 }
 0x5f7   :  { %1244 = vadd.xlane.f32.xlu0 %v1243_v13 }
 0x5f9   :  { %1247 = vadd.xlane.f32.xlu1 %v1246_v23 }
 0x5fd   :  { %1241 = vadd.xlane.f32.xlu1 %v1240_v44 }
 0x635   :  { %v1486_v24 = vpop.xlane.xlu1 %1485 }
 0x636   :  { %v1504_v56 = vsub.f32 %v10579_v16, %v1486_v24 }
 0x637   :  { %v1489_v12 = vpop.xlane.xlu0 %1488 }
 0x638   :  { %v1514_v3 = vmul.f32 1.442695, %v1504_v56  ;;  %v1505_v5 = vsub.f32 %v10585_v30, %v1489_v12 }
 0x639   :  { %v1480_v52 = vpop.xlane.xlu1 %1479 }
 0x63a   :  { %9035 = vpow2.f32 %v1514_v3  ;;  %v1516_v49 = vmul.f32 1.442695, %v1505_v5  ;;  %v1502_v11 = vsub.f32 %v10589_v32, %v1480_v52 }
 0x63b   :  { %v1483_v0 = vpop.xlane.xlu0 %1482 }
 0x63c   :  { %9037 = vpow2.f32 %v1516_v49  ;;  %v1510_v29 = vmul.f32 1.442695, %v1502_v11  ;;  %v1503_v40 = vsub.f32 %v10595_v46, %v1483_v0 }
 0x63d   :  { %v1498_v24 = vpop.xlane.xlu1 %1497 }
 0x63e   :  { %9039 = vpow2.f32 %v1510_v29  ;;  %v1512_v61 = vmul.f32 1.442695, %v1503_v40  ;;  %v1508_v5 = vsub.f32 %v10603_v63, %v1498_v24 }
 0x63f   :  { %v1501_v56 = vpop.xlane.xlu0 %1500 }
 0x640   :  { %9041 = vpow2.f32 %v1512_v61  ;;  %v1522_v11 = vmul.f32 1.442695, %v1508_v5 }
 0x641   :  { %v1492_v12 = vpop.xlane.xlu1 %1491 }
 0x642   :  { %v1506_v0 = vsub.f32 %v10613_v19, %v1492_v12  ;;  %9043 = vpow2.f32 %v1522_v11 }
 0x643   :  { %v1495_v3 = vpop.xlane.xlu0 %1494 }
 0x644   :  { %v10677_v42 = vpop.eup %9035  ;;  %v1507_v52 = vsub.f32 %v10619_v34, %v1495_v3  ;;  %v1518_v40 = vmul.f32 1.442695, %v1506_v0 }
 0x645   :  { %v1532_v16 = vsel %vm1179_vm7, %v10677_v42, 0.0  ;;  %v10701_v49 = vpop.permute.xlu1 %1578 }
 0x646   :  { %v10681_v13 = vpop.eup %9037  ;;  %1533 = vadd.xlane.f32.xlu1 %v1532_v16  ;;  %v1520_v29 = vmul.f32 1.442695, %v1507_v52 }
 0x647   :  { %v1535_v30 = vsel %vm1179_vm7, %v10681_v13, 0.0  ;;  %v1577_v61 = vpop.permute.xlu0 %1576 }
 0x648   :  { %v10685_v32 = vpop.eup %9039  ;;  %1536 = vadd.xlane.f32.xlu0 %v1535_v30  ;;  %9045 = vpow2.f32 %v1520_v29 }
 0x649   :  { %v1526_v46 = vsel %vm1179_vm7, %v10685_v32, 0.0  ;;  %v10705_v16 = vpop.permute.xlu1 %1580  ;;  %9047 = vpow2.f32 %v1518_v40 }
 0x64a   :  { %v10689_v23 = vpop.eup %9041  ;;  %1527 = vadd.xlane.f32.xlu1 %v1526_v46 }
 0x64b   :  { %v1529_v44 = vsel %vm1179_vm7, %v10689_v23, 0.0 }
 0x64c   :  { %1530 = vadd.xlane.f32.xlu0 %v1529_v44  ;;  %v10709_v44 = vpop.eup %9043 }
 0x64d   :  { %v10707_v63 = vpop.permute.xlu1 %1671 }
 0x652   :  { %v10711_v19 = vpop.eup %9045 }
 0x653   :  { %v1541_v5 = vsel %vm1179_vm7, %v10711_v19, 0.0 }
 0x65b   :  { %1675 = vrot.lane.b32.xlu1 %v10368_v37, %s9823_s27 }
 0x65f   :  { %1973 = vrot.lane.b32.xlu1 %v10327_v60, %s9833_s19  ;;  %v1509_v60 = vsub.f32 %v10609_v14, %v1501_v56  ;;  %v1544_v14 = vsel %vm1179_vm7, %v10709_v44, 0.0  ;;  %v10715_v56 = vpop.eup %9047 }
 0x660   :  { %v1538_v52 = vsel %vm1179_vm7, %v10715_v56, 0.0 }
 0x661   :  { %v1524_v30 = vmul.f32 1.442695, %v1509_v60 }
 0x662   :  { %1673 = vrot.lane.b32.xlu0 %v10346_v21, %s9823_s27 }
 0x663   :  { %9049 = vpow2.f32 %v1524_v30 }
 0x66d   :  { %v10721_v11 = vpop.eup %9049 }
 0x66e   :  { %v1547_v60 = vsel %vm1179_vm7, %v10721_v11, 0.0 }
 0x678   :  { %v1239_v46 = vpop.xlane.xlu0 %1238 }
 0x67c   :  { %v1233_v34 = vpop.xlane.xlu0 %1232 }
 0x67e   :  { %v1236_v24 = vpop.xlane.xlu1 %1235 }
 0x67f   :  { %9051 = vrcp.f32 %v1236_v24 }
 0x680   :  { %v1251_v12 = vpop.xlane.xlu0 %1250  ;;  %9053 = vrcp.f32 %v1233_v34 }
 0x681   :  { %1545 = vadd.xlane.f32.xlu0 %v1544_v14  ;;  %9055 = vrcp.f32 %v1239_v46 }
 0x682   :  { %v1230_v3 = vpop.xlane.xlu1 %1229 }
 0x683   :  { %9057 = vrcp.f32 %v1230_v3  ;;  %1542 = vadd.xlane.f32.xlu1 %v1541_v5 }
 0x684   :  { %v1245_v0 = vpop.xlane.xlu0 %1244 }
 0x685   :  { %1539 = vadd.xlane.f32.xlu0 %v1538_v52 }
 0x686   :  { %v1248_v29 = vpop.xlane.xlu1 %1247 }
 0x687   :  { %9059 = vrcp.f32 %v1248_v29 }
 0x688   :  { %9061 = vrcp.f32 %v1245_v0 }
 0x689   :  { %1548 = vadd.xlane.f32.xlu0 %v1547_v60  ;;  %v9052_v40 = vpop.eup %9051  ;;  %9063 = vrcp.f32 %v1251_v12 }
 0x68a   :  { %v1242_v30 = vpop.xlane.xlu1 %1241  ;;  %v9054_v46 = vpop.eup %9053  ;;  %v1262_v14 = vmul.f32 %v9052_v40, %v10647_v26 }
 0x68b   :  { %9065 = vrcp.f32 %v1242_v30  ;;  %v9056_v34 = vpop.eup %9055  ;;  %v1261_v5 = vmul.f32 %v9054_v46, %v10645_v54  ;;  %v1692_v46 = vsel %vm1073_vm8, %v10707_v63, 0 }
 0x68c   :  { %v1263_v52 = vmul.f32 %v9056_v34, %v10640_v50 }
 0x68d   :  { %v9058_v24 = vpop.eup %9057 }
 0x68e   :  { %v1260_v3 = vmul.f32 %v9058_v24, %v10655_v51  ;;  %v1269_v58 = vpack.c.bf16 %v1263_v52, %v1262_v14 }
 0x690   :  { %v1268_v29 = vpack.c.bf16 %v1261_v5, %v1260_v3 }
 0x691   :  { %v9060_v43 = vpop.eup %9059 }
 0x692   :  { %8258 = vmatprep.mubr.msk.bf16.mxu0 %vm1179_vm7, %v1268_v29  ;;  %v9062_v0 = vpop.eup %9061  ;;  %v1266_v54 = vmul.f32 %v9060_v43, %v10663_v10 }
 0x693   :  { %8259 = vmatmul.mubr.msk.bf16.vlgmr.msra.gmra.mrb[24].mxu0 %vm1179_vm7, %v1269_v58  ;;  %v9064_v12 = vpop.eup %9063  ;;  %v1265_v51 = vmul.f32 %v9062_v0, %v10659_v8 }
 0x694   :  { %8283 = vmatpush3.bf16.msra.mxu0 %v10423_v39  ;;  %1975 = vrot.lane.b32.xlu1 %v10346_v21, %s9833_s19  ;;  %v1267_v60 = vmul.f32 %v9064_v12, %v10651_v2 }
 0x695   :  { %v9066_v26 = vpop.eup %9065  ;;  %8284 = vmatprep.subr.bf16.mxu0 %v1577_v61 }
 0x696   :  { %v1264_v50 = vmul.f32 %v9066_v26, %v10669_v62  ;;  %v1271_v39 = vpack.c.bf16 %v1267_v60, %v1266_v54 }
 0x698   :  { %8285 = vmatpush3.bf16.msra.mxu0 %v1577_v61  ;;  %1665 = vrot.lane.b32.xlu1 %v10342_v35, %s9823_s27  ;;  %v1270_v58 = vpack.c.bf16 %v1265_v51, %v1264_v50 }
 0x699   :  { %8286 = vmatprep.subr.bf16.mxu0 %v10701_v49 }
 0x69a   :  { %8262 = vmatprep.mubr.msk.bf16.mxu0 %vm1179_vm7, %v1270_v58 }
 0x69b   :  { %8263 = vmatmul.mubr.msk.bf16.gmra.mrb[28].mxu0 %vm1179_vm7, %v1271_v39 }
 0x69c   :  { %8287 = vmatpush3.bf16.msra.mxu0 %v10701_v49  ;;  %1667 = vrot.lane.b32.xlu1 %v10365_v36, %s9823_s27 }
 0x69d   :  { %8288 = vmatprep.subr.bf16.mxu0 %v10705_v16 }
 0x69f   :  { %1677 = vrot.lane.b32.xlu0 %v10388_v9, %s9823_s27 }
 0x6a0   :  { %8289 = vmatpush3.bf16.msra.mxu0 %v10705_v16  ;;  %1979 = vrot.lane.b32.xlu1 %v10388_v9, %s9833_s19 }
 0x6a1   :  { %8570 = vmatprep.subr.msk.bf16.mxu0 %vm1073_vm8, %v10707_v63 }
 0x6a3   :  { %1663 = vrot.lane.b32.xlu0 %v10322_v57, %s9823_s27 }
 0x6a4   :  { %1967 = vrot.lane.b32.xlu1 %v10342_v35, %s9833_s19 }
 0x6a7   :  { %1977 = vrot.lane.b32.xlu0 %v10368_v37, %s9833_s19 }
 0x6a8   :  { %1971 = vrot.lane.b32.xlu1 %v10386_v31, %s9833_s19 }
 0x6ab   :  { %1669 = vrot.lane.b32.xlu0 %v10386_v31, %s9823_s27 }
 0x6af   :  { %1965 = vrot.lane.b32.xlu0 %v10322_v57, %s9833_s19 }
 0x6b3   :  { %1969 = vrot.lane.b32.xlu0 %v10365_v36, %s9833_s19 }
 0x6d3   :  { %v1534_v43 = vpop.xlane.xlu1 %1533 }
 0x6d5   :  { %v1537_v21 = vpop.xlane.xlu0 %1536 }
 0x6d6   :  { %9067 = vrcp.f32 %v1537_v21 }
 0x6d7   :  { %v1528_v9 = vpop.xlane.xlu1 %1527 }
 0x6d8   :  { %9069 = vrcp.f32 %v1528_v9 }
 0x6d9   :  { %9071 = vrcp.f32 %v1534_v43  ;;  %v1531_v35 = vpop.xlane.xlu0 %1530 }
 0x6da   :  { %9073 = vrcp.f32 %v1531_v35 }
 0x6db   :  { %v1676_v37 = vpop.permute.xlu1 %1675 }
 0x6dd   :  { %v1674_v34 = vpop.permute.xlu0 %1673 }
 0x6df   :  { %v1974_v2 = vpop.permute.xlu1 %1973 }
 0x6e0   :  { %8574 = vmatprep.subr.msk.bf16.mxu1 %vm1073_vm8, %v1974_v2  ;;  %v1994_v31 = vsel %vm1073_vm8, %v1974_v2, 0  ;;  %v9068_v8 = vpop.eup %9067 }
 0x6e1   :  { %8331 = vmatpush3.bf16.xpose.msra.mxu1 %v1994_v31  ;;  %v1561_v36 = vmul.f32 %v9068_v8, %v10681_v13  ;;  %v1695_v13 = vsel %vm1073_vm8, %v1674_v34, 0 }
 0x6e2   :  { %v9070_v57 = vpop.eup %9069 }
 0x6e3   :  { %v9072_v10 = vpop.eup %9071  ;;  %v1558_v49 = vmul.f32 %v9070_v57, %v10685_v32  ;;  %v13442_v57 = vmov 0  }
 0x6e4   :  { %v9074_v62 = vpop.eup %9073  ;;  %v1560_v16 = vmul.f32 %v9072_v10, %v10677_v42  ;;  %v1698_v42 = vsel %vm1073_vm8, %v1676_v37, 0 }
 0x6e5   :  { %v1559_v61 = vmul.f32 %v9074_v62, %v10689_v23 }
 0x6e6   :  { %v1567_v30 = vpack.c.bf16 %v1561_v36, %v1560_v16 }
 0x6e7   :  { %v1566_v40 = vpack.c.bf16 %v1559_v61, %v1558_v49 }
 0x6e9   :  { %8290 = vmatprep.mubr.msk.bf16.mxu0 %vm1179_vm7, %v1566_v40 }
 0x6ea   :  { %8291 = vmatmul.mubr.msk.bf16.vlgmr.msra.gmra.mrb[32].mxu0 %vm1179_vm7, %v1567_v30 }
 0x6eb   :  { %8299 = vmatpush3.bf16.xpose.msra.mxu0 %v1692_v46 }
 0x6ec   :  { %8571 = vmatprep.subr.msk.bf16.mxu0 %vm1073_vm8, %v1674_v34 }
 0x6f3   :  { %8301 = vmatpush3.bf16.xpose.msra.mxu0 %v1695_v13 }
 0x6f4   :  { %8572 = vmatprep.subr.msk.bf16.mxu0 %vm1073_vm8, %v1676_v37 }
 0x6fb   :  { %8303 = vmatpush3.bf16.xpose.msra.mxu0 %v1698_v42 }
 0x70e   :  { %v1546_v32 = vpop.xlane.xlu0 %1545 }
 0x710   :  { %v1543_v23 = vpop.xlane.xlu1 %1542 }
 0x711   :  { %9075 = vrcp.f32 %v1543_v23 }
 0x712   :  { %v1540_v24 = vpop.xlane.xlu0 %1539 }
 0x713   :  { %9077 = vrcp.f32 %v1540_v24 }
 0x714   :  { %v1976_v14 = vpop.permute.xlu1 %1975  ;;  %9079 = vrcp.f32 %v1546_v32 }
 0x715   :  { %8575 = vmatprep.subr.msk.bf16.mxu1 %vm1073_vm8, %v1976_v14  ;;  %v1997_v63 = vsel %vm1073_vm8, %v1976_v14, 0 }
 0x716   :  { %8333 = vmatpush3.bf16.xpose.msra.mxu1 %v1997_v63  ;;  %v1549_v3 = vpop.xlane.xlu0 %1548 }
 0x717   :  { %9081 = vrcp.f32 %v1549_v3 }
 0x718   :  { %v1666_v5 = vpop.permute.xlu1 %1665 }
 0x71a   :  { %v1678_v52 = vpop.permute.xlu0 %1677 }
 0x71b   :  { %v9076_v29 = vpop.eup %9075  ;;  %8573 = vmatprep.subr.msk.bf16.mxu0 %vm1073_vm8, %v1678_v52  ;;  %v1701_v0 = vsel %vm1073_vm8, %v1678_v52, 0 }
 0x71c   :  { %8305 = vmatpush3.bf16.xpose.msra.mxu0 %v1701_v0  ;;  %v1668_v26 = vpop.permute.xlu1 %1667  ;;  %v1563_v51 = vmul.f32 %v9076_v29, %v10711_v19 }
 0x71d   :  { %v9078_v12 = vpop.eup %9077 }
 0x71e   :  { %v1664_v54 = vpop.permute.xlu0 %1663  ;;  %v1562_v50 = vmul.f32 %v9078_v12, %v10715_v56  ;;  %v9080_v60 = vpop.eup %9079 }
 0x71f   :  { %v1564_v21 = vmul.f32 %v9080_v60, %v10709_v44 }
 0x720   :  { %v1568_v58 = vpack.c.bf16 %v1563_v51, %v1562_v50  ;;  %v1980_v37 = vpop.permute.xlu1 %1979 }
 0x721   :  { %v9082_v39 = vpop.eup %9081  ;;  %v2003_v44 = vsel %vm1073_vm8, %v1980_v37, 0 }
 0x722   :  { %8294 = vmatprep.mubr.msk.bf16.mxu0 %vm1179_vm7, %v1568_v58  ;;  %v1978_v43 = vpop.permute.xlu0 %1977  ;;  %v1565_v9 = vmul.f32 %v9082_v39, %v10721_v11 }
 0x723   :  { %8576 = vmatprep.subr.msk.bf16.mxu1 %vm1073_vm8, %v1978_v43  ;;  %v2000_v35 = vsel %vm1073_vm8, %v1978_v43, 0 }
 0x724   :  { %8335 = vmatpush3.bf16.xpose.msra.mxu1 %v2000_v35  ;;  %v1569_v2 = vpack.c.bf16 %v1565_v9, %v1564_v21  ;;  %v1968_v11 = vpop.permute.xlu1 %1967 }
 0x725   :  { %8577 = vmatprep.subr.msk.bf16.mxu1 %vm1073_vm8, %v1980_v37 }
 0x726   :  { %8295 = vmatmul.mubr.msk.bf16.gmra.mrb[36].mxu0 %vm1179_vm7, %v1569_v2  ;;  %v1670_v19 = vpop.permute.xlu0 %1669 }
 0x727   :  { %8306 = vmatprep.mubr.msk.bf16.mxu0 %vm1073_vm8, %v1664_v54 }
 0x728   :  { %v1972_v8 = vpop.permute.xlu1 %1971 }
 0x72a   :  { %v1966_v56 = vpop.permute.xlu0 %1965 }
 0x72b   :  { %8338 = vmatprep.mubr.msk.bf16.mxu1 %vm1073_vm8, %v1966_v56 }
 0x72c   :  { %8337 = vmatpush3.bf16.xpose.msra.mxu1 %v2003_v44 }
 0x72e   :  { %8307 = vmatmul.mubr.msk.bf16.vlgmr.msra.gmra.mrb[40].mxu0 %vm1073_vm8, %v1666_v5  ;;  %v1970_v31 = vpop.permute.xlu0 %1969 }
 0x72f   :  { %8310 = vmatprep.mubr.msk.bf16.mxu0 %vm1073_vm8, %v1668_v26 }
 0x733   :  { %8339 = vmatmul.mubr.msk.bf16.vlgmr.msra.gmra.mrb[32].mxu1 %vm1073_vm8, %v1968_v11 }
 0x734   :  { %8342 = vmatprep.mubr.msk.bf16.mxu1 %vm1073_vm8, %v1970_v31 }
 0x736   :  { %8311 = vmatmul.mubr.msk.bf16.gmra.mrb[44].mxu0 %vm1073_vm8, %v1670_v19 }
 0x73b   :  { %8343 = vmatmul.mubr.msk.bf16.gmra.mrb[36].mxu1 %vm1073_vm8, %v1972_v8 }
 0x73c   :  { %2912 = vmatprep.mubr.bf16.mxu1 %v13442_v57 }
 0x766   :  { %v10805_v10 = vpop.f32.mrb[24].mxu0 }
 0x767   :  { %v10807_v62 = vpop.f32.mrb[25].mxu0 }
 0x768   :  { %v10809_v36 = vpop.f32.mrb[26].mxu0 }
 0x769   :  { %v10811_v49 = vpop.f32.mrb[27].mxu0 }
 0x76e   :  { %v10813_v61 = vpop.f32.mrb[28].mxu0 }
 0x76f   :  { %v10815_v16 = vpop.f32.mrb[29].mxu0 }
 0x770   :  { %v10817_v40 = vpop.f32.mrb[30].mxu0 }
 0x771   :  { %v10819_v30 = vpop.f32.mrb[31].mxu0 }
 0x7bd   :  { %v10821_v46 = vpop.f32.mrb[32].mxu0 }
 0x7be   :  { %v10823_v34 = vpop.f32.mrb[33].mxu0 }
 0x7bf   :  { %v10825_v13 = vpop.f32.mrb[34].mxu0 }
 0x7c0   :  { %v10829_v32 = vpop.f32.mrb[35].mxu0 }
 0x7f9   :  { %v10833_v24 = vpop.f32.mrb[36].mxu0 }
 0x7fa   :  { %v10835_v14 = vpop.f32.mrb[37].mxu0 }
 0x7fb   :  { %v10837_v63 = vpop.f32.mrb[38].mxu0 }
 0x7fc   :  { %v10841_v5 = vpop.f32.mrb[39].mxu0 }
 0x801   :  { %v8308_v29 = vpop.f32.mrb[40].mxu0 }
 0x802   :  { %v1737_v0 = vpop.f32.mrb[41].mxu0 }
 0x803   :  { %v8309_v12 = vpop.f32.mrb[42].mxu0 }
 0x804   :  { %v10845_v26 = vpop.f32.mrb[43].mxu0 }
 0x806   :  { %v8340_v54 = vpop.f32.mrb[32].mxu1 }
 0x807   :  { %v2039_v50 = vpop.f32.mrb[33].mxu1  ;;  %v2072_v58 = vmul.f32 0.17677669, %v8340_v54 }
 0x808   :  { %v2070_v51 = vmul.f32 0.17677669, %v2039_v50  ;;  %v8341_v60 = vpop.f32.mrb[34].mxu1 }
 0x809   :  { %v8312_v39 = vpop.f32.mrb[44].mxu0  ;;  %v2042_v43 = vpop.f32.mrb[35].mxu1  ;;  %v2073_v21 = vmul.f32 0.17677669, %v8341_v60  ;;  %v10861_v31 = vsel %vm10450_vm1, %v2072_v58, -1e+09 }
 0x80a   :  { %v2071_v9 = vmul.f32 0.17677669, %v2042_v43  ;;  %v1753_v35 = vpop.f32.mrb[45].mxu0  ;;  %v10849_v2 = vsel %vm10467_vm6, %v2070_v51, -1e+09  ;;  %v2092_v60 = vsel %vm1179_vm7, %v10861_v31, -inf }
 0x80b   :  { %v8313_v37 = vpop.f32.mrb[46].mxu0  ;;  %v2086_v56 = vsel %vm1179_vm7, %v10849_v2, -inf  ;;  %v10865_v54 = vsel %vm10496_vm15, %v2073_v21, -1e+09 }
 0x80c   :  { %v1756_v19 = vpop.f32.mrb[47].mxu0  ;;  %v10855_v44 = vsel %vm10487_vm13, %v2071_v9, -1e+09  ;;  %2087 = vmax.xlane.f32.xlu1 %v2086_v56  ;;  %v2095_v52 = vsel %vm1179_vm7, %v10865_v54, -inf }
 0x80d   :  { %v2089_v11 = vsel %vm1179_vm7, %v10855_v44, -inf }
 0x80e   :  { %2090 = vmax.xlane.f32.xlu0 %v2089_v11  ;;  %v8344_v8 = vpop.f32.mrb[36].mxu1 }
 0x80f   :  { %v2055_v50 = vpop.f32.mrb[37].mxu1  ;;  %v2076_v9 = vmul.f32 0.17677669, %v8344_v8 }
 0x810   :  { %v2074_v51 = vmul.f32 0.17677669, %v2055_v50  ;;  %v8345_v43 = vpop.f32.mrb[38].mxu1  ;;  %2093 = vmax.xlane.f32.xlu1 %v2092_v60 }
 0x811   :  { %v2058_v56 = vpop.f32.mrb[39].mxu1  ;;  %v2077_v58 = vmul.f32 0.17677669, %v8345_v43  ;;  %v10885_v60 = vsel %vm10522_vm5, %v2076_v9, -1e+09 }
 0x812   :  { %v2075_v3 = vmul.f32 0.17677669, %v2058_v56  ;;  %2096 = vmax.xlane.f32.xlu0 %v2095_v52  ;;  %v10873_v11 = vsel %vm10533_vm12, %v2074_v51, -1e+09  ;;  %v1770_v52 = vmul.f32 0.17677669, %v8308_v29 }
 0x813   :  { %v2098_v21 = vsel %vm1179_vm7, %v10873_v11, -inf  ;;  %v10889_v51 = vsel %vm10539_vm10, %v2077_v58, -1e+09  ;;  %v2104_v43 = vsel %vm1179_vm7, %v10885_v60, -inf  ;;  %v1768_v56 = vmul.f32 0.17677669, %v1737_v0 }
 0x814   :  { %v10879_v50 = vsel %vm10563_vm11, %v2075_v3, -1e+09  ;;  %2099 = vmax.xlane.f32.xlu1 %v2098_v21  ;;  %v2107_v3 = vsel %vm1179_vm7, %v10889_v51, -inf  ;;  %v10897_v21 = vsel %vm10450_vm1, %v1770_v52, -1e+09 }
 0x815   :  { %v2101_v8 = vsel %vm1179_vm7, %v10879_v50, -inf  ;;  %v1790_v29 = vsel %vm1179_vm7, %v10897_v21, -inf  ;;  %v1771_v9 = vmul.f32 0.17677669, %v8309_v12  ;;  %v10903_v58 = vsel %vm10467_vm6, %v1768_v56, -1e+09 }
 0x816   :  { %2102 = vmax.xlane.f32.xlu0 %v2101_v8  ;;  %v1784_v8 = vsel %vm1179_vm7, %v10903_v58, -inf }
 0x817   :  { %v10909_v0 = vsel %vm10496_vm15, %v1771_v9, -1e+09  ;;  %v1769_v9 = vmul.f32 0.17677669, %v10845_v26 }
 0x818   :  { %2105 = vmax.xlane.f32.xlu1 %v2104_v43  ;;  %v1775_v43 = vmul.f32 0.17677669, %v8313_v37  ;;  %v1793_v52 = vsel %vm1179_vm7, %v10909_v0, -inf }
 0x81a   :  { %2108 = vmax.xlane.f32.xlu0 %v2107_v3  ;;  %v10915_v12 = vsel %vm10539_vm10, %v1775_v43, -1e+09  ;;  %v1773_v3 = vmul.f32 0.17677669, %v1756_v19  ;;  %v10930_v19 = vsel %vm10487_vm13, %v1769_v9, -1e+09 }
 0x81b   :  { %v1805_v56 = vsel %vm1179_vm7, %v10915_v12, -inf  ;;  %v1787_v43 = vsel %vm1179_vm7, %v10930_v19, -inf }
 0x81c   :  { %v10921_v37 = vsel %vm10563_vm11, %v1773_v3, -1e+09 }
 0x81e   :  { %1791 = vmax.xlane.f32.xlu0 %v1790_v29  ;;  %v1799_v29 = vsel %vm1179_vm7, %v10921_v37, -inf }
 0x822   :  { %1785 = vmax.xlane.f32.xlu0 %v1784_v8  ;;  %v1774_v8 = vmul.f32 0.17677669, %v8312_v39 }
 0x824   :  { %v10936_v3 = vsel %vm10522_vm5, %v1774_v8, -1e+09 }
 0x826   :  { %1794 = vmax.xlane.f32.xlu0 %v1793_v52  ;;  %v1772_v52 = vmul.f32 0.17677669, %v1753_v35 }
 0x828   :  { %v10942_v26 = vsel %vm10533_vm12, %v1772_v52, -1e+09 }
 0x829   :  { %1876 = vrot.lane.b32.xlu1 %v10348_v22, %s9823_s27  ;;  %v1796_v39 = vsel %vm1179_vm7, %v10942_v26, -inf }
 0x82a   :  { %1806 = vmax.xlane.f32.xlu0 %v1805_v56  ;;  %v1802_v56 = vsel %vm1179_vm7, %v10936_v3, -inf }
 0x82e   :  { %1800 = vmax.xlane.f32.xlu0 %v1799_v29 }
 0x84d   :  { %1788 = vmax.xlane.f32.xlu1 %v1787_v43 }
 0x851   :  { %1803 = vmax.xlane.f32.xlu1 %v1802_v56 }
 0x855   :  { %1797 = vmax.xlane.f32.xlu1 %v1796_v39 }
 0x866   :  { %1878 = vrot.lane.b32.xlu1 %v10344_v20, %s9823_s27 }
 0x86a   :  { %1882 = vrot.lane.b32.xlu1 %v10379_v1, %s9823_s27 }
 0x86e   :  { %2178 = vrot.lane.b32.xlu1 %v10348_v22, %s9833_s19 }
 0x899   :  { %v2088_v35 = vpop.xlane.xlu1 %2087 }
 0x89a   :  { %v2110_v29 = vsub.f32 %v10849_v2, %v2088_v35 }
 0x89b   :  { %v2091_v9 = vpop.xlane.xlu0 %2090 }
 0x89c   :  { %v2111_v8 = vsub.f32 %v10855_v44, %v2091_v9  ;;  %v2118_v43 = vmul.f32 1.442695, %v2110_v29 }
 0x89d   :  { %v2094_v56 = vpop.xlane.xlu1 %2093 }
 0x89e   :  { %v2120_v52 = vmul.f32 1.442695, %v2111_v8  ;;  %9083 = vpow2.f32 %v2118_v43  ;;  %v2112_v39 = vsub.f32 %v10861_v31, %v2094_v56 }
 0x89f   :  { %v2097_v23 = vpop.xlane.xlu0 %2096 }
 0x8a0   :  { %9085 = vpow2.f32 %v2120_v52  ;;  %v2122_v42 = vmul.f32 1.442695, %v2112_v39  ;;  %v2113_v33 = vsub.f32 %v10865_v54, %v2097_v23 }
 0x8a1   :  { %v2100_v53 = vpop.xlane.xlu1 %2099 }
 0x8a2   :  { %v2114_v22 = vsub.f32 %v10873_v11, %v2100_v53  ;;  %9087 = vpow2.f32 %v2122_v42  ;;  %v2124_v2 = vmul.f32 1.442695, %v2113_v33 }
 0x8a3   :  { %v2103_v27 = vpop.xlane.xlu0 %2102 }
 0x8a4   :  { %v2126_v35 = vmul.f32 1.442695, %v2114_v22 }
 0x8a5   :  { %v2106_v18 = vpop.xlane.xlu1 %2105 }
 0x8a6   :  { %9089 = vpow2.f32 %v2126_v35  ;;  %v2116_v44 = vsub.f32 %v10885_v60, %v2106_v18 }
 0x8a7   :  { %v2109_v29 = vpop.xlane.xlu0 %2108  ;;  %9091 = vpow2.f32 %v2124_v2 }
 0x8a8   :  { %v2117_v9 = vsub.f32 %v10889_v51, %v2109_v29  ;;  %v10959_v31 = vpop.eup %9083  ;;  %v2130_v8 = vmul.f32 1.442695, %v2116_v44 }
 0x8a9   :  { %v1877_v23 = vpop.permute.xlu1 %1876  ;;  %v2134_v53 = vsel %vm1179_vm7, %v10959_v31, 0.0 }
 0x8aa   :  { %v2132_v43 = vmul.f32 1.442695, %v2117_v9  ;;  %v10963_v54 = vpop.eup %9085  ;;  %9093 = vpow2.f32 %v2130_v8  ;;  %8314 = vmatprep.subr.bf16.mxu0 %v1877_v23  ;;  %2135 = vadd.xlane.f32.xlu0 %v2134_v53 }
 0x8ab   :  { %v1792_v33 = vpop.xlane.xlu0 %1791  ;;  %8315 = vmatpush3.bf16.msra.mxu0 %v1877_v23  ;;  %v2137_v11 = vsel %vm1179_vm7, %v10963_v54, 0.0 }
 0x8ac   :  { %v1810_v18 = vsub.f32 %v10897_v21, %v1792_v33  ;;  %9095 = vpow2.f32 %v2132_v43  ;;  %v10968_v60 = vpop.eup %9087  ;;  %v2115_v33 = vsub.f32 %v10879_v50, %v2103_v27 }
 0x8ad   :  { %v2140_v21 = vsel %vm1179_vm7, %v10968_v60, 0.0 }
 0x8ae   :  { %v1820_v42 = vmul.f32 1.442695, %v1810_v18  ;;  %2138 = vadd.xlane.f32.xlu0 %v2137_v11 }
 0x8af   :  { %v1786_v51 = vpop.xlane.xlu0 %1785 }
 0x8b0   :  { %v1808_v52 = vsub.f32 %v10903_v58, %v1786_v51  ;;  %v10971_v56 = vpop.eup %9089  ;;  %9097 = vpow2.f32 %v1820_v42  ;;  %v2128_v42 = vmul.f32 1.442695, %v2115_v33 }
 0x8b1   :  { %v2146_v22 = vsel %vm1179_vm7, %v10971_v56, 0.0  ;;  %v10977_v2 = vpop.eup %9091 }
 0x8b2   :  { %v1816_v39 = vmul.f32 1.442695, %v1808_v52  ;;  %2147 = vadd.xlane.f32.xlu1 %v2146_v22  ;;  %2141 = vadd.xlane.f32.xlu0 %v2140_v21  ;;  %v2143_v44 = vsel %vm1179_vm7, %v10977_v2, 0.0 }
 0x8b3   :  { %v1795_v18 = vpop.xlane.xlu0 %1794 }
 0x8b4   :  { %v10979_v35 = vpop.eup %9093  ;;  %9099 = vpow2.f32 %v1816_v39  ;;  %v1811_v11 = vsub.f32 %v10909_v0, %v1795_v18 }
 0x8b5   :  { %v2152_v58 = vsel %vm1179_vm7, %v10979_v35, 0.0  ;;  %9101 = vpow2.f32 %v2128_v42 }
 0x8b6   :  { %v10985_v29 = vpop.eup %9095  ;;  %2153 = vadd.xlane.f32.xlu1 %v2152_v58  ;;  %2144 = vadd.xlane.f32.xlu0 %v2143_v44  ;;  %v1822_v39 = vmul.f32 1.442695, %v1811_v11 }
 0x8b7   :  { %v2155_v9 = vsel %vm1179_vm7, %v10985_v29, 0.0  ;;  %v1807_v52 = vpop.xlane.xlu0 %1806 }
 0x8b8   :  { %9103 = vpow2.f32 %v1822_v39  ;;  %v1815_v44 = vsub.f32 %v10915_v12, %v1807_v52 }
 0x8ba   :  { %v10989_v8 = vpop.eup %9097  ;;  %2156 = vadd.xlane.f32.xlu1 %v2155_v9  ;;  %v1830_v0 = vmul.f32 1.442695, %v1815_v44 }
 0x8bb   :  { %v1838_v43 = vsel %vm1179_vm7, %v10989_v8, 0.0 }
 0x8be   :  { %v10993_v23 = vpop.eup %9099  ;;  %1839 = vadd.xlane.f32.xlu1 %v1838_v43 }
 0x8bf   :  { %v1832_v53 = vsel %vm1179_vm7, %v10993_v23, 0.0 }
 0x8c2   :  { %1833 = vadd.xlane.f32.xlu1 %v1832_v53  ;;  %v1801_v53 = vpop.xlane.xlu0 %1800 }
 0x8c3   :  { %v1813_v33 = vsub.f32 %v10921_v37, %v1801_v53  ;;  %v13443_v53 = vpack.i.bf16 %v10825_v13, %v10821_v46 }
 0x8c5   :  { %v1826_v12 = vmul.f32 1.442695, %v1813_v33 }
 0x8cc   :  { %1880 = vrot.lane.b32.xlu0 %v10383_v6, %s9823_s27 }
 0x8da   :  { %v1789_v51 = vpop.xlane.xlu1 %1788 }
 0x8db   :  { %v1809_v22 = vsub.f32 %v10930_v19, %v1789_v51  ;;  %v11006_v19 = vpop.eup %9101 }
 0x8dc   :  { %v11010_v11 = vpop.eup %9103 }
 0x8dd   :  { %v1818_v9 = vmul.f32 1.442695, %v1809_v22  ;;  %v1841_v51 = vsel %vm1179_vm7, %v11010_v11, 0.0 }
 0x8de   :  { %v1804_v21 = vpop.xlane.xlu1 %1803 }
 0x8df   :  { %v1814_v58 = vsub.f32 %v10936_v3, %v1804_v21  ;;  %v2149_v3 = vsel %vm1179_vm7, %v11006_v19, 0.0 }
 0x8e1   :  { %v1828_v43 = vmul.f32 1.442695, %v1814_v58 }
 0x8e2   :  { %v1798_v27 = vpop.xlane.xlu1 %1797 }
 0x8e3   :  { %9105 = vpow2.f32 %v1828_v43  ;;  %v1812_v50 = vsub.f32 %v10942_v26, %v1798_v27  ;;  %v13444_v27 = vpack.i.bf16 %v10829_v32, %v10823_v34 }
 0x8e4   :  { %9107 = vpow2.f32 %v1818_v9 }
 0x8e5   :  { %v1824_v18 = vmul.f32 1.442695, %v1812_v50 }
 0x8e6   :  { %v1879_v42 = vpop.permute.xlu1 %1878 }
 0x8e7   :  { %9109 = vpow2.f32 %v1824_v18  ;;  %8316 = vmatprep.subr.bf16.mxu0 %v1879_v42 }
 0x8e8   :  { %8317 = vmatpush3.bf16.msra.mxu0 %v1879_v42  ;;  %9111 = vpow2.f32 %v1830_v0 }
 0x8e9   :  { %9113 = vpow2.f32 %v1826_v12 }
 0x8ea   :  { %v1883_v18 = vpop.permute.xlu1 %1882 }
 0x8eb   :  { %2150 = vadd.xlane.f32.xlu0 %v2149_v3 }
 0x8ed   :  { %v11012_v26 = vpop.eup %9105 }
 0x8ee   :  { %v1850_v37 = vsel %vm1179_vm7, %v11012_v26, 0.0  ;;  %v9108_v52 = vpop.eup %9107 }
 0x8ef   :  { %1851 = vadd.xlane.f32.xlu1 %v1850_v37  ;;  %1842 = vadd.xlane.f32.xlu0 %v1841_v51  ;;  %v1835_v21 = vsel %vm1179_vm7, %v9108_v52, 0.0 }
 0x8f1   :  { %v11018_v39 = vpop.eup %9109 }
 0x8f2   :  { %v1844_v22 = vsel %vm1179_vm7, %v11018_v39, 0.0  ;;  %v11023_v58 = vpop.eup %9111 }
 0x8f3   :  { %1845 = vadd.xlane.f32.xlu1 %v1844_v22  ;;  %1836 = vadd.xlane.f32.xlu0 %v1835_v21  ;;  %v1853_v44 = vsel %vm1179_vm7, %v11023_v58, 0.0  ;;  %v11027_v9 = vpop.eup %9113 }
 0x8f4   :  { %v1847_v43 = vsel %vm1179_vm7, %v11027_v9, 0.0 }
 0x8f7   :  { %1854 = vadd.xlane.f32.xlu0 %v1853_v44 }
 0x8fb   :  { %1848 = vadd.xlane.f32.xlu0 %v1847_v43 }
 0x904   :  { %2182 = vrot.lane.b32.xlu1 %v10383_v6, %s9833_s19 }
 0x908   :  { %2184 = vrot.lane.b32.xlu1 %v10379_v1, %s9833_s19  ;;  %v2179_v1 = vpop.permute.xlu1 %2178 }
 0x90c   :  { %8633 = vrot.lane.b32.xlu1 %v13443_v53, %s9833_s19 }
 0x911   :  { %2180 = vrot.lane.b32.xlu0 %v10344_v20, %s9833_s19 }
 0x915   :  { %8628 = vrot.lane.b32.xlu0 %v13444_v27, %s9833_s19 }
 0x937   :  { %v2136_v50 = vpop.xlane.xlu0 %2135 }
 0x93b   :  { %v2139_v0 = vpop.xlane.xlu0 %2138 }
 0x93f   :  { %v2142_v33 = vpop.xlane.xlu0 %2141  ;;  %v2148_v46 = vpop.xlane.xlu1 %2147 }
 0x943   :  { %v2145_v6 = vpop.xlane.xlu0 %2144  ;;  %v2154_v13 = vpop.xlane.xlu1 %2153 }
 0x947   :  { %v1881_v42 = vpop.permute.xlu0 %1880  ;;  %v2157_v20 = vpop.xlane.xlu1 %2156 }
 0x948   :  { %8318 = vmatprep.subr.bf16.mxu0 %v1881_v42 }
 0x949   :  { %8319 = vmatpush3.bf16.msra.mxu0 %v1881_v42 }
 0x94a   :  { %8320 = vmatprep.subr.bf16.mxu0 %v1883_v18 }
 0x94b   :  { %v1840_v12 = vpop.xlane.xlu1 %1839 }
 0x94d   :  { %8321 = vmatpush3.bf16.msra.mxu0 %v1883_v18 }
 0x94e   :  { %8346 = vmatprep.subr.bf16.mxu0 %v2179_v1 }
 0x94f   :  { %v1834_v37 = vpop.xlane.xlu1 %1833 }
 0x978   :  { %v2151_v3 = vpop.xlane.xlu0 %2150 }
 0x97c   :  { %v1843_v34 = vpop.xlane.xlu0 %1842  ;;  %v1852_v32 = vpop.xlane.xlu1 %1851 }
 0x97d   :  { %9115 = vrcp.f32 %v1843_v34 }
 0x97e   :  { %9117 = vrcp.f32 %v1834_v37 }
 0x97f   :  { %9119 = vrcp.f32 %v1840_v12 }
 0x980   :  { %v1837_v51 = vpop.xlane.xlu0 %1836  ;;  %v1846_v22 = vpop.xlane.xlu1 %1845 }
 0x981   :  { %9121 = vrcp.f32 %v1837_v51 }
 0x982   :  { %9123 = vrcp.f32 %v2139_v0 }
 0x983   :  { %9125 = vrcp.f32 %v1846_v22 }
 0x984   :  { %v1855_v21 = vpop.xlane.xlu0 %1854 }
 0x985   :  { %9127 = vrcp.f32 %v1855_v21 }
 0x986   :  { %9129 = vrcp.f32 %v1852_v32 }
 0x987   :  { %v9116_v43 = vpop.eup %9115 }
 0x988   :  { %v1849_v44 = vpop.xlane.xlu0 %1848  ;;  %v9118_v53 = vpop.eup %9117  ;;  %v1867_v42 = vmul.f32 %v9116_v43, %v11010_v11 }
 0x989   :  { %9131 = vrcp.f32 %v1849_v44  ;;  %v9120_v27 = vpop.eup %9119  ;;  %v1864_v37 = vmul.f32 %v9118_v53, %v10993_v23 }
 0x98a   :  { %9133 = vrcp.f32 %v2136_v50  ;;  %v1866_v12 = vmul.f32 %v9120_v27, %v10989_v8 }
 0x98b   :  { %v9122_v18 = vpop.eup %9121  ;;  %9135 = vrcp.f32 %v2145_v6 }
 0x98c   :  { %v1865_v34 = vmul.f32 %v9122_v18, %v9108_v52  ;;  %v9124_v51 = vpop.eup %9123  ;;  %9137 = vrcp.f32 %v2151_v3  ;;  %v1873_v32 = vpack.c.bf16 %v1867_v42, %v1866_v12  ;;  %v2181_v44 = vpop.permute.xlu0 %2180 }
 0x98d   :  { %v9126_v22 = vpop.eup %9125  ;;  %9139 = vrcp.f32 %v2142_v33  ;;  %v2183_v3 = vpop.permute.xlu1 %2182  ;;  %v2167_v33 = vmul.f32 %v9124_v51, %v10963_v54 }
 0x98e   :  { %v1872_v0 = vpack.c.bf16 %v1865_v34, %v1864_v37  ;;  %9141 = vrcp.f32 %v2148_v46  ;;  %v1868_v8 = vmul.f32 %v9126_v22, %v11018_v39 }
 0x98f   :  { %v9128_v21 = vpop.eup %9127  ;;  %9143 = vrcp.f32 %v2157_v20 }
 0x990   :  { %8322 = vmatprep.mubr.msk.bf16.mxu0 %vm1179_vm7, %v1872_v0  ;;  %v9130_v50 = vpop.eup %9129  ;;  %v1871_v6 = vmul.f32 %v9128_v21, %v11023_v58  ;;  %9145 = vrcp.f32 %v2154_v13 }
 0x991   :  { %8323 = vmatmul.mubr.msk.bf16.vlgmr.msra.gmra.mrb[48].mxu0 %vm1179_vm7, %v1873_v32  ;;  %v1870_v53 = vmul.f32 %v9130_v50, %v11012_v26  ;;  %v2185_v18 = vpop.permute.xlu1 %2184  ;;  %v8800_v50 = vld [vmem:[%s13319_s10 + $0x28] sm:$0xff]  }
 0x992   :  { %8347 = vmatpush3.bf16.msra.mxu0 %v2179_v1 }
 0x993   :  { %v9132_v11 = vpop.eup %9131  ;;  %8348 = vmatprep.subr.bf16.mxu0 %v2181_v44  ;;  %v1875_v1 = vpack.c.bf16 %v1871_v6, %v1870_v53  ;;  %v8802_v53 = vld [vmem:[%s13319_s10 + $0x38] sm:$0xff]  }
 0x994   :  { %v9134_v23 = vpop.eup %9133  ;;  %v1869_v52 = vmul.f32 %v9132_v11, %v11027_v9 }
 0x995   :  { %v2166_v46 = vmul.f32 %v9134_v23, %v10959_v31  ;;  %v9136_v27 = vpop.eup %9135 }
 0x996   :  { %v1874_v43 = vpack.c.bf16 %v1869_v52, %v1868_v8  ;;  %8349 = vmatpush3.bf16.msra.mxu0 %v2181_v44  ;;  %v9138_v9 = vpop.eup %9137  ;;  %v2169_v26 = vmul.f32 %v9136_v27, %v10977_v2  ;;  %v8801_v8 = vld [vmem:[%s13319_s10 + $0x30] sm:$0xff]  }
 0x997   :  { %8350 = vmatprep.subr.bf16.mxu0 %v2183_v3  ;;  %v2174_v39 = vpack.c.bf16 %v2167_v33, %v2166_v46  ;;  %v9140_v58 = vpop.eup %9139  ;;  %v2171_v31 = vmul.f32 %v9138_v9, %v11006_v19  ;;  %v8799_v19 = vld [vmem:[%s13319_s10 + $0x20] sm:$0xff]  }
 0x998   :  { %8326 = vmatprep.mubr.msk.bf16.mxu0 %vm1179_vm7, %v1874_v43  ;;  %v9142_v54 = vpop.eup %9141  ;;  %v2168_v20 = vmul.f32 %v9140_v58, %v10968_v60  ;;  %v8795_v60 = vld [vmem:[%s13319_s10] sm:$0xff]  }
 0x999   :  { %8327 = vmatmul.mubr.msk.bf16.gmra.mrb[52].mxu0 %vm1179_vm7, %v1875_v1  ;;  %v2170_v13 = vmul.f32 %v9142_v54, %v10971_v56  ;;  %v9144_v37 = vpop.eup %9143  ;;  %v8796_v56 = vld [vmem:[%s13319_s10 + $0x8] sm:$0xff]  }
 0x99a   :  { %8351 = vmatpush3.bf16.msra.mxu0 %v2183_v3  ;;  %8354 = vmatprep.mubr.msk.bf16.mxu0 %vm1179_vm7, %v2174_v39  ;;  %v2175_v42 = vpack.c.bf16 %v2169_v26, %v2168_v20  ;;  %v9146_v12 = vpop.eup %9145  ;;  %v2173_v51 = vmul.f32 %v9144_v37, %v10985_v29  ;;  %v8797_v29 = vld [vmem:[%s13319_s10 + $0x10] sm:$0xff]   ;;  %v13445_v26 = vpack.i.bf16 %v10837_v63, %v10833_v24  ;;  %v8634_v24 = vpop.permute.xlu1 %8633 }
 0x99b   :  { %8352 = vmatprep.subr.bf16.mxu0 %v2185_v18  ;;  %v2176_v34 = vpack.c.bf16 %v2171_v31, %v2170_v13  ;;  %v2172_v2 = vmul.f32 %v9146_v12, %v10979_v35  ;;  %v8798_v35 = vld [vmem:[%s13319_s10 + $0x18] sm:$0xff]   ;;  %v13446_v20 = vpack.i.bf16 %v10841_v5, %v10835_v14  ;;  %v8629_v63 = vpop.permute.xlu0 %8628 }
 0x99c   :  { %v8631_v14 = vunpack.i.h.bf16 %v8629_v63  ;;  %v8630_v5 = vunpack.i.l.bf16 %v8629_v63 }
 0x99d   :  { %v2177_v0 = vpack.c.bf16 %v2173_v51, %v2172_v2  ;;  %v8636_v51 = vunpack.i.h.bf16 %v8634_v24  ;;  %v8635_v2 = vunpack.i.l.bf16 %v8634_v24 }
 0x99e   :  { %8353 = vmatpush3.bf16.msra.mxu0 %v2185_v18 }
 0x99f   :  { %8362 = vmatprep.subr.bf16.mxu0 %v8795_v60 }
 0x9a1   :  { %8355 = vmatmul.mubr.msk.bf16.vlgmr.msra.gmra.mrb[56].mxu0 %vm1179_vm7, %v2175_v42 }
 0x9a2   :  { %8358 = vmatprep.mubr.msk.bf16.mxu0 %vm1179_vm7, %v2176_v34  ;;  %8363 = vmatpush3.bf16.msra.mxu0 %v8795_v60 }
 0x9a3   :  { %8364 = vmatprep.subr.bf16.mxu0 %v8796_v56 }
 0x9a6   :  { %8365 = vmatpush3.bf16.msra.mxu0 %v8796_v56 }
 0x9a7   :  { %8366 = vmatprep.subr.bf16.mxu0 %v8797_v29 }
 0x9a9   :  { %8359 = vmatmul.mubr.msk.bf16.gmra.mrb[60].mxu0 %vm1179_vm7, %v2177_v0 }
 0x9aa   :  { %8367 = vmatpush3.bf16.msra.mxu0 %v8797_v29 }
 0x9ab   :  { %8368 = vmatprep.subr.bf16.mxu0 %v8798_v35 }
 0x9ae   :  { %8369 = vmatpush3.bf16.msra.mxu0 %v8798_v35 }
 0x9af   :  { %8370 = vmatprep.subr.bf16.mxu0 %v8799_v19 }
 0x9b2   :  { %8371 = vmatpush3.bf16.msra.mxu0 %v8799_v19  ;;  %v2366_v19 = vsel %vm1073_vm8, %v10809_v36, %v8636_v51 }
 0x9b3   :  { %8372 = vmatprep.subr.bf16.mxu0 %v8800_v50 }
 0x9b6   :  { %8373 = vmatpush3.bf16.msra.mxu0 %v8800_v50  ;;  %v2363_v50 = vsel %vm1073_vm8, %v10807_v62, %v8630_v5 }
 0x9b7   :  { %8374 = vmatprep.subr.bf16.mxu0 %v8801_v8 }
 0x9ba   :  { %8375 = vmatpush3.bf16.msra.mxu0 %v8801_v8 }
 0x9bb   :  { %8376 = vmatprep.subr.bf16.mxu0 %v8802_v53 }
 0x9be   :  { %8377 = vmatpush3.bf16.msra.mxu0 %v8802_v53 }
 0xa64   :  { %v8324_v22 = vpop.f32.mrb[48].mxu0 }
 0xa65   :  { %v1934_v32 = vpop.f32.mrb[49].mxu0 }
 0xa66   :  { %v8325_v21 = vpop.f32.mrb[50].mxu0 }
 0xa67   :  { %v8637_v11 = vpack.i.bf16 %v8325_v21, %v8324_v22  ;;  %v1937_v44 = vpop.f32.mrb[51].mxu0  ;;  %v2365_v22 = vsel %vm1073_vm8, %v10805_v10, %v8635_v2  ;;  %v2364_v21 = vsel %vm1073_vm8, %v10811_v49, %v8631_v14 }
 0xa68   :  { %v8642_v23 = vpack.i.bf16 %v1937_v44, %v1934_v32 }
 0xa69   :  { %8638 = vrot.lane.b32.xlu1 %v8637_v11, %s9823_s27 }
 0xa6a   :  { %8643 = vrot.lane.b32.xlu0 %v8642_v23, %s9823_s27 }
 0xa6c   :  { %v8328_v52 = vpop.f32.mrb[52].mxu0 }
 0xa6d   :  { %v1950_v6 = vpop.f32.mrb[53].mxu0 }
 0xa6e   :  { %v8329_v3 = vpop.f32.mrb[54].mxu0 }
 0xa6f   :  { %v8672_v33 = vpack.i.bf16 %v8329_v3, %v8328_v52  ;;  %v1953_v43 = vpop.f32.mrb[55].mxu0 }
 0xa70   :  { %v8667_v46 = vpack.i.bf16 %v1953_v43, %v1950_v6 }
 0xa74   :  { %v8356_v1 = vpop.f32.mrb[56].mxu0 }
 0xa75   :  { %v2236_v27 = vpop.f32.mrb[57].mxu0 }
 0xa76   :  { %v8357_v39 = vpop.f32.mrb[58].mxu0 }
 0xa77   :  { %v8652_v9 = vpack.i.bf16 %v8357_v39, %v8356_v1  ;;  %v2239_v58 = vpop.f32.mrb[59].mxu0 }
 0xa78   :  { %v8647_v18 = vpack.i.bf16 %v2239_v58, %v2236_v27 }
 0xa79   :  { %8653 = vrot.lane.b32.xlu1 %v8652_v9, %s9832_s21 }
 0xa7a   :  { %8648 = vrot.lane.b32.xlu0 %v8647_v18, %s9832_s21 }
 0xa7c   :  { %v8360_v54 = vpop.f32.mrb[60].mxu0 }
 0xa7d   :  { %8663 = vrot.lane.b32.xlu1 %v13445_v26, %s9833_s19  ;;  %v2252_v31 = vpop.f32.mrb[61].mxu0 }
 0xa7e   :  { %8658 = vrot.lane.b32.xlu0 %v13446_v20, %s9833_s19  ;;  %v8361_v13 = vpop.f32.mrb[62].mxu0 }
 0xa7f   :  { %v8682_v42 = vpack.i.bf16 %v8361_v13, %v8360_v54  ;;  %v2255_v37 = vpop.f32.mrb[63].mxu0 }
 0xa80   :  { %v8677_v34 = vpack.i.bf16 %v2255_v37, %v2252_v31 }
 0xa81   :  { %8673 = vrot.lane.b32.xlu1 %v8672_v33, %s9823_s27 }
 0xa82   :  { %8668 = vrot.lane.b32.xlu0 %v8667_v46, %s9823_s27 }
 0xa85   :  { %8683 = vrot.lane.b32.xlu1 %v8682_v42, %s9832_s21 }
 0xa86   :  { %8678 = vrot.lane.b32.xlu0 %v8677_v34, %s9832_s21 }
 0xadb   :  { %v8639_v12 = vpop.permute.xlu1 %8638 }
 0xadc   :  { %v8644_v0 = vpop.permute.xlu0 %8643  ;;  %v8641_v60 = vunpack.i.h.bf16 %v8639_v12  ;;  %v8640_v56 = vunpack.i.l.bf16 %v8639_v12 }
 0xadd   :  { %v8646_v29 = vunpack.i.h.bf16 %v8644_v0  ;;  %v8645_v35 = vunpack.i.l.bf16 %v8644_v0 }
 0xade   :  { %v2374_v8 = vsel %vm1179_vm7, %v2366_v19, %v8641_v60  ;;  %v2373_v52 = vsel %vm1179_vm7, %v2365_v22, %v8640_v56 }
 0xadf   :  { %v2371_v33 = vsel %vm1179_vm7, %v2363_v50, %v8645_v35  ;;  %v2372_v49 = vsel %vm1179_vm7, %v2364_v21, %v8646_v29  ;;  %v7553_v21 = vld [vmem:[#allocation7] ss:$0 sm:$0xff] }
 0xaeb   :  { %v8654_v32 = vpop.permute.xlu1 %8653 }
 0xaec   :  { %v8656_v11 = vunpack.i.h.bf16 %v8654_v32  ;;  %v8655_v44 = vunpack.i.l.bf16 %v8654_v32  ;;  %v8649_v23 = vpop.permute.xlu0 %8648 }
 0xaed   :  { %v8651_v6 = vunpack.i.h.bf16 %v8649_v23  ;;  %v8650_v36 = vunpack.i.l.bf16 %v8649_v23 }
 0xaee   :  { %v2383_v3 = vsel %vm2379_vm14, %v2374_v8, %v8656_v11  ;;  %v2382_v10 = vsel %vm2379_vm14, %v2373_v52, %v8655_v44 }
 0xaef   :  { %v2389_v43 = vpack.c.bf16 %v2383_v3, %v2382_v10  ;;  %v8664_v53 = vpop.permute.xlu1 %8663  ;;  %v2380_v62 = vsel %vm2379_vm14, %v2371_v33, %v8650_v36  ;;  %v2381_v46 = vsel %vm2379_vm14, %v2372_v49, %v8651_v6 }
 0xaf0   :  { %v8659_v1 = vpop.permute.xlu0 %8658  ;;  %v2388_v27 = vpack.c.bf16 %v2381_v46, %v2380_v62  ;;  %v8666_v39 = vunpack.i.h.bf16 %v8664_v53  ;;  %v8665_v9 = vunpack.i.l.bf16 %v8664_v53 }
 0xaf1   :  { %v8661_v18 = vunpack.i.h.bf16 %v8659_v1  ;;  %v8660_v54 = vunpack.i.l.bf16 %v8659_v1 }
 0xaf2   :  { %8378 = vmatprep.mubr.bf16.mxu0 %v2388_v27  ;;  %v2370_v37 = vsel %vm1073_vm8, %v10817_v40, %v8666_v39  ;;  %v2369_v34 = vsel %vm1073_vm8, %v10813_v61, %v8665_v9  ;;  %v8805_v39 = vld [vmem:[#allocation11 + $0x4] ss:$16 sps:$4 sm:$0xff]   ;;  %v8806_v9 = vld [vmem:[#allocation11 + $0x8] ss:$16 sps:$4 sm:$0xff]  }
 0xaf3   :  { %v8674_v58 = vpop.permute.xlu1 %8673  ;;  %8379 = vmatmul.mubr.bf16.vlgmr.msra.gmra.mrb[64].mxu0 %v2389_v43  ;;  %v2368_v63 = vsel %vm1073_vm8, %v10819_v30, %v8661_v18  ;;  %v2367_v12 = vsel %vm1073_vm8, %v10815_v16, %v8660_v54  ;;  %2880 = vmatprep.subr.bf16.mxu1 %v8805_v39  ;;  %v8809_v18 = vld [vmem:[#allocation11 + $0x20] ss:$16 sps:$4 sm:$0xff]   ;;  %v8812_v54 = vld [vmem:[#allocation11 + $0x28] ss:$16 sps:$4 sm:$0xff]  }
 0xaf4   :  { %v8669_v26 = vpop.permute.xlu0 %8668  ;;  %v8676_v31 = vunpack.i.h.bf16 %v8674_v58  ;;  %v8675_v20 = vunpack.i.l.bf16 %v8674_v58  ;;  %v8811_v58 = vld [vmem:[#allocation11 + $0x24] ss:$16 sps:$4 sm:$0xff]   ;;  %v8830_v39 = vld [vmem:[#allocation11 + $0x88] ss:$16 sps:$4 sm:$0xff]  }
 0xaf5   :  { %v8671_v13 = vunpack.i.h.bf16 %v8669_v26  ;;  %v8670_v42 = vunpack.i.l.bf16 %v8669_v26 }
 0xaf6   :  { %v2377_v60 = vsel %vm1179_vm7, %v2369_v34, %v8675_v20  ;;  %v2378_v56 = vsel %vm1179_vm7, %v2370_v37, %v8676_v31 }
 0xaf7   :  { %v8684_v24 = vpop.permute.xlu1 %8683  ;;  %v2375_v40 = vsel %vm1179_vm7, %v2367_v12, %v8670_v42  ;;  %v2376_v61 = vsel %vm1179_vm7, %v2368_v63, %v8671_v13 }
 0xaf8   :  { %v8686_v51 = vunpack.i.h.bf16 %v8684_v24  ;;  %v8685_v2 = vunpack.i.l.bf16 %v8684_v24  ;;  %v8679_v0 = vpop.permute.xlu0 %8678 }
 0xaf9   :  { %v8681_v14 = vunpack.i.h.bf16 %v8679_v0  ;;  %v8680_v5 = vunpack.i.l.bf16 %v8679_v0 }
 0xafa   :  { %v2386_v29 = vsel %vm2379_vm14, %v2377_v60, %v8685_v2  ;;  %v2387_v30 = vsel %vm2379_vm14, %v2378_v56, %v8686_v51 }
 0xafb   :  { %v2384_v35 = vsel %vm2379_vm14, %v2375_v40, %v8680_v5  ;;  %v2385_v16 = vsel %vm2379_vm14, %v2376_v61, %v8681_v14  ;;  %v2391_v19 = vpack.c.bf16 %v2387_v30, %v2386_v29 }
 0xafc   :  { %v2390_v22 = vpack.c.bf16 %v2385_v16, %v2384_v35 }
 0xafe   :  { %8382 = vmatprep.mubr.bf16.mxu0 %v2390_v22 }
 0xaff   :  { %8383 = vmatmul.mubr.bf16.gmra.mrb[68].mxu0 %v2391_v19 }
 0xb00   :  { %2985 = vmatprep.mubr.bf16.mxu0 %v13442_v57 }
 0xbc6   :  { %v8380_v32 = vpop.f32.mrb[64].mxu0 }
 0xbc7   :  { %v2490_v50 = vpop.f32.mrb[65].mxu0  ;;  %v2523_v8 = vadd.f32 %v8380_v32, %v10222_v55 }
 0xbc8   :  { %v2521_v11 = vadd.f32 %v2490_v50, %v10213_v45  ;;  %v8381_v44 = vpop.f32.mrb[66].mxu0 }
 0xbc9   :  { %v2493_v23 = vpop.f32.mrb[67].mxu0  ;;  %v11149_v3 = vadd.f32 %v7553_v21, %v2523_v8  ;;  %v2524_v10 = vadd.f32 %v8381_v44, %v10228_v59 }
 0xbca   :  { %v11143_v52 = vadd.f32 %v7553_v21, %v2521_v11  ;;  %v2522_v6 = vadd.f32 %v2493_v23, %v10218_v48 }
 0xbcb   :  { %13449 = vst [vmem:[#allocation46_spill] sm:$0xff] %v11149_v3  ;;  %v11154_v45 = vadd.f32 %v7553_v21, %v2524_v10  ;;  %v8820_v10 = vld [vmem:[#allocation11 + $0x4c] ss:$16 sps:$4 sm:$0xff]  }
 0xbcc   :  { %13447 = vst [vmem:[#allocation44_spill] sm:$0xff] %v11143_v52  ;;  %v11146_v36 = vadd.f32 %v7553_v21, %v2522_v6  ;;  %2546 = vadd.xlane.f32.xlu0 %v11143_v52  ;;  %v8817_v6 = vld [vmem:[#allocation11 + $0x44] ss:$16 sps:$4 sm:$0xff]  }
 0xbcd   :  { %13450 = vst [vmem:[#allocation47_spill] sm:$0xff] %v11154_v45 }
 0xbce   :  { %13448 = vst [vmem:[#allocation45_spill] sm:$0xff] %v11146_v36  ;;  %2548 = vadd.xlane.f32.xlu1 %v11146_v36 }
 0xbd0   :  { %2550 = vadd.xlane.f32.xlu0 %v11149_v3 }
 0xbd2   :  { %v8384_v33 = vpop.f32.mrb[68].mxu0 }
 0xbd3   :  { %v2506_v55 = vpop.f32.mrb[69].mxu0  ;;  %v2527_v53 = vadd.f32 %v8384_v33, %v10240_v15  ;;  %v8803_v15 = vld [vmem:[#allocation11] ss:$16 sps:$4 sm:$0xff]  }
 0xbd4   :  { %v2525_v49 = vadd.f32 %v2506_v55, %v10231_v4  ;;  %2552 = vadd.xlane.f32.xlu0 %v11154_v45  ;;  %v8385_v48 = vpop.f32.mrb[70].mxu0  ;;  %2881 = vmatpush1.bf16.msra.mxu1 %v8803_v15  ;;  %v8815_v33 = vld [vmem:[#allocation11 + $0x40] ss:$16 sps:$4 sm:$0xff]   ;;  %v8818_v55 = vld [vmem:[#allocation11 + $0x48] ss:$16 sps:$4 sm:$0xff]  }
 0xbd5   :  { %v2509_v43 = vpop.f32.mrb[71].mxu0  ;;  %v2528_v46 = vadd.f32 %v8385_v48, %v10242_v17  ;;  %v11166_v27 = vadd.f32 %v7553_v21, %v2527_v53  ;;  %v8814_v17 = vld [vmem:[#allocation11 + $0x2c] ss:$16 sps:$4 sm:$0xff]   ;;  %2882 = vmatprep.subr.bf16.mxu1 %v8811_v58  ;;  %v8824_v53 = vld [vmem:[#allocation11 + $0x68] ss:$16 sps:$4 sm:$0xff]  }
 0xbd6   :  { %v11159_v62 = vadd.f32 %v7553_v21, %v2525_v49  ;;  %v2526_v59 = vadd.f32 %v2509_v43, %v10236_v7  ;;  %v8808_v7 = vld [vmem:[#allocation11 + $0xc] ss:$16 sps:$4 sm:$0xff]   ;;  %v8823_v49 = vld [vmem:[#allocation11 + $0x64] ss:$16 sps:$4 sm:$0xff]   ;;  %v8821_v43 = vld [vmem:[#allocation11 + $0x60] ss:$16 sps:$4 sm:$0xff]  }
 0xbd7   :  { %13453 = vst [vmem:[#allocation50_spill] sm:$0xff] %v11166_v27  ;;  %v11169_v4 = vadd.f32 %v7553_v21, %v2528_v46  ;;  %2953 = vmatprep.subr.bf16.mxu0 %v8808_v7  ;;  %v8826_v48 = vld [vmem:[#allocation11 + $0x6c] ss:$16 sps:$4 sm:$0xff]   ;;  %v8827_v15 = vld [vmem:[#allocation11 + $0x80] ss:$16 sps:$4 sm:$0xff]  }
 0xbd8   :  { %13451 = vst [vmem:[#allocation48_spill] sm:$0xff] %v11159_v62  ;;  %v11163_v1 = vadd.f32 %v7553_v21, %v2526_v59  ;;  %2554 = vadd.xlane.f32.xlu1 %v11159_v62  ;;  %2954 = vmatpush1.bf16.msra.mxu0 %v8806_v9  ;;  %v8829_v59 = vld [vmem:[#allocation11 + $0x84] ss:$16 sps:$4 sm:$0xff]   ;;  %v8832_v46 = vld [vmem:[#allocation11 + $0x8c] ss:$16 sps:$4 sm:$0xff]  }
 0xbd9   :  { %13454 = vst [vmem:[#allocation51_spill] sm:$0xff] %v11169_v4  ;;  %2955 = vmatprep.subr.bf16.mxu0 %v8814_v17  ;;  %2883 = vmatpush1.bf16.msra.mxu1 %v8809_v18  ;;  %v8835_v9 = vld [vmem:[#allocation11 + $0xa4] ss:$16 sps:$4 sm:$0xff]   ;;  %v8838_v7 = vld [vmem:[#allocation11 + $0xac] ss:$16 sps:$4 sm:$0xff]  }
 0xbda   :  { %13452 = vst [vmem:[#allocation49_spill] sm:$0xff] %v11163_v1  ;;  %2556 = vadd.xlane.f32.xlu0 %v11163_v1  ;;  %2884 = vmatprep.subr.bf16.mxu1 %v8817_v6  ;;  %v8833_v58 = vld [vmem:[#allocation11 + $0xa0] ss:$16 sps:$4 sm:$0xff]   ;;  %v8836_v17 = vld [vmem:[#allocation11 + $0xa8] ss:$16 sps:$4 sm:$0xff]  }
 0xbdb   :  { %v8839_v18 = vld [vmem:[#allocation11 + $0xc0] ss:$16 sps:$4 sm:$0xff]  }
 0xbdc   :  { %2558 = vadd.xlane.f32.xlu1 %v11166_v27  ;;  %2956 = vmatpush1.bf16.msra.mxu0 %v8812_v54  ;;  %v8841_v54 = vld [vmem:[#allocation11 + $0xc4] ss:$16 sps:$4 sm:$0xff]  }
 0xbdd   :  { %2957 = vmatprep.subr.bf16.mxu0 %v8820_v10  ;;  %2885 = vmatpush1.bf16.msra.mxu1 %v8815_v33 }
 0xbde   :  { %2560 = vadd.xlane.f32.xlu0 %v11169_v4  ;;  %2886 = vmatprep.subr.bf16.mxu1 %v8823_v49 }
 0xbe0   :  { %2958 = vmatpush1.bf16.msra.mxu0 %v8818_v55 }
 0xbe1   :  { %2959 = vmatprep.subr.bf16.mxu0 %v8826_v48  ;;  %2887 = vmatpush1.bf16.msra.mxu1 %v8821_v43 }
 0xbe2   :  { %2888 = vmatprep.subr.bf16.mxu1 %v8829_v59 }
 0xbe4   :  { %2960 = vmatpush1.bf16.msra.mxu0 %v8824_v53 }
 0xbe5   :  { %2961 = vmatprep.subr.bf16.mxu0 %v8832_v46  ;;  %2889 = vmatpush1.bf16.msra.mxu1 %v8827_v15 }
 0xbe6   :  { %2890 = vmatprep.subr.bf16.mxu1 %v8835_v9 }
 0xbe8   :  { %2962 = vmatpush1.bf16.msra.mxu0 %v8830_v39  ;;  %v7555_v39 = vld [vmem:[#allocation10] ss:$0 sm:$0xff] }
 0xbe9   :  { %2963 = vmatprep.subr.bf16.mxu0 %v8838_v7  ;;  %2891 = vmatpush1.bf16.msra.mxu1 %v8833_v58 }
 0xbea   :  { %2892 = vmatprep.subr.bf16.mxu1 %v8841_v54 }
 0xbec   :  { %2964 = vmatpush1.bf16.msra.mxu0 %v8836_v17 }
 0xbed   :  { %2893 = vmatpush1.bf16.msra.mxu1 %v8839_v18 }
 0xc59   :  { %v2547_v26 = vpop.xlane.xlu0 %2546 }
 0xc5a   :  { %v2562_v31 = vmul.f32 0.0078125, %v2547_v26  ;;  %v8842_v26 = vld [vmem:[#allocation11 + $0xc8] ss:$16 sps:$4 sm:$0xff]  }
 0xc5b   :  { %v2549_v20 = vpop.xlane.xlu1 %2548 }
 0xc5c   :  { %v11174_v13 = vsub.f32 %v11143_v52, %v2562_v31  ;;  %v2563_v42 = vmul.f32 0.0078125, %v2549_v20  ;;  %v8844_v31 = vld [vmem:[#allocation11 + $0xcc] ss:$16 sps:$4 sm:$0xff]   ;;  %v8847_v20 = vld [vmem:[#allocation11 + $0xe4] ss:$16 sps:$4 sm:$0xff]  }
 0xc5d   :  { %v2551_v37 = vpop.xlane.xlu0 %2550  ;;  %2965 = vmatprep.subr.bf16.mxu0 %v8844_v31  ;;  %2894 = vmatprep.subr.bf16.mxu1 %v8847_v20 }
 0xc5e   :  { %v11177_v34 = vsub.f32 %v11146_v36, %v2563_v42  ;;  %v2564_v24 = vmul.f32 0.0078125, %v2551_v37  ;;  %v2578_v63 = vmul.f32 %v11174_v13, %v11174_v13  ;;  %v8845_v42 = vld [vmem:[#allocation11 + $0xe0] ss:$16 sps:$4 sm:$0xff]   ;;  %v8850_v37 = vld [vmem:[#allocation11 + $0xec] ss:$16 sps:$4 sm:$0xff]   ;;  %2966 = vmatpush1.bf16.msra.mxu0 %v8842_v26 }
 0xc5f   :  { %2967 = vmatprep.subr.bf16.mxu0 %v8850_v37  ;;  %2895 = vmatpush1.bf16.msra.mxu1 %v8845_v42 }
 0xc60   :  { %v11182_v12 = vsub.f32 %v11149_v3, %v2564_v24  ;;  %2586 = vadd.xlane.f32.xlu1 %v2578_v63  ;;  %v2579_v51 = vmul.f32 %v11177_v34, %v11177_v34  ;;  %v8848_v24 = vld [vmem:[#allocation11 + $0xe8] ss:$16 sps:$4 sm:$0xff]  }
 0xc61   :  { %v2553_v2 = vpop.xlane.xlu0 %2552 }
 0xc62   :  { %v2565_v0 = vmul.f32 0.0078125, %v2553_v2  ;;  %2588 = vadd.xlane.f32.xlu0 %v2579_v51  ;;  %v2580_v14 = vmul.f32 %v11182_v12, %v11182_v12  ;;  %2968 = vmatpush1.bf16.msra.mxu0 %v8848_v24 }
 0xc64   :  { %v11189_v5 = vsub.f32 %v11154_v45, %v2565_v0  ;;  %2590 = vadd.xlane.f32.xlu1 %v2580_v14 }
 0xc65   :  { %v2555_v60 = vpop.xlane.xlu1 %2554 }
 0xc66   :  { %v2566_v56 = vmul.f32 0.0078125, %v2555_v60  ;;  %v2581_v40 = vmul.f32 %v11189_v5, %v11189_v5 }
 0xc67   :  { %v2557_v61 = vpop.xlane.xlu0 %2556 }
 0xc68   :  { %v11194_v29 = vsub.f32 %v11159_v62, %v2566_v56  ;;  %v2567_v30 = vmul.f32 0.0078125, %v2557_v61  ;;  %2592 = vadd.xlane.f32.xlu0 %v2581_v40 }
 0xc69   :  { %v2559_v35 = vpop.xlane.xlu1 %2558 }
 0xc6a   :  { %v11197_v16 = vsub.f32 %v11163_v1, %v2567_v30  ;;  %v2568_v19 = vmul.f32 0.0078125, %v2559_v35  ;;  %v2582_v22 = vmul.f32 %v11194_v29, %v11194_v29 }
 0xc6b   :  { %v2561_v32 = vpop.xlane.xlu0 %2560 }
 0xc6c   :  { %v11202_v21 = vsub.f32 %v11166_v27, %v2568_v19  ;;  %v2569_v50 = vmul.f32 0.0078125, %v2561_v32  ;;  %2594 = vadd.xlane.f32.xlu1 %v2582_v22  ;;  %v2583_v11 = vmul.f32 %v11197_v16, %v11197_v16 }
 0xc6e   :  { %v11207_v44 = vsub.f32 %v11169_v4, %v2569_v50  ;;  %2596 = vadd.xlane.f32.xlu0 %v2583_v11  ;;  %v2584_v23 = vmul.f32 %v11202_v21, %v11202_v21 }
 0xc70   :  { %2598 = vadd.xlane.f32.xlu1 %v2584_v23  ;;  %v2585_v8 = vmul.f32 %v11207_v44, %v11207_v44  ;;  %v7554_v23 = vld [vmem:[#allocation8] ss:$0 sm:$0xff] }
 0xc72   :  { %2600 = vadd.xlane.f32.xlu0 %v2585_v8 }
 0xced   :  { %v2587_v63 = vpop.xlane.xlu1 %2586 }
 0xcee   :  { %v2602_v51 = vmul.f32 0.0078125, %v2587_v63 }
 0xcef   :  { %v2589_v2 = vpop.xlane.xlu0 %2588 }
 0xcf0   :  { %v2610_v0 = vadd.f32 1e-05, %v2602_v51  ;;  %v2603_v14 = vmul.f32 0.0078125, %v2589_v2 }
 0xcf1   :  { %v2591_v60 = vpop.xlane.xlu1 %2590 }
 0xcf2   :  { %9147 = vrsqrt.f32 %v2610_v0  ;;  %v2611_v56 = vadd.f32 1e-05, %v2603_v14  ;;  %v2604_v40 = vmul.f32 0.0078125, %v2591_v60 }
 0xcf4   :  { %9149 = vrsqrt.f32 %v2611_v56  ;;  %v2612_v61 = vadd.f32 1e-05, %v2604_v40 }
 0xcf5   :  { %v2593_v30 = vpop.xlane.xlu0 %2592 }
 0xcf6   :  { %9151 = vrsqrt.f32 %v2612_v61  ;;  %v2605_v35 = vmul.f32 0.0078125, %v2593_v30 }
 0xcf8   :  { %v2613_v19 = vadd.f32 1e-05, %v2605_v35 }
 0xcf9   :  { %v2595_v22 = vpop.xlane.xlu1 %2594 }
 0xcfa   :  { %9153 = vrsqrt.f32 %v2613_v19  ;;  %v2606_v32 = vmul.f32 0.0078125, %v2595_v22 }
 0xcfb   :  { %v2597_v50 = vpop.xlane.xlu0 %2596 }
 0xcfc   :  { %v9148_v11 = vpop.eup %9147  ;;  %v2614_v8 = vadd.f32 1e-05, %v2606_v32  ;;  %v2607_v6 = vmul.f32 0.0078125, %v2597_v50  ;;  %v8851_v50 = vld [vmem:[#allocation14 + $0x40] sm:$0xff]  }
 0xcfd   :  { %v2626_v10 = vmul.f32 %v9148_v11, %v11174_v13  ;;  %v2599_v33 = vpop.xlane.xlu1 %2598  ;;  %v8852_v11 = vld [vmem:[#allocation14 + $0xc0] sm:$0xff]   ;;  %7938 = vmatprep.subr.bf16.mxu1 %v8851_v50 }
 0xcfe   :  { %v9150_v55 = vpop.eup %9149  ;;  %9155 = vrsqrt.f32 %v2614_v8  ;;  %v2615_v49 = vadd.f32 1e-05, %v2607_v6  ;;  %v2608_v48 = vmul.f32 0.0078125, %v2599_v33  ;;  %v8854_v8 = vld [vmem:[#allocation14 + $0x80] sm:$0xff]   ;;  %7978 = vmatprep.subr.bf16.mxu0 %v8852_v11  ;;  %v8856_v6 = vld [vmem:[#allocation14 + $0xc8] sm:$0xff]   ;;  %v8859_v33 = vld [vmem:[#allocation14 + $0x50] sm:$0xff]  }
 0xcff   :  { %v2640_v43 = vmul.f32 %v7554_v23, %v2626_v10  ;;  %v2627_v53 = vmul.f32 %v9150_v55, %v11177_v34  ;;  %v2601_v59 = vpop.xlane.xlu0 %2600  ;;  %v8858_v10 = vld [vmem:[#allocation14 + $0x88] sm:$0xff]   ;;  %v8860_v55 = vld [vmem:[#allocation14 + $0xd0] sm:$0xff]  }
 0xd00   :  { %v9152_v46 = vpop.eup %9151  ;;  %9157 = vrsqrt.f32 %v2615_v49  ;;  %v2609_v15 = vmul.f32 0.0078125, %v2601_v59  ;;  %v2616_v7 = vadd.f32 1e-05, %v2608_v48  ;;  %v8861_v49 = vld [vmem:[#allocation14 + $0x10] sm:$0xff]   ;;  %v8865_v59 = vld [vmem:[#allocation14 + $0x18] sm:$0xff]  }
 0xd01   :  { %v2641_v9 = vmul.f32 %v7554_v23, %v2627_v53  ;;  %v2654_v17 = vadd.f32 %v7555_v39, %v2640_v43  ;;  %v2628_v13 = vmul.f32 %v9152_v46, %v11182_v12  ;;  %v8862_v48 = vld [vmem:[#allocation14 + $0x90] sm:$0xff]   ;;  %v8863_v43 = vld [vmem:[#allocation14 + $0x58] sm:$0xff]  }
 0xd02   :  { %v2617_v58 = vadd.f32 1e-05, %v2609_v15  ;;  %v8864_v53 = vld [vmem:[#allocation14 + $0xd8] sm:$0xff]   ;;  %v8867_v15 = vld [vmem:[#allocation14 + $0x60] sm:$0xff]  }
 0xd03   :  { %v2655_v18 = vadd.f32 %v7555_v39, %v2641_v9  ;;  %v2642_v34 = vmul.f32 %v7554_v23, %v2628_v13  ;;  %v8866_v46 = vld [vmem:[#allocation14 + $0x98] sm:$0xff]   ;;  %v8869_v9 = vld [vmem:[#allocation14 + $0x20] sm:$0xff]   ;;  %v8874_v13 = vld [vmem:[#allocation14 + $0xa8] sm:$0xff]  }
 0xd04   :  { %v9154_v54 = vpop.eup %9153  ;;  %9159 = vrsqrt.f32 %v2617_v58  ;;  %v8871_v58 = vld [vmem:[#allocation14 + $0x68] sm:$0xff]  }
 0xd05   :  { %v2662_v26 = vpack.c.bf16 %v2655_v18, %v2654_v17  ;;  %v2629_v31 = vmul.f32 %v9154_v54, %v11189_v5  ;;  %9161 = vrsqrt.f32 %v2616_v7  ;;  %v2656_v63 = vadd.f32 %v7555_v39, %v2642_v34  ;;  %v8870_v7 = vld [vmem:[#allocation14 + $0xa0] sm:$0xff]   ;;  %v8872_v17 = vld [vmem:[#allocation14 + $0xe8] sm:$0xff]   ;;  %v8875_v54 = vld [vmem:[#allocation14 + $0x70] sm:$0xff]  }
 0xd06   :  { %v8873_v18 = vld [vmem:[#allocation14 + $0x28] sm:$0xff]   ;;  %v8878_v34 = vld [vmem:[#allocation14 + $0xb0] sm:$0xff]  }
 0xd07   :  { %2913 = vmatmul.mubr.bf16.vlgmr.msra.gmra.mrb[40].mxu1 %v2662_v26  ;;  %2986 = vmatmul.mubr.bf16.vlgmr.msra.gmra.mrb[72].mxu0 %v2662_v26  ;;  %v2643_v20 = vmul.f32 %v7554_v23, %v2629_v31  ;;  %v8876_v26 = vld [vmem:[#allocation14 + $0xf0] sm:$0xff]  }
 0xd08   :  { %v9156_v42 = vpop.eup %9155  ;;  %2922 = vmatprep.mubr.bf16.mxu1 %v13442_v57  ;;  %2995 = vmatprep.mubr.bf16.mxu0 %v13442_v57  ;;  %v8877_v31 = vld [vmem:[#allocation14 + $0x30] sm:$0xff]  }
 0xd09   :  { %v2657_v37 = vadd.f32 %v7555_v39, %v2643_v20  ;;  %v2630_v12 = vmul.f32 %v9156_v42, %v11194_v29  ;;  %7979 = vmatpush3.bf16.msra.mxu0 %v8854_v8  ;;  %v8879_v20 = vld [vmem:[#allocation14 + $0x78] sm:$0xff]  }
 0xd0a   :  { %v9158_v24 = vpop.eup %9157  ;;  %7980 = vmatprep.subr.bf16.mxu0 %v8856_v6  ;;  %v8880_v42 = vld [vmem:[#allocation14 + $0xf8] sm:$0xff]  }
 0xd0b   :  { %v2631_v51 = vmul.f32 %v9158_v24, %v11197_v16  ;;  %v2663_v2 = vpack.c.bf16 %v2657_v37, %v2656_v63  ;;  %v2644_v14 = vmul.f32 %v7554_v23, %v2630_v12  ;;  %v8881_v37 = vld [vmem:[#allocation14 + $0x38] sm:$0xff]   ;;  %v13357_v12 = vsub.s32 3, %v10301_v41 }
 0xd0c   :  { %v8882_v24 = vld [vmem:[#allocation14 + $0xb8] sm:$0xff]  }
 0xd0d   :  { %v2645_v0 = vmul.f32 %v7554_v23, %v2631_v51  ;;  %v2658_v61 = vadd.f32 %v7555_v39, %v2644_v14  ;;  %7981 = vmatpush3.bf16.msra.mxu0 %v8858_v10  ;;  %v2698_v63 = vld [vmem:[#allocation13] sm:$0xf]  ;;  %v13455_v51 = vld [vmem:[#allocation33_spill] sm:$0xff]  ;;  %v13457_v14 = vld [vmem:[#allocation34_spill] sm:$0xff] }
 0xd0e   :  { %v9160_v5 = vpop.eup %9159  ;;  %7982 = vmatprep.subr.bf16.mxu0 %v8860_v55 }
 0xd0f   :  { %2923 = vmatmul.mubr.bf16.gmra.mrb[44].mxu1 %v2663_v2  ;;  %2996 = vmatmul.mubr.bf16.gmra.mrb[76].mxu0 %v2663_v2  ;;  %v9162_v60 = vpop.eup %9161  ;;  %v2659_v56 = vadd.f32 %v7555_v39, %v2645_v0  ;;  %v2633_v40 = vmul.f32 %v9160_v5, %v11207_v44  ;;  %v8853_v44 = vld [vmem:[#allocation14] sm:$0xff]   ;;  %v11229_v2 = vrot.slane %v2698_v63, %v13455_v51  ;;  %v13456_v0 = vld [vmem:[#allocation35_spill] sm:$0xff] }
 0xd10   :  { %2932 = vmatprep.mubr.bf16.mxu1 %v13442_v57  ;;  %3005 = vmatprep.mubr.bf16.mxu0 %v13442_v57  ;;  %v2632_v30 = vmul.f32 %v9162_v60, %v11202_v21  ;;  %v8855_v21 = vld [vmem:[#allocation14 + $0x48] sm:$0xff]   ;;  %v11232_v5 = vrot.slane %v2698_v63, %v13456_v0  ;;  %v11235_v60 = vrot.slane %v2698_v63, %v13457_v14 }
 0xd11   :  { %v2664_v29 = vpack.c.bf16 %v2659_v56, %v2658_v61  ;;  %v2647_v35 = vmul.f32 %v7554_v23, %v2633_v40  ;;  %7939 = vmatpush3.bf16.msra.mxu1 %v8853_v44  ;;  %7983 = vmatpush3.bf16.msra.mxu0 %v8862_v48  ;;  %v11239_v56 = vrot.slane %v2698_v63, %v13357_v12 }
 0xd12   :  { %v2646_v16 = vmul.f32 %v7554_v23, %v2632_v30  ;;  %7940 = vmatprep.subr.bf16.mxu1 %v8855_v21  ;;  %v8857_v23 = vld [vmem:[#allocation14 + $0x8] sm:$0xff]   ;;  %7984 = vmatprep.subr.bf16.mxu0 %v8864_v53 }
 0xd13   :  { %v2661_v19 = vadd.f32 %v7555_v39, %v2647_v35 }
 0xd14   :  { %v2660_v22 = vadd.f32 %v7555_v39, %v2646_v16  ;;  %v8868_v39 = vld [vmem:[#allocation14 + $0xe0] sm:$0xff]  }
 0xd15   :  { %7941 = vmatpush3.bf16.msra.mxu1 %v8857_v23  ;;  %7985 = vmatpush3.bf16.msra.mxu0 %v8866_v46 }
 0xd16   :  { %v2665_v32 = vpack.c.bf16 %v2661_v19, %v2660_v22  ;;  %7942 = vmatprep.subr.bf16.mxu1 %v8859_v33  ;;  %7986 = vmatprep.subr.bf16.mxu0 %v8868_v39 }
 0xd17   :  { %2933 = vmatmul.mubr.bf16.gmra.mrb[48].mxu1 %v2664_v29  ;;  %3006 = vmatmul.mubr.bf16.gmra.mrb[80].mxu0 %v2664_v29 }
 0xd18   :  { %2942 = vmatprep.mubr.bf16.mxu1 %v13442_v57  ;;  %3015 = vmatprep.mubr.bf16.mxu0 %v13442_v57 }
 0xd19   :  { %7943 = vmatpush3.bf16.msra.mxu1 %v8861_v49  ;;  %7987 = vmatpush3.bf16.msra.mxu0 %v8870_v7 }
 0xd1a   :  { %7944 = vmatprep.subr.bf16.mxu1 %v8863_v43  ;;  %7988 = vmatprep.subr.bf16.mxu0 %v8872_v17 }
 0xd1d   :  { %7945 = vmatpush3.bf16.msra.mxu1 %v8865_v59  ;;  %7989 = vmatpush3.bf16.msra.mxu0 %v8874_v13 }
 0xd1e   :  { %7946 = vmatprep.subr.bf16.mxu1 %v8867_v15  ;;  %7990 = vmatprep.subr.bf16.mxu0 %v8876_v26 }
 0xd1f   :  { %2943 = vmatmul.mubr.bf16.gmra.mrb[52].mxu1 %v2665_v32  ;;  %3016 = vmatmul.mubr.bf16.gmra.mrb[84].mxu0 %v2665_v32 }
 0xd21   :  { %7947 = vmatpush3.bf16.msra.mxu1 %v8869_v9  ;;  %7991 = vmatpush3.bf16.msra.mxu0 %v8878_v34 }
 0xd22   :  { %7948 = vmatprep.subr.bf16.mxu1 %v8871_v58  ;;  %7992 = vmatprep.subr.bf16.mxu0 %v8880_v42 }
 0xd25   :  { %7949 = vmatpush3.bf16.msra.mxu1 %v8873_v18  ;;  %7993 = vmatpush3.bf16.msra.mxu0 %v8882_v24 }
 0xd26   :  { %7950 = vmatprep.subr.bf16.mxu1 %v8875_v54 }
 0xd29   :  { %7951 = vmatpush3.bf16.msra.mxu1 %v8877_v31 }
 0xd2a   :  { %7952 = vmatprep.subr.bf16.mxu1 %v8879_v20 }
 0xd2d   :  { %7953 = vmatpush3.bf16.msra.mxu1 %v8881_v37 }
 0xdda   :  { %v2914_v40 = vpop.f32.mrb[40].mxu1  ;;  %v2987_v61 = vpop.f32.mrb[72].mxu0 }
 0xddb   :  { %v11242_v30 = vadd.f32 %v2914_v40, %v11229_v2  ;;  %v11245_v29 = vadd.f32 %v2987_v61, %v11232_v5  ;;  %v2916_v35 = vpop.f32.mrb[41].mxu1  ;;  %v2989_v16 = vpop.f32.mrb[73].mxu0 }
 0xddc   :  { %v11248_v19 = vadd.f32 %v2916_v35, %v11235_v60  ;;  %v11251_v22 = vadd.f32 %v2989_v16, %v11239_v56  ;;  %v2918_v32 = vpop.f32.mrb[42].mxu1  ;;  %v2991_v50 = vpop.f32.mrb[74].mxu0 }
 0xddd   :  { %v3026_v11 = vmul.f32 %v11242_v30, %v11242_v30  ;;  %v3028_v44 = vmul.f32 %v11245_v29, %v11245_v29  ;;  %v11258_v8 = vadd.f32 %v2918_v32, %v11229_v2  ;;  %v11261_v21 = vadd.f32 %v2991_v50, %v11232_v5  ;;  %v2920_v6 = vpop.f32.mrb[43].mxu1  ;;  %v2993_v23 = vpop.f32.mrb[75].mxu0 }
 0xdde   :  { %v3027_v10 = vmul.f32 %v11248_v19, %v11248_v19  ;;  %v3029_v33 = vmul.f32 %v11251_v22, %v11251_v22  ;;  %v11268_v55 = vadd.f32 %v2920_v6, %v11235_v60  ;;  %v11271_v49 = vadd.f32 %v2993_v23, %v11239_v56 }
 0xddf   :  { %v3058_v48 = vmul.f32 %v3026_v11, %v11242_v30  ;;  %v3060_v43 = vmul.f32 %v3028_v44, %v11245_v29  ;;  %v3030_v53 = vmul.f32 %v11258_v8, %v11258_v8  ;;  %v3032_v59 = vmul.f32 %v11261_v21, %v11261_v21 }
 0xde0   :  { %v3059_v46 = vmul.f32 %v3027_v10, %v11248_v19  ;;  %v3061_v15 = vmul.f32 %v3029_v33, %v11251_v22  ;;  %v3031_v39 = vmul.f32 %v11268_v55, %v11268_v55  ;;  %v3033_v9 = vmul.f32 %v11271_v49, %v11271_v49 }
 0xde1   :  { %v3090_v7 = vmul.f32 0.044715, %v3058_v48  ;;  %v3092_v58 = vmul.f32 0.044715, %v3060_v43  ;;  %v3062_v17 = vmul.f32 %v3030_v53, %v11258_v8  ;;  %v3064_v18 = vmul.f32 %v3032_v59, %v11261_v21 }
 0xde2   :  { %v3091_v13 = vmul.f32 0.044715, %v3059_v46  ;;  %v3093_v54 = vmul.f32 0.044715, %v3061_v15  ;;  %v3063_v26 = vmul.f32 %v3031_v39, %v11268_v55  ;;  %v3065_v31 = vmul.f32 %v3033_v9, %v11271_v49  ;;  %v2924_v34 = vpop.f32.mrb[44].mxu1  ;;  %v2997_v20 = vpop.f32.mrb[76].mxu0 }
 0xde3   :  { %v3122_v42 = vadd.f32 %v3090_v7, %v11242_v30  ;;  %v3124_v37 = vadd.f32 %v3092_v58, %v11245_v29  ;;  %v3094_v24 = vmul.f32 0.044715, %v3062_v17  ;;  %v3096_v63 = vmul.f32 0.044715, %v3064_v18  ;;  %v2926_v40 = vpop.f32.mrb[45].mxu1  ;;  %v2999_v61 = vpop.f32.mrb[77].mxu0 }
 0xde4   :  { %v3123_v35 = vadd.f32 %v3091_v13, %v11248_v19  ;;  %v3125_v16 = vadd.f32 %v3093_v54, %v11251_v22  ;;  %v3095_v32 = vmul.f32 0.044715, %v3063_v26  ;;  %v3097_v50 = vmul.f32 0.044715, %v3065_v31  ;;  %v2928_v11 = vpop.f32.mrb[46].mxu1  ;;  %v3001_v44 = vpop.f32.mrb[78].mxu0 }
 0xde5   :  { %v3154_v6 = vmul.f32 0.7978846, %v3122_v42  ;;  %v3156_v23 = vmul.f32 0.7978846, %v3124_v37  ;;  %v3126_v10 = vadd.f32 %v3094_v24, %v11258_v8  ;;  %v3128_v33 = vadd.f32 %v3096_v63, %v11261_v21  ;;  %v2930_v48 = vpop.f32.mrb[47].mxu1  ;;  %v3003_v43 = vpop.f32.mrb[79].mxu0 }
 0xde6   :  { %v3155_v53 = vmul.f32 0.7978846, %v3123_v35  ;;  %v3157_v59 = vmul.f32 0.7978846, %v3125_v16  ;;  %v3127_v46 = vadd.f32 %v3095_v32, %v11268_v55  ;;  %v3129_v15 = vadd.f32 %v3097_v50, %v11271_v49 }
 0xde7   :  { %9163 = vtanh.f32 %v3154_v6  ;;  %v3158_v39 = vmul.f32 0.7978846, %v3126_v10  ;;  %v3160_v9 = vmul.f32 0.7978846, %v3128_v33  ;;  %v11298_v7 = vadd.f32 %v2924_v34, %v11229_v2 }
 0xde8   :  { %9165 = vtanh.f32 %v3156_v23  ;;  %v3159_v58 = vmul.f32 0.7978846, %v3127_v46  ;;  %v3161_v17 = vmul.f32 0.7978846, %v3129_v15  ;;  %v11301_v18 = vadd.f32 %v2997_v20, %v11232_v5 }
 0xde9   :  { %9167 = vtanh.f32 %v3155_v53  ;;  %v3034_v13 = vmul.f32 %v11298_v7, %v11298_v7  ;;  %v11306_v54 = vadd.f32 %v2926_v40, %v11235_v60  ;;  %v11309_v26 = vadd.f32 %v2999_v61, %v11239_v56 }
 0xdea   :  { %9169 = vtanh.f32 %v3157_v59  ;;  %v3036_v31 = vmul.f32 %v11301_v18, %v11301_v18  ;;  %v11314_v34 = vadd.f32 %v2928_v11, %v11229_v2  ;;  %v11317_v20 = vadd.f32 %v3001_v44, %v11232_v5  ;;  %v11319_v42 = vpop.f32.mrb[48].mxu1  ;;  %v11321_v37 = vpop.f32.mrb[80].mxu0 }
 0xdeb   :  { %9171 = vtanh.f32 %v3158_v39  ;;  %v3066_v24 = vmul.f32 %v3034_v13, %v11298_v7  ;;  %v3035_v63 = vmul.f32 %v11306_v54, %v11306_v54  ;;  %v3037_v40 = vmul.f32 %v11309_v26, %v11309_v26  ;;  %v11328_v61 = vpop.f32.mrb[49].mxu1  ;;  %v11330_v35 = vpop.f32.mrb[81].mxu0 }
 0xdec   :  { %9173 = vtanh.f32 %v3160_v9  ;;  %v3068_v16 = vmul.f32 %v3036_v31, %v11301_v18  ;;  %v3038_v32 = vmul.f32 %v11314_v34, %v11314_v34  ;;  %v3040_v50 = vmul.f32 %v11317_v20, %v11317_v20  ;;  %v11337_v11 = vpop.f32.mrb[50].mxu1  ;;  %v11339_v44 = vpop.f32.mrb[82].mxu0 }
 0xded   :  { %9175 = vtanh.f32 %v3159_v58  ;;  %v3098_v6 = vmul.f32 0.044715, %v3066_v24  ;;  %v3067_v23 = vmul.f32 %v3035_v63, %v11306_v54  ;;  %v3069_v10 = vmul.f32 %v3037_v40, %v11309_v26  ;;  %v11343_v33 = vpop.f32.mrb[51].mxu1  ;;  %v11345_v53 = vpop.f32.mrb[83].mxu0 }
 0xdee   :  { %9177 = vtanh.f32 %v3161_v17  ;;  %v3100_v59 = vmul.f32 0.044715, %v3068_v16  ;;  %v3070_v46 = vmul.f32 %v3038_v32, %v11314_v34  ;;  %v3072_v15 = vmul.f32 %v3040_v50, %v11317_v20 }
 0xdef   :  { %v3130_v39 = vadd.f32 %v3098_v6, %v11298_v7  ;;  %v3099_v9 = vmul.f32 0.044715, %v3067_v23  ;;  %v3101_v13 = vmul.f32 0.044715, %v3069_v10  ;;  %v11351_v58 = vadd.f32 %v2930_v48, %v11235_v60 }
 0xdf0   :  { %v3132_v31 = vadd.f32 %v3100_v59, %v11301_v18  ;;  %v3102_v24 = vmul.f32 0.044715, %v3070_v46  ;;  %v3104_v63 = vmul.f32 0.044715, %v3072_v15  ;;  %v11355_v40 = vadd.f32 %v3003_v43, %v11239_v56 }
 0xdf1   :  { %v9164_v17 = vpop.eup %9163  ;;  %v3162_v16 = vmul.f32 0.7978846, %v3130_v39  ;;  %v3131_v32 = vadd.f32 %v3099_v9, %v11306_v54  ;;  %v3133_v50 = vadd.f32 %v3101_v13, %v11309_v26  ;;  %v3039_v6 = vmul.f32 %v11351_v58, %v11351_v58 }
 0xdf2   :  { %v9166_v23 = vpop.eup %9165  ;;  %v3218_v10 = vadd.f32 1.0, %v9164_v17  ;;  %v3164_v48 = vmul.f32 0.7978846, %v3132_v31  ;;  %v3134_v12 = vadd.f32 %v3102_v24, %v11314_v34  ;;  %v3136_v59 = vadd.f32 %v3104_v63, %v11317_v20  ;;  %v11363_v46 = vpop.f32.mrb[52].mxu1 }
 0xdf3   :  { %v11365_v43 = vpop.f32.mrb[84].mxu0  ;;  %v11367_v15 = vpop.eup %9167  ;;  %v3220_v39 = vadd.f32 1.0, %v9166_v23  ;;  %9179 = vtanh.f32 %v3162_v16  ;;  %v3163_v9 = vmul.f32 0.7978846, %v3131_v32  ;;  %v3165_v13 = vmul.f32 0.7978846, %v3133_v50 }
 0xdf4   :  { %v11369_v41 = vpop.f32.mrb[53].mxu1  ;;  %v11371_v47 = vpop.eup %9169  ;;  %v3250_v17 = vmul.f32 0.5, %v3218_v10  ;;  %9181 = vtanh.f32 %v3164_v48  ;;  %v3166_v31 = vmul.f32 0.7978846, %v3134_v12  ;;  %v3168_v24 = vmul.f32 0.7978846, %v3136_v59 }
 0xdf5   :  { %v11373_v28 = vpop.f32.mrb[85].mxu0  ;;  %v9172_v63 = vpop.eup %9171  ;;  %v3252_v25 = vmul.f32 0.5, %v3220_v39  ;;  %9183 = vtanh.f32 %v3163_v9  ;;  %v3071_v38 = vmul.f32 %v3039_v6, %v11351_v58  ;;  %v3041_v16 = vmul.f32 %v11355_v40, %v11355_v40 }
 0xdf6   :  { %v11378_v32 = vpop.f32.mrb[54].mxu1  ;;  %v11380_v50 = vpop.f32.mrb[86].mxu0  ;;  %v11383_v10 = vmul.f32 %v3250_v17, %v11242_v30  ;;  %v3222_v12 = vadd.f32 1.0, %v9172_v63  ;;  %9185 = vtanh.f32 %v3165_v13  ;;  %v11387_v48 = vadd.f32 %v11319_v42, %v11229_v2 }
 0xdf7   :  { %v9174_v23 = vpop.eup %9173  ;;  %v11389_v59 = vpop.f32.mrb[55].mxu1  ;;  %v11396_v9 = vmul.f32 %v3252_v25, %v11245_v29  ;;  %9187 = vtanh.f32 %v3166_v31  ;;  %v3103_v14 = vmul.f32 0.044715, %v3071_v38  ;;  %v3073_v13 = vmul.f32 %v3041_v16, %v11355_v40 }
 0xdf8   :  { %v11391_v6 = vpop.f32.mrb[87].mxu0  ;;  %v11393_v39 = vpop.eup %9175  ;;  %v3224_v0 = vadd.f32 1.0, %v9174_v23  ;;  %v3254_v17 = vmul.f32 0.5, %v3222_v12  ;;  %9189 = vtanh.f32 %v3168_v24  ;;  %v3042_v42 = vmul.f32 %v11387_v48, %v11387_v48 }
 0xdf9   :  { %v11398_v30 = vpop.eup %9177  ;;  %v3135_v51 = vadd.f32 %v3103_v14, %v11351_v58  ;;  %v11406_v4 = vadd.f32 %v11321_v37, %v11232_v5  ;;  %v11410_v25 = vadd.f32 %v11328_v61, %v11235_v60  ;;  %v3105_v29 = vmul.f32 0.044715, %v3073_v13 }
 0xdfa   :  { %v3256_v63 = vmul.f32 0.5, %v3224_v0  ;;  %v11413_v38 = vmul.f32 %v3254_v17, %v11258_v8  ;;  %v3074_v31 = vmul.f32 %v3042_v42, %v11387_v48  ;;  %v11418_v24 = vadd.f32 %v11330_v35, %v11239_v56 }
 0xdfb   :  { %v3167_v14 = vmul.f32 0.7978846, %v3135_v51  ;;  %v3044_v37 = vmul.f32 %v11406_v4, %v11406_v4  ;;  %v3043_v61 = vmul.f32 %v11410_v25, %v11410_v25  ;;  %v3137_v16 = vadd.f32 %v3105_v29, %v11355_v40 }
 0xdfc   :  { %v11421_v0 = vmul.f32 %v3256_v63, %v11261_v21  ;;  %v3106_v23 = vmul.f32 0.044715, %v3074_v31  ;;  %v3045_v35 = vmul.f32 %v11418_v24, %v11418_v24  ;;  %v11444_v31 = vadd.f32 %v11337_v11, %v11229_v2 }
 0xdfd   :  { %v11432_v12 = vpop.eup %9179  ;;  %9191 = vtanh.f32 %v3167_v14  ;;  %v3076_v21 = vmul.f32 %v3044_v37, %v11406_v4  ;;  %v3075_v17 = vmul.f32 %v3043_v61, %v11410_v25  ;;  %v3169_v42 = vmul.f32 0.7978846, %v3137_v16 }
 0xdfe   :  { %v11438_v13 = vpop.eup %9181  ;;  %v3138_v63 = vadd.f32 %v3106_v23, %v11387_v48  ;;  %v3077_v29 = vmul.f32 %v3045_v35, %v11418_v24  ;;  %v11450_v14 = vadd.f32 %v11339_v44, %v11232_v5  ;;  %v11454_v37 = vadd.f32 %v11343_v33, %v11235_v60 }
 0xdff   :  { %v11446_v8 = vpop.eup %9183  ;;  %v3108_v27 = vmul.f32 0.044715, %v3076_v21  ;;  %v3107_v51 = vmul.f32 0.044715, %v3075_v17  ;;  %9193 = vtanh.f32 %v3169_v42  ;;  %v3046_v11 = vmul.f32 %v11444_v31, %v11444_v31 }
 0xe00   :  { %v11456_v61 = vpop.eup %9185  ;;  %v3170_v16 = vmul.f32 0.7978846, %v3138_v63  ;;  %v3109_v23 = vmul.f32 0.044715, %v3077_v29  ;;  %v3048_v44 = vmul.f32 %v11450_v14, %v11450_v14  ;;  %v3047_v33 = vmul.f32 %v11454_v37, %v11454_v37 }
 0xe01   :  { %v11460_v35 = vpop.eup %9187  ;;  %v3140_v21 = vadd.f32 %v3108_v27, %v11406_v4  ;;  %v3139_v17 = vadd.f32 %v3107_v51, %v11410_v25  ;;  %v3078_v63 = vmul.f32 %v3046_v11, %v11444_v31  ;;  %v11474_v29 = vadd.f32 %v11345_v53, %v11239_v56 }
 0xe02   :  { %v11468_v1 = vpop.eup %9189  ;;  %9195 = vtanh.f32 %v3170_v16  ;;  %v3141_v42 = vadd.f32 %v3109_v23, %v11418_v24  ;;  %v3080_v51 = vmul.f32 %v3048_v44, %v11450_v14  ;;  %v3079_v45 = vmul.f32 %v3047_v33, %v11454_v37 }
 0xe03   :  { %v3172_v27 = vmul.f32 0.7978846, %v3140_v21  ;;  %v3171_v62 = vmul.f32 0.7978846, %v3139_v17  ;;  %v3110_v36 = vmul.f32 0.044715, %v3078_v63  ;;  %v3049_v52 = vmul.f32 %v11474_v29, %v11474_v29 }
 0xe04   :  { %v3173_v3 = vmul.f32 0.7978846, %v3141_v42  ;;  %v11482_v16 = vadd.f32 %v11363_v46, %v11229_v2  ;;  %v3112_v23 = vmul.f32 0.044715, %v3080_v51  ;;  %v3111_v11 = vmul.f32 0.044715, %v3079_v45 }
 0xe05   :  { %9197 = vtanh.f32 %v3172_v27  ;;  %v11486_v53 = vadd.f32 %v11365_v43, %v11232_v5  ;;  %v3142_v21 = vadd.f32 %v3110_v36, %v11444_v31  ;;  %v3081_v17 = vmul.f32 %v3049_v52, %v11474_v29 }
 0xe06   :  { %13458 = vst [vmem:[#allocation52_spill] sm:$0xff] %v11482_v16  ;;  %9199 = vtanh.f32 %v3171_v62  ;;  %v3050_v44 = vmul.f32 %v11482_v16, %v11482_v16  ;;  %v3144_v46 = vadd.f32 %v3112_v23, %v11450_v14  ;;  %v3143_v42 = vadd.f32 %v3111_v11, %v11454_v37 }
 0xe07   :  { %13459 = vst [vmem:[#allocation53_spill] sm:$0xff] %v11486_v53  ;;  %v11492_v33 = vpop.eup %9191  ;;  %9201 = vtanh.f32 %v3173_v3  ;;  %v3052_v45 = vmul.f32 %v11486_v53, %v11486_v53  ;;  %v3174_v43 = vmul.f32 0.7978846, %v3142_v21  ;;  %v3113_v63 = vmul.f32 0.044715, %v3081_v17 }
 0xe08   :  { %v3082_v62 = vmul.f32 %v3050_v44, %v11482_v16  ;;  %v11501_v52 = vadd.f32 %v11369_v41, %v11235_v60  ;;  %v3176_v36 = vmul.f32 0.7978846, %v3144_v46  ;;  %v3175_v27 = vmul.f32 0.7978846, %v3143_v42 }
 0xe09   :  { %v3084_v51 = vmul.f32 %v3052_v45, %v11486_v53  ;;  %v11506_v3 = vadd.f32 %v11373_v28, %v11239_v56  ;;  %v11508_v23 = vpop.eup %9193  ;;  %9203 = vtanh.f32 %v3174_v43  ;;  %v3145_v11 = vadd.f32 %v3113_v63, %v11474_v29 }
 0xe0a   :  { %v3114_v21 = vmul.f32 0.044715, %v3082_v62  ;;  %v3051_v17 = vmul.f32 %v11501_v52, %v11501_v52  ;;  %9205 = vtanh.f32 %v3176_v36  ;;  %v11517_v46 = vadd.f32 %v11378_v32, %v11229_v2 }
 0xe0b   :  { %v3116_v41 = vmul.f32 0.044715, %v3084_v51  ;;  %v3053_v44 = vmul.f32 %v11506_v3, %v11506_v3  ;;  %9207 = vtanh.f32 %v3175_v27  ;;  %v3177_v42 = vmul.f32 0.7978846, %v3145_v11 }
 0xe0c   :  { %13460 = vst [vmem:[#allocation54_spill] sm:$0xff] %v11517_v46  ;;  %v11519_v28 = vpop.eup %9195  ;;  %v3146_v45 = vadd.f32 %v3114_v21, %v11482_v16  ;;  %v3083_v43 = vmul.f32 %v3051_v17, %v11501_v52  ;;  %v3054_v36 = vmul.f32 %v11517_v46, %v11517_v46  ;;  %v11529_v51 = vadd.f32 %v11380_v50, %v11232_v5 }
 0xe0d   :  { %v3148_v63 = vadd.f32 %v3116_v41, %v11486_v53  ;;  %v3085_v62 = vmul.f32 %v3053_v44, %v11506_v3  ;;  %9209 = vtanh.f32 %v3177_v42  ;;  %v11533_v27 = vadd.f32 %v11389_v59, %v11235_v60 }
 0xe0e   :  { %v3178_v2 = vmul.f32 0.7978846, %v3146_v45  ;;  %v3115_v32 = vmul.f32 0.044715, %v3083_v43  ;;  %v3086_v41 = vmul.f32 %v3054_v36, %v11517_v46  ;;  %v3056_v44 = vmul.f32 %v11529_v51, %v11529_v51 }
 0xe0f   :  { %v11535_v11 = vpop.eup %9197  ;;  %v3180_v21 = vmul.f32 0.7978846, %v3148_v63  ;;  %v3117_v17 = vmul.f32 0.044715, %v3085_v62  ;;  %v3055_v50 = vmul.f32 %v11533_v27, %v11533_v27  ;;  %v11547_v60 = vadd.f32 %v11391_v6, %v11239_v56 }
 0xe10   :  { %v11540_v57 = vpop.eup %9199  ;;  %9211 = vtanh.f32 %v3178_v2  ;;  %v3147_v5 = vadd.f32 %v3115_v32, %v11501_v52  ;;  %v3118_v45 = vmul.f32 0.044715, %v3086_v41  ;;  %v3088_v43 = vmul.f32 %v3056_v44, %v11529_v51 }
 0xe11   :  { %v11549_v59 = vpop.eup %9201  ;;  %9213 = vtanh.f32 %v3180_v21  ;;  %v3149_v42 = vadd.f32 %v3117_v17, %v11506_v3  ;;  %v3087_v62 = vmul.f32 %v3055_v50, %v11533_v27  ;;  %v3057_v36 = vmul.f32 %v11547_v60, %v11547_v60 }
 0xe12   :  { %v3179_v63 = vmul.f32 0.7978846, %v3147_v5  ;;  %v3219_v2 = vadd.f32 1.0, %v11367_v15  ;;  %v3150_v56 = vadd.f32 %v3118_v45, %v11517_v46  ;;  %v3120_v6 = vmul.f32 0.044715, %v3088_v43 }
 0xe13   :  { %v3181_v32 = vmul.f32 0.7978846, %v3149_v42  ;;  %v3223_v53 = vadd.f32 1.0, %v11393_v39  ;;  %v11559_v21 = vpop.eup %9203  ;;  %v3119_v17 = vmul.f32 0.044715, %v3087_v62  ;;  %v3089_v41 = vmul.f32 %v3057_v36, %v11547_v60 }
 0xe14   :  { %9215 = vtanh.f32 %v3179_v63  ;;  %v3251_v44 = vmul.f32 0.5, %v3219_v2  ;;  %v11562_v5 = vpop.eup %9205  ;;  %v3182_v50 = vmul.f32 0.7978846, %v3150_v56  ;;  %v3152_v16 = vadd.f32 %v3120_v6, %v11529_v51 }
 0xe15   :  { %9217 = vtanh.f32 %v3181_v32  ;;  %v3255_v15 = vmul.f32 0.5, %v3223_v53  ;;  %v9208_v42 = vpop.eup %9207  ;;  %v3151_v45 = vadd.f32 %v3119_v17, %v11533_v27  ;;  %v3121_v43 = vmul.f32 0.044715, %v3089_v41 }
 0xe16   :  { %v3283_v39 = vmul.f32 %v3251_v44, %v11248_v19  ;;  %v3221_v46 = vadd.f32 1.0, %v11371_v47  ;;  %9219 = vtanh.f32 %v3182_v50  ;;  %v3184_v63 = vmul.f32 0.7978846, %v3152_v16 }
 0xe17   :  { %v3287_v62 = vmul.f32 %v3255_v15, %v11268_v55  ;;  %v3225_v36 = vadd.f32 1.0, %v11398_v30  ;;  %v9210_v2 = vpop.eup %9209  ;;  %v3183_v32 = vmul.f32 0.7978846, %v3151_v45  ;;  %v3153_v56 = vadd.f32 %v3121_v43, %v11547_v60 }
 0xe18   :  { %v3253_v6 = vmul.f32 0.5, %v3221_v46  ;;  %v3227_v53 = vadd.f32 1.0, %v11446_v8  ;;  %9221 = vtanh.f32 %v3184_v63  ;;  %v3231_v19 = vadd.f32 1.0, %v11492_v33 }
 0xe19   :  { %v3315_v17 = vpack.c.bf16 %v3287_v62, %v3283_v39  ;;  %v3257_v41 = vmul.f32 0.5, %v3225_v36  ;;  %9223 = vtanh.f32 %v3183_v32  ;;  %v3185_v47 = vmul.f32 0.7978846, %v3153_v56 }
 0xe1a   :  { %v11573_v44 = vpop.eup %9211  ;;  %v3285_v55 = vmul.f32 %v3253_v6, %v11251_v22  ;;  %v3259_v16 = vmul.f32 0.5, %v3227_v53  ;;  %v3263_v46 = vmul.f32 0.5, %v3231_v19  ;;  %v3229_v8 = vadd.f32 1.0, %v11456_v61 }
 0xe1b   :  { %v11576_v30 = vpop.eup %9213  ;;  %3618 = vmatprep.mubr.bf16.mxu1 %v3315_v17  ;;  %v3289_v50 = vmul.f32 %v3257_v41, %v11271_v49  ;;  %v3233_v15 = vadd.f32 1.0, %v11508_v23  ;;  %9225 = vtanh.f32 %v3185_v47  ;;  %v13461_v33 = vpack.c.bf16 %v11413_v38, %v11383_v10 }
 0xe1c   :  { %v3291_v45 = vmul.f32 %v3259_v16, %v11306_v54  ;;  %v3226_v22 = vadd.f32 1.0, %v11432_v12  ;;  %v3230_v43 = vadd.f32 1.0, %v11460_v35  ;;  %v3295_v63 = vmul.f32 %v3263_v46, %v11351_v58 }
 0xe1d   :  { %3619 = vmatmul.mubr.bf16.vlgmr.msra.gmra.mrb[56].mxu1 %v13461_v33  ;;  %v3317_v39 = vpack.c.bf16 %v3289_v50, %v3285_v55  ;;  %v3261_v49 = vmul.f32 0.5, %v3229_v8  ;;  %v3265_v62 = vmul.f32 0.5, %v3233_v15  ;;  %v3228_v23 = vadd.f32 1.0, %v11438_v13 }
 0xe1e   :  { %v9216_v36 = vpop.eup %9215  ;;  %v3258_v61 = vmul.f32 0.5, %v3226_v22  ;;  %v3262_v32 = vmul.f32 0.5, %v3230_v43  ;;  %v3232_v56 = vadd.f32 1.0, %v11468_v1  ;;  %v3319_v38 = vpack.c.bf16 %v3295_v63, %v3291_v45 }
 0xe1f   :  { %v9218_v10 = vpop.eup %9217  ;;  %3683 = vmatprep.mubr.bf16.mxu0 %v3317_v39  ;;  %v3293_v54 = vmul.f32 %v3261_v49, %v11309_v26  ;;  %v3297_v12 = vmul.f32 %v3265_v62, %v11355_v40  ;;  %v3235_v35 = vadd.f32 1.0, %v11540_v57  ;;  %v13462_v58 = vpack.c.bf16 %v11421_v0, %v11396_v9 }
 0xe20   :  { %v3290_v6 = vmul.f32 %v3258_v61, %v11298_v7  ;;  %v3294_v53 = vmul.f32 %v3262_v32, %v11314_v34  ;;  %v3260_v13 = vmul.f32 0.5, %v3228_v23  ;;  %v3264_v17 = vmul.f32 0.5, %v3232_v56  ;;  %v9220_v1 = vpop.eup %9219  ;;  %3626 = vmatprep.mubr.bf16.mxu1 %v3319_v38 }
 0xe21   :  { %3684 = vmatmul.mubr.bf16.vlgmr.msra.gmra.mrb[88].mxu0 %v13462_v58  ;;  %v3321_v41 = vpack.c.bf16 %v3297_v12, %v3293_v54  ;;  %v3239_v19 = vadd.f32 1.0, %v9208_v42  ;;  %v3267_v47 = vmul.f32 0.5, %v3235_v35  ;;  %v3237_v26 = vadd.f32 1.0, %v11549_v59 }
 0xe22   :  { %v3318_v40 = vpack.c.bf16 %v3294_v53, %v3290_v6  ;;  %v3292_v57 = vmul.f32 %v3260_v13, %v11301_v18  ;;  %v3296_v55 = vmul.f32 %v3264_v17, %v11317_v20  ;;  %v3241_v9 = vadd.f32 1.0, %v9210_v2  ;;  %v9222_v0 = vpop.eup %9221 }
 0xe23   :  { %3691 = vmatprep.mubr.bf16.mxu0 %v3321_v41  ;;  %v3271_v7 = vmul.f32 0.5, %v3239_v19  ;;  %v3299_v34 = vmul.f32 %v3267_v47, %v11410_v25  ;;  %v3269_v16 = vmul.f32 0.5, %v3237_v26  ;;  %v3234_v50 = vadd.f32 1.0, %v11519_v28  ;;  %v9224_v46 = vpop.eup %9223  ;;  %v13465_v47 = vld [vmem:[#allocation53_spill] sm:$0xff] }
 0xe24   :  { %v3320_v42 = vpack.c.bf16 %v3296_v55, %v3292_v57  ;;  %v3273_v8 = vmul.f32 0.5, %v3241_v9  ;;  %v3238_v59 = vadd.f32 1.0, %v11559_v21  ;;  %v3236_v15 = vadd.f32 1.0, %v11535_v11 }
 0xe25   :  { %3627 = vmatmul.mubr.bf16.gmra.mrb[60].mxu1 %v3318_v40  ;;  %v3303_v18 = vmul.f32 %v3271_v7, %v11454_v37  ;;  %v3301_v20 = vmul.f32 %v3269_v16, %v11418_v24  ;;  %v3266_v2 = vmul.f32 0.5, %v3234_v50  ;;  %v3240_v33 = vadd.f32 1.0, %v11562_v5  ;;  %v9226_v45 = vpop.eup %9225 }
 0xe26   :  { %v3305_v25 = vmul.f32 %v3273_v8, %v11474_v29  ;;  %v3270_v22 = vmul.f32 0.5, %v3238_v59  ;;  %v3268_v28 = vmul.f32 0.5, %v3236_v15  ;;  %v3243_v43 = vadd.f32 1.0, %v9216_v36 }
 0xe27   :  { %v3323_v39 = vpack.c.bf16 %v3303_v18, %v3299_v34  ;;  %v3298_v63 = vmul.f32 %v3266_v2, %v11387_v48  ;;  %v3272_v49 = vmul.f32 0.5, %v3240_v33  ;;  %v3247_v21 = vadd.f32 1.0, %v9224_v46  ;;  %v11624_v18 = vld [vmem:[#allocation16] ss:$0 sm:$0xff] }
 0xe28   :  { %v3325_v11 = vpack.c.bf16 %v3305_v25, %v3301_v20  ;;  %v3302_v37 = vmul.f32 %v3270_v22, %v11444_v31  ;;  %v3300_v24 = vmul.f32 %v3268_v28, %v11406_v4  ;;  %v3275_v62 = vmul.f32 0.5, %v3243_v43  ;;  %v13467_v20 = vld [vmem:[#allocation44_spill] sm:$0xff]  ;;  %v13468_v28 = vld [vmem:[#allocation45_spill] sm:$0xff] }
 0xe29   :  { %3692 = vmatmul.mubr.bf16.gmra.mrb[92].mxu0 %v3320_v42  ;;  %3634 = vmatprep.mubr.bf16.mxu1 %v3323_v39  ;;  %v3304_v5 = vmul.f32 %v3272_v49, %v11450_v14  ;;  %v3279_v61 = vmul.f32 0.5, %v3247_v21  ;;  %v3245_v29 = vadd.f32 1.0, %v9218_v10  ;;  %v3249_v32 = vadd.f32 1.0, %v9226_v45 }
 0xe2a   :  { %3699 = vmatprep.mubr.bf16.mxu0 %v3325_v11  ;;  %v3322_v36 = vpack.c.bf16 %v3302_v37, %v3298_v63  ;;  %v3307_v23 = vmul.f32 %v3275_v62, %v11501_v52  ;;  %v3242_v48 = vadd.f32 1.0, %v11573_v44  ;;  %v3246_v56 = vadd.f32 1.0, %v9220_v1  ;;  %v13463_v52 = vld [vmem:[#allocation52_spill] sm:$0xff]  ;;  %v13464_v44 = vld [vmem:[#allocation54_spill] sm:$0xff] }
 0xe2b   :  { %v3324_v38 = vpack.c.bf16 %v3304_v5, %v3300_v24  ;;  %v3311_v54 = vmul.f32 %v3279_v61, %v11533_v27  ;;  %v3277_v31 = vmul.f32 0.5, %v3245_v29  ;;  %v3281_v12 = vmul.f32 0.5, %v3249_v32 }
 0xe2c   :  { %v3274_v4 = vmul.f32 0.5, %v3242_v48  ;;  %v3278_v35 = vmul.f32 0.5, %v3246_v56  ;;  %v3244_v14 = vadd.f32 1.0, %v11576_v30  ;;  %v3248_v58 = vadd.f32 1.0, %v9222_v0 }
 0xe2d   :  { %3635 = vmatmul.mubr.bf16.gmra.mrb[64].mxu1 %v3322_v36  ;;  %v3327_v10 = vpack.c.bf16 %v3311_v54, %v3307_v23  ;;  %v3309_v6 = vmul.f32 %v3277_v31, %v11506_v3  ;;  %v3313_v53 = vmul.f32 %v3281_v12, %v11547_v60  ;;  %v13466_v3 = vmov 0   ;;  %v13469_v36 = vld [vmem:[#allocation46_spill] sm:$0xff]  ;;  %v13470_v31 = vld [vmem:[#allocation47_spill] sm:$0xff] }
 0xe2e   :  { %v3306_v13 = vmul.f32 %v3274_v4, %v13463_v52  ;;  %v3310_v17 = vmul.f32 %v3278_v35, %v13464_v44  ;;  %v3276_v1 = vmul.f32 0.5, %v3244_v14  ;;  %v3280_v41 = vmul.f32 0.5, %v3248_v58 }
 0xe2f   :  { %3642 = vmatprep.mubr.bf16.mxu1 %v3327_v10  ;;  %v3329_v27 = vpack.c.bf16 %v3313_v53, %v3309_v6 }
 0xe30   :  { %v3326_v19 = vpack.c.bf16 %v3310_v17, %v3306_v13  ;;  %v3308_v26 = vmul.f32 %v3276_v1, %v13465_v47  ;;  %v3312_v30 = vmul.f32 %v3280_v41, %v11529_v51  ;;  %v13472_v41 = vld [vmem:[#allocation48_spill] sm:$0xff] }
 0xe31   :  { %3700 = vmatmul.mubr.bf16.gmra.mrb[96].mxu0 %v3324_v38 }
 0xe32   :  { %3707 = vmatprep.mubr.bf16.mxu0 %v3329_v27  ;;  %v3328_v40 = vpack.c.bf16 %v3312_v30, %v3308_v26 }
 0xe35   :  { %3643 = vmatmul.mubr.bf16.gmra.mrb[68].mxu1 %v3326_v19 }
 0xe36   :  { %4074 = vmatprep.mubr.bf16.mxu1 %v13466_v3 }
 0xe39   :  { %3708 = vmatmul.mubr.bf16.gmra.mrb[100].mxu0 %v3328_v40  ;;  %v13473_v40 = vld [vmem:[#allocation49_spill] sm:$0xff] }
 0xef0   :  { %v7954_v60 = vpop.f32.mrb[56].mxu1 }
 0xef1   :  { %v7955_v57 = vpop.f32.mrb[57].mxu1 }
 0xef2   :  { %v7956_v55 = vadd.f32 %v7955_v57, %v7954_v60  ;;  %v7957_v9 = vpop.f32.mrb[58].mxu1 }
 0xef3   :  { %v7958_v0 = vpop.f32.mrb[59].mxu1 }
 0xef4   :  { %v7994_v7 = vpop.f32.mrb[88].mxu0  ;;  %v7959_v34 = vadd.f32 %v7958_v0, %v7957_v9 }
 0xef5   :  { %v7995_v16 = vpop.f32.mrb[89].mxu0 }
 0xef6   :  { %v7996_v50 = vadd.f32 %v7995_v16, %v7994_v7  ;;  %v7997_v46 = vpop.f32.mrb[90].mxu0 }
 0xef7   :  { %v7998_v42 = vpop.f32.mrb[91].mxu0 }
 0xef8   :  { %v3686_v8 = vadd.f32 %v7996_v50, %v7956_v55  ;;  %v7999_v59 = vadd.f32 %v7998_v42, %v7997_v46  ;;  %v7960_v51 = vpop.f32.mrb[60].mxu1 }
 0xef9   :  { %v7961_v15 = vpop.f32.mrb[61].mxu1 }
 0xefa   :  { %v3716_v2 = vadd.f32 %v3686_v8, %v13467_v20  ;;  %v3689_v33 = vadd.f32 %v7999_v59, %v7959_v34  ;;  %v7962_v45 = vadd.f32 %v7961_v15, %v7960_v51  ;;  %v7963_v25 = vpop.f32.mrb[62].mxu1  ;;  %v13476_v8 = vld [vmem:[#allocation50_spill] sm:$0xff]  ;;  %v13477_v15 = vld [vmem:[#allocation51_spill] sm:$0xff] }
 0xefb   :  { %v7964_v22 = vpop.f32.mrb[63].mxu1 }
 0xefc   :  { %v3717_v43 = vadd.f32 %v3689_v33, %v13468_v28  ;;  %v8000_v39 = vpop.f32.mrb[92].mxu0  ;;  %v11629_v63 = vadd.f32 %v11624_v18, %v3716_v2  ;;  %v7965_v49 = vadd.f32 %v7964_v22, %v7963_v25  ;;  %v8885_v25 = vld [vmem:[#allocation5 + $0xc4] ss:$12 sps:$4 sm:$0xff]   ;;  %v8888_v22 = vld [vmem:[#allocation5 + $0xdc] ss:$12 sps:$4 sm:$0xff]  }
 0xefd   :  { %v8001_v21 = vpop.f32.mrb[93].mxu0  ;;  %4042 = vmatprep.subr.bf16.mxu1 %v8885_v25  ;;  %v8886_v28 = vld [vmem:[#allocation5 + $0xd8] ss:$12 sps:$4 sm:$0xff]  }
 0xefe   :  { %v8002_v11 = vadd.f32 %v8001_v21, %v8000_v39  ;;  %v8003_v37 = vpop.f32.mrb[94].mxu0  ;;  %3743 = vadd.xlane.f32.xlu1 %v11629_v63  ;;  %v11633_v24 = vadd.f32 %v11624_v18, %v3717_v43 }
 0xeff   :  { %v8004_v62 = vpop.f32.mrb[95].mxu0 }
 0xf00   :  { %v3694_v5 = vadd.f32 %v8002_v11, %v7962_v45  ;;  %v8005_v61 = vadd.f32 %v8004_v62, %v8003_v37  ;;  %3745 = vadd.xlane.f32.xlu0 %v11633_v24  ;;  %v7966_v29 = vpop.f32.mrb[64].mxu1  ;;  %v8883_v45 = vld [vmem:[#allocation5 + $0xc0] ss:$12 sps:$4 sm:$0xff]  }
 0xf01   :  { %v7967_v32 = vpop.f32.mrb[65].mxu1  ;;  %4043 = vmatpush1.bf16.msra.mxu1 %v8883_v45  ;;  %v8914_v45 = vld [vmem:[#allocation5 + $0x170] ss:$12 sps:$4 sm:$0xff]  }
 0xf02   :  { %v3718_v23 = vadd.f32 %v3694_v5, %v13469_v36  ;;  %v3697_v48 = vadd.f32 %v8005_v61, %v7965_v49  ;;  %v7968_v56 = vadd.f32 %v7967_v32, %v7966_v29  ;;  %v7969_v38 = vpop.f32.mrb[66].mxu1  ;;  %4044 = vmatprep.subr.bf16.mxu1 %v8888_v22 }
 0xf03   :  { %v7970_v54 = vpop.f32.mrb[67].mxu1 }
 0xf04   :  { %v3719_v12 = vadd.f32 %v3697_v48, %v13470_v31  ;;  %v8006_v4 = vpop.f32.mrb[96].mxu0  ;;  %v11639_v35 = vadd.f32 %v11624_v18, %v3718_v23  ;;  %v7971_v14 = vadd.f32 %v7970_v54, %v7969_v38 }
 0xf05   :  { %v8007_v58 = vpop.f32.mrb[97].mxu0  ;;  %4045 = vmatpush1.bf16.msra.mxu1 %v8886_v28 }
 0xf06   :  { %v8008_v10 = vadd.f32 %v8007_v58, %v8006_v4  ;;  %v8009_v6 = vpop.f32.mrb[98].mxu0  ;;  %3747 = vadd.xlane.f32.xlu1 %v11639_v35  ;;  %v11643_v53 = vadd.f32 %v11624_v18, %v3719_v12 }
 0xf07   :  { %v8010_v52 = vpop.f32.mrb[99].mxu0 }
 0xf08   :  { %13471 = vst [vmem:[#allocation52_spill] sm:$0xff] %v11643_v53  ;;  %v3702_v13 = vadd.f32 %v8008_v10, %v7968_v56  ;;  %v8011_v44 = vadd.f32 %v8010_v52, %v8009_v6  ;;  %3749 = vadd.xlane.f32.xlu0 %v11643_v53  ;;  %v7972_v17 = vpop.f32.mrb[68].mxu1  ;;  %v8891_v10 = vld [vmem:[#allocation5 + $0xf4] ss:$12 sps:$4 sm:$0xff]  }
 0xf09   :  { %v7973_v1 = vpop.f32.mrb[69].mxu1  ;;  %v8892_v6 = vld [vmem:[#allocation5 + $0xc8] ss:$12 sps:$4 sm:$0xff]   ;;  %4046 = vmatprep.subr.bf16.mxu1 %v8891_v10 }
 0xf0a   :  { %v3720_v27 = vadd.f32 %v3702_v13, %v13472_v41  ;;  %v3705_v19 = vadd.f32 %v8011_v44, %v7971_v14  ;;  %v7974_v47 = vadd.f32 %v7973_v1, %v7972_v17  ;;  %v7975_v26 = vpop.f32.mrb[70].mxu1  ;;  %v8889_v13 = vld [vmem:[#allocation5 + $0xf0] ss:$12 sps:$4 sm:$0xff]   ;;  %8386 = vmatprep.subr.bf16.mxu0 %v8892_v6  ;;  %v8895_v41 = vld [vmem:[#allocation5 + $0x10c] ss:$12 sps:$4 sm:$0xff]  }
 0xf0b   :  { %v7976_v30 = vpop.f32.mrb[71].mxu1  ;;  %4047 = vmatpush1.bf16.msra.mxu1 %v8889_v13  ;;  %8387 = vmatpush3.bf16.msra.mxu0 %v8892_v6  ;;  %v7623_v13 = vld [vmem:[#allocation2 + $0x1] ss:$0 sm:$0xff] }
 0xf0c   :  { %v3721_v60 = vadd.f32 %v3705_v19, %v13473_v40  ;;  %v8012_v57 = vpop.f32.mrb[100].mxu0  ;;  %v11649_v55 = vadd.f32 %v11624_v18, %v3720_v27  ;;  %v7977_v9 = vadd.f32 %v7976_v30, %v7975_v26  ;;  %v8896_v27 = vld [vmem:[#allocation5 + $0xe0] ss:$12 sps:$4 sm:$0xff]   ;;  %v8893_v26 = vld [vmem:[#allocation5 + $0x108] ss:$12 sps:$4 sm:$0xff]   ;;  %4048 = vmatprep.subr.bf16.mxu1 %v8895_v41 }
 0xf0d   :  { %v8013_v0 = vpop.f32.mrb[101].mxu0  ;;  %8388 = vmatprep.subr.bf16.mxu0 %v8896_v27 }
 0xf0e   :  { %13474 = vst [vmem:[#allocation54_spill] sm:$0xff] %v11649_v55  ;;  %v8014_v7 = vadd.f32 %v8013_v0, %v8012_v57  ;;  %v8015_v34 = vpop.f32.mrb[102].mxu0  ;;  %3751 = vadd.xlane.f32.xlu1 %v11649_v55  ;;  %v11653_v16 = vadd.f32 %v11624_v18, %v3721_v60  ;;  %v8899_v60 = vld [vmem:[#allocation5 + $0x124] ss:$12 sps:$4 sm:$0xff]   ;;  %v8897_v0 = vld [vmem:[#allocation5 + $0x120] ss:$12 sps:$4 sm:$0xff]  }
 0xf0f   :  { %v8016_v50 = vpop.f32.mrb[103].mxu0  ;;  %4049 = vmatpush1.bf16.msra.mxu1 %v8893_v26  ;;  %8389 = vmatpush3.bf16.msra.mxu0 %v8896_v27  ;;  %v8900_v57 = vld [vmem:[#allocation5 + $0xf8] ss:$12 sps:$4 sm:$0xff]  }
 0xf10   :  { %13475 = vst [vmem:[#allocation53_spill] sm:$0xff] %v11653_v16  ;;  %v3710_v46 = vadd.f32 %v8014_v7, %v7974_v47  ;;  %v8017_v42 = vadd.f32 %v8016_v50, %v8015_v34  ;;  %3753 = vadd.xlane.f32.xlu0 %v11653_v16  ;;  %4050 = vmatprep.subr.bf16.mxu1 %v8899_v60  ;;  %v8903_v7 = vld [vmem:[#allocation5 + $0x13c] ss:$12 sps:$4 sm:$0xff]   ;;  %v8901_v50 = vld [vmem:[#allocation5 + $0x138] ss:$12 sps:$4 sm:$0xff]  }
 0xf11   :  { %8390 = vmatprep.subr.bf16.mxu0 %v8900_v57  ;;  %v8904_v34 = vld [vmem:[#allocation5 + $0x110] ss:$12 sps:$4 sm:$0xff]  }
 0xf12   :  { %v3722_v59 = vadd.f32 %v3710_v46, %v13476_v8  ;;  %v3713_v51 = vadd.f32 %v8017_v42, %v7977_v9  ;;  %v8907_v46 = vld [vmem:[#allocation5 + $0x154] ss:$12 sps:$4 sm:$0xff]   ;;  %v8905_v8 = vld [vmem:[#allocation5 + $0x150] ss:$12 sps:$4 sm:$0xff]  }
 0xf13   :  { %4051 = vmatpush1.bf16.msra.mxu1 %v8897_v0  ;;  %8391 = vmatpush3.bf16.msra.mxu0 %v8900_v57  ;;  %v8908_v42 = vld [vmem:[#allocation5 + $0x128] ss:$12 sps:$4 sm:$0xff]  }
 0xf14   :  { %v3723_v20 = vadd.f32 %v3713_v51, %v13477_v15  ;;  %v11659_v2 = vadd.f32 %v11624_v18, %v3722_v59  ;;  %4052 = vmatprep.subr.bf16.mxu1 %v8903_v7  ;;  %8392 = vmatprep.subr.bf16.mxu0 %v8904_v34  ;;  %v8911_v59 = vld [vmem:[#allocation5 + $0x16c] ss:$12 sps:$4 sm:$0xff]   ;;  %v8909_v15 = vld [vmem:[#allocation5 + $0x168] ss:$12 sps:$4 sm:$0xff]  }
 0xf15   :  { %v8912_v51 = vld [vmem:[#allocation5 + $0x140] ss:$12 sps:$4 sm:$0xff]  }
 0xf16   :  { %13478 = vst [vmem:[#allocation44_spill] sm:$0xff] %v11659_v2  ;;  %3755 = vadd.xlane.f32.xlu1 %v11659_v2  ;;  %v11663_v33 = vadd.f32 %v11624_v18, %v3723_v20  ;;  %v8913_v20 = vld [vmem:[#allocation5 + $0x158] ss:$12 sps:$4 sm:$0xff]  }
 0xf17   :  { %4053 = vmatpush1.bf16.msra.mxu1 %v8901_v50  ;;  %8393 = vmatpush3.bf16.msra.mxu0 %v8904_v34 }
 0xf18   :  { %13479 = vst [vmem:[#allocation45_spill] sm:$0xff] %v11663_v33  ;;  %3757 = vadd.xlane.f32.xlu0 %v11663_v33  ;;  %4054 = vmatprep.subr.bf16.mxu1 %v8907_v46 }
 0xf19   :  { %8394 = vmatprep.subr.bf16.mxu0 %v8908_v42 }
 0xf1b   :  { %4055 = vmatpush1.bf16.msra.mxu1 %v8905_v8  ;;  %8395 = vmatpush3.bf16.msra.mxu0 %v8908_v42 }
 0xf1c   :  { %4056 = vmatprep.subr.bf16.mxu1 %v8911_v59  ;;  %8396 = vmatprep.subr.bf16.mxu0 %v8912_v51 }
 0xf1f   :  { %4057 = vmatpush1.bf16.msra.mxu1 %v8909_v15  ;;  %8397 = vmatpush3.bf16.msra.mxu0 %v8912_v51 }
 0xf20   :  { %8398 = vmatprep.subr.bf16.mxu0 %v8913_v20 }
 0xf23   :  { %8399 = vmatpush3.bf16.msra.mxu0 %v8913_v20 }
 0xf24   :  { %8400 = vmatprep.subr.bf16.mxu0 %v8914_v45 }
 0xf27   :  { %8401 = vmatpush3.bf16.msra.mxu0 %v8914_v45 }
 0xf8b   :  { %v3744_v43 = vpop.xlane.xlu1 %3743 }
 0xf8c   :  { %v3759_v39 = vmul.f32 0.0078125, %v3744_v43 }
 0xf8d   :  { %v3746_v49 = vpop.xlane.xlu0 %3745 }
 0xf8e   :  { %v11667_v21 = vsub.f32 %v11629_v63, %v3759_v39  ;;  %v3760_v11 = vmul.f32 0.0078125, %v3746_v49 }
 0xf90   :  { %v11670_v18 = vsub.f32 %v11633_v24, %v3760_v11  ;;  %v3775_v37 = vmul.f32 %v11667_v21, %v11667_v21 }
 0xf92   :  { %3783 = vadd.xlane.f32.xlu1 %v3775_v37  ;;  %v3776_v62 = vmul.f32 %v11670_v18, %v11670_v18 }
 0xf93   :  { %v3748_v5 = vpop.xlane.xlu1 %3747 }
 0xf94   :  { %v3761_v61 = vmul.f32 0.0078125, %v3748_v5  ;;  %3785 = vadd.xlane.f32.xlu0 %v3776_v62 }
 0xf95   :  { %v3750_v29 = vpop.xlane.xlu0 %3749 }
 0xf96   :  { %v11677_v32 = vsub.f32 %v11639_v35, %v3761_v61  ;;  %v3762_v36 = vmul.f32 0.0078125, %v3750_v29 }
 0xf98   :  { %v11680_v23 = vsub.f32 %v11643_v53, %v3762_v36  ;;  %v3777_v48 = vmul.f32 %v11677_v32, %v11677_v32 }
 0xf9a   :  { %3787 = vadd.xlane.f32.xlu1 %v3777_v48  ;;  %v3778_v56 = vmul.f32 %v11680_v23, %v11680_v23  ;;  %v7622_v48 = vld [vmem:[%s13315_s6 + $0x1] ss:$0 sm:$0xff] }
 0xf9b   :  { %v3752_v38 = vpop.xlane.xlu1 %3751 }
 0xf9c   :  { %v3763_v54 = vmul.f32 0.0078125, %v3752_v38  ;;  %3789 = vadd.xlane.f32.xlu0 %v3778_v56 }
 0xf9d   :  { %v3754_v31 = vpop.xlane.xlu0 %3753 }
 0xf9e   :  { %v11687_v12 = vsub.f32 %v11649_v55, %v3763_v54  ;;  %v3764_v4 = vmul.f32 0.0078125, %v3754_v31 }
 0xfa0   :  { %v11690_v14 = vsub.f32 %v11653_v16, %v3764_v4  ;;  %v3779_v58 = vmul.f32 %v11687_v12, %v11687_v12 }
 0xfa2   :  { %3791 = vadd.xlane.f32.xlu1 %v3779_v58  ;;  %v3780_v52 = vmul.f32 %v11690_v14, %v11690_v14 }
 0xfa3   :  { %v3756_v44 = vpop.xlane.xlu1 %3755 }
 0xfa4   :  { %v3765_v17 = vmul.f32 0.0078125, %v3756_v44  ;;  %3793 = vadd.xlane.f32.xlu0 %v3780_v52 }
 0xfa5   :  { %v3758_v1 = vpop.xlane.xlu0 %3757 }
 0xfa6   :  { %v11697_v19 = vsub.f32 %v11659_v2, %v3765_v17  ;;  %v3766_v47 = vmul.f32 0.0078125, %v3758_v1 }
 0xfa8   :  { %v11700_v30 = vsub.f32 %v11663_v33, %v3766_v47  ;;  %v3781_v40 = vmul.f32 %v11697_v19, %v11697_v19 }
 0xfaa   :  { %3795 = vadd.xlane.f32.xlu1 %v3781_v40  ;;  %v3782_v9 = vmul.f32 %v11700_v30, %v11700_v30 }
 0xfac   :  { %3797 = vadd.xlane.f32.xlu0 %v3782_v9 }
0x101f   :  { %v3784_v25 = vpop.xlane.xlu1 %3783 }
0x1020   :  { %v3799_v22 = vmul.f32 0.0078125, %v3784_v25 }
0x1021   :  { %v3786_v28 = vpop.xlane.xlu0 %3785 }
0x1022   :  { %v3807_v43 = vadd.f32 1e-05, %v3799_v22  ;;  %v3800_v39 = vmul.f32 0.0078125, %v3786_v28 }
0x1024   :  { %9227 = vrsqrt.f32 %v3807_v43  ;;  %v3808_v49 = vadd.f32 1e-05, %v3800_v39 }
0x1026   :  { %9229 = vrsqrt.f32 %v3808_v49 }
0x1027   :  { %v3788_v11 = vpop.xlane.xlu1 %3787 }
0x1028   :  { %v3801_v37 = vmul.f32 0.0078125, %v3788_v11 }
0x1029   :  { %v3790_v62 = vpop.xlane.xlu0 %3789 }
0x102a   :  { %v3809_v5 = vadd.f32 1e-05, %v3801_v37  ;;  %v3802_v61 = vmul.f32 0.0078125, %v3790_v62 }
0x102c   :  { %9231 = vrsqrt.f32 %v3809_v5  ;;  %v3810_v29 = vadd.f32 1e-05, %v3802_v61  ;;  %v7624_v5 = vld [vmem:[%s13318_s9 + $0x3] sm:$0x7]  ;;  %v13480_v61 = vld [vmem:[#allocation33_spill] sm:$0xff] }
0x102e   :  { %v9228_v36 = vpop.eup %9227  ;;  %9233 = vrsqrt.f32 %v3810_v29 }
0x102f   :  { %v3823_v56 = vmul.f32 %v9228_v36, %v11667_v21  ;;  %v3792_v38 = vpop.xlane.xlu1 %3791  ;;  %v13481_v36 = vld [vmem:[#allocation34_spill] sm:$0xff] }
0x1030   :  { %v9230_v54 = vpop.eup %9229  ;;  %v3803_v31 = vmul.f32 0.0078125, %v3792_v38 }
0x1031   :  { %v3837_v4 = vmul.f32 %v7622_v48, %v3823_v56  ;;  %v3824_v58 = vmul.f32 %v9230_v54, %v11670_v18  ;;  %v3794_v10 = vpop.xlane.xlu0 %3793  ;;  %v11727_v56 = vrot.slane %v7624_v5, %v13481_v36 }
0x1032   :  { %v3811_v6 = vadd.f32 1e-05, %v3803_v31  ;;  %v3804_v52 = vmul.f32 0.0078125, %v3794_v10 }
0x1033   :  { %v3838_v44 = vmul.f32 %v7622_v48, %v3824_v58  ;;  %v3851_v1 = vadd.f32 %v7623_v13, %v3837_v4 }
0x1034   :  { %9235 = vrsqrt.f32 %v3811_v6  ;;  %v3812_v17 = vadd.f32 1e-05, %v3804_v52  ;;  %v13482_v52 = vld [vmem:[#allocation35_spill] sm:$0xff] }
0x1035   :  { %v3852_v41 = vadd.f32 %v7623_v13, %v3838_v44 }
0x1036   :  { %v9232_v27 = vpop.eup %9231  ;;  %9237 = vrsqrt.f32 %v3812_v17 }
0x1037   :  { %v3796_v47 = vpop.xlane.xlu1 %3795  ;;  %v3859_v26 = vpack.c.bf16 %v3852_v41, %v3851_v1  ;;  %v3825_v21 = vmul.f32 %v9232_v27, %v11677_v32 }
0x1038   :  { %v9234_v40 = vpop.eup %9233  ;;  %v3805_v60 = vmul.f32 0.0078125, %v3796_v47 }
0x1039   :  { %v3798_v57 = vpop.xlane.xlu0 %3797  ;;  %4075 = vmatmul.mubr.bf16.vlgmr.msra.gmra.mrb[72].mxu1 %v3859_v26  ;;  %8402 = vmatprep.mubr.bf16.mxu0 %v3859_v26  ;;  %v3826_v18 = vmul.f32 %v9234_v40, %v11680_v23  ;;  %v3839_v9 = vmul.f32 %v7622_v48, %v3825_v21 }
0x103a   :  { %v3813_v0 = vadd.f32 1e-05, %v3805_v60  ;;  %v3806_v7 = vmul.f32 0.0078125, %v3798_v57  ;;  %4084 = vmatprep.mubr.bf16.mxu1 %v13466_v3 }
0x103b   :  { %v3840_v34 = vmul.f32 %v7622_v48, %v3826_v18  ;;  %v3853_v46 = vadd.f32 %v7623_v13, %v3839_v9 }
0x103c   :  { %9239 = vrsqrt.f32 %v3813_v0  ;;  %v3814_v50 = vadd.f32 1e-05, %v3806_v7 }
0x103d   :  { %v3854_v42 = vadd.f32 %v7623_v13, %v3840_v34 }
0x103e   :  { %v9236_v8 = vpop.eup %9235  ;;  %9241 = vrsqrt.f32 %v3814_v50 }
0x103f   :  { %v3860_v32 = vpack.c.bf16 %v3854_v42, %v3853_v46  ;;  %v3827_v59 = vmul.f32 %v9236_v8, %v11687_v12 }
0x1040   :  { %v9238_v51 = vpop.eup %9237 }
0x1041   :  { %4085 = vmatmul.mubr.bf16.gmra.mrb[76].mxu1 %v3860_v32  ;;  %8403 = vmatmul.mubr.bf16.vlgmr.msra.gmra.mrb[104].mxu0 %v3860_v32  ;;  %v3828_v23 = vmul.f32 %v9238_v51, %v11690_v14  ;;  %v3841_v15 = vmul.f32 %v7622_v48, %v3827_v59 }
0x1042   :  { %4094 = vmatprep.mubr.bf16.mxu1 %v13466_v3 }
0x1043   :  { %v3842_v20 = vmul.f32 %v7622_v48, %v3828_v23  ;;  %v3855_v45 = vadd.f32 %v7623_v13, %v3841_v15 }
0x1045   :  { %v3856_v25 = vadd.f32 %v7623_v13, %v3842_v20 }
0x1046   :  { %v9240_v22 = vpop.eup %9239 }
0x1047   :  { %v3861_v28 = vpack.c.bf16 %v3856_v25, %v3855_v45  ;;  %v3829_v43 = vmul.f32 %v9240_v22, %v11697_v19  ;;  %v11724_v19 = vrot.slane %v7624_v5, %v13480_v61 }
0x1048   :  { %v9242_v39 = vpop.eup %9241 }
0x1049   :  { %4095 = vmatmul.mubr.bf16.gmra.mrb[80].mxu1 %v3861_v28  ;;  %8406 = vmatprep.mubr.bf16.mxu0 %v3861_v28  ;;  %v3830_v12 = vmul.f32 %v9242_v39, %v11700_v30  ;;  %v3843_v49 = vmul.f32 %v7622_v48, %v3829_v43 }
0x104a   :  { %4104 = vmatprep.mubr.bf16.mxu1 %v13466_v3 }
0x104b   :  { %v3844_v11 = vmul.f32 %v7622_v48, %v3830_v12  ;;  %v3857_v14 = vadd.f32 %v7623_v13, %v3843_v49 }
0x104d   :  { %v3858_v37 = vadd.f32 %v7623_v13, %v3844_v11  ;;  %v11740_v13 = vrot.slane %v7624_v5, %v13482_v52 }
0x104f   :  { %v3862_v62 = vpack.c.bf16 %v3858_v37, %v3857_v14 }
0x1051   :  { %4105 = vmatmul.mubr.bf16.gmra.mrb[84].mxu1 %v3862_v62  ;;  %8407 = vmatmul.mubr.bf16.gmra.mrb[108].mxu0 %v3862_v62 }
0x110c   :  { %v4076_v29 = vpop.f32.mrb[72].mxu1 }
0x110d   :  { %v4078_v30 = vpop.f32.mrb[73].mxu1  ;;  %v4077_v48 = vadd.f32 %v4076_v29, %v11724_v19 }
0x110e   :  { %v4080_v38 = vpop.f32.mrb[74].mxu1  ;;  %v4079_v4 = vadd.f32 %v4078_v30, %v11727_v56 }
0x110f   :  { %v4081_v54 = vadd.f32 %v4080_v38, %v11724_v19  ;;  %v4082_v31 = vpop.f32.mrb[75].mxu1 }
0x1110   :  { %v4083_v58 = vadd.f32 %v4082_v31, %v11727_v56 }
0x1111   :  { %v11733_v10 = vpack.c.bf16 %v4081_v54, %v4077_v48 }
0x1112   :  { %v11735_v6 = vpack.c.bf16 %v4083_v58, %v4079_v4 }
0x1113   :  { %8418 = vmatprep.mubr.msk.bf16.mxu1 %vm1073_vm8, %v11733_v10 }
0x1114   :  { %4482 = vrot.lane.b32.xlu1 %v11735_v6, %s9832_s21  ;;  %v4086_v44 = vpop.f32.mrb[76].mxu1  ;;  %v8404_v17 = vpop.f32.mrb[104].mxu0  ;;  %8578 = vmatprep.subr.msk.bf16.mxu1 %vm1073_vm8, %v11735_v6  ;;  %v4205_v1 = vsel %vm1073_vm8, %v11735_v6, 0 }
0x1115   :  { %v4088_v41 = vpop.f32.mrb[77].mxu1  ;;  %v4149_v27 = vpop.f32.mrb[105].mxu0  ;;  %8411 = vmatpush3.bf16.xpose.msra.mxu1 %v4205_v1  ;;  %v4087_v21 = vadd.f32 %v4086_v44, %v11724_v19  ;;  %v4158_v40 = vadd.f32 %v8404_v17, %v11740_v13 }
0x1116   :  { %v4090_v47 = vpop.f32.mrb[78].mxu1  ;;  %v8405_v26 = vpop.f32.mrb[106].mxu0  ;;  %v4089_v0 = vadd.f32 %v4088_v41, %v11727_v56  ;;  %v4150_v7 = vadd.f32 %v4149_v27, %v11740_v13 }
0x1117   :  { %v4091_v60 = vadd.f32 %v4090_v47, %v11724_v19  ;;  %v4161_v57 = vadd.f32 %v8405_v26, %v11740_v13  ;;  %v4092_v18 = vpop.f32.mrb[79].mxu1  ;;  %v4152_v9 = vpop.f32.mrb[107].mxu0 }
0x1118   :  { %v4093_v34 = vadd.f32 %v4092_v18, %v11727_v56  ;;  %v4153_v50 = vadd.f32 %v4152_v9, %v11740_v13 }
0x1119   :  { %v11756_v46 = vpack.c.bf16 %v4091_v60, %v4087_v21  ;;  %v11758_v42 = vpack.c.bf16 %v4161_v57, %v4158_v40 }
0x111a   :  { %v11760_v8 = vpack.c.bf16 %v4093_v34, %v4089_v0  ;;  %v11762_v32 = vpack.c.bf16 %v4153_v50, %v4150_v7 }
0x111c   :  { %8426 = vmatprep.subr.bf16.mxu0 %v11762_v32  ;;  %4484 = vrot.lane.b32.xlu0 %v11760_v8, %s9832_s21  ;;  %v4096_v59 = vpop.f32.mrb[80].mxu1  ;;  %v4208_v51 = vsel %vm1073_vm8, %v11760_v8, 0 }
0x111d   :  { %8579 = vmatprep.subr.msk.bf16.mxu1 %vm1073_vm8, %v11760_v8  ;;  %v4098_v23 = vpop.f32.mrb[81].mxu1  ;;  %8427 = vmatpush3.bf16.msra.mxu0 %v11762_v32  ;;  %v4097_v20 = vadd.f32 %v4096_v59, %v11724_v19 }
0x111e   :  { %8413 = vmatpush3.bf16.xpose.msra.mxu1 %v4208_v51  ;;  %v4100_v15 = vpop.f32.mrb[82].mxu1  ;;  %8428 = vmatprep.subr.bf16.mxu0 %v11758_v42  ;;  %v4099_v22 = vadd.f32 %v4098_v23, %v11727_v56 }
0x111f   :  { %v4101_v45 = vadd.f32 %v4100_v15, %v11724_v19  ;;  %v4102_v25 = vpop.f32.mrb[83].mxu1 }
0x1120   :  { %v4103_v28 = vadd.f32 %v4102_v25, %v11727_v56  ;;  %4470 = vrot.lane.b32.xlu0 %v11733_v10, %s9832_s21 }
0x1121   :  { %v11779_v43 = vpack.c.bf16 %v4101_v45, %v4097_v20  ;;  %8429 = vmatpush3.bf16.msra.mxu0 %v11758_v42 }
0x1122   :  { %v11782_v39 = vpack.c.bf16 %v4103_v28, %v4099_v22 }
0x1124   :  { %4486 = vrot.lane.b32.xlu1 %v11782_v39, %s9832_s21  ;;  %8580 = vmatprep.subr.msk.bf16.mxu1 %vm1073_vm8, %v11782_v39  ;;  %v4106_v12 = vpop.f32.mrb[84].mxu1  ;;  %v8408_v49 = vpop.f32.mrb[108].mxu0  ;;  %v4211_v11 = vsel %vm1073_vm8, %v11782_v39, 0 }
0x1125   :  { %4474 = vrot.lane.b32.xlu0 %v11779_v43, %s9832_s21  ;;  %v4108_v14 = vpop.f32.mrb[85].mxu1  ;;  %v4165_v37 = vpop.f32.mrb[109].mxu0  ;;  %v4107_v29 = vadd.f32 %v4106_v12, %v11724_v19  ;;  %v4174_v30 = vadd.f32 %v8408_v49, %v11740_v13 }
0x1126   :  { %8415 = vmatpush3.bf16.xpose.msra.mxu1 %v4211_v11  ;;  %v4110_v62 = vpop.f32.mrb[86].mxu1  ;;  %v8409_v5 = vpop.f32.mrb[110].mxu0  ;;  %v4109_v4 = vadd.f32 %v4108_v14, %v11727_v56  ;;  %v4166_v58 = vadd.f32 %v4165_v37, %v11740_v13 }
0x1127   :  { %v4111_v38 = vadd.f32 %v4110_v62, %v11724_v19  ;;  %v4177_v48 = vadd.f32 %v8409_v5, %v11740_v13  ;;  %v4112_v54 = vpop.f32.mrb[87].mxu1  ;;  %v4168_v31 = vpop.f32.mrb[111].mxu0 }
0x1128   :  { %v4113_v44 = vadd.f32 %v4112_v54, %v11727_v56  ;;  %v4169_v17 = vadd.f32 %v4168_v31, %v11740_v13 }
0x1129   :  { %v11800_v1 = vpack.c.bf16 %v4111_v38, %v4107_v29  ;;  %v11802_v41 = vpack.c.bf16 %v4177_v48, %v4174_v30 }
0x112a   :  { %v11804_v27 = vpack.c.bf16 %v4113_v44, %v4109_v4  ;;  %v11806_v47 = vpack.c.bf16 %v4169_v17, %v4166_v58 }
0x112c   :  { %8430 = vmatprep.subr.bf16.mxu0 %v11806_v47  ;;  %4488 = vrot.lane.b32.xlu1 %v11804_v27, %s9832_s21  ;;  %v4214_v19 = vsel %vm1073_vm8, %v11804_v27, 0 }
0x112d   :  { %8581 = vmatprep.subr.msk.bf16.mxu1 %vm1073_vm8, %v11804_v27  ;;  %8431 = vmatpush3.bf16.msra.mxu0 %v11806_v47 }
0x112e   :  { %8417 = vmatpush3.bf16.xpose.msra.mxu1 %v4214_v19  ;;  %8432 = vmatprep.subr.bf16.mxu0 %v11802_v41 }
0x1130   :  { %4472 = vrot.lane.b32.xlu1 %v11756_v46, %s9832_s21 }
0x1131   :  { %8433 = vmatpush3.bf16.msra.mxu0 %v11802_v41 }
0x1134   :  { %4476 = vrot.lane.b32.xlu1 %v11800_v1, %s9832_s21 }
0x1135   :  { %8419 = vmatmul.mubr.msk.bf16.vlgmr.msra.gmra.mrb[88].mxu1 %vm1073_vm8, %v11756_v46 }
0x1136   :  { %8422 = vmatprep.mubr.msk.bf16.mxu1 %vm1073_vm8, %v11779_v43 }
0x113d   :  { %8423 = vmatmul.mubr.msk.bf16.gmra.mrb[92].mxu1 %vm1073_vm8, %v11800_v1 }
0x1186   :  { %v4483_v56 = vpop.permute.xlu1 %4482 }
0x1187   :  { %8582 = vmatprep.subr.msk.bf16.mxu1 %vm1073_vm8, %v4483_v56  ;;  %v4503_v13 = vsel %vm1073_vm8, %v4483_v56, 0 }
0x1188   :  { %8443 = vmatpush3.bf16.xpose.msra.mxu1 %v4503_v13 }
0x118e   :  { %v4485_v26 = vpop.permute.xlu0 %4484 }
0x118f   :  { %8583 = vmatprep.subr.msk.bf16.mxu1 %vm1073_vm8, %v4485_v26  ;;  %v4506_v21 = vsel %vm1073_vm8, %v4485_v26, 0 }
0x1190   :  { %8445 = vmatpush3.bf16.xpose.msra.mxu1 %v4506_v21 }
0x1192   :  { %v4471_v40 = vpop.permute.xlu0 %4470 }
0x1193   :  { %8450 = vmatprep.mubr.msk.bf16.mxu1 %vm1073_vm8, %v4471_v40 }
0x1196   :  { %v4487_v60 = vpop.permute.xlu1 %4486 }
0x1197   :  { %8584 = vmatprep.subr.msk.bf16.mxu1 %vm1073_vm8, %v4487_v60  ;;  %v4509_v57 = vsel %vm1073_vm8, %v4487_v60, 0  ;;  %v4475_v7 = vpop.permute.xlu0 %4474 }
0x1198   :  { %8447 = vmatpush3.bf16.xpose.msra.mxu1 %v4509_v57 }
0x119e   :  { %v4489_v18 = vpop.permute.xlu1 %4488 }
0x119f   :  { %8585 = vmatprep.subr.msk.bf16.mxu1 %vm1073_vm8, %v4489_v18  ;;  %v4512_v9 = vsel %vm1073_vm8, %v4489_v18, 0 }
0x11a0   :  { %8449 = vmatpush3.bf16.xpose.msra.mxu1 %v4512_v9 }
0x11a2   :  { %v4473_v0 = vpop.permute.xlu1 %4472 }
0x11a6   :  { %v4477_v34 = vpop.permute.xlu1 %4476 }
0x11a7   :  { %8451 = vmatmul.mubr.msk.bf16.vlgmr.msra.gmra.mrb[96].mxu1 %vm1073_vm8, %v4473_v0 }
0x11a8   :  { %8454 = vmatprep.mubr.msk.bf16.mxu1 %vm1073_vm8, %v4475_v7 }
0x11af   :  { %8455 = vmatmul.mubr.msk.bf16.gmra.mrb[100].mxu1 %vm1073_vm8, %v4477_v34 }
0x1208   :  { %v8420_v50 = vpop.f32.mrb[88].mxu1 }
0x1209   :  { %v4283_v59 = vmul.f32 0.17677669, %v8420_v50  ;;  %v4250_v51 = vpop.f32.mrb[89].mxu1 }
0x120a   :  { %v4281_v23 = vmul.f32 0.17677669, %v4250_v51  ;;  %v8421_v15 = vpop.f32.mrb[90].mxu1 }
0x120b   :  { %v11842_v45 = vsel %vm10450_vm1, %v4283_v59, -1e+09  ;;  %v4253_v25 = vpop.f32.mrb[91].mxu1  ;;  %v4284_v11 = vmul.f32 0.17677669, %v8421_v15 }
0x120c   :  { %v4282_v22 = vmul.f32 0.17677669, %v4253_v25  ;;  %v4303_v28 = vsel %vm1179_vm7, %v11842_v45, -inf  ;;  %v11848_v49 = vsel %vm10467_vm6, %v4281_v23, -1e+09 }
0x120d   :  { %4304 = vmax.xlane.f32.xlu0 %v4303_v28  ;;  %v4297_v29 = vsel %vm1179_vm7, %v11848_v49, -inf  ;;  %v11860_v38 = vsel %vm10496_vm15, %v4284_v11, -1e+09 }
0x120e   :  { %v11852_v37 = vsel %vm10487_vm13, %v4282_v22, -1e+09  ;;  %v4306_v56 = vsel %vm1179_vm7, %v11860_v38, -inf }
0x120f   :  { %v4300_v62 = vsel %vm1179_vm7, %v11852_v37, -inf }
0x1210   :  { %4301 = vmax.xlane.f32.xlu1 %v4300_v62  ;;  %v8424_v5 = vpop.f32.mrb[92].mxu1 }
0x1211   :  { %v4287_v48 = vmul.f32 0.17677669, %v8424_v5  ;;  %4298 = vmax.xlane.f32.xlu0 %v4297_v29  ;;  %v4266_v54 = vpop.f32.mrb[93].mxu1 }
0x1212   :  { %v4285_v31 = vmul.f32 0.17677669, %v4266_v54  ;;  %v8425_v4 = vpop.f32.mrb[94].mxu1 }
0x1213   :  { %v11864_v44 = vsel %vm10522_vm5, %v4287_v48, -1e+09  ;;  %v4269_v17 = vpop.f32.mrb[95].mxu1  ;;  %v4288_v40 = vmul.f32 0.17677669, %v8425_v4 }
0x1214   :  { %v4286_v19 = vmul.f32 0.17677669, %v4269_v17  ;;  %v4315_v13 = vsel %vm1179_vm7, %v11864_v44, -inf  ;;  %v11872_v21 = vsel %vm10533_vm12, %v4285_v31, -1e+09 }
0x1215   :  { %4307 = vmax.xlane.f32.xlu0 %v4306_v56  ;;  %4316 = vmax.xlane.f32.xlu1 %v4315_v13  ;;  %v4309_v9 = vsel %vm1179_vm7, %v11872_v21, -inf  ;;  %v4296_v7 = vsel %vm10539_vm10, %v4288_v40, -1e+09 }
0x1216   :  { %v11876_v57 = vsel %vm10563_vm11, %v4286_v19, -1e+09  ;;  %v4318_v34 = vsel %vm1179_vm7, %v4296_v7, -inf }
0x1217   :  { %v4312_v18 = vsel %vm1179_vm7, %v11876_v57, -inf }
0x1219   :  { %4310 = vmax.xlane.f32.xlu1 %v4309_v9  ;;  %4313 = vmax.xlane.f32.xlu0 %v4312_v18 }
0x121d   :  { %4319 = vmax.xlane.f32.xlu0 %v4318_v34 }
0x127a   :  { %v8452_v50 = vpop.f32.mrb[96].mxu1 }
0x127b   :  { %v4581_v59 = vmul.f32 0.17677669, %v8452_v50  ;;  %v4548_v51 = vpop.f32.mrb[97].mxu1 }
0x127c   :  { %v4579_v23 = vmul.f32 0.17677669, %v4548_v51  ;;  %v8453_v15 = vpop.f32.mrb[98].mxu1 }
0x127d   :  { %v11887_v25 = vsel %vm10450_vm1, %v4581_v59, -1e+09  ;;  %v4551_v22 = vpop.f32.mrb[99].mxu1  ;;  %v4582_v28 = vmul.f32 0.17677669, %v8453_v15 }
0x127e   :  { %v4580_v11 = vmul.f32 0.17677669, %v4551_v22  ;;  %v4601_v62 = vsel %vm1179_vm7, %v11887_v25, -inf  ;;  %v11893_v5 = vsel %vm10467_vm6, %v4579_v23, -1e+09 }
0x127f   :  { %4602 = vmax.xlane.f32.xlu1 %v4601_v62  ;;  %v11903_v54 = vsel %vm10496_vm15, %v4582_v28, -1e+09  ;;  %v4595_v4 = vsel %vm1179_vm7, %v11893_v5, -inf }
0x1280   :  { %v11897_v29 = vsel %vm10487_vm13, %v4580_v11, -1e+09  ;;  %v4604_v40 = vsel %vm1179_vm7, %v11903_v54, -inf }
0x1281   :  { %v4598_v48 = vsel %vm1179_vm7, %v11897_v29, -inf }
0x1282   :  { %4599 = vmax.xlane.f32.xlu0 %v4598_v48  ;;  %v8456_v31 = vpop.f32.mrb[100].mxu1 }
0x1283   :  { %4596 = vmax.xlane.f32.xlu1 %v4595_v4  ;;  %v4564_v17 = vpop.f32.mrb[101].mxu1  ;;  %v4585_v62 = vmul.f32 0.17677669, %v8456_v31 }
0x1284   :  { %v8457_v19 = vpop.f32.mrb[102].mxu1 }
0x1285   :  { %v4586_v56 = vmul.f32 0.17677669, %v8457_v19  ;;  %v4567_v13 = vpop.f32.mrb[103].mxu1 }
0x1286   :  { %v4584_v18 = vmul.f32 0.17677669, %v4567_v13  ;;  %4605 = vmax.xlane.f32.xlu0 %v4604_v40  ;;  %v4583_v13 = vmul.f32 0.17677669, %v4564_v17 }
0x1287   :  { %v11911_v9 = vsel %vm10539_vm10, %v4586_v56, -1e+09  ;;  %v11929_v56 = vsel %vm10522_vm5, %v4585_v62, -1e+09 }
0x1288   :  { %v4616_v34 = vsel %vm1179_vm7, %v11911_v9, -inf  ;;  %v11917_v50 = vsel %vm10563_vm11, %v4584_v18, -1e+09 }
0x1289   :  { %v4610_v59 = vsel %vm1179_vm7, %v11917_v50, -inf }
0x128a   :  { %4617 = vmax.xlane.f32.xlu0 %v4616_v34  ;;  %v4613_v34 = vsel %vm1179_vm7, %v11929_v56, -inf }
0x128e   :  { %4611 = vmax.xlane.f32.xlu0 %v4610_v59 }
0x1294   :  { %4691 = vrot.lane.b32.xlu1 %v11762_v32, %s9832_s21 }
0x129a   :  { %v4305_v51 = vpop.xlane.xlu0 %4304 }
0x129d   :  { %v4302_v11 = vpop.xlane.xlu1 %4301 }
0x129e   :  { %v4299_v23 = vpop.xlane.xlu0 %4298  ;;  %v4322_v48 = vsub.f32 %v11852_v37, %v4302_v11 }
0x12a0   :  { %v4331_v40 = vmul.f32 1.442695, %v4322_v48 }
0x12a2   :  { %v4308_v15 = vpop.xlane.xlu0 %4307 }
0x12a3   :  { %v4324_v28 = vsub.f32 %v11860_v38, %v4308_v15  ;;  %v11935_v38 = vsel %vm10533_vm12, %v4583_v13, -1e+09 }
0x12a4   :  { %4693 = vrot.lane.b32.xlu0 %v11758_v42, %s9832_s21  ;;  %v4607_v59 = vsel %vm1179_vm7, %v11935_v38, -inf }
0x12a5   :  { %v4335_v4 = vmul.f32 1.442695, %v4324_v28 }
0x12a6   :  { %v4314_v22 = vpop.xlane.xlu0 %4313 }
0x12a7   :  { %9243 = vpow2.f32 %v4335_v4  ;;  %v4326_v37 = vsub.f32 %v11876_v57, %v4314_v22  ;;  %v4323_v4 = vsub.f32 %v11842_v45, %v4305_v51 }
0x12a8   :  { %9245 = vpow2.f32 %v4331_v40  ;;  %v4321_v40 = vsub.f32 %v11848_v49, %v4299_v23 }
0x12a9   :  { %v4339_v17 = vmul.f32 1.442695, %v4326_v37  ;;  %v4333_v13 = vmul.f32 1.442695, %v4323_v4 }
0x12aa   :  { %v4320_v19 = vpop.xlane.xlu0 %4319 }
0x12ab   :  { %v4328_v18 = vsub.f32 %v4296_v7, %v4320_v19  ;;  %v4317_v19 = vpop.xlane.xlu1 %4316 }
0x12ad   :  { %v4343_v31 = vmul.f32 1.442695, %v4328_v18  ;;  %v4329_v18 = vmul.f32 1.442695, %v4321_v40 }
0x12af   :  { %9247 = vpow2.f32 %v4343_v31  ;;  %v4311_v37 = vpop.xlane.xlu1 %4310 }
0x12b0   :  { %9249 = vpow2.f32 %v4339_v17 }
0x12b1   :  { %v11940_v15 = vpop.eup %9243  ;;  %9251 = vpow2.f32 %v4333_v13 }
0x12b2   :  { %v4354_v7 = vsel %vm1179_vm7, %v11940_v15, 0.0  ;;  %v11944_v28 = vpop.eup %9245  ;;  %9253 = vpow2.f32 %v4329_v18 }
0x12b3   :  { %v4348_v11 = vsel %vm1179_vm7, %v11944_v28, 0.0 }
0x12b8   :  { %4614 = vmax.xlane.f32.xlu1 %v4613_v34  ;;  %v4327_v34 = vsub.f32 %v11864_v44, %v4317_v19 }
0x12b9   :  { %v11948_v57 = vpop.eup %9247 }
0x12ba   :  { %v4366_v22 = vsel %vm1179_vm7, %v11948_v57, 0.0  ;;  %v11952_v62 = vpop.eup %9249  ;;  %v4341_v31 = vmul.f32 1.442695, %v4327_v34 }
0x12bb   :  { %v4360_v48 = vsel %vm1179_vm7, %v11952_v62, 0.0 }
0x12bc   :  { %4608 = vmax.xlane.f32.xlu1 %v4607_v59  ;;  %v4325_v59 = vsub.f32 %v11872_v21, %v4311_v37  ;;  %9255 = vpow2.f32 %v4341_v31 }
0x12be   :  { %v4337_v17 = vmul.f32 1.442695, %v4325_v59 }
0x12c0   :  { %9257 = vpow2.f32 %v4337_v17 }
0x12c3   :  { %4355 = vadd.xlane.f32.xlu0 %v4354_v7  ;;  %v11966_v7 = vpop.eup %9251 }
0x12c4   :  { %v4351_v45 = vsel %vm1179_vm7, %v11966_v7, 0.0  ;;  %v11970_v51 = vpop.eup %9253 }
0x12c5   :  { %v4345_v49 = vsel %vm1179_vm7, %v11970_v51, 0.0 }
0x12c6   :  { %v11974_v44 = vpop.eup %9255 }
0x12c7   :  { %4349 = vadd.xlane.f32.xlu0 %v4348_v11  ;;  %v4363_v21 = vsel %vm1179_vm7, %v11974_v44, 0.0 }
0x12ca   :  { %v11978_v23 = vpop.eup %9257 }
0x12cb   :  { %4367 = vadd.xlane.f32.xlu0 %v4366_v22  ;;  %v4357_v11 = vsel %vm1179_vm7, %v11978_v23, 0.0 }
0x12cd   :  { %4695 = vrot.lane.b32.xlu1 %v11806_v47, %s9832_s21 }
0x12cf   :  { %4361 = vadd.xlane.f32.xlu0 %v4360_v48 }
0x12d1   :  { %4697 = vrot.lane.b32.xlu1 %v11802_v41, %s9832_s21 }
0x12d5   :  { %4788 = vrot.lane.b32.xlu1 %v11735_v6, %s9823_s27 }
0x12f9   :  { %4352 = vadd.xlane.f32.xlu1 %v4351_v45 }
0x12fd   :  { %4346 = vadd.xlane.f32.xlu1 %v4345_v49 }
0x1301   :  { %4364 = vadd.xlane.f32.xlu1 %v4363_v21 }
0x1305   :  { %4358 = vadd.xlane.f32.xlu1 %v4357_v11 }
0x130c   :  { %v4603_v22 = vpop.xlane.xlu1 %4602 }
0x130d   :  { %v4621_v48 = vsub.f32 %v11887_v25, %v4603_v22 }
0x130f   :  { %v4631_v4 = vmul.f32 1.442695, %v4621_v48  ;;  %v4600_v19 = vpop.xlane.xlu0 %4599 }
0x1310   :  { %v4597_v13 = vpop.xlane.xlu1 %4596  ;;  %v4620_v18 = vsub.f32 %v11897_v29, %v4600_v19 }
0x1311   :  { %9259 = vpow2.f32 %v4631_v4  ;;  %v4619_v40 = vsub.f32 %v11893_v5, %v4597_v13 }
0x1312   :  { %v4629_v17 = vmul.f32 1.442695, %v4620_v18 }
0x1313   :  { %v4627_v34 = vmul.f32 1.442695, %v4619_v40  ;;  %v4606_v37 = vpop.xlane.xlu0 %4605 }
0x1314   :  { %v4622_v31 = vsub.f32 %v11903_v54, %v4606_v37  ;;  %v11986_v59 = vpop.permute.xlu1 %4691 }
0x1315   :  { %9261 = vpow2.f32 %v4627_v34  ;;  %8458 = vmatprep.subr.bf16.mxu0 %v11986_v59 }
0x1316   :  { %v4633_v45 = vmul.f32 1.442695, %v4622_v31 }
0x1317   :  { %v4618_v48 = vpop.xlane.xlu0 %4617 }
0x1318   :  { %9263 = vpow2.f32 %v4633_v45  ;;  %v4626_v34 = vsub.f32 %v11911_v9, %v4618_v48 }
0x1319   :  { %9265 = vpow2.f32 %v4629_v17 }
0x131a   :  { %v4641_v45 = vmul.f32 1.442695, %v4626_v34 }
0x131b   :  { %v11989_v25 = vpop.eup %9259  ;;  %v4612_v4 = vpop.xlane.xlu0 %4611 }
0x131c   :  { %v4649_v5 = vsel %vm1179_vm7, %v11989_v25, 0.0  ;;  %v4624_v19 = vsub.f32 %v11917_v50, %v4612_v4 }
0x131d   :  { %4650 = vadd.xlane.f32.xlu1 %v4649_v5 }
0x131e   :  { %v4637_v13 = vmul.f32 1.442695, %v4624_v19 }
0x131f   :  { %v11993_v29 = vpop.eup %9261  ;;  %v4694_v19 = vpop.permute.xlu0 %4693 }
0x1320   :  { %v4643_v54 = vsel %vm1179_vm7, %v11993_v29, 0.0  ;;  %9267 = vpow2.f32 %v4637_v13 }
0x1321   :  { %4644 = vadd.xlane.f32.xlu1 %v4643_v54 }
0x1322   :  { %v11997_v49 = vpop.eup %9263 }
0x1323   :  { %v4652_v21 = vsel %vm1179_vm7, %v11997_v49, 0.0  ;;  %v12001_v11 = vpop.eup %9265 }
0x1324   :  { %4653 = vadd.xlane.f32.xlu0 %v4652_v21  ;;  %v4646_v22 = vsel %vm1179_vm7, %v12001_v11, 0.0 }
0x1328   :  { %4647 = vadd.xlane.f32.xlu0 %v4646_v22 }
0x132a   :  { %v12011_v54 = vpop.eup %9267 }
0x132b   :  { %v4658_v50 = vsel %vm1179_vm7, %v12011_v54, 0.0 }
0x1332   :  { %4792 = vrot.lane.b32.xlu1 %v11782_v39, %s9823_s27 }
0x1345   :  { %v4615_v40 = vpop.xlane.xlu1 %4614 }
0x1346   :  { %v4625_v18 = vsub.f32 %v11929_v56, %v4615_v40 }
0x1348   :  { %v4639_v37 = vmul.f32 1.442695, %v4625_v18 }
0x1349   :  { %v4609_v31 = vpop.xlane.xlu1 %4608 }
0x134a   :  { %9269 = vpow2.f32 %v4639_v37  ;;  %v4623_v17 = vsub.f32 %v11935_v38, %v4609_v31 }
0x134c   :  { %v4635_v5 = vmul.f32 1.442695, %v4623_v17 }
0x134d   :  { %v4696_v4 = vpop.permute.xlu1 %4695 }
0x134e   :  { %9271 = vpow2.f32 %v4635_v5 }
0x134f   :  { %9273 = vpow2.f32 %v4641_v45 }
0x1350   :  { %v4356_v13 = vpop.xlane.xlu0 %4355 }
0x1351   :  { %v4698_v40 = vpop.permute.xlu1 %4697 }
0x1354   :  { %v12013_v21 = vpop.eup %9269  ;;  %v4350_v18 = vpop.xlane.xlu0 %4349 }
0x1355   :  { %v4661_v9 = vsel %vm1179_vm7, %v12013_v21, 0.0  ;;  %v12039_v34 = vpop.permute.xlu1 %4788 }
0x1356   :  { %4659 = vadd.xlane.f32.xlu1 %v4658_v50  ;;  %4662 = vadd.xlane.f32.xlu0 %v4661_v9 }
0x1358   :  { %v12019_v56 = vpop.eup %9271  ;;  %v4368_v31 = vpop.xlane.xlu0 %4367 }
0x1359   :  { %v4655_v38 = vsel %vm1179_vm7, %v12019_v56, 0.0  ;;  %v12023_v22 = vpop.eup %9273 }
0x135a   :  { %4656 = vadd.xlane.f32.xlu0 %v4655_v38  ;;  %v4664_v48 = vsel %vm1179_vm7, %v12023_v22, 0.0 }
0x135c   :  { %v4362_v45 = vpop.xlane.xlu0 %4361 }
0x135e   :  { %4665 = vadd.xlane.f32.xlu0 %v4664_v48 }
0x1367   :  { %4794 = vrot.lane.b32.xlu1 %v11804_v27, %s9823_s27 }
0x136b   :  { %4782 = vrot.lane.b32.xlu1 %v11756_v46, %s9823_s27 }
0x136f   :  { %4786 = vrot.lane.b32.xlu1 %v11800_v1, %s9823_s27 }
0x1374   :  { %4790 = vrot.lane.b32.xlu0 %v11760_v8, %s9823_s27 }
0x1378   :  { %4780 = vrot.lane.b32.xlu0 %v11733_v10, %s9823_s27 }
0x137c   :  { %4784 = vrot.lane.b32.xlu0 %v11779_v43, %s9823_s27 }
0x1386   :  { %v4353_v37 = vpop.xlane.xlu1 %4352 }
0x1387   :  { %9275 = vrcp.f32 %v4353_v37 }
0x1388   :  { %9277 = vrcp.f32 %v4350_v18 }
0x1389   :  { %9279 = vrcp.f32 %v4356_v13 }
0x138a   :  { %v4347_v17 = vpop.xlane.xlu1 %4346 }
0x138b   :  { %9281 = vrcp.f32 %v4347_v17 }
0x138e   :  { %v4365_v5 = vpop.xlane.xlu1 %4364 }
0x138f   :  { %9283 = vrcp.f32 %v4365_v5 }
0x1390   :  { %9285 = vrcp.f32 %v4362_v45 }
0x1391   :  { %v9276_v50 = vpop.eup %9275  ;;  %9287 = vrcp.f32 %v4368_v31 }
0x1392   :  { %v4359_v9 = vpop.xlane.xlu1 %4358  ;;  %v9278_v38 = vpop.eup %9277  ;;  %v4379_v52 = vmul.f32 %v9276_v50, %v11966_v7 }
0x1393   :  { %9289 = vrcp.f32 %v4359_v9  ;;  %v9280_v48 = vpop.eup %9279  ;;  %v4378_v18 = vmul.f32 %v9278_v38, %v11944_v28 }
0x1394   :  { %v4380_v13 = vmul.f32 %v9280_v48, %v11940_v15 }
0x1395   :  { %v9282_v36 = vpop.eup %9281 }
0x1396   :  { %v4377_v61 = vmul.f32 %v9282_v36, %v11970_v51  ;;  %v4386_v17 = vpack.c.bf16 %v4380_v13, %v4379_v52 }
0x1398   :  { %v4385_v37 = vpack.c.bf16 %v4378_v18, %v4377_v61  ;;  %v4809_v18 = vsel %vm1073_vm8, %v12039_v34, 0 }
0x1399   :  { %v9284_v33 = vpop.eup %9283 }
0x139a   :  { %8434 = vmatprep.mubr.msk.bf16.mxu0 %vm1179_vm7, %v4385_v37  ;;  %v9286_v45 = vpop.eup %9285  ;;  %v4383_v7 = vmul.f32 %v9284_v33, %v11974_v44 }
0x139b   :  { %8435 = vmatmul.mubr.msk.bf16.vlgmr.msra.gmra.mrb[112].mxu0 %vm1179_vm7, %v4386_v17  ;;  %v9288_v31 = vpop.eup %9287  ;;  %v4382_v28 = vmul.f32 %v9286_v45, %v11952_v62 }
0x139c   :  { %8459 = vmatpush3.bf16.msra.mxu0 %v11986_v59  ;;  %v4384_v61 = vmul.f32 %v9288_v31, %v11948_v57 }
0x139d   :  { %v9290_v5 = vpop.eup %9289  ;;  %8460 = vmatprep.subr.bf16.mxu0 %v4694_v19 }
0x139e   :  { %v4381_v36 = vmul.f32 %v9290_v5, %v11978_v23  ;;  %v4388_v15 = vpack.c.bf16 %v4384_v61, %v4383_v7 }
0x13a0   :  { %8461 = vmatpush3.bf16.msra.mxu0 %v4694_v19  ;;  %v4387_v52 = vpack.c.bf16 %v4382_v28, %v4381_v36 }
0x13a1   :  { %8462 = vmatprep.subr.bf16.mxu0 %v4696_v4 }
0x13a2   :  { %8438 = vmatprep.mubr.msk.bf16.mxu0 %vm1179_vm7, %v4387_v52 }
0x13a3   :  { %8439 = vmatmul.mubr.msk.bf16.gmra.mrb[116].mxu0 %vm1179_vm7, %v4388_v15 }
0x13a4   :  { %8463 = vmatpush3.bf16.msra.mxu0 %v4696_v4 }
0x13a5   :  { %8464 = vmatprep.subr.bf16.mxu0 %v4698_v40 }
0x13a8   :  { %8465 = vmatpush3.bf16.msra.mxu0 %v4698_v40 }
0x13a9   :  { %8586 = vmatprep.subr.msk.bf16.mxu0 %vm1073_vm8, %v12039_v34 }
0x13aa   :  { %v4651_v33 = vpop.xlane.xlu1 %4650 }
0x13ae   :  { %v4645_v51 = vpop.xlane.xlu1 %4644 }
0x13b1   :  { %v4654_v44 = vpop.xlane.xlu0 %4653 }
0x13b2   :  { %9291 = vrcp.f32 %v4654_v44  ;;  %v4793_v13 = vpop.permute.xlu1 %4792 }
0x13b3   :  { %9293 = vrcp.f32 %v4645_v51  ;;  %v4815_v15 = vsel %vm1073_vm8, %v4793_v13, 0 }
0x13b4   :  { %9295 = vrcp.f32 %v4651_v33 }
0x13b5   :  { %v4648_v57 = vpop.xlane.xlu0 %4647 }
0x13b6   :  { %9297 = vrcp.f32 %v4648_v57 }
0x13bc   :  { %v9292_v62 = vpop.eup %9291 }
0x13bd   :  { %v9294_v23 = vpop.eup %9293  ;;  %v4678_v50 = vmul.f32 %v9292_v62, %v11997_v49 }
0x13be   :  { %v9296_v59 = vpop.eup %9295  ;;  %v4675_v4 = vmul.f32 %v9294_v23, %v11993_v29 }
0x13bf   :  { %v4677_v9 = vmul.f32 %v9296_v59, %v11989_v25 }
0x13c0   :  { %v9298_v19 = vpop.eup %9297 }
0x13c1   :  { %v4676_v40 = vmul.f32 %v9298_v19, %v12001_v11  ;;  %v4684_v48 = vpack.c.bf16 %v4678_v50, %v4677_v9 }
0x13c3   :  { %v4683_v38 = vpack.c.bf16 %v4676_v40, %v4675_v4 }
0x13c5   :  { %8466 = vmatprep.mubr.msk.bf16.mxu0 %vm1179_vm7, %v4683_v38 }
0x13c6   :  { %8467 = vmatmul.mubr.msk.bf16.vlgmr.msra.gmra.mrb[120].mxu0 %vm1179_vm7, %v4684_v48 }
0x13c7   :  { %8475 = vmatpush3.bf16.xpose.msra.mxu0 %v4809_v18 }
0x13e3   :  { %v4663_v37 = vpop.xlane.xlu0 %4662  ;;  %v4660_v17 = vpop.xlane.xlu1 %4659 }
0x13e4   :  { %9299 = vrcp.f32 %v4660_v17 }
0x13e7   :  { %v4657_v49 = vpop.xlane.xlu0 %4656  ;;  %v4795_v33 = vpop.permute.xlu1 %4794 }
0x13e8   :  { %9301 = vrcp.f32 %v4657_v49 }
0x13e9   :  { %9303 = vrcp.f32 %v4663_v37 }
0x13eb   :  { %v4666_v29 = vpop.xlane.xlu0 %4665 }
0x13ec   :  { %9305 = vrcp.f32 %v4666_v29 }
0x13ee   :  { %v9300_v11 = vpop.eup %9299 }
0x13ef   :  { %v4791_v25 = vpop.permute.xlu0 %4790  ;;  %v4680_v5 = vmul.f32 %v9300_v11, %v12011_v54  ;;  %v4818_v54 = vsel %vm1073_vm8, %v4795_v33, 0 }
0x13f0   :  { %8587 = vmatprep.subr.msk.bf16.mxu0 %vm1073_vm8, %v4791_v25  ;;  %v4812_v45 = vsel %vm1073_vm8, %v4791_v25, 0 }
0x13f1   :  { %8477 = vmatpush3.bf16.xpose.msra.mxu0 %v4812_v45 }
0x13f2   :  { %v9302_v31 = vpop.eup %9301  ;;  %8588 = vmatprep.subr.msk.bf16.mxu0 %vm1073_vm8, %v4793_v13 }
0x13f3   :  { %v4679_v34 = vmul.f32 %v9302_v31, %v12019_v56  ;;  %v9304_v7 = vpop.eup %9303  ;;  %v4781_v44 = vpop.permute.xlu0 %4780 }
0x13f4   :  { %v4681_v61 = vmul.f32 %v9304_v7, %v12013_v21  ;;  %v4783_v56 = vpop.permute.xlu1 %4782 }
0x13f5   :  { %v4685_v36 = vpack.c.bf16 %v4680_v5, %v4679_v34 }
0x13f6   :  { %v9306_v28 = vpop.eup %9305 }
0x13f7   :  { %8470 = vmatprep.mubr.msk.bf16.mxu0 %vm1179_vm7, %v4685_v36  ;;  %v4682_v52 = vmul.f32 %v9306_v28, %v12023_v22  ;;  %v4785_v57 = vpop.permute.xlu0 %4784 }
0x13f8   :  { %v4787_v21 = vpop.permute.xlu1 %4786 }
0x13f9   :  { %8479 = vmatpush3.bf16.xpose.msra.mxu0 %v4815_v15  ;;  %v4686_v51 = vpack.c.bf16 %v4682_v52, %v4681_v61 }
0x13fa   :  { %8589 = vmatprep.subr.msk.bf16.mxu0 %vm1073_vm8, %v4795_v33 }
0x13fb   :  { %8471 = vmatmul.mubr.msk.bf16.gmra.mrb[124].mxu0 %vm1179_vm7, %v4686_v51 }
0x13fc   :  { %8482 = vmatprep.mubr.msk.bf16.mxu0 %vm1073_vm8, %v4781_v44 }
0x1401   :  { %8481 = vmatpush3.bf16.xpose.msra.mxu0 %v4818_v54 }
0x1408   :  { %8483 = vmatmul.mubr.msk.bf16.vlgmr.msra.gmra.mrb[128].mxu0 %vm1073_vm8, %v4783_v56 }
0x1409   :  { %8486 = vmatprep.mubr.msk.bf16.mxu0 %vm1073_vm8, %v4785_v57 }
0x1410   :  { %8487 = vmatmul.mubr.msk.bf16.gmra.mrb[132].mxu0 %vm1073_vm8, %v4787_v21 }
0x146e   :  { %v12080_v22 = vpop.f32.mrb[112].mxu0 }
0x146f   :  { %v12082_v62 = vpop.f32.mrb[113].mxu0 }
0x1470   :  { %v12084_v23 = vpop.f32.mrb[114].mxu0 }
0x1471   :  { %v12086_v59 = vpop.f32.mrb[115].mxu0 }
0x1476   :  { %v12088_v19 = vpop.f32.mrb[116].mxu0 }
0x1477   :  { %v12090_v50 = vpop.f32.mrb[117].mxu0 }
0x1478   :  { %v12092_v4 = vpop.f32.mrb[118].mxu0 }
0x1479   :  { %v12094_v40 = vpop.f32.mrb[119].mxu0 }
0x1499   :  { %v12096_v9 = vpop.f32.mrb[120].mxu0 }
0x149a   :  { %v12098_v38 = vpop.f32.mrb[121].mxu0 }
0x149b   :  { %v12100_v48 = vpop.f32.mrb[122].mxu0 }
0x149c   :  { %v12104_v13 = vpop.f32.mrb[123].mxu0 }
0x14ce   :  { %v12108_v17 = vpop.f32.mrb[124].mxu0 }
0x14cf   :  { %v12110_v49 = vpop.f32.mrb[125].mxu0 }
0x14d0   :  { %v12112_v29 = vpop.f32.mrb[126].mxu0 }
0x14d1   :  { %v12116_v11 = vpop.f32.mrb[127].mxu0 }
0x14db   :  { %v8484_v31 = vpop.f32.mrb[128].mxu0 }
0x14dc   :  { %v4887_v34 = vmul.f32 0.17677669, %v8484_v31  ;;  %v4854_v5 = vpop.f32.mrb[129].mxu0 }
0x14dd   :  { %v4885_v7 = vmul.f32 0.17677669, %v4854_v5  ;;  %v8485_v36 = vpop.f32.mrb[130].mxu0 }
0x14de   :  { %v4895_v28 = vsel %vm10450_vm1, %v4887_v34, -1e+09  ;;  %v4857_v61 = vpop.f32.mrb[131].mxu0  ;;  %v4888_v51 = vmul.f32 0.17677669, %v8485_v36 }
0x14df   :  { %v4886_v52 = vmul.f32 0.17677669, %v4857_v61  ;;  %v4907_v15 = vsel %vm1179_vm7, %v4895_v28, -inf  ;;  %v4893_v33 = vsel %vm10467_vm6, %v4885_v7, -1e+09 }
0x14e0   :  { %4908 = vmax.xlane.f32.xlu0 %v4907_v15  ;;  %v4901_v57 = vsel %vm1179_vm7, %v4893_v33, -inf  ;;  %v4896_v21 = vsel %vm10496_vm15, %v4888_v51, -1e+09 }
0x14e1   :  { %v4894_v44 = vsel %vm10487_vm13, %v4886_v52, -1e+09  ;;  %v4910_v52 = vsel %vm1179_vm7, %v4896_v21, -inf }
0x14e2   :  { %v4904_v54 = vsel %vm1179_vm7, %v4894_v44, -inf }
0x14e3   :  { %4905 = vmax.xlane.f32.xlu1 %v4904_v54  ;;  %v8488_v56 = vpop.f32.mrb[132].mxu0 }
0x14e4   :  { %v4891_v31 = vmul.f32 0.17677669, %v8488_v56  ;;  %4902 = vmax.xlane.f32.xlu0 %v4901_v57  ;;  %v4870_v34 = vpop.f32.mrb[133].mxu0 }
0x14e5   :  { %v4889_v5 = vmul.f32 0.17677669, %v4870_v34  ;;  %v8489_v61 = vpop.f32.mrb[134].mxu0 }
0x14e6   :  { %v4899_v7 = vsel %vm10522_vm5, %v4891_v31, -1e+09  ;;  %v4873_v36 = vpop.f32.mrb[135].mxu0  ;;  %v4892_v25 = vmul.f32 0.17677669, %v8489_v61 }
0x14e7   :  { %v4890_v15 = vmul.f32 0.17677669, %v4873_v36  ;;  %v4919_v54 = vsel %vm1179_vm7, %v4899_v7, -inf  ;;  %v4897_v45 = vsel %vm10533_vm12, %v4889_v5, -1e+09 }
0x14e8   :  { %4911 = vmax.xlane.f32.xlu0 %v4910_v52  ;;  %4920 = vmax.xlane.f32.xlu1 %v4919_v54  ;;  %v4913_v57 = vsel %vm1179_vm7, %v4897_v45, -inf  ;;  %v4900_v31 = vsel %vm10539_vm10, %v4892_v25, -1e+09 }
0x14e9   :  { %v12139_v51 = vsel %vm10563_vm11, %v4890_v15, -1e+09  ;;  %v4922_v34 = vsel %vm1179_vm7, %v4900_v31, -inf }
0x14ea   :  { %v4916_v56 = vsel %vm1179_vm7, %v12139_v51, -inf }
0x14ec   :  { %4914 = vmax.xlane.f32.xlu1 %v4913_v57  ;;  %4917 = vmax.xlane.f32.xlu0 %v4916_v56 }
0x14f0   :  { %4923 = vmax.xlane.f32.xlu0 %v4922_v34 }
0x14fd   :  { %4993 = vrot.lane.b32.xlu1 %v11762_v32, %s9823_s27 }
0x1501   :  { %4997 = vrot.lane.b32.xlu1 %v11806_v47, %s9823_s27 }
0x1505   :  { %4999 = vrot.lane.b32.xlu1 %v11802_v41, %s9823_s27 }
0x1506   :  { %4995 = vrot.lane.b32.xlu0 %v11758_v42, %s9823_s27 }
0x1509   :  { %5090 = vrot.lane.b32.xlu1 %v11735_v6, %s9833_s19 }
0x156d   :  { %v4909_v25 = vpop.xlane.xlu0 %4908 }
0x156e   :  { %v4927_v5 = vsub.f32 %v4895_v28, %v4909_v25 }
0x1570   :  { %v4937_v61 = vmul.f32 1.442695, %v4927_v5  ;;  %v4906_v36 = vpop.xlane.xlu1 %4905 }
0x1571   :  { %v4903_v15 = vpop.xlane.xlu0 %4902  ;;  %v4926_v54 = vsub.f32 %v4894_v44, %v4906_v36 }
0x1572   :  { %9307 = vpow2.f32 %v4937_v61  ;;  %v4925_v52 = vsub.f32 %v4893_v33, %v4903_v15 }
0x1573   :  { %v4935_v37 = vmul.f32 1.442695, %v4926_v54 }
0x1574   :  { %v4933_v56 = vmul.f32 1.442695, %v4925_v52 }
0x1575   :  { %v4912_v57 = vpop.xlane.xlu0 %4911  ;;  %v4921_v34 = vpop.xlane.xlu1 %4920 }
0x1576   :  { %9309 = vpow2.f32 %v4933_v56  ;;  %v4928_v18 = vsub.f32 %v4896_v21, %v4912_v57  ;;  %v4931_v2 = vsub.f32 %v4899_v7, %v4921_v34 }
0x1578   :  { %v4939_v16 = vmul.f32 1.442695, %v4928_v18  ;;  %v4945_v28 = vmul.f32 1.442695, %v4931_v2 }
0x1579   :  { %v4918_v55 = vpop.xlane.xlu0 %4917  ;;  %v4915_v53 = vpop.xlane.xlu1 %4914 }
0x157a   :  { %9311 = vpow2.f32 %v4939_v16  ;;  %v4929_v25 = vsub.f32 %v4897_v45, %v4915_v53 }
0x157b   :  { %9313 = vpow2.f32 %v4935_v37 }
0x157c   :  { %v12157_v6 = vpop.eup %9307  ;;  %9315 = vpow2.f32 %v4945_v28  ;;  %v4941_v18 = vmul.f32 1.442695, %v4929_v25 }
0x157d   :  { %v4924_v5 = vpop.xlane.xlu0 %4923  ;;  %v4994_v61 = vpop.permute.xlu1 %4993  ;;  %v4955_v33 = vsel %vm1179_vm7, %v12157_v6, 0.0 }
0x157e   :  { %4956 = vadd.xlane.f32.xlu1 %v4955_v33  ;;  %8490 = vmatprep.subr.bf16.mxu1 %v4994_v61  ;;  %v4932_v21 = vsub.f32 %v4900_v31, %v4924_v5  ;;  %9317 = vpow2.f32 %v4941_v18  ;;  %v4930_v5 = vsub.f32 %v12139_v51, %v4918_v55 }
0x157f   :  { %8491 = vmatpush3.bf16.msra.mxu1 %v4994_v61 }
0x1580   :  { %v12161_v44 = vpop.eup %9309  ;;  %v4947_v2 = vmul.f32 1.442695, %v4932_v21  ;;  %v4943_v61 = vmul.f32 1.442695, %v4930_v5 }
0x1581   :  { %v4996_v7 = vpop.permute.xlu0 %4995  ;;  %v4998_v16 = vpop.permute.xlu1 %4997  ;;  %v4949_v37 = vsel %vm1179_vm7, %v12161_v44, 0.0 }
0x1582   :  { %4950 = vadd.xlane.f32.xlu1 %v4949_v37  ;;  %8492 = vmatprep.subr.bf16.mxu1 %v4996_v7  ;;  %9319 = vpow2.f32 %v4947_v2 }
0x1583   :  { %8493 = vmatpush3.bf16.msra.mxu1 %v4996_v7  ;;  %9321 = vpow2.f32 %v4943_v61 }
0x1584   :  { %v9312_v53 = vpop.eup %9311  ;;  %8494 = vmatprep.subr.bf16.mxu1 %v4998_v16 }
0x1585   :  { %v5000_v45 = vpop.permute.xlu1 %4999  ;;  %v4958_v36 = vsel %vm1179_vm7, %v9312_v53, 0.0  ;;  %v9314_v15 = vpop.eup %9313 }
0x1586   :  { %4959 = vadd.xlane.f32.xlu0 %v4958_v36  ;;  %v4952_v31 = vsel %vm1179_vm7, %v9314_v15, 0.0  ;;  %v12167_v52 = vpop.eup %9315 }
0x1587   :  { %8495 = vmatpush3.bf16.msra.mxu1 %v4998_v16  ;;  %v4967_v56 = vsel %vm1179_vm7, %v12167_v52, 0.0 }
0x1588   :  { %8496 = vmatprep.subr.bf16.mxu1 %v5000_v45  ;;  %v12172_v57 = vpop.eup %9317 }
0x1589   :  { %v5091_v54 = vpop.permute.xlu1 %5090  ;;  %v4961_v34 = vsel %vm1179_vm7, %v12172_v57, 0.0 }
0x158a   :  { %4953 = vadd.xlane.f32.xlu0 %v4952_v31 }
0x158b   :  { %8497 = vmatpush3.bf16.msra.mxu1 %v5000_v45 }
0x158c   :  { %8590 = vmatprep.subr.msk.bf16.mxu1 %vm1073_vm8, %v5091_v54  ;;  %v12176_v28 = vpop.eup %9319 }
0x158d   :  { %v4970_v25 = vsel %vm1179_vm7, %v12176_v28, 0.0  ;;  %v9322_v33 = vpop.eup %9321 }
0x158e   :  { %4968 = vadd.xlane.f32.xlu0 %v4967_v56 }
0x1592   :  { %4962 = vadd.xlane.f32.xlu0 %v4961_v34  ;;  %v5111_v34 = vsel %vm1073_vm8, %v5091_v54, 0 }
0x1593   :  { %5094 = vrot.lane.b32.xlu1 %v11782_v39, %s9833_s19  ;;  %v4964_v39 = vsel %vm1179_vm7, %v9322_v33, 0.0 }
0x1596   :  { %4971 = vadd.xlane.f32.xlu0 %v4970_v25 }
0x15ac   :  { %5092 = vrot.lane.b32.xlu0 %v11760_v8, %s9833_s19 }
0x15b0   :  { %5082 = vrot.lane.b32.xlu0 %v11733_v10, %s9833_s19 }
0x15b4   :  { %5086 = vrot.lane.b32.xlu0 %v11779_v43, %s9833_s19 }
0x15b7   :  { %4965 = vadd.xlane.f32.xlu1 %v4964_v39 }
0x15c8   :  { %5096 = vrot.lane.b32.xlu1 %v11804_v27, %s9833_s19 }
0x15cc   :  { %5084 = vrot.lane.b32.xlu1 %v11756_v46, %s9833_s19 }
0x15d0   :  { %5088 = vrot.lane.b32.xlu1 %v11800_v1, %s9833_s19 }
0x160b   :  { %v4957_v55 = vpop.xlane.xlu1 %4956 }
0x160f   :  { %v4951_v8 = vpop.xlane.xlu1 %4950 }
0x1613   :  { %v4960_v51 = vpop.xlane.xlu0 %4959  ;;  %v5095_v25 = vpop.permute.xlu1 %5094 }
0x1614   :  { %9323 = vrcp.f32 %v4960_v51 }
0x1615   :  { %9325 = vrcp.f32 %v4951_v8 }
0x1616   :  { %9327 = vrcp.f32 %v4957_v55 }
0x1617   :  { %v4954_v10 = vpop.xlane.xlu0 %4953 }
0x1618   :  { %9329 = vrcp.f32 %v4954_v10 }
0x161b   :  { %v4969_v43 = vpop.xlane.xlu0 %4968 }
0x161e   :  { %v9324_v18 = vpop.eup %9323 }
0x161f   :  { %v4963_v21 = vpop.xlane.xlu0 %4962  ;;  %v9326_v7 = vpop.eup %9325  ;;  %v4984_v37 = vmul.f32 %v9324_v18, %v9312_v53 }
0x1620   :  { %v9328_v16 = vpop.eup %9327  ;;  %v4981_v46 = vmul.f32 %v9326_v7, %v12161_v44 }
0x1621   :  { %v4983_v1 = vmul.f32 %v9328_v16, %v12157_v6  ;;  %v5117_v6 = vsel %vm1073_vm8, %v5095_v25, 0 }
0x1622   :  { %v9330_v27 = vpop.eup %9329 }
0x1623   :  { %v4972_v2 = vpop.xlane.xlu0 %4971  ;;  %v4982_v45 = vmul.f32 %v9330_v27, %v9314_v15  ;;  %v4990_v31 = vpack.c.bf16 %v4984_v37, %v4983_v1 }
0x1624   :  { %9331 = vrcp.f32 %v4972_v2 }
0x1625   :  { %v4989_v36 = vpack.c.bf16 %v4982_v45, %v4981_v46  ;;  %9333 = vrcp.f32 %v4963_v21 }
0x1626   :  { %9335 = vrcp.f32 %v4969_v43 }
0x1627   :  { %v5093_v56 = vpop.permute.xlu0 %5092  ;;  %8498 = vmatprep.mubr.msk.bf16.mxu1 %vm1179_vm7, %v4989_v36 }
0x1628   :  { %8499 = vmatmul.mubr.msk.bf16.vlgmr.msra.gmra.mrb[104].mxu1 %vm1179_vm7, %v4990_v31  ;;  %v5114_v53 = vsel %vm1073_vm8, %v5093_v56, 0 }
0x1629   :  { %8507 = vmatpush3.bf16.xpose.msra.mxu1 %v5111_v34 }
0x162a   :  { %8591 = vmatprep.subr.msk.bf16.mxu1 %vm1073_vm8, %v5093_v56 }
0x162b   :  { %v5083_v7 = vpop.permute.xlu0 %5082 }
0x162e   :  { %v9332_v5 = vpop.eup %9331 }
0x162f   :  { %v9334_v61 = vpop.eup %9333  ;;  %v4988_v8 = vmul.f32 %v9332_v5, %v12176_v28  ;;  %v5087_v27 = vpop.permute.xlu0 %5086 }
0x1630   :  { %v9336_v39 = vpop.eup %9335  ;;  %v4985_v51 = vmul.f32 %v9334_v61, %v12172_v57 }
0x1631   :  { %8509 = vmatpush3.bf16.xpose.msra.mxu1 %v5114_v53  ;;  %v4987_v18 = vmul.f32 %v9336_v39, %v12167_v52 }
0x1632   :  { %8592 = vmatprep.subr.msk.bf16.mxu1 %vm1073_vm8, %v5095_v25 }
0x1633   :  { %v4992_v21 = vpack.c.bf16 %v4988_v8, %v4987_v18 }
0x1639   :  { %8511 = vmatpush3.bf16.xpose.msra.mxu1 %v5117_v6 }
0x1644   :  { %v4966_v44 = vpop.xlane.xlu1 %4965 }
0x1645   :  { %9337 = vrcp.f32 %v4966_v44 }
0x1648   :  { %v5097_v15 = vpop.permute.xlu1 %5096 }
0x1649   :  { %8593 = vmatprep.subr.msk.bf16.mxu1 %vm1073_vm8, %v5097_v15  ;;  %v5120_v54 = vsel %vm1073_vm8, %v5097_v15, 0 }
0x164a   :  { %8513 = vmatpush3.bf16.xpose.msra.mxu1 %v5120_v54 }
0x164c   :  { %v5085_v16 = vpop.permute.xlu1 %5084 }
0x164f   :  { %v9338_v55 = vpop.eup %9337 }
0x1650   :  { %v4986_v10 = vmul.f32 %v9338_v55, %v9322_v33  ;;  %v5089_v28 = vpop.permute.xlu1 %5088 }
0x1652   :  { %v4991_v43 = vpack.c.bf16 %v4986_v10, %v4985_v51 }
0x1654   :  { %8502 = vmatprep.mubr.msk.bf16.mxu1 %vm1179_vm7, %v4991_v43 }
0x1655   :  { %8503 = vmatmul.mubr.msk.bf16.gmra.mrb[108].mxu1 %vm1179_vm7, %v4992_v21 }
0x1656   :  { %8514 = vmatprep.mubr.msk.bf16.mxu1 %vm1073_vm8, %v5083_v7 }
0x165d   :  { %8515 = vmatmul.mubr.msk.bf16.vlgmr.msra.gmra.mrb[112].mxu1 %vm1073_vm8, %v5085_v16 }
0x165e   :  { %8518 = vmatprep.mubr.msk.bf16.mxu1 %vm1073_vm8, %v5087_v27 }
0x1665   :  { %8519 = vmatmul.mubr.msk.bf16.gmra.mrb[116].mxu1 %vm1073_vm8, %v5089_v28 }
0x1666   :  { %6034 = vmatprep.mubr.bf16.mxu1 %v13466_v3 }
0x16fb   :  { %v12217_v52 = vpop.f32.mrb[104].mxu1 }
0x16fc   :  { %v12219_v57 = vpop.f32.mrb[105].mxu1 }
0x16fd   :  { %v12221_v33 = vpop.f32.mrb[106].mxu1 }
0x16fe   :  { %v8702_v37 = vpack.i.bf16 %v12221_v33, %v12217_v52  ;;  %v12225_v2 = vpop.f32.mrb[107].mxu1 }
0x16ff   :  { %v8697_v46 = vpack.i.bf16 %v12225_v2, %v12219_v57 }
0x1728   :  { %v12229_v45 = vpop.f32.mrb[108].mxu1 }
0x1729   :  { %v12231_v1 = vpop.f32.mrb[109].mxu1 }
0x172a   :  { %v12233_v36 = vpop.f32.mrb[110].mxu1 }
0x172b   :  { %v8732_v31 = vpack.i.bf16 %v12233_v36, %v12229_v45  ;;  %v12237_v56 = vpop.f32.mrb[111].mxu1 }
0x172c   :  { %v8727_v34 = vpack.i.bf16 %v12237_v56, %v12231_v1 }
0x1730   :  { %v8516_v53 = vpop.f32.mrb[112].mxu1 }
0x1731   :  { %v5156_v25 = vpop.f32.mrb[113].mxu1  ;;  %v5189_v6 = vmul.f32 0.17677669, %v8516_v53 }
0x1732   :  { %v5187_v44 = vmul.f32 0.17677669, %v5156_v25  ;;  %v8517_v15 = vpop.f32.mrb[114].mxu1 }
0x1733   :  { %v5159_v54 = vpop.f32.mrb[115].mxu1  ;;  %v5190_v39 = vmul.f32 0.17677669, %v8517_v15  ;;  %v5197_v8 = vsel %vm10450_vm1, %v5189_v6, -1e+09 }
0x1734   :  { %v5195_v5 = vsel %vm10467_vm6, %v5187_v44, -1e+09  ;;  %v5188_v61 = vmul.f32 0.17677669, %v5159_v54  ;;  %v5209_v21 = vsel %vm1179_vm7, %v5197_v8, -inf }
0x1735   :  { %v5203_v55 = vsel %vm1179_vm7, %v5195_v5, -inf  ;;  %v5198_v43 = vsel %vm10496_vm15, %v5190_v39, -1e+09 }
0x1736   :  { %v5196_v51 = vsel %vm10487_vm13, %v5188_v61, -1e+09  ;;  %5204 = vmax.xlane.f32.xlu0 %v5203_v55  ;;  %v5212_v53 = vsel %vm1179_vm7, %v5198_v43, -inf }
0x1737   :  { %v5206_v10 = vsel %vm1179_vm7, %v5196_v51, -inf }
0x1738   :  { %5207 = vmax.xlane.f32.xlu1 %v5206_v10  ;;  %v8520_v18 = vpop.f32.mrb[116].mxu1 }
0x1739   :  { %v5172_v12 = vpop.f32.mrb[117].mxu1  ;;  %v5193_v7 = vmul.f32 0.17677669, %v8520_v18 }
0x173a   :  { %v5191_v16 = vmul.f32 0.17677669, %v5172_v12  ;;  %5210 = vmax.xlane.f32.xlu0 %v5209_v21  ;;  %v8521_v27 = vpop.f32.mrb[118].mxu1 }
0x173b   :  { %v5175_v20 = vpop.f32.mrb[119].mxu1  ;;  %v5201_v30 = vsel %vm10522_vm5, %v5193_v7, -1e+09  ;;  %v5194_v6 = vmul.f32 0.17677669, %v8521_v27 }
0x173c   :  { %v5199_v14 = vsel %vm10533_vm12, %v5191_v16, -1e+09  ;;  %v5192_v28 = vmul.f32 0.17677669, %v5175_v20  ;;  %v5221_v15 = vsel %vm1179_vm7, %v5201_v30, -inf }
0x173d   :  { %v5215_v25 = vsel %vm1179_vm7, %v5199_v14, -inf  ;;  %v5202_v26 = vsel %vm10539_vm10, %v5194_v6, -1e+09 }
0x173e   :  { %v5200_v44 = vsel %vm10563_vm11, %v5192_v28, -1e+09  ;;  %5213 = vmax.xlane.f32.xlu0 %v5212_v53  ;;  %5216 = vmax.xlane.f32.xlu1 %v5215_v25  ;;  %v5224_v61 = vsel %vm1179_vm7, %v5202_v26, -inf }
0x173f   :  { %v5218_v54 = vsel %vm1179_vm7, %v5200_v44, -inf }
0x1742   :  { %5222 = vmax.xlane.f32.xlu1 %v5221_v15  ;;  %5219 = vmax.xlane.f32.xlu0 %v5218_v54 }
0x1746   :  { %5225 = vmax.xlane.f32.xlu0 %v5224_v61 }
0x1753   :  { %5295 = vrot.lane.b32.xlu1 %v11762_v32, %s9833_s19 }
0x1757   :  { %5297 = vrot.lane.b32.xlu1 %v11758_v42, %s9833_s19 }
0x17c3   :  { %v5205_v58 = vpop.xlane.xlu0 %5204 }
0x17c4   :  { %v5227_v60 = vsub.f32 %v5195_v5, %v5205_v58 }
0x17c5   :  { %v5208_v39 = vpop.xlane.xlu1 %5207 }
0x17c6   :  { %v5235_v18 = vmul.f32 1.442695, %v5227_v60  ;;  %v5228_v12 = vsub.f32 %v5196_v51, %v5208_v39 }
0x17c7   :  { %v5211_v55 = vpop.xlane.xlu0 %5210 }
0x17c8   :  { %v5229_v10 = vsub.f32 %v5197_v8, %v5211_v55  ;;  %v5237_v27 = vmul.f32 1.442695, %v5228_v12 }
0x17ca   :  { %v5239_v0 = vmul.f32 1.442695, %v5229_v10 }
0x17cb   :  { %v5214_v21 = vpop.xlane.xlu0 %5213  ;;  %v5217_v7 = vpop.xlane.xlu1 %5216 }
0x17cc   :  { %9339 = vpow2.f32 %v5239_v0  ;;  %v5230_v16 = vsub.f32 %v5198_v43, %v5214_v21  ;;  %v5231_v42 = vsub.f32 %v5199_v14, %v5217_v7 }
0x17cd   :  { %9341 = vpow2.f32 %v5235_v18 }
0x17ce   :  { %v5241_v20 = vmul.f32 1.442695, %v5230_v16  ;;  %v5243_v51 = vmul.f32 1.442695, %v5231_v42 }
0x17cf   :  { %v5220_v28 = vpop.xlane.xlu0 %5219  ;;  %v5223_v32 = vpop.xlane.xlu1 %5222 }
0x17d0   :  { %9343 = vpow2.f32 %v5241_v20  ;;  %v5233_v53 = vsub.f32 %v5201_v30, %v5223_v32  ;;  %v5232_v14 = vsub.f32 %v5200_v44, %v5220_v28  ;;  %v13491_v20 = vpack.i.bf16 %v12104_v13, %v12098_v38 }
0x17d1   :  { %9345 = vpow2.f32 %v5237_v27  ;;  %v13492_v28 = vpack.i.bf16 %v12100_v48, %v12096_v9 }
0x17d2   :  { %v5247_v5 = vmul.f32 1.442695, %v5233_v53 }
0x17d3   :  { %v5226_v25 = vpop.xlane.xlu0 %5225  ;;  %v5296_v6 = vpop.permute.xlu1 %5295 }
0x17d4   :  { %8522 = vmatprep.subr.bf16.mxu0 %v5296_v6  ;;  %9347 = vpow2.f32 %v5247_v5  ;;  %v5234_v15 = vsub.f32 %v5202_v26, %v5226_v25  ;;  %v5245_v26 = vmul.f32 1.442695, %v5232_v14 }
0x17d5   :  { %8523 = vmatpush3.bf16.msra.mxu0 %v5296_v6  ;;  %9349 = vpow2.f32 %v5243_v51 }
0x17d6   :  { %v12269_v8 = vpop.eup %9339  ;;  %v5249_v58 = vmul.f32 1.442695, %v5234_v15 }
0x17d7   :  { %v5298_v43 = vpop.permute.xlu1 %5297  ;;  %v5257_v54 = vsel %vm1179_vm7, %v12269_v8, 0.0  ;;  %v9342_v61 = vpop.eup %9341 }
0x17d8   :  { %5258 = vadd.xlane.f32.xlu1 %v5257_v54  ;;  %8524 = vmatprep.subr.bf16.mxu0 %v5298_v43  ;;  %v5251_v60 = vsel %vm1179_vm7, %v9342_v61, 0.0  ;;  %9351 = vpow2.f32 %v5249_v58 }
0x17d9   :  { %8525 = vmatpush3.bf16.msra.mxu0 %v5298_v43  ;;  %9353 = vpow2.f32 %v5245_v26 }
0x17da   :  { %v9344_v30 = vpop.eup %9343 }
0x17db   :  { %v5260_v39 = vsel %vm1179_vm7, %v9344_v30, 0.0  ;;  %v9346_v55 = vpop.eup %9345 }
0x17dc   :  { %5252 = vadd.xlane.f32.xlu1 %v5251_v60  ;;  %5261 = vadd.xlane.f32.xlu0 %v5260_v39  ;;  %v5254_v10 = vsel %vm1179_vm7, %v9346_v55, 0.0 }
0x17de   :  { %v12276_v18 = vpop.eup %9347 }
0x17df   :  { %v5269_v12 = vsel %vm1179_vm7, %v12276_v18, 0.0  ;;  %v9350_v44 = vpop.eup %9349 }
0x17e0   :  { %5255 = vadd.xlane.f32.xlu0 %v5254_v10  ;;  %v5263_v0 = vsel %vm1179_vm7, %v9350_v44, 0.0  ;;  %v8916_v10 = vld [vmem:[%s13319_s10 + $0x48] sm:$0xff]  }
0x17e2   :  { %v9352_v21 = vpop.eup %9351 }
0x17e3   :  { %v5272_v7 = vsel %vm1179_vm7, %v9352_v21, 0.0  ;;  %v9354_v16 = vpop.eup %9353 }
0x17e4   :  { %5270 = vadd.xlane.f32.xlu0 %v5269_v12  ;;  %v5266_v27 = vsel %vm1179_vm7, %v9354_v16, 0.0  ;;  %v8917_v12 = vld [vmem:[%s13319_s10 + $0x50] sm:$0xff]  }
0x17e8   :  { %5264 = vadd.xlane.f32.xlu0 %v5263_v0  ;;  %v8920_v0 = vld [vmem:[%s13319_s10 + $0x68] sm:$0xff]  }
0x17ec   :  { %5273 = vadd.xlane.f32.xlu0 %v5272_v7  ;;  %v8922_v7 = vld [vmem:[%s13319_s10 + $0x78] sm:$0xff]  }
0x17ed   :  { %5301 = vrot.lane.b32.xlu1 %v11802_v41, %s9833_s19 }
0x17f0   :  { %5267 = vadd.xlane.f32.xlu0 %v5266_v27 }
0x17f1   :  { %8688 = vrot.lane.b32.xlu1 %v13491_v20, %s9833_s19 }
0x17f5   :  { %8693 = vrot.lane.b32.xlu1 %v13492_v28, %s9833_s19 }
0x17f9   :  { %8698 = vrot.lane.b32.xlu1 %v8697_v46, %s9823_s27 }
0x17fd   :  { %8703 = vrot.lane.b32.xlu1 %v8702_v37, %s9823_s27 }
0x1806   :  { %5299 = vrot.lane.b32.xlu0 %v11806_v47, %s9833_s19 }
0x1865   :  { %v5259_v41 = vpop.xlane.xlu1 %5258 }
0x1869   :  { %v5262_v38 = vpop.xlane.xlu0 %5261  ;;  %v5253_v13 = vpop.xlane.xlu1 %5252 }
0x186a   :  { %9355 = vrcp.f32 %v5253_v13 }
0x186d   :  { %v5256_v32 = vpop.xlane.xlu0 %5255  ;;  %v5302_v25 = vpop.permute.xlu1 %5301 }
0x186e   :  { %9357 = vrcp.f32 %v5256_v32  ;;  %v13493_v32 = vpack.i.bf16 %v12112_v29, %v12108_v17 }
0x186f   :  { %9359 = vrcp.f32 %v5262_v38 }
0x1870   :  { %9361 = vrcp.f32 %v5259_v41 }
0x1871   :  { %v5271_v9 = vpop.xlane.xlu0 %5270  ;;  %v8689_v17 = vpop.permute.xlu1 %8688 }
0x1874   :  { %v9356_v53 = vpop.eup %9355 }
0x1875   :  { %v5265_v48 = vpop.xlane.xlu0 %5264  ;;  %v5283_v46 = vmul.f32 %v9356_v53, %v9342_v61 }
0x1876   :  { %9363 = vrcp.f32 %v5265_v48  ;;  %v13494_v48 = vpack.i.bf16 %v12116_v11, %v12110_v49  ;;  %v8694_v49 = vpop.permute.xlu1 %8693 }
0x1878   :  { %v9358_v57 = vpop.eup %9357 }
0x1879   :  { %v5274_v2 = vpop.xlane.xlu0 %5273  ;;  %v5284_v42 = vmul.f32 %v9358_v57, %v9346_v55  ;;  %v9360_v47 = vpop.eup %9359 }
0x187a   :  { %v9362_v5 = vpop.eup %9361  ;;  %v5286_v6 = vmul.f32 %v9360_v47, %v9344_v30  ;;  %v8699_v29 = vpop.permute.xlu1 %8698  ;;  %v8695_v47 = vunpack.i.l.bf16 %v8694_v49 }
0x187b   :  { %v5291_v52 = vpack.c.bf16 %v5284_v42, %v5283_v46  ;;  %v5285_v15 = vmul.f32 %v9362_v5, %v12269_v8  ;;  %v8915_v8 = vld [vmem:[%s13319_s10 + $0x40] sm:$0xff]   ;;  %v8691_v42 = vunpack.i.h.bf16 %v8689_v17  ;;  %v8701_v36 = vunpack.i.h.bf16 %v8699_v29 }
0x187d   :  { %v5268_v33 = vpop.xlane.xlu0 %5267  ;;  %8530 = vmatprep.mubr.msk.bf16.mxu0 %vm1179_vm7, %v5291_v52  ;;  %v5292_v54 = vpack.c.bf16 %v5286_v6, %v5285_v15  ;;  %v8690_v52 = vunpack.i.l.bf16 %v8689_v17  ;;  %v5481_v1 = vsel %vm1073_vm8, %v12086_v59, %v8691_v42 }
0x187e   :  { %9365 = vrcp.f32 %v5268_v33  ;;  %v8704_v11 = vpop.permute.xlu1 %8703  ;;  %v8696_v33 = vunpack.i.h.bf16 %v8694_v49 }
0x187f   :  { %9367 = vrcp.f32 %v5274_v2  ;;  %v8705_v45 = vunpack.i.l.bf16 %v8704_v11  ;;  %v5480_v56 = vsel %vm1073_vm8, %v12082_v62, %v8690_v52  ;;  %v5489_v62 = vsel %vm1179_vm7, %v5481_v1, %v8701_v36  ;;  %v7705_v52 = vld [vmem:[#allocation7 + $0x1] ss:$0 sm:$0xff] }
0x1880   :  { %9369 = vrcp.f32 %v5271_v9  ;;  %v9364_v51 = vpop.eup %9363  ;;  %v5483_v5 = vsel %vm1073_vm8, %v12084_v23, %v8696_v33 }
0x1881   :  { %v5300_v37 = vpop.permute.xlu0 %5299  ;;  %v5287_v14 = vmul.f32 %v9364_v51, %v9350_v44  ;;  %v8919_v44 = vld [vmem:[%s13319_s10 + $0x60] sm:$0xff]  }
0x1882   :  { %8526 = vmatprep.subr.bf16.mxu0 %v5300_v37 }
0x1883   :  { %8527 = vmatpush3.bf16.msra.mxu0 %v5300_v37  ;;  %v8706_v37 = vunpack.i.h.bf16 %v8704_v11 }
0x1884   :  { %8528 = vmatprep.subr.bf16.mxu0 %v5302_v25 }
0x1887   :  { %8529 = vmatpush3.bf16.msra.mxu0 %v5302_v25  ;;  %v5482_v25 = vsel %vm1073_vm8, %v12080_v22, %v8695_v47 }
0x1888   :  { %v9366_v43 = vpop.eup %9365  ;;  %8538 = vmatprep.subr.bf16.mxu0 %v8915_v8 }
0x1889   :  { %v9368_v61 = vpop.eup %9367  ;;  %v5288_v58 = vmul.f32 %v9366_v43, %v9354_v16  ;;  %v5490_v43 = vsel %vm1179_vm7, %v5482_v25, %v8705_v45 }
0x188a   :  { %8531 = vmatmul.mubr.msk.bf16.vlgmr.msra.gmra.mrb[136].mxu0 %vm1179_vm7, %v5292_v54  ;;  %v9370_v60 = vpop.eup %9369  ;;  %v5290_v55 = vmul.f32 %v9368_v61, %v9352_v21  ;;  %v8921_v21 = vld [vmem:[%s13319_s10 + $0x70] sm:$0xff]   ;;  %v5491_v54 = vsel %vm1179_vm7, %v5483_v5, %v8706_v37  ;;  %v13498_v5 = vld [vmem:[#allocation52_spill] sm:$0xff] }
0x188b   :  { %v5293_v39 = vpack.c.bf16 %v5288_v58, %v5287_v14  ;;  %v5289_v26 = vmul.f32 %v9370_v60, %v12276_v18  ;;  %8539 = vmatpush3.bf16.msra.mxu0 %v8915_v8  ;;  %v8918_v18 = vld [vmem:[%s13319_s10 + $0x58] sm:$0xff]  }
0x188c   :  { %8540 = vmatprep.subr.bf16.mxu0 %v8916_v10 }
0x188d   :  { %8534 = vmatprep.mubr.msk.bf16.mxu0 %vm1179_vm7, %v5293_v39  ;;  %v5294_v30 = vpack.c.bf16 %v5290_v55, %v5289_v26 }
0x188f   :  { %8541 = vmatpush3.bf16.msra.mxu0 %v8916_v10 }
0x1890   :  { %8542 = vmatprep.subr.bf16.mxu0 %v8917_v12 }
0x1892   :  { %8535 = vmatmul.mubr.msk.bf16.gmra.mrb[140].mxu0 %vm1179_vm7, %v5294_v30 }
0x1893   :  { %8543 = vmatpush3.bf16.msra.mxu0 %v8917_v12 }
0x1894   :  { %8544 = vmatprep.subr.bf16.mxu0 %v8918_v18 }
0x1897   :  { %8545 = vmatpush3.bf16.msra.mxu0 %v8918_v18 }
0x1898   :  { %8546 = vmatprep.subr.bf16.mxu0 %v8919_v44 }
0x189b   :  { %8547 = vmatpush3.bf16.msra.mxu0 %v8919_v44 }
0x189c   :  { %8548 = vmatprep.subr.bf16.mxu0 %v8920_v0 }
0x189f   :  { %8549 = vmatpush3.bf16.msra.mxu0 %v8920_v0 }
0x18a0   :  { %8550 = vmatprep.subr.bf16.mxu0 %v8921_v21 }
0x18a3   :  { %8551 = vmatpush3.bf16.msra.mxu0 %v8921_v21 }
0x18a4   :  { %8552 = vmatprep.subr.bf16.mxu0 %v8922_v7 }
0x18a7   :  { %8553 = vmatpush3.bf16.msra.mxu0 %v8922_v7 }
0x195d   :  { %v8532_v16 = vpop.f32.mrb[136].mxu0 }
0x195e   :  { %v5353_v27 = vpop.f32.mrb[137].mxu0 }
0x195f   :  { %v8533_v20 = vpop.f32.mrb[138].mxu0 }
0x1960   :  { %v8712_v28 = vpack.i.bf16 %v8533_v20, %v8532_v16  ;;  %v5356_v41 = vpop.f32.mrb[139].mxu0 }
0x1961   :  { %v8707_v38 = vpack.i.bf16 %v5356_v41, %v5353_v27 }
0x1962   :  { %8713 = vrot.lane.b32.xlu1 %v8712_v28, %s9832_s21 }
0x1963   :  { %8708 = vrot.lane.b32.xlu0 %v8707_v38, %s9832_s21 }
0x1965   :  { %v8536_v13 = vpop.f32.mrb[140].mxu0 }
0x1966   :  { %8723 = vrot.lane.b32.xlu1 %v13493_v32, %s9833_s19  ;;  %v5369_v9 = vpop.f32.mrb[141].mxu0 }
0x1967   :  { %8718 = vrot.lane.b32.xlu0 %v13494_v48, %s9833_s19  ;;  %v8537_v53 = vpop.f32.mrb[142].mxu0 }
0x1968   :  { %v8742_v57 = vpack.i.bf16 %v8537_v53, %v8536_v13  ;;  %v5372_v2 = vpop.f32.mrb[143].mxu0 }
0x1969   :  { %v8737_v46 = vpack.i.bf16 %v5372_v2, %v5369_v9 }
0x196a   :  { %8733 = vrot.lane.b32.xlu1 %v8732_v31, %s9823_s27  ;;  %v8700_v31 = vunpack.i.l.bf16 %v8699_v29 }
0x196b   :  { %8728 = vrot.lane.b32.xlu0 %v8727_v34, %s9823_s27 }
0x196c   :  { %v5488_v59 = vsel %vm1179_vm7, %v5480_v56, %v8700_v31 }
0x196e   :  { %8743 = vrot.lane.b32.xlu1 %v8742_v57, %s9832_s21 }
0x196f   :  { %8738 = vrot.lane.b32.xlu0 %v8737_v46, %s9832_s21 }
0x19d4   :  { %v8714_v34 = vpop.permute.xlu1 %8713 }
0x19d5   :  { %v8716_v6 = vunpack.i.h.bf16 %v8714_v34  ;;  %v8715_v51 = vunpack.i.l.bf16 %v8714_v34  ;;  %v8709_v15 = vpop.permute.xlu0 %8708 }
0x19d6   :  { %v8711_v61 = vunpack.i.h.bf16 %v8709_v15  ;;  %v8710_v14 = vunpack.i.l.bf16 %v8709_v15 }
0x19d7   :  { %v5498_v58 = vsel %vm2379_vm14, %v5490_v43, %v8715_v51  ;;  %v5499_v23 = vsel %vm2379_vm14, %v5491_v54, %v8716_v6  ;;  %v13500_v51 = vld [vmem:[#allocation54_spill] sm:$0xff]  ;;  %v13501_v54 = vld [vmem:[#allocation44_spill] sm:$0xff] }
0x19d8   :  { %v5505_v60 = vpack.c.bf16 %v5499_v23, %v5498_v58  ;;  %v8724_v39 = vpop.permute.xlu1 %8723  ;;  %v5496_v22 = vsel %vm2379_vm14, %v5488_v59, %v8710_v14  ;;  %v5497_v55 = vsel %vm2379_vm14, %v5489_v62, %v8711_v61  ;;  %v13503_v59 = vld [vmem:[#allocation53_spill] sm:$0xff] }
0x19d9   :  { %v8719_v26 = vpop.permute.xlu0 %8718  ;;  %v5504_v30 = vpack.c.bf16 %v5497_v55, %v5496_v22  ;;  %v8726_v8 = vunpack.i.h.bf16 %v8724_v39  ;;  %v8725_v10 = vunpack.i.l.bf16 %v8724_v39  ;;  %v13504_v58 = vld [vmem:[#allocation45_spill] sm:$0xff]  ;;  %v8923_v55 = vld [vmem:[#allocation11 + $0x100] ss:$16 sps:$4 sm:$0xff]  }
0x19da   :  { %v8721_v18 = vunpack.i.h.bf16 %v8719_v26  ;;  %v8720_v44 = vunpack.i.l.bf16 %v8719_v26  ;;  %v8925_v26 = vld [vmem:[#allocation11 + $0x104] ss:$16 sps:$4 sm:$0xff]  }
0x19db   :  { %8554 = vmatprep.mubr.bf16.mxu0 %v5504_v30  ;;  %v5487_v20 = vsel %vm1073_vm8, %v12092_v4, %v8726_v8  ;;  %v5486_v28 = vsel %vm1073_vm8, %v12088_v19, %v8725_v10  ;;  %v8926_v30 = vld [vmem:[#allocation11 + $0x108] ss:$16 sps:$4 sm:$0xff]   ;;  %v8928_v8 = vld [vmem:[#allocation11 + $0x10c] ss:$16 sps:$4 sm:$0xff]   ;;  %v8931_v10 = vld [vmem:[#allocation11 + $0x124] ss:$16 sps:$4 sm:$0xff]   ;;  %6002 = vmatprep.subr.bf16.mxu1 %v8925_v26 }
0x19dc   :  { %v8734_v12 = vpop.permute.xlu1 %8733  ;;  %8555 = vmatmul.mubr.bf16.vlgmr.msra.gmra.mrb[144].mxu0 %v5505_v60  ;;  %v5485_v38 = vsel %vm1073_vm8, %v12094_v40, %v8721_v18  ;;  %v5484_v13 = vsel %vm1073_vm8, %v12090_v50, %v8720_v44  ;;  %6075 = vmatprep.subr.bf16.mxu0 %v8928_v8  ;;  %v8929_v18 = vld [vmem:[#allocation11 + $0x120] ss:$16 sps:$4 sm:$0xff]   ;;  %v8932_v44 = vld [vmem:[#allocation11 + $0x128] ss:$16 sps:$4 sm:$0xff]   ;;  %v8961_v26 = vld [vmem:[#allocation11 + $0x1c4] ss:$16 sps:$4 sm:$0xff]  }
0x19dd   :  { %v8729_v0 = vpop.permute.xlu0 %8728  ;;  %v8736_v21 = vunpack.i.h.bf16 %v8734_v12  ;;  %v8735_v7 = vunpack.i.l.bf16 %v8734_v12  ;;  %v8934_v12 = vld [vmem:[#allocation11 + $0x12c] ss:$16 sps:$4 sm:$0xff]   ;;  %6003 = vmatpush1.bf16.msra.mxu1 %v8923_v55  ;;  %6076 = vmatpush1.bf16.msra.mxu0 %v8926_v30  ;;  %v8956_v55 = vld [vmem:[#allocation11 + $0x1a8] ss:$16 sps:$4 sm:$0xff]   ;;  %v8959_v8 = vld [vmem:[#allocation11 + $0x1c0] ss:$16 sps:$4 sm:$0xff]  }
0x19de   :  { %v8731_v16 = vunpack.i.h.bf16 %v8729_v0  ;;  %v8730_v27 = vunpack.i.l.bf16 %v8729_v0  ;;  %6004 = vmatprep.subr.bf16.mxu1 %v8931_v10  ;;  %6077 = vmatprep.subr.bf16.mxu0 %v8934_v12  ;;  %v8964_v30 = vld [vmem:[#allocation11 + $0x1cc] ss:$16 sps:$4 sm:$0xff]   ;;  %v8962_v10 = vld [vmem:[#allocation11 + $0x1c8] ss:$16 sps:$4 sm:$0xff]   ;;  %v8967_v12 = vld [vmem:[#allocation11 + $0x1e4] ss:$16 sps:$4 sm:$0xff]  }
0x19df   :  { %v5494_v53 = vsel %vm1179_vm7, %v5486_v28, %v8735_v7  ;;  %v5495_v57 = vsel %vm1179_vm7, %v5487_v20, %v8736_v21 }
0x19e0   :  { %v8744_v41 = vpop.permute.xlu1 %8743  ;;  %v5492_v4 = vsel %vm1179_vm7, %v5484_v13, %v8730_v27  ;;  %v5493_v19 = vsel %vm1179_vm7, %v5485_v38, %v8731_v16 }
0x19e1   :  { %v8746_v32 = vunpack.i.h.bf16 %v8744_v41  ;;  %v8745_v9 = vunpack.i.l.bf16 %v8744_v41  ;;  %v8739_v48 = vpop.permute.xlu0 %8738  ;;  %6005 = vmatpush1.bf16.msra.mxu1 %v8929_v18  ;;  %6078 = vmatpush1.bf16.msra.mxu0 %v8932_v44  ;;  %v8970_v18 = vld [vmem:[#allocation11 + $0x1ec] ss:$16 sps:$4 sm:$0xff]   ;;  %v8965_v44 = vld [vmem:[#allocation11 + $0x1e0] ss:$16 sps:$4 sm:$0xff]  }
0x19e2   :  { %v8741_v2 = vunpack.i.h.bf16 %v8739_v48  ;;  %v8740_v46 = vunpack.i.l.bf16 %v8739_v48 }
0x19e3   :  { %v5502_v17 = vsel %vm2379_vm14, %v5494_v53, %v8745_v9  ;;  %v5503_v40 = vsel %vm2379_vm14, %v5495_v57, %v8746_v32 }
0x19e4   :  { %v5500_v49 = vsel %vm2379_vm14, %v5492_v4, %v8740_v46  ;;  %v5501_v50 = vsel %vm2379_vm14, %v5493_v19, %v8741_v2  ;;  %v5507_v29 = vpack.c.bf16 %v5503_v40, %v5502_v17 }
0x19e5   :  { %v5506_v11 = vpack.c.bf16 %v5501_v50, %v5500_v49 }
0x19e7   :  { %8558 = vmatprep.mubr.bf16.mxu0 %v5506_v11 }
0x19e8   :  { %8559 = vmatmul.mubr.bf16.gmra.mrb[148].mxu0 %v5507_v29 }
0x19e9   :  { %6107 = vmatprep.mubr.bf16.mxu0 %v13466_v3 }
0x1aaf   :  { %v8556_v42 = vpop.f32.mrb[144].mxu0 }
0x1ab0   :  { %v5607_v33 = vpop.f32.mrb[145].mxu0  ;;  %v5640_v36 = vadd.f32 %v8556_v42, %v11639_v35 }
0x1ab1   :  { %v5638_v47 = vadd.f32 %v5607_v33, %v11629_v63  ;;  %v8557_v37 = vpop.f32.mrb[146].mxu0 }
0x1ab2   :  { %v5610_v45 = vpop.f32.mrb[147].mxu0  ;;  %v12394_v34 = vadd.f32 %v7705_v52, %v5640_v36  ;;  %v5641_v25 = vadd.f32 %v8557_v37, %v13498_v5  ;;  %v8937_v36 = vld [vmem:[#allocation11 + $0x144] ss:$16 sps:$4 sm:$0xff]  }
0x1ab3   :  { %v12388_v31 = vadd.f32 %v7705_v52, %v5638_v47  ;;  %v5639_v1 = vadd.f32 %v5610_v45, %v11633_v24  ;;  %6006 = vmatprep.subr.bf16.mxu1 %v8937_v36 }
0x1ab4   :  { %13497 = vst [vmem:[#allocation48_spill] sm:$0xff] %v12394_v34  ;;  %v12399_v63 = vadd.f32 %v7705_v52, %v5641_v25  ;;  %v8935_v25 = vld [vmem:[#allocation11 + $0x140] ss:$16 sps:$4 sm:$0xff]  }
0x1ab5   :  { %13495 = vst [vmem:[#allocation46_spill] sm:$0xff] %v12388_v31  ;;  %v12391_v56 = vadd.f32 %v7705_v52, %v5639_v1  ;;  %5666 = vadd.xlane.f32.xlu0 %v12388_v31  ;;  %v8940_v1 = vld [vmem:[#allocation11 + $0x14c] ss:$16 sps:$4 sm:$0xff]   ;;  %6007 = vmatpush1.bf16.msra.mxu1 %v8935_v25 }
0x1ab6   :  { %13499 = vst [vmem:[#allocation49_spill] sm:$0xff] %v12399_v63  ;;  %6079 = vmatprep.subr.bf16.mxu0 %v8940_v1 }
0x1ab7   :  { %13496 = vst [vmem:[#allocation47_spill] sm:$0xff] %v12391_v56  ;;  %5668 = vadd.xlane.f32.xlu1 %v12391_v56 }
0x1ab9   :  { %5670 = vadd.xlane.f32.xlu0 %v12394_v34 }
0x1abb   :  { %v8560_v6 = vpop.f32.mrb[148].mxu0 }
0x1abc   :  { %v5623_v35 = vpop.f32.mrb[149].mxu0  ;;  %v5644_v61 = vadd.f32 %v8560_v6, %v13501_v54  ;;  %v8938_v6 = vld [vmem:[#allocation11 + $0x148] ss:$16 sps:$4 sm:$0xff]   ;;  %v8952_v54 = vld [vmem:[#allocation11 + $0x18c] ss:$16 sps:$4 sm:$0xff]  }
0x1abd   :  { %v5642_v15 = vadd.f32 %v5623_v35, %v13500_v51  ;;  %5672 = vadd.xlane.f32.xlu0 %v12399_v63  ;;  %v8561_v24 = vpop.f32.mrb[150].mxu0  ;;  %6080 = vmatpush1.bf16.msra.mxu0 %v8938_v6  ;;  %v8943_v35 = vld [vmem:[#allocation11 + $0x164] ss:$16 sps:$4 sm:$0xff]   ;;  %v8946_v51 = vld [vmem:[#allocation11 + $0x16c] ss:$16 sps:$4 sm:$0xff]  }
0x1abe   :  { %v5626_v43 = vpop.f32.mrb[151].mxu0  ;;  %v5645_v23 = vadd.f32 %v8561_v24, %v13504_v58  ;;  %v12411_v39 = vadd.f32 %v7705_v52, %v5644_v61  ;;  %v8944_v24 = vld [vmem:[#allocation11 + $0x168] ss:$16 sps:$4 sm:$0xff]   ;;  %6008 = vmatprep.subr.bf16.mxu1 %v8943_v35  ;;  %6081 = vmatprep.subr.bf16.mxu0 %v8946_v51  ;;  %v8947_v61 = vld [vmem:[#allocation11 + $0x180] ss:$16 sps:$4 sm:$0xff]  }
0x1abf   :  { %v12404_v14 = vadd.f32 %v7705_v52, %v5642_v15  ;;  %v5643_v62 = vadd.f32 %v5626_v43, %v13503_v59  ;;  %v8941_v15 = vld [vmem:[#allocation11 + $0x160] ss:$16 sps:$4 sm:$0xff]   ;;  %v8949_v43 = vld [vmem:[#allocation11 + $0x184] ss:$16 sps:$4 sm:$0xff]   ;;  %v8950_v59 = vld [vmem:[#allocation11 + $0x188] ss:$16 sps:$4 sm:$0xff]  }
0x1ac0   :  { %13506 = vst [vmem:[#allocation36_spill] sm:$0xff] %v12411_v39  ;;  %v12414_v22 = vadd.f32 %v7705_v52, %v5645_v23  ;;  %6009 = vmatpush1.bf16.msra.mxu1 %v8941_v15  ;;  %v8958_v58 = vld [vmem:[#allocation11 + $0x1ac] ss:$16 sps:$4 sm:$0xff]   ;;  %v8953_v23 = vld [vmem:[#allocation11 + $0x1a0] ss:$16 sps:$4 sm:$0xff]  }
0x1ac1   :  { %13502 = vst [vmem:[#allocation50_spill] sm:$0xff] %v12404_v14  ;;  %v12408_v60 = vadd.f32 %v7705_v52, %v5643_v62  ;;  %5674 = vadd.xlane.f32.xlu1 %v12404_v14  ;;  %6082 = vmatpush1.bf16.msra.mxu0 %v8944_v24  ;;  %v8955_v62 = vld [vmem:[#allocation11 + $0x1a4] ss:$16 sps:$4 sm:$0xff]   ;;  %v7707_v15 = vld [vmem:[#allocation10 + $0x1] ss:$0 sm:$0xff] }
0x1ac2   :  { %13507 = vst [vmem:[#allocation37_spill] sm:$0xff] %v12414_v22  ;;  %6010 = vmatprep.subr.bf16.mxu1 %v8949_v43  ;;  %6083 = vmatprep.subr.bf16.mxu0 %v8952_v54 }
0x1ac3   :  { %13505 = vst [vmem:[#allocation51_spill] sm:$0xff] %v12408_v60  ;;  %5676 = vadd.xlane.f32.xlu0 %v12408_v60 }
0x1ac4   :  { %6011 = vmatpush1.bf16.msra.mxu1 %v8947_v61 }
0x1ac5   :  { %5678 = vadd.xlane.f32.xlu1 %v12411_v39  ;;  %6084 = vmatpush1.bf16.msra.mxu0 %v8950_v59 }
0x1ac6   :  { %6012 = vmatprep.subr.bf16.mxu1 %v8955_v62  ;;  %6085 = vmatprep.subr.bf16.mxu0 %v8958_v58 }
0x1ac7   :  { %5680 = vadd.xlane.f32.xlu0 %v12414_v22 }
0x1ac8   :  { %6013 = vmatpush1.bf16.msra.mxu1 %v8953_v23 }
0x1ac9   :  { %6086 = vmatpush1.bf16.msra.mxu0 %v8956_v55  ;;  %6014 = vmatprep.subr.bf16.mxu1 %v8961_v26 }
0x1aca   :  { %6087 = vmatprep.subr.bf16.mxu0 %v8964_v30 }
0x1acc   :  { %6015 = vmatpush1.bf16.msra.mxu1 %v8959_v8 }
0x1acd   :  { %6088 = vmatpush1.bf16.msra.mxu0 %v8962_v10  ;;  %6016 = vmatprep.subr.bf16.mxu1 %v8967_v12 }
0x1ace   :  { %6089 = vmatprep.subr.bf16.mxu0 %v8970_v18 }
0x1ad0   :  { %6017 = vmatpush1.bf16.msra.mxu1 %v8965_v44 }
0x1b42   :  { %v5667_v0 = vpop.xlane.xlu0 %5666 }
0x1b43   :  { %v5682_v21 = vmul.f32 0.0078125, %v5667_v0  ;;  %v8968_v0 = vld [vmem:[#allocation11 + $0x1e8] ss:$16 sps:$4 sm:$0xff]  }
0x1b44   :  { %v5669_v7 = vpop.xlane.xlu1 %5668  ;;  %6090 = vmatpush1.bf16.msra.mxu0 %v8968_v0 }
0x1b45   :  { %v12419_v16 = vsub.f32 %v12388_v31, %v5682_v21  ;;  %v5683_v27 = vmul.f32 0.0078125, %v5669_v7 }
0x1b46   :  { %v5671_v20 = vpop.xlane.xlu0 %5670 }
0x1b47   :  { %v12422_v28 = vsub.f32 %v12391_v56, %v5683_v27  ;;  %v5684_v41 = vmul.f32 0.0078125, %v5671_v20  ;;  %v5698_v38 = vmul.f32 %v12419_v16, %v12419_v16 }
0x1b49   :  { %v12427_v13 = vsub.f32 %v12394_v34, %v5684_v41  ;;  %5706 = vadd.xlane.f32.xlu1 %v5698_v38  ;;  %v5699_v32 = vmul.f32 %v12422_v28, %v12422_v28 }
0x1b4a   :  { %v5673_v9 = vpop.xlane.xlu0 %5672 }
0x1b4b   :  { %v5685_v48 = vmul.f32 0.0078125, %v5673_v9  ;;  %5708 = vadd.xlane.f32.xlu0 %v5699_v32  ;;  %v5700_v53 = vmul.f32 %v12427_v13, %v12427_v13 }
0x1b4d   :  { %v12434_v57 = vsub.f32 %v12399_v63, %v5685_v48  ;;  %5710 = vadd.xlane.f32.xlu1 %v5700_v53 }
0x1b4e   :  { %v5675_v2 = vpop.xlane.xlu1 %5674 }
0x1b4f   :  { %v5686_v46 = vmul.f32 0.0078125, %v5675_v2  ;;  %v5701_v4 = vmul.f32 %v12434_v57, %v12434_v57 }
0x1b50   :  { %v5677_v19 = vpop.xlane.xlu0 %5676 }
0x1b51   :  { %v12439_v17 = vsub.f32 %v12404_v14, %v5686_v46  ;;  %v5687_v40 = vmul.f32 0.0078125, %v5677_v19  ;;  %5712 = vadd.xlane.f32.xlu0 %v5701_v4 }
0x1b52   :  { %v5679_v49 = vpop.xlane.xlu1 %5678 }
0x1b53   :  { %v12442_v50 = vsub.f32 %v12408_v60, %v5687_v40  ;;  %v5688_v29 = vmul.f32 0.0078125, %v5679_v49  ;;  %v5702_v11 = vmul.f32 %v12439_v17, %v12439_v17 }
0x1b54   :  { %v5681_v42 = vpop.xlane.xlu0 %5680 }
0x1b55   :  { %v12447_v52 = vsub.f32 %v12411_v39, %v5688_v29  ;;  %v5689_v33 = vmul.f32 0.0078125, %v5681_v42  ;;  %5714 = vadd.xlane.f32.xlu1 %v5702_v11  ;;  %v5703_v47 = vmul.f32 %v12442_v50, %v12442_v50  ;;  %v7706_v29 = vld [vmem:[#allocation8 + $0x1] ss:$0 sm:$0xff] }
0x1b57   :  { %v12452_v37 = vsub.f32 %v12414_v22, %v5689_v33  ;;  %5716 = vadd.xlane.f32.xlu0 %v5703_v47  ;;  %v5704_v45 = vmul.f32 %v12447_v52, %v12447_v52 }
0x1b59   :  { %5718 = vadd.xlane.f32.xlu1 %v5704_v45  ;;  %v5705_v5 = vmul.f32 %v12452_v37, %v12452_v37 }
0x1b5b   :  { %5720 = vadd.xlane.f32.xlu0 %v5705_v5 }
0x1bd6   :  { %v5707_v21 = vpop.xlane.xlu1 %5706 }
0x1bd7   :  { %v5722_v7 = vmul.f32 0.0078125, %v5707_v21 }
0x1bd8   :  { %v5709_v27 = vpop.xlane.xlu0 %5708 }
0x1bd9   :  { %v5730_v20 = vadd.f32 1e-05, %v5722_v7  ;;  %v5723_v41 = vmul.f32 0.0078125, %v5709_v27 }
0x1bda   :  { %v5711_v38 = vpop.xlane.xlu1 %5710 }
0x1bdb   :  { %9371 = vrsqrt.f32 %v5730_v20  ;;  %v5731_v32 = vadd.f32 1e-05, %v5723_v41  ;;  %v5724_v9 = vmul.f32 0.0078125, %v5711_v38 }
0x1bdd   :  { %9373 = vrsqrt.f32 %v5731_v32  ;;  %v5732_v48 = vadd.f32 1e-05, %v5724_v9 }
0x1bde   :  { %v5713_v53 = vpop.xlane.xlu0 %5712 }
0x1bdf   :  { %9375 = vrsqrt.f32 %v5732_v48  ;;  %v5725_v2 = vmul.f32 0.0078125, %v5713_v53  ;;  %v8971_v53 = vld [vmem:[#allocation14 + $0x140] sm:$0xff]  }
0x1be0   :  { %8106 = vmatprep.subr.bf16.mxu1 %v8971_v53 }
0x1be1   :  { %v5733_v46 = vadd.f32 1e-05, %v5725_v2  ;;  %v8972_v2 = vld [vmem:[#allocation14 + $0x1c0] sm:$0xff]  }
0x1be2   :  { %v5715_v4 = vpop.xlane.xlu1 %5714  ;;  %8146 = vmatprep.subr.bf16.mxu0 %v8972_v2 }
0x1be3   :  { %9377 = vrsqrt.f32 %v5733_v46  ;;  %v5726_v19 = vmul.f32 0.0078125, %v5715_v4  ;;  %v8974_v46 = vld [vmem:[#allocation14 + $0x180] sm:$0xff]   ;;  %v8976_v4 = vld [vmem:[#allocation14 + $0x1c8] sm:$0xff]  }
0x1be4   :  { %v5717_v40 = vpop.xlane.xlu0 %5716 }
0x1be5   :  { %v9372_v49 = vpop.eup %9371  ;;  %v5734_v11 = vadd.f32 1e-05, %v5726_v19  ;;  %v5727_v42 = vmul.f32 0.0078125, %v5717_v40  ;;  %v8977_v19 = vld [vmem:[#allocation14 + $0x108] sm:$0xff]  }
0x1be6   :  { %v5746_v33 = vmul.f32 %v9372_v49, %v12419_v16  ;;  %v5719_v47 = vpop.xlane.xlu1 %5718  ;;  %v8978_v40 = vld [vmem:[#allocation14 + $0x188] sm:$0xff]   ;;  %v8980_v49 = vld [vmem:[#allocation14 + $0x1d0] sm:$0xff]  }
0x1be7   :  { %v9374_v45 = vpop.eup %9373  ;;  %9379 = vrsqrt.f32 %v5734_v11  ;;  %v5735_v36 = vadd.f32 1e-05, %v5727_v42  ;;  %v5728_v1 = vmul.f32 0.0078125, %v5719_v47  ;;  %v8982_v11 = vld [vmem:[#allocation14 + $0x190] sm:$0xff]   ;;  %v8983_v42 = vld [vmem:[#allocation14 + $0x158] sm:$0xff]  }
0x1be8   :  { %v5760_v5 = vmul.f32 %v7706_v29, %v5746_v33  ;;  %v5747_v25 = vmul.f32 %v9374_v45, %v12422_v28  ;;  %v5721_v6 = vpop.xlane.xlu0 %5720  ;;  %v8984_v33 = vld [vmem:[#allocation14 + $0x1d8] sm:$0xff]  }
0x1be9   :  { %v9376_v35 = vpop.eup %9375  ;;  %9381 = vrsqrt.f32 %v5735_v36  ;;  %v5729_v51 = vmul.f32 0.0078125, %v5721_v6  ;;  %v5736_v43 = vadd.f32 1e-05, %v5728_v1  ;;  %v8985_v47 = vld [vmem:[#allocation14 + $0x118] sm:$0xff]   ;;  %v8987_v36 = vld [vmem:[#allocation14 + $0x160] sm:$0xff]   ;;  %v8991_v6 = vld [vmem:[#allocation14 + $0x168] sm:$0xff]  }
0x1bea   :  { %v5761_v24 = vmul.f32 %v7706_v29, %v5747_v25  ;;  %v5774_v61 = vadd.f32 %v7707_v15, %v5760_v5  ;;  %v5748_v16 = vmul.f32 %v9376_v35, %v12427_v13  ;;  %v8986_v45 = vld [vmem:[#allocation14 + $0x198] sm:$0xff]   ;;  %v8988_v1 = vld [vmem:[#allocation14 + $0x1e0] sm:$0xff]   ;;  %v8992_v35 = vld [vmem:[#allocation14 + $0x1e8] sm:$0xff]  }
0x1beb   :  { %v5737_v54 = vadd.f32 1e-05, %v5729_v51  ;;  %v8989_v5 = vld [vmem:[#allocation14 + $0x120] sm:$0xff]   ;;  %v8993_v51 = vld [vmem:[#allocation14 + $0x128] sm:$0xff]  }
0x1bec   :  { %v5775_v59 = vadd.f32 %v7707_v15, %v5761_v24  ;;  %v5762_v28 = vmul.f32 %v7706_v29, %v5748_v16  ;;  %v8990_v25 = vld [vmem:[#allocation14 + $0x1a0] sm:$0xff]   ;;  %v8995_v24 = vld [vmem:[#allocation14 + $0x170] sm:$0xff]   ;;  %v9000_v16 = vld [vmem:[#allocation14 + $0x1f8] sm:$0xff]  }
0x1bed   :  { %v9378_v62 = vpop.eup %9377  ;;  %9383 = vrsqrt.f32 %v5737_v54  ;;  %v8997_v54 = vld [vmem:[#allocation14 + $0x130] sm:$0xff]  }
0x1bee   :  { %v5782_v58 = vpack.c.bf16 %v5775_v59, %v5774_v61  ;;  %v5749_v23 = vmul.f32 %v9378_v62, %v12434_v57  ;;  %9385 = vrsqrt.f32 %v5736_v43  ;;  %v5776_v10 = vadd.f32 %v7707_v15, %v5762_v28  ;;  %v8996_v43 = vld [vmem:[#allocation14 + $0x1f0] sm:$0xff]   ;;  %v8999_v59 = vld [vmem:[#allocation14 + $0x178] sm:$0xff]  }
0x1bef   :  { %v8998_v61 = vld [vmem:[#allocation14 + $0x1b0] sm:$0xff]   ;;  %v9001_v62 = vld [vmem:[#allocation14 + $0x138] sm:$0xff]  }
0x1bf0   :  { %6035 = vmatmul.mubr.bf16.vlgmr.msra.gmra.mrb[120].mxu1 %v5782_v58  ;;  %6108 = vmatmul.mubr.bf16.vlgmr.msra.gmra.mrb[152].mxu0 %v5782_v58  ;;  %v5763_v55 = vmul.f32 %v7706_v29, %v5749_v23  ;;  %v9002_v58 = vld [vmem:[#allocation14 + $0x1b8] sm:$0xff]   ;;  %v9517_v23 = vld [vmem:[%s13403_s16 + $0x40] sm:$0xff]  }
0x1bf1   :  { %v9380_v26 = vpop.eup %9379  ;;  %6044 = vmatprep.mubr.bf16.mxu1 %v13466_v3  ;;  %6117 = vmatprep.mubr.bf16.mxu0 %v13466_v3  ;;  %v5820_v28 = vld [vmem:[#allocation13 + $0x4] sm:$0xf] }
0x1bf2   :  { %v5777_v30 = vadd.f32 %v7707_v15, %v5763_v55  ;;  %v5750_v13 = vmul.f32 %v9380_v26, %v12439_v17  ;;  %8147 = vmatpush3.bf16.msra.mxu0 %v8974_v46  ;;  %v13508_v55 = vld [vmem:[#allocation33_spill] sm:$0xff] }
0x1bf3   :  { %v9382_v8 = vpop.eup %9381  ;;  %8148 = vmatprep.subr.bf16.mxu0 %v8976_v4  ;;  %v12476_v26 = vrot.slane %v5820_v28, %v13508_v55 }
0x1bf4   :  { %v5751_v12 = vmul.f32 %v9382_v8, %v12442_v50  ;;  %v5783_v18 = vpack.c.bf16 %v5777_v30, %v5776_v10  ;;  %v5764_v0 = vmul.f32 %v7706_v29, %v5750_v13  ;;  %v13509_v30 = vld [vmem:[#allocation35_spill] sm:$0xff]  ;;  %v13510_v10 = vld [vmem:[#allocation34_spill] sm:$0xff] }
0x1bf5   :  { %v12479_v8 = vrot.slane %v5820_v28, %v13509_v30  ;;  %v12482_v13 = vrot.slane %v5820_v28, %v13510_v10 }
0x1bf6   :  { %v5765_v44 = vmul.f32 %v7706_v29, %v5751_v12  ;;  %v5778_v20 = vadd.f32 %v7707_v15, %v5764_v0  ;;  %8149 = vmatpush3.bf16.msra.mxu0 %v8978_v40  ;;  %v13511_v12 = vld [vmem:[#allocation32_spill] sm:$0xff] }
0x1bf7   :  { %v9384_v57 = vpop.eup %9383  ;;  %8150 = vmatprep.subr.bf16.mxu0 %v8980_v49 }
0x1bf8   :  { %6045 = vmatmul.mubr.bf16.gmra.mrb[124].mxu1 %v5783_v18  ;;  %6118 = vmatmul.mubr.bf16.gmra.mrb[156].mxu0 %v5783_v18  ;;  %v9386_v21 = vpop.eup %9385  ;;  %v5779_v7 = vadd.f32 %v7707_v15, %v5765_v44  ;;  %v5753_v27 = vmul.f32 %v9384_v57, %v12452_v37  ;;  %v8973_v37 = vld [vmem:[#allocation14 + $0x100] sm:$0xff]   ;;  %v13512_v18 = vsub.s32 3, %v13511_v12 }
0x1bf9   :  { %6054 = vmatprep.mubr.bf16.mxu1 %v13466_v3  ;;  %6127 = vmatprep.mubr.bf16.mxu0 %v13466_v3  ;;  %v5752_v41 = vmul.f32 %v9386_v21, %v12447_v52  ;;  %v8975_v52 = vld [vmem:[#allocation14 + $0x148] sm:$0xff]  }
0x1bfa   :  { %v5784_v17 = vpack.c.bf16 %v5779_v7, %v5778_v20  ;;  %v5767_v38 = vmul.f32 %v7706_v29, %v5753_v27  ;;  %8107 = vmatpush3.bf16.msra.mxu1 %v8973_v37  ;;  %8151 = vmatpush3.bf16.msra.mxu0 %v8982_v11  ;;  %v12486_v44 = vrot.slane %v5820_v28, %v13512_v18 }
0x1bfb   :  { %v5766_v50 = vmul.f32 %v7706_v29, %v5752_v41  ;;  %8108 = vmatprep.subr.bf16.mxu1 %v8975_v52  ;;  %v8981_v29 = vld [vmem:[#allocation14 + $0x110] sm:$0xff]   ;;  %8152 = vmatprep.subr.bf16.mxu0 %v8984_v33 }
0x1bfc   :  { %v5781_v32 = vadd.f32 %v7707_v15, %v5767_v38 }
0x1bfd   :  { %v5780_v9 = vadd.f32 %v7707_v15, %v5766_v50  ;;  %v8994_v15 = vld [vmem:[#allocation14 + $0x1a8] sm:$0xff]  }
0x1bfe   :  { %8109 = vmatpush3.bf16.msra.mxu1 %v8977_v19  ;;  %8153 = vmatpush3.bf16.msra.mxu0 %v8986_v45 }
0x1bff   :  { %v5785_v48 = vpack.c.bf16 %v5781_v32, %v5780_v9  ;;  %8154 = vmatprep.subr.bf16.mxu0 %v8988_v1 }
0x1c00   :  { %6055 = vmatmul.mubr.bf16.gmra.mrb[128].mxu1 %v5784_v17  ;;  %6128 = vmatmul.mubr.bf16.gmra.mrb[160].mxu0 %v5784_v17 }
0x1c01   :  { %6064 = vmatprep.mubr.bf16.mxu1 %v13466_v3  ;;  %6137 = vmatprep.mubr.bf16.mxu0 %v13466_v3  ;;  %v8979_v3 = vld [vmem:[#allocation14 + $0x150] sm:$0xff]  }
0x1c02   :  { %8110 = vmatprep.subr.bf16.mxu1 %v8979_v3  ;;  %8155 = vmatpush3.bf16.msra.mxu0 %v8990_v25 }
0x1c03   :  { %8111 = vmatpush3.bf16.msra.mxu1 %v8981_v29  ;;  %8156 = vmatprep.subr.bf16.mxu0 %v8992_v35 }
0x1c04   :  { %8112 = vmatprep.subr.bf16.mxu1 %v8983_v42 }
0x1c06   :  { %8157 = vmatpush3.bf16.msra.mxu0 %v8994_v15 }
0x1c07   :  { %8113 = vmatpush3.bf16.msra.mxu1 %v8985_v47  ;;  %8158 = vmatprep.subr.bf16.mxu0 %v8996_v43 }
0x1c08   :  { %6065 = vmatmul.mubr.bf16.gmra.mrb[132].mxu1 %v5785_v48  ;;  %6138 = vmatmul.mubr.bf16.gmra.mrb[164].mxu0 %v5785_v48 }
0x1c09   :  { %8114 = vmatprep.subr.bf16.mxu1 %v8987_v36 }
0x1c0a   :  { %8159 = vmatpush3.bf16.msra.mxu0 %v8998_v61 }
0x1c0b   :  { %8115 = vmatpush3.bf16.msra.mxu1 %v8989_v5  ;;  %8160 = vmatprep.subr.bf16.mxu0 %v9000_v16 }
0x1c0c   :  { %8116 = vmatprep.subr.bf16.mxu1 %v8991_v6 }
0x1c0e   :  { %8161 = vmatpush3.bf16.msra.mxu0 %v9002_v58 }
0x1c0f   :  { %8117 = vmatpush3.bf16.msra.mxu1 %v8993_v51 }
0x1c10   :  { %8118 = vmatprep.subr.bf16.mxu1 %v8995_v24 }
0x1c13   :  { %8119 = vmatpush3.bf16.msra.mxu1 %v8997_v54 }
0x1c14   :  { %8120 = vmatprep.subr.bf16.mxu1 %v8999_v59 }
0x1c17   :  { %8121 = vmatpush3.bf16.msra.mxu1 %v9001_v62 }
0x1c18   :  { %8186 = vmatprep.subr.bf16.mxu1 %v9517_v23 }
0x1cc3   :  { %v6036_v57 = vpop.f32.mrb[120].mxu1  ;;  %v6109_v0 = vpop.f32.mrb[152].mxu0 }
0x1cc4   :  { %v12489_v21 = vadd.f32 %v6036_v57, %v12476_v26  ;;  %v12492_v7 = vadd.f32 %v6109_v0, %v12479_v8  ;;  %v6038_v27 = vpop.f32.mrb[121].mxu1  ;;  %v6111_v20 = vpop.f32.mrb[153].mxu0 }
0x1cc5   :  { %v12495_v41 = vadd.f32 %v6038_v27, %v12482_v13  ;;  %v12498_v17 = vadd.f32 %v6111_v20, %v12486_v44  ;;  %v6040_v38 = vpop.f32.mrb[122].mxu1  ;;  %v6113_v50 = vpop.f32.mrb[154].mxu0 }
0x1cc6   :  { %v6148_v32 = vmul.f32 %v12489_v21, %v12489_v21  ;;  %v6150_v9 = vmul.f32 %v12492_v7, %v12492_v7  ;;  %v12505_v48 = vadd.f32 %v6040_v38, %v12476_v26  ;;  %v12508_v53 = vadd.f32 %v6113_v50, %v12479_v8  ;;  %v6042_v2 = vpop.f32.mrb[123].mxu1  ;;  %v6115_v37 = vpop.f32.mrb[155].mxu0 }
0x1cc7   :  { %v6149_v46 = vmul.f32 %v12495_v41, %v12495_v41  ;;  %v6151_v52 = vmul.f32 %v12498_v17, %v12498_v17  ;;  %v12515_v4 = vadd.f32 %v6042_v2, %v12482_v13  ;;  %v12518_v19 = vadd.f32 %v6115_v37, %v12486_v44 }
0x1cc8   :  { %v6180_v40 = vmul.f32 %v6148_v32, %v12489_v21  ;;  %v6182_v3 = vmul.f32 %v6150_v9, %v12492_v7  ;;  %v6152_v49 = vmul.f32 %v12505_v48, %v12505_v48  ;;  %v6154_v29 = vmul.f32 %v12508_v53, %v12508_v53 }
0x1cc9   :  { %v6181_v11 = vmul.f32 %v6149_v46, %v12495_v41  ;;  %v6183_v42 = vmul.f32 %v6151_v52, %v12498_v17  ;;  %v6153_v33 = vmul.f32 %v12515_v4, %v12515_v4  ;;  %v6155_v47 = vmul.f32 %v12518_v19, %v12518_v19 }
0x1cca   :  { %v6212_v45 = vmul.f32 0.044715, %v6180_v40  ;;  %v6214_v36 = vmul.f32 0.044715, %v6182_v3  ;;  %v6184_v1 = vmul.f32 %v6152_v49, %v12505_v48  ;;  %v6186_v5 = vmul.f32 %v6154_v29, %v12508_v53 }
0x1ccb   :  { %v6213_v25 = vmul.f32 0.044715, %v6181_v11  ;;  %v6215_v6 = vmul.f32 0.044715, %v6183_v42  ;;  %v6185_v35 = vmul.f32 %v6153_v33, %v12515_v4  ;;  %v6187_v51 = vmul.f32 %v6155_v47, %v12518_v19  ;;  %v6046_v15 = vpop.f32.mrb[124].mxu1  ;;  %v6119_v24 = vpop.f32.mrb[156].mxu0 }
0x1ccc   :  { %v6244_v43 = vadd.f32 %v6212_v45, %v12489_v21  ;;  %v6246_v54 = vadd.f32 %v6214_v36, %v12492_v7  ;;  %v6216_v61 = vmul.f32 0.044715, %v6184_v1  ;;  %v6218_v59 = vmul.f32 0.044715, %v6186_v5  ;;  %v6048_v16 = vpop.f32.mrb[125].mxu1  ;;  %v6121_v62 = vpop.f32.mrb[157].mxu0 }
0x1ccd   :  { %v6245_v58 = vadd.f32 %v6213_v25, %v12495_v41  ;;  %v6247_v23 = vadd.f32 %v6215_v6, %v12498_v17  ;;  %v6217_v28 = vmul.f32 0.044715, %v6185_v35  ;;  %v6219_v55 = vmul.f32 0.044715, %v6187_v51  ;;  %v6050_v30 = vpop.f32.mrb[126].mxu1  ;;  %v6123_v10 = vpop.f32.mrb[158].mxu0 }
0x1cce   :  { %v6276_v12 = vmul.f32 0.7978846, %v6244_v43  ;;  %v6278_v18 = vmul.f32 0.7978846, %v6246_v54  ;;  %v6248_v57 = vadd.f32 %v6216_v61, %v12505_v48  ;;  %v6250_v0 = vadd.f32 %v6218_v59, %v12508_v53  ;;  %v6052_v27 = vpop.f32.mrb[127].mxu1  ;;  %v6125_v20 = vpop.f32.mrb[159].mxu0 }
0x1ccf   :  { %v6277_v38 = vmul.f32 0.7978846, %v6245_v58  ;;  %v6279_v50 = vmul.f32 0.7978846, %v6247_v23  ;;  %v6249_v32 = vadd.f32 %v6217_v28, %v12515_v4  ;;  %v6251_v9 = vadd.f32 %v6219_v55, %v12518_v19 }
0x1cd0   :  { %9387 = vtanh.f32 %v6276_v12  ;;  %v6280_v2 = vmul.f32 0.7978846, %v6248_v57  ;;  %v6282_v37 = vmul.f32 0.7978846, %v6250_v0  ;;  %v12545_v46 = vadd.f32 %v6046_v15, %v12476_v26 }
0x1cd1   :  { %9389 = vtanh.f32 %v6278_v18  ;;  %v6281_v52 = vmul.f32 0.7978846, %v6249_v32  ;;  %v6283_v40 = vmul.f32 0.7978846, %v6251_v9  ;;  %v12548_v3 = vadd.f32 %v6119_v24, %v12479_v8 }
0x1cd2   :  { %9391 = vtanh.f32 %v6277_v38  ;;  %v6156_v49 = vmul.f32 %v12545_v46, %v12545_v46  ;;  %v12553_v29 = vadd.f32 %v6048_v16, %v12482_v13  ;;  %v12556_v11 = vadd.f32 %v6121_v62, %v12486_v44 }
0x1cd3   :  { %9393 = vtanh.f32 %v6279_v50  ;;  %v6158_v42 = vmul.f32 %v12548_v3, %v12548_v3  ;;  %v12561_v33 = vadd.f32 %v6050_v30, %v12476_v26  ;;  %v12564_v47 = vadd.f32 %v6123_v10, %v12479_v8  ;;  %v12566_v45 = vpop.f32.mrb[128].mxu1  ;;  %v12568_v36 = vpop.f32.mrb[160].mxu0 }
0x1cd4   :  { %9395 = vtanh.f32 %v6280_v2  ;;  %v6188_v1 = vmul.f32 %v6156_v49, %v12545_v46  ;;  %v6157_v5 = vmul.f32 %v12553_v29, %v12553_v29  ;;  %v6159_v25 = vmul.f32 %v12556_v11, %v12556_v11  ;;  %v12575_v6 = vpop.f32.mrb[129].mxu1  ;;  %v12577_v35 = vpop.f32.mrb[161].mxu0 }
0x1cd5   :  { %9397 = vtanh.f32 %v6282_v37  ;;  %v6190_v51 = vmul.f32 %v6158_v42, %v12548_v3  ;;  %v6160_v15 = vmul.f32 %v12561_v33, %v12561_v33  ;;  %v6162_v24 = vmul.f32 %v12564_v47, %v12564_v47  ;;  %v12584_v43 = vpop.f32.mrb[130].mxu1  ;;  %v12586_v54 = vpop.f32.mrb[162].mxu0 }
0x1cd6   :  { %9399 = vtanh.f32 %v6281_v52  ;;  %v6220_v61 = vmul.f32 0.044715, %v6188_v1  ;;  %v6189_v59 = vmul.f32 %v6157_v5, %v12553_v29  ;;  %v6191_v16 = vmul.f32 %v6159_v25, %v12556_v11  ;;  %v12590_v62 = vpop.f32.mrb[131].mxu1  ;;  %v12592_v58 = vpop.f32.mrb[163].mxu0 }
0x1cd7   :  { %9401 = vtanh.f32 %v6283_v40  ;;  %v6222_v23 = vmul.f32 0.044715, %v6190_v51  ;;  %v6192_v28 = vmul.f32 %v6160_v15, %v12561_v33  ;;  %v6194_v55 = vmul.f32 %v6162_v24, %v12564_v47 }
0x1cd8   :  { %v6252_v30 = vadd.f32 %v6220_v61, %v12545_v46  ;;  %v6221_v10 = vmul.f32 0.044715, %v6189_v59  ;;  %v6223_v12 = vmul.f32 0.044715, %v6191_v16  ;;  %v12598_v18 = vadd.f32 %v6052_v27, %v12482_v13 }
0x1cd9   :  { %v6254_v57 = vadd.f32 %v6222_v23, %v12548_v3  ;;  %v6224_v0 = vmul.f32 0.044715, %v6192_v28  ;;  %v6226_v38 = vmul.f32 0.044715, %v6194_v55  ;;  %v12602_v50 = vadd.f32 %v6125_v20, %v12486_v44 }
0x1cda   :  { %v9388_v32 = vpop.eup %9387  ;;  %v6284_v9 = vmul.f32 0.7978846, %v6252_v30  ;;  %v6253_v2 = vadd.f32 %v6221_v10, %v12553_v29  ;;  %v6255_v37 = vadd.f32 %v6223_v12, %v12556_v11  ;;  %v6161_v52 = vmul.f32 %v12598_v18, %v12598_v18 }
0x1cdb   :  { %v9390_v40 = vpop.eup %9389  ;;  %v6340_v49 = vadd.f32 1.0, %v9388_v32  ;;  %v6286_v27 = vmul.f32 0.7978846, %v6254_v57  ;;  %v6256_v42 = vadd.f32 %v6224_v0, %v12561_v33  ;;  %v6258_v1 = vadd.f32 %v6226_v38, %v12564_v47  ;;  %v12610_v5 = vpop.f32.mrb[132].mxu1 }
0x1cdc   :  { %v12612_v20 = vpop.f32.mrb[164].mxu0  ;;  %v12614_v25 = vpop.eup %9391  ;;  %v6342_v51 = vadd.f32 1.0, %v9390_v40  ;;  %9403 = vtanh.f32 %v6284_v9  ;;  %v6285_v15 = vmul.f32 0.7978846, %v6253_v2  ;;  %v6287_v24 = vmul.f32 0.7978846, %v6255_v37 }
0x1cdd   :  { %v12616_v61 = vpop.f32.mrb[133].mxu1  ;;  %v12618_v59 = vpop.eup %9393  ;;  %v6372_v16 = vmul.f32 0.5, %v6340_v49  ;;  %9405 = vtanh.f32 %v6286_v27  ;;  %v6288_v23 = vmul.f32 0.7978846, %v6256_v42  ;;  %v6290_v28 = vmul.f32 0.7978846, %v6258_v1 }
0x1cde   :  { %v12620_v55 = vpop.f32.mrb[165].mxu0  ;;  %v9396_v30 = vpop.eup %9395  ;;  %v6374_v10 = vmul.f32 0.5, %v6342_v51  ;;  %9407 = vtanh.f32 %v6285_v15  ;;  %v6193_v12 = vmul.f32 %v6161_v52, %v12598_v18  ;;  %v6163_v57 = vmul.f32 %v12602_v50, %v12602_v50 }
0x1cdf   :  { %v12625_v0 = vpop.f32.mrb[134].mxu1  ;;  %v12627_v38 = vpop.f32.mrb[166].mxu0  ;;  %v12630_v9 = vmul.f32 %v6372_v16, %v12489_v21  ;;  %v6344_v2 = vadd.f32 1.0, %v9396_v30  ;;  %9409 = vtanh.f32 %v6287_v24  ;;  %v12634_v37 = vadd.f32 %v12566_v45, %v12476_v26 }
0x1ce0   :  { %v9398_v32 = vpop.eup %9397  ;;  %v12636_v40 = vpop.f32.mrb[135].mxu1  ;;  %v12643_v27 = vmul.f32 %v6374_v10, %v12492_v7  ;;  %9411 = vtanh.f32 %v6288_v23  ;;  %v6225_v1 = vmul.f32 0.044715, %v6193_v12  ;;  %v6195_v15 = vmul.f32 %v6163_v57, %v12602_v50 }
0x1ce1   :  { %v12638_v52 = vpop.f32.mrb[167].mxu0  ;;  %v12640_v49 = vpop.eup %9399  ;;  %v6346_v42 = vadd.f32 1.0, %v9398_v32  ;;  %v6376_v51 = vmul.f32 0.5, %v6344_v2  ;;  %9413 = vtanh.f32 %v6290_v28  ;;  %v6164_v45 = vmul.f32 %v12634_v37, %v12634_v37 }
0x1ce2   :  { %v12645_v21 = vpop.eup %9401  ;;  %v6257_v16 = vadd.f32 %v6225_v1, %v12598_v18  ;;  %v12653_v30 = vadd.f32 %v12568_v36, %v12479_v8  ;;  %v12657_v7 = vadd.f32 %v12575_v6, %v12482_v13  ;;  %v6227_v28 = vmul.f32 0.044715, %v6195_v15 }
0x1ce3   :  { %v6378_v24 = vmul.f32 0.5, %v6346_v42  ;;  %v12660_v23 = vmul.f32 %v6376_v51, %v12505_v48  ;;  %v6196_v10 = vmul.f32 %v6164_v45, %v12634_v37  ;;  %v12665_v12 = vadd.f32 %v12577_v35, %v12486_v44 }
0x1ce4   :  { %v6289_v32 = vmul.f32 0.7978846, %v6257_v16  ;;  %v6166_v36 = vmul.f32 %v12653_v30, %v12653_v30  ;;  %v6165_v6 = vmul.f32 %v12657_v7, %v12657_v7  ;;  %v6259_v2 = vadd.f32 %v6227_v28, %v12602_v50 }
0x1ce5   :  { %v12668_v57 = vmul.f32 %v6378_v24, %v12508_v53  ;;  %v6228_v42 = vmul.f32 0.044715, %v6196_v10  ;;  %v6167_v35 = vmul.f32 %v12665_v12, %v12665_v12  ;;  %v12691_v10 = vadd.f32 %v12584_v43, %v12476_v26 }
0x1ce6   :  { %v12679_v1 = vpop.eup %9403  ;;  %9415 = vtanh.f32 %v6289_v32  ;;  %v6198_v51 = vmul.f32 %v6166_v36, %v12653_v30  ;;  %v6197_v15 = vmul.f32 %v6165_v6, %v12657_v7  ;;  %v6291_v24 = vmul.f32 0.7978846, %v6259_v2 }
0x1ce7   :  { %v12685_v45 = vpop.eup %9405  ;;  %v6260_v16 = vadd.f32 %v6228_v42, %v12634_v37  ;;  %v6199_v28 = vmul.f32 %v6167_v35, %v12665_v12  ;;  %v12697_v32 = vadd.f32 %v12586_v54, %v12479_v8  ;;  %v12701_v36 = vadd.f32 %v12590_v62, %v12482_v13 }
0x1ce8   :  { %v12693_v48 = vpop.eup %9407  ;;  %v6230_v22 = vmul.f32 0.044715, %v6198_v51  ;;  %v6229_v53 = vmul.f32 0.044715, %v6197_v15  ;;  %9417 = vtanh.f32 %v6291_v24  ;;  %v6168_v43 = vmul.f32 %v12691_v10, %v12691_v10 }
0x1ce9   :  { %v12703_v6 = vpop.eup %9409  ;;  %v6292_v2 = vmul.f32 0.7978846, %v6260_v16  ;;  %v6231_v42 = vmul.f32 0.044715, %v6199_v28  ;;  %v6170_v54 = vmul.f32 %v12697_v32, %v12697_v32  ;;  %v6169_v62 = vmul.f32 %v12701_v36, %v12701_v36 }
0x1cea   :  { %v12707_v35 = vpop.eup %9411  ;;  %v6262_v51 = vadd.f32 %v6230_v22, %v12653_v30  ;;  %v6261_v15 = vadd.f32 %v6229_v53, %v12657_v7  ;;  %v6200_v16 = vmul.f32 %v6168_v43, %v12691_v10  ;;  %v12721_v28 = vadd.f32 %v12592_v58, %v12486_v44 }
0x1ceb   :  { %v12715_v39 = vpop.eup %9413  ;;  %9419 = vtanh.f32 %v6292_v2  ;;  %v6263_v24 = vadd.f32 %v6231_v42, %v12665_v12  ;;  %v6202_v53 = vmul.f32 %v6170_v54, %v12697_v32  ;;  %v6201_v14 = vmul.f32 %v6169_v62, %v12701_v36 }
0x1cec   :  { %v6294_v22 = vmul.f32 0.7978846, %v6262_v51  ;;  %v6293_v60 = vmul.f32 0.7978846, %v6261_v15  ;;  %v6232_v34 = vmul.f32 0.044715, %v6200_v16  ;;  %v6171_v56 = vmul.f32 %v12721_v28, %v12721_v28 }
0x1ced   :  { %v6295_v63 = vmul.f32 0.7978846, %v6263_v24  ;;  %v12729_v2 = vadd.f32 %v12610_v5, %v12476_v26  ;;  %v6234_v42 = vmul.f32 0.044715, %v6202_v53  ;;  %v6233_v43 = vmul.f32 0.044715, %v6201_v14 }
0x1cee   :  { %9421 = vtanh.f32 %v6294_v22  ;;  %v12733_v58 = vadd.f32 %v12612_v20, %v12479_v8  ;;  %v6264_v51 = vadd.f32 %v6232_v34, %v12691_v10  ;;  %v6203_v15 = vmul.f32 %v6171_v56, %v12721_v28 }
0x1cef   :  { %13513 = vst [vmem:[#allocation38_spill] sm:$0xff] %v12729_v2  ;;  %9423 = vtanh.f32 %v6293_v60  ;;  %v6172_v54 = vmul.f32 %v12729_v2, %v12729_v2  ;;  %v6266_v5 = vadd.f32 %v6234_v42, %v12697_v32  ;;  %v6265_v24 = vadd.f32 %v6233_v43, %v12701_v36 }
0x1cf0   :  { %13514 = vst [vmem:[#allocation39_spill] sm:$0xff] %v12733_v58  ;;  %v12739_v62 = vpop.eup %9415  ;;  %9425 = vtanh.f32 %v6295_v63  ;;  %v6174_v14 = vmul.f32 %v12733_v58, %v12733_v58  ;;  %v6296_v20 = vmul.f32 0.7978846, %v6264_v51  ;;  %v6235_v16 = vmul.f32 0.044715, %v6203_v15 }
0x1cf1   :  { %v6204_v60 = vmul.f32 %v6172_v54, %v12729_v2  ;;  %v12748_v56 = vadd.f32 %v12616_v61, %v12482_v13  ;;  %v6298_v34 = vmul.f32 0.7978846, %v6266_v5  ;;  %v6297_v22 = vmul.f32 0.7978846, %v6265_v24 }
0x1cf2   :  { %v6206_v53 = vmul.f32 %v6174_v14, %v12733_v58  ;;  %v12753_v63 = vadd.f32 %v12620_v55, %v12486_v44  ;;  %v12755_v42 = vpop.eup %9417  ;;  %9427 = vtanh.f32 %v6296_v20  ;;  %v6267_v43 = vadd.f32 %v6235_v16, %v12721_v28 }
0x1cf3   :  { %v6236_v51 = vmul.f32 0.044715, %v6204_v60  ;;  %v6173_v15 = vmul.f32 %v12748_v56, %v12748_v56  ;;  %9429 = vtanh.f32 %v6298_v34  ;;  %v12764_v5 = vadd.f32 %v12625_v0, %v12476_v26 }
0x1cf4   :  { %v6238_v61 = vmul.f32 0.044715, %v6206_v53  ;;  %v6175_v54 = vmul.f32 %v12753_v63, %v12753_v63  ;;  %9431 = vtanh.f32 %v6297_v22  ;;  %v6299_v24 = vmul.f32 0.7978846, %v6267_v43 }
0x1cf5   :  { %13515 = vst [vmem:[#allocation40_spill] sm:$0xff] %v12764_v5  ;;  %v12766_v55 = vpop.eup %9419  ;;  %v6268_v14 = vadd.f32 %v6236_v51, %v12729_v2  ;;  %v6205_v20 = vmul.f32 %v6173_v15, %v12748_v56  ;;  %v6176_v34 = vmul.f32 %v12764_v5, %v12764_v5  ;;  %v12776_v53 = vadd.f32 %v12627_v38, %v12479_v8 }
0x1cf6   :  { %v6270_v16 = vadd.f32 %v6238_v61, %v12733_v58  ;;  %v6207_v60 = vmul.f32 %v6175_v54, %v12753_v63  ;;  %9433 = vtanh.f32 %v6299_v24  ;;  %v12780_v22 = vadd.f32 %v12636_v40, %v12482_v13 }
0x1cf7   :  { %v6300_v26 = vmul.f32 0.7978846, %v6268_v14  ;;  %v6237_v0 = vmul.f32 0.044715, %v6205_v20  ;;  %v6208_v61 = vmul.f32 %v6176_v34, %v12764_v5  ;;  %v6178_v54 = vmul.f32 %v12776_v53, %v12776_v53 }
0x1cf8   :  { %v12782_v43 = vpop.eup %9421  ;;  %v6302_v51 = vmul.f32 0.7978846, %v6270_v16  ;;  %v6239_v15 = vmul.f32 0.044715, %v6207_v60  ;;  %v6177_v38 = vmul.f32 %v12780_v22, %v12780_v22  ;;  %v12794_v13 = vadd.f32 %v12638_v52, %v12486_v44 }
0x1cf9   :  { %v12787_v31 = vpop.eup %9423  ;;  %9435 = vtanh.f32 %v6300_v26  ;;  %v6269_v8 = vadd.f32 %v6237_v0, %v12748_v56  ;;  %v6240_v14 = vmul.f32 0.044715, %v6208_v61  ;;  %v6210_v20 = vmul.f32 %v6178_v54, %v12776_v53 }
0x1cfa   :  { %v12796_v40 = vpop.eup %9425  ;;  %9437 = vtanh.f32 %v6302_v51  ;;  %v6271_v24 = vadd.f32 %v6239_v15, %v12753_v63  ;;  %v6209_v60 = vmul.f32 %v6177_v38, %v12780_v22  ;;  %v6179_v34 = vmul.f32 %v12794_v13, %v12794_v13 }
0x1cfb   :  { %v6301_v16 = vmul.f32 0.7978846, %v6269_v8  ;;  %v6341_v26 = vadd.f32 1.0, %v12614_v25  ;;  %v6272_v44 = vadd.f32 %v6240_v14, %v12764_v5  ;;  %v6242_v52 = vmul.f32 0.044715, %v6210_v20 }
0x1cfc   :  { %v6303_v0 = vmul.f32 0.7978846, %v6271_v24  ;;  %v6345_v58 = vadd.f32 1.0, %v12640_v49  ;;  %v12806_v51 = vpop.eup %9427  ;;  %v6241_v15 = vmul.f32 0.044715, %v6209_v60  ;;  %v6211_v61 = vmul.f32 %v6179_v34, %v12794_v13 }
0x1cfd   :  { %9439 = vtanh.f32 %v6301_v16  ;;  %v6373_v54 = vmul.f32 0.5, %v6341_v26  ;;  %v12809_v8 = vpop.eup %9429  ;;  %v6304_v38 = vmul.f32 0.7978846, %v6272_v44  ;;  %v6274_v2 = vadd.f32 %v6242_v52, %v12776_v53 }
0x1cfe   :  { %9441 = vtanh.f32 %v6303_v0  ;;  %v6377_v25 = vmul.f32 0.5, %v6345_v58  ;;  %v9432_v24 = vpop.eup %9431  ;;  %v6273_v14 = vadd.f32 %v6241_v15, %v12780_v22  ;;  %v6243_v20 = vmul.f32 0.044715, %v6211_v61 }
0x1cff   :  { %v6405_v49 = vmul.f32 %v6373_v54, %v12495_v41  ;;  %v6343_v5 = vadd.f32 1.0, %v12618_v59  ;;  %9443 = vtanh.f32 %v6304_v38  ;;  %v6306_v16 = vmul.f32 0.7978846, %v6274_v2 }
0x1d00   :  { %v6409_v60 = vmul.f32 %v6377_v25, %v12515_v4  ;;  %v6347_v34 = vadd.f32 1.0, %v12645_v21  ;;  %v9434_v26 = vpop.eup %9433  ;;  %v6305_v0 = vmul.f32 0.7978846, %v6273_v14  ;;  %v6275_v44 = vadd.f32 %v6243_v20, %v12794_v13 }
0x1d01   :  { %v6375_v52 = vmul.f32 0.5, %v6343_v5  ;;  %v6349_v58 = vadd.f32 1.0, %v12693_v48  ;;  %9445 = vtanh.f32 %v6306_v16  ;;  %v6353_v41 = vadd.f32 1.0, %v12739_v62 }
0x1d02   :  { %v6437_v15 = vpack.c.bf16 %v6409_v60, %v6405_v49  ;;  %v6379_v61 = vmul.f32 0.5, %v6347_v34  ;;  %9447 = vtanh.f32 %v6305_v0  ;;  %v6307_v59 = vmul.f32 0.7978846, %v6275_v44 }
0x1d03   :  { %v12820_v54 = vpop.eup %9435  ;;  %v6407_v4 = vmul.f32 %v6375_v52, %v12498_v17  ;;  %v6381_v2 = vmul.f32 0.5, %v6349_v58  ;;  %v6385_v5 = vmul.f32 0.5, %v6353_v41  ;;  %v6351_v48 = vadd.f32 1.0, %v12703_v6  ;;  %v9518_v6 = vld [vmem:[%s13403_s16] sm:$0xff]  }
0x1d04   :  { %v12823_v21 = vpop.eup %9437  ;;  %6741 = vmatprep.mubr.bf16.mxu1 %v6437_v15  ;;  %v6411_v38 = vmul.f32 %v6379_v61, %v12518_v19  ;;  %v6355_v25 = vadd.f32 1.0, %v12755_v42  ;;  %9449 = vtanh.f32 %v6307_v59  ;;  %v13516_v62 = vpack.c.bf16 %v12660_v23, %v12630_v9 }
0x1d05   :  { %v6413_v14 = vmul.f32 %v6381_v2, %v12553_v29  ;;  %v6348_v17 = vadd.f32 1.0, %v12679_v1  ;;  %v6352_v20 = vadd.f32 1.0, %v12707_v35  ;;  %v6417_v16 = vmul.f32 %v6385_v5, %v12598_v18  ;;  %v9519_v1 = vld [vmem:[%s13403_s16 + $0x48] sm:$0xff]  }
0x1d06   :  { %6742 = vmatmul.mubr.bf16.vlgmr.msra.gmra.mrb[136].mxu1 %v13516_v62  ;;  %v6439_v49 = vpack.c.bf16 %v6411_v38, %v6407_v4  ;;  %v6383_v19 = vmul.f32 0.5, %v6351_v48  ;;  %v6387_v60 = vmul.f32 0.5, %v6355_v25  ;;  %v6350_v23 = vadd.f32 1.0, %v12685_v45 }
0x1d07   :  { %8187 = vmatpush3.bf16.xpose.msra.mxu1 %v9518_v6  ;;  %v9440_v42 = vpop.eup %9439  ;;  %v6380_v34 = vmul.f32 0.5, %v6348_v17  ;;  %v6384_v9 = vmul.f32 0.5, %v6352_v20  ;;  %v6354_v29 = vadd.f32 1.0, %v12715_v39  ;;  %v6441_v35 = vpack.c.bf16 %v6417_v16, %v6413_v14 }
0x1d08   :  { %8188 = vmatprep.subr.bf16.mxu1 %v9519_v1  ;;  %v9442_v18 = vpop.eup %9441  ;;  %6806 = vmatprep.mubr.bf16.mxu0 %v6439_v49  ;;  %v6415_v0 = vmul.f32 %v6383_v19, %v12556_v11  ;;  %v6419_v44 = vmul.f32 %v6387_v60, %v12602_v50  ;;  %v6357_v52 = vadd.f32 1.0, %v12787_v31  ;;  %v13517_v58 = vpack.c.bf16 %v12668_v57, %v12643_v27 }
0x1d09   :  { %v6412_v39 = vmul.f32 %v6380_v34, %v12545_v46  ;;  %v6416_v45 = vmul.f32 %v6384_v9, %v12561_v33  ;;  %v6382_v15 = vmul.f32 0.5, %v6350_v23  ;;  %v6386_v61 = vmul.f32 0.5, %v6354_v29  ;;  %v9444_v41 = vpop.eup %9443  ;;  %6749 = vmatprep.mubr.bf16.mxu1 %v6441_v35 }
0x1d0a   :  { %6807 = vmatmul.mubr.bf16.vlgmr.msra.gmra.mrb[168].mxu0 %v13517_v58  ;;  %v6443_v59 = vpack.c.bf16 %v6419_v44, %v6415_v0  ;;  %v6361_v4 = vadd.f32 1.0, %v9432_v24  ;;  %v6389_v2 = vmul.f32 0.5, %v6357_v52  ;;  %v6359_v11 = vadd.f32 1.0, %v12796_v40 }
0x1d0b   :  { %v6440_v50 = vpack.c.bf16 %v6416_v45, %v6412_v39  ;;  %v6414_v31 = vmul.f32 %v6382_v15, %v12548_v3  ;;  %v6418_v38 = vmul.f32 %v6386_v61, %v12564_v47  ;;  %v6363_v27 = vadd.f32 1.0, %v9434_v26  ;;  %v9446_v57 = vpop.eup %9445 }
0x1d0c   :  { %6814 = vmatprep.mubr.bf16.mxu0 %v6443_v59  ;;  %v6393_v46 = vmul.f32 0.5, %v6361_v4  ;;  %v6421_v33 = vmul.f32 %v6389_v2, %v12657_v7  ;;  %v6391_v5 = vmul.f32 0.5, %v6359_v11  ;;  %v6356_v48 = vadd.f32 1.0, %v12766_v55  ;;  %v9448_v25 = vpop.eup %9447  ;;  %v9520_v7 = vld [vmem:[%s13403_s16 + $0x8] sm:$0xff]   ;;  %v13520_v11 = vld [vmem:[#allocation39_spill] sm:$0xff] }
0x1d0d   :  { %v6442_v24 = vpack.c.bf16 %v6418_v38, %v6414_v31  ;;  %v6395_v62 = vmul.f32 0.5, %v6363_v27  ;;  %v6360_v40 = vadd.f32 1.0, %v12806_v51  ;;  %v6358_v14 = vadd.f32 1.0, %v12782_v43  ;;  %v9524_v27 = vld [vmem:[%s13403_s16 + $0x18] sm:$0xff]  }
0x1d0e   :  { %6750 = vmatmul.mubr.bf16.gmra.mrb[140].mxu1 %v6440_v50  ;;  %v6425_v3 = vmul.f32 %v6393_v46, %v12701_v36  ;;  %v6423_v47 = vmul.f32 %v6391_v5, %v12665_v12  ;;  %v6388_v26 = vmul.f32 0.5, %v6356_v48  ;;  %v6362_v17 = vadd.f32 1.0, %v12809_v8  ;;  %v9450_v55 = vpop.eup %9449  ;;  %v9521_v36 = vld [vmem:[%s13403_s16 + $0x50] sm:$0xff]   ;;  %v9526_v46 = vld [vmem:[%s13403_s16 + $0x20] sm:$0xff]  }
0x1d0f   :  { %8189 = vmatpush3.bf16.xpose.msra.mxu1 %v9520_v7  ;;  %v6427_v20 = vmul.f32 %v6395_v62, %v12721_v28  ;;  %v6392_v49 = vmul.f32 0.5, %v6360_v40  ;;  %v6390_v16 = vmul.f32 0.5, %v6358_v14  ;;  %v6365_v51 = vadd.f32 1.0, %v9440_v42  ;;  %v9529_v5 = vld [vmem:[%s13403_s16 + $0x70] sm:$0xff]  }
0x1d10   :  { %8190 = vmatprep.subr.bf16.mxu1 %v9521_v36  ;;  %v6445_v12 = vpack.c.bf16 %v6425_v3, %v6421_v33  ;;  %v6420_v43 = vmul.f32 %v6388_v26, %v12634_v37  ;;  %v6394_v8 = vmul.f32 0.5, %v6362_v17  ;;  %v6369_v19 = vadd.f32 1.0, %v9448_v25  ;;  %v9528_v33 = vld [vmem:[%s13403_s16 + $0x28] sm:$0xff]   ;;  %v9530_v48 = vld [vmem:[%s13403_s16 + $0x30] sm:$0xff]   ;;  %v9531_v25 = vld [vmem:[%s13403_s16 + $0x78] sm:$0xff]  }
0x1d11   :  { %v6447_v60 = vpack.c.bf16 %v6427_v20, %v6423_v47  ;;  %v6424_v6 = vmul.f32 %v6392_v49, %v12691_v10  ;;  %v6422_v34 = vmul.f32 %v6390_v16, %v12653_v30  ;;  %v6397_v28 = vmul.f32 0.5, %v6365_v51 }
0x1d12   :  { %6815 = vmatmul.mubr.bf16.gmra.mrb[172].mxu0 %v6442_v24  ;;  %6757 = vmatprep.mubr.bf16.mxu1 %v6445_v12  ;;  %v6426_v42 = vmul.f32 %v6394_v8, %v12697_v32  ;;  %v6401_v9 = vmul.f32 0.5, %v6369_v19  ;;  %v6367_v23 = vadd.f32 1.0, %v9442_v18  ;;  %v6371_v29 = vadd.f32 1.0, %v9450_v55  ;;  %v9532_v24 = vld [vmem:[%s13403_s16 + $0x38] sm:$0xff]  }
0x1d13   :  { %6822 = vmatprep.mubr.bf16.mxu0 %v6447_v60  ;;  %v6444_v1 = vpack.c.bf16 %v6424_v6, %v6420_v43  ;;  %v6429_v35 = vmul.f32 %v6397_v28, %v12748_v56  ;;  %v6364_v37 = vadd.f32 1.0, %v12820_v54  ;;  %v6368_v0 = vadd.f32 1.0, %v9444_v41  ;;  %v9522_v56 = vld [vmem:[%s13403_s16 + $0x10] sm:$0xff]   ;;  %v13519_v41 = vld [vmem:[#allocation40_spill] sm:$0xff] }
0x1d14   :  { %v6446_v44 = vpack.c.bf16 %v6426_v42, %v6422_v34  ;;  %v6433_v52 = vmul.f32 %v6401_v9, %v12780_v22  ;;  %v6399_v10 = vmul.f32 0.5, %v6367_v23  ;;  %v6403_v58 = vmul.f32 0.5, %v6371_v29  ;;  %v13518_v54 = vld [vmem:[#allocation38_spill] sm:$0xff]  ;;  %v12915_v43 = vld [vmem:[#allocation16 + $0x1] ss:$0 sm:$0xff]  ;;  %v13522_v42 = vld [vmem:[#allocation47_spill] sm:$0xff] }
0x1d15   :  { %v6396_v30 = vmul.f32 0.5, %v6364_v37  ;;  %v6400_v39 = vmul.f32 0.5, %v6368_v0  ;;  %v6366_v32 = vadd.f32 1.0, %v12823_v21  ;;  %v6370_v45 = vadd.f32 1.0, %v9446_v57  ;;  %v9523_v21 = vld [vmem:[%s13403_s16 + $0x58] sm:$0xff]   ;;  %v9525_v57 = vld [vmem:[%s13403_s16 + $0x60] sm:$0xff]  }
0x1d16   :  { %6758 = vmatmul.mubr.bf16.gmra.mrb[144].mxu1 %v6444_v1  ;;  %v6449_v18 = vpack.c.bf16 %v6433_v52, %v6429_v35  ;;  %v6431_v15 = vmul.f32 %v6399_v10, %v12753_v63  ;;  %v6435_v61 = vmul.f32 %v6403_v58, %v12794_v13  ;;  %v13521_v8 = vld [vmem:[#allocation46_spill] sm:$0xff] }
0x1d17   :  { %8191 = vmatpush3.bf16.xpose.msra.mxu1 %v9522_v56  ;;  %v6428_v22 = vmul.f32 %v6396_v30, %v13518_v54  ;;  %v6432_v59 = vmul.f32 %v6400_v39, %v13519_v41  ;;  %v6398_v4 = vmul.f32 0.5, %v6366_v32  ;;  %v6402_v2 = vmul.f32 0.5, %v6370_v45  ;;  %v13523_v32 = vld [vmem:[#allocation48_spill] sm:$0xff]  ;;  %v13524_v54 = vld [vmem:[#allocation49_spill] sm:$0xff] }
0x1d18   :  { %8192 = vmatprep.subr.bf16.mxu1 %v9523_v21  ;;  %6765 = vmatprep.mubr.bf16.mxu1 %v6449_v18  ;;  %v6451_v63 = vpack.c.bf16 %v6435_v61, %v6431_v15 }
0x1d19   :  { %v6448_v13 = vpack.c.bf16 %v6432_v59, %v6428_v22  ;;  %v6430_v50 = vmul.f32 %v6398_v4, %v13520_v11  ;;  %v6434_v31 = vmul.f32 %v6402_v2, %v12776_v53  ;;  %v9527_v53 = vld [vmem:[%s13403_s16 + $0x68] sm:$0xff]  }
0x1d1a   :  { %6823 = vmatmul.mubr.bf16.gmra.mrb[176].mxu0 %v6446_v44 }
0x1d1b   :  { %6830 = vmatprep.mubr.bf16.mxu0 %v6451_v63  ;;  %v6450_v38 = vpack.c.bf16 %v6434_v31, %v6430_v50 }
0x1d1e   :  { %6766 = vmatmul.mubr.bf16.gmra.mrb[148].mxu1 %v6448_v13 }
0x1d1f   :  { %8193 = vmatpush3.bf16.xpose.msra.mxu1 %v9524_v27 }
0x1d20   :  { %8194 = vmatprep.subr.bf16.mxu1 %v9525_v57  ;;  %v13525_v57 = vld [vmem:[#allocation50_spill] sm:$0xff] }
0x1d22   :  { %6831 = vmatmul.mubr.bf16.gmra.mrb[180].mxu0 %v6450_v38 }
0x1d27   :  { %8195 = vmatpush3.bf16.xpose.msra.mxu1 %v9526_v46 }
0x1d28   :  { %8196 = vmatprep.subr.bf16.mxu1 %v9527_v53 }
0x1d2f   :  { %8197 = vmatpush3.bf16.xpose.msra.mxu1 %v9528_v33 }
0x1d30   :  { %8198 = vmatprep.subr.bf16.mxu1 %v9529_v5 }
0x1d37   :  { %8199 = vmatpush3.bf16.xpose.msra.mxu1 %v9530_v48 }
0x1d38   :  { %8200 = vmatprep.subr.bf16.mxu1 %v9531_v25  ;;  %v13526_v25 = vld [vmem:[#allocation51_spill] sm:$0xff] }
0x1d3f   :  { %8201 = vmatpush3.bf16.xpose.msra.mxu1 %v9532_v24 }
0x1dd9   :  { %v8122_v62 = vpop.f32.mrb[136].mxu1 }
0x1dda   :  { %v8123_v40 = vpop.f32.mrb[137].mxu1 }
0x1ddb   :  { %v8124_v14 = vadd.f32 %v8123_v40, %v8122_v62  ;;  %v8125_v3 = vpop.f32.mrb[138].mxu1 }
0x1ddc   :  { %v8126_v47 = vpop.f32.mrb[139].mxu1 }
0x1ddd   :  { %v8162_v26 = vpop.f32.mrb[168].mxu0  ;;  %v8127_v17 = vadd.f32 %v8126_v47, %v8125_v3 }
0x1dde   :  { %v8163_v7 = vpop.f32.mrb[169].mxu0 }
0x1ddf   :  { %v8164_v55 = vadd.f32 %v8163_v7, %v8162_v26  ;;  %v8165_v20 = vpop.f32.mrb[170].mxu0 }
0x1de0   :  { %v8166_v49 = vpop.f32.mrb[171].mxu0 }
0x1de1   :  { %v6809_v16 = vadd.f32 %v8164_v55, %v8124_v14  ;;  %v8167_v51 = vadd.f32 %v8166_v49, %v8165_v20  ;;  %v8128_v36 = vpop.f32.mrb[140].mxu1  ;;  %v13527_v49 = vld [vmem:[#allocation36_spill] sm:$0xff] }
0x1de2   :  { %v8129_v12 = vpop.f32.mrb[141].mxu1 }
0x1de3   :  { %v6839_v19 = vadd.f32 %v6809_v16, %v13521_v8  ;;  %v6812_v60 = vadd.f32 %v8167_v51, %v8127_v17  ;;  %v8130_v6 = vadd.f32 %v8129_v12, %v8128_v36  ;;  %v8131_v34 = vpop.f32.mrb[142].mxu1  ;;  %v13528_v36 = vld [vmem:[#allocation37_spill] sm:$0xff] }
0x1de4   :  { %v8132_v28 = vpop.f32.mrb[143].mxu1 }
0x1de5   :  { %v6840_v9 = vadd.f32 %v6812_v60, %v13522_v42  ;;  %v8168_v23 = vpop.f32.mrb[172].mxu0  ;;  %v6855_v29 = vadd.f32 %v12915_v43, %v6839_v19  ;;  %v8133_v1 = vadd.f32 %v8132_v28, %v8131_v34 }
0x1de6   :  { %v8169_v35 = vpop.f32.mrb[173].mxu0 }
0x1de7   :  { %v8170_v37 = vadd.f32 %v8169_v35, %v8168_v23  ;;  %v8171_v0 = vpop.f32.mrb[174].mxu0  ;;  %6865 = vadd.xlane.f32.xlu1 %v6855_v29  ;;  %v6856_v44 = vadd.f32 %v12915_v43, %v6840_v9 }
0x1de8   :  { %v8172_v52 = vpop.f32.mrb[175].mxu0 }
0x1de9   :  { %v6817_v10 = vadd.f32 %v8170_v37, %v8130_v6  ;;  %v8173_v58 = vadd.f32 %v8172_v52, %v8171_v0  ;;  %6867 = vadd.xlane.f32.xlu0 %v6856_v44  ;;  %v8134_v30 = vpop.f32.mrb[144].mxu1 }
0x1dea   :  { %v8135_v39 = vpop.f32.mrb[145].mxu1 }
0x1deb   :  { %v6841_v45 = vadd.f32 %v6817_v10, %v13523_v32  ;;  %v6820_v18 = vadd.f32 %v8173_v58, %v8133_v1  ;;  %v8136_v15 = vadd.f32 %v8135_v39, %v8134_v30  ;;  %v8137_v61 = vpop.f32.mrb[146].mxu1 }
0x1dec   :  { %v8138_v56 = vpop.f32.mrb[147].mxu1 }
0x1ded   :  { %v6842_v22 = vadd.f32 %v6820_v18, %v13524_v54  ;;  %v8174_v41 = vpop.f32.mrb[176].mxu0  ;;  %v6857_v59 = vadd.f32 %v12915_v43, %v6841_v45  ;;  %v8139_v4 = vadd.f32 %v8138_v56, %v8137_v61 }
0x1dee   :  { %v8175_v2 = vpop.f32.mrb[177].mxu0 }
0x1def   :  { %v8176_v21 = vadd.f32 %v8175_v2, %v8174_v41  ;;  %v8177_v63 = vpop.f32.mrb[178].mxu0  ;;  %6869 = vadd.xlane.f32.xlu1 %v6857_v59  ;;  %v6858_v13 = vadd.f32 %v12915_v43, %v6842_v22 }
0x1df0   :  { %v8178_v11 = vpop.f32.mrb[179].mxu0 }
0x1df1   :  { %v6825_v50 = vadd.f32 %v8176_v21, %v8136_v15  ;;  %v8179_v31 = vadd.f32 %v8178_v11, %v8177_v63  ;;  %6871 = vadd.xlane.f32.xlu0 %v6858_v13  ;;  %v8140_v38 = vpop.f32.mrb[148].mxu1  ;;  %v7178_v63 = vld [vmem:[%s13529_s17] sm:$0xff]  ;;  %v7179_v11 = vld [vmem:[%s13529_s17 + $0x8] sm:$0xff] }
0x1df2   :  { %v8141_v27 = vpop.f32.mrb[149].mxu1 }
0x1df3   :  { %v6843_v46 = vadd.f32 %v6825_v50, %v13525_v57  ;;  %v6828_v53 = vadd.f32 %v8179_v31, %v8139_v4  ;;  %v8142_v33 = vadd.f32 %v8141_v27, %v8140_v38  ;;  %v8143_v5 = vpop.f32.mrb[150].mxu1  ;;  %v7181_v50 = vld [vmem:[%s13529_s17 + $0x18] sm:$0xff]  ;;  %v7182_v31 = vld [vmem:[%s13529_s17 + $0x20] sm:$0xff]  ;;  %v7183_v38 = vld [vmem:[%s13529_s17 + $0x28] sm:$0xff] }
0x1df4   :  { %v8144_v48 = vpop.f32.mrb[151].mxu1 }
0x1df5   :  { %v6844_v24 = vadd.f32 %v6828_v53, %v13526_v25  ;;  %v8180_v62 = vpop.f32.mrb[180].mxu0  ;;  %v6859_v40 = vadd.f32 %v12915_v43, %v6843_v46  ;;  %v8145_v14 = vadd.f32 %v8144_v48, %v8143_v5 }
0x1df6   :  { %v8181_v3 = vpop.f32.mrb[181].mxu0 }
0x1df7   :  { %v8182_v47 = vadd.f32 %v8181_v3, %v8180_v62  ;;  %v8183_v26 = vpop.f32.mrb[182].mxu0  ;;  %6873 = vadd.xlane.f32.xlu1 %v6859_v40  ;;  %v6860_v17 = vadd.f32 %v12915_v43, %v6844_v24 }
0x1df8   :  { %v8184_v7 = vpop.f32.mrb[183].mxu0 }
0x1df9   :  { %v6833_v55 = vadd.f32 %v8182_v47, %v8142_v33  ;;  %v8185_v20 = vadd.f32 %v8184_v7, %v8183_v26  ;;  %6875 = vadd.xlane.f32.xlu0 %v6860_v17  ;;  %v7773_v47 = vld [vmem:[%s13327_s18] ss:$0 sm:$0xff] }
0x1dfb   :  { %v6845_v16 = vadd.f32 %v6833_v55, %v13527_v49  ;;  %v6836_v51 = vadd.f32 %v8185_v20, %v8145_v14 }
0x1dfd   :  { %v6846_v12 = vadd.f32 %v6836_v51, %v13528_v36  ;;  %v6861_v8 = vadd.f32 %v12915_v43, %v6845_v16 }
0x1dff   :  { %6877 = vadd.xlane.f32.xlu1 %v6861_v8  ;;  %v6862_v19 = vadd.f32 %v12915_v43, %v6846_v12  ;;  %v7774_v12 = vld [vmem:[#allocation17] ss:$0 sm:$0xff] }
0x1e01   :  { %6879 = vadd.xlane.f32.xlu0 %v6862_v19 }
0x1e74   :  { %v6866_v60 = vpop.xlane.xlu1 %6865 }
0x1e75   :  { %v6881_v6 = vmul.f32 0.0078125, %v6866_v60 }
0x1e76   :  { %v6868_v34 = vpop.xlane.xlu0 %6867 }
0x1e77   :  { %v12933_v28 = vsub.f32 %v6855_v29, %v6881_v6  ;;  %v6882_v42 = vmul.f32 0.0078125, %v6868_v34 }
0x1e79   :  { %v12935_v9 = vsub.f32 %v6856_v44, %v6882_v42  ;;  %v6897_v23 = vmul.f32 %v12933_v28, %v12933_v28 }
0x1e7b   :  { %6905 = vadd.xlane.f32.xlu1 %v6897_v23  ;;  %v6898_v1 = vmul.f32 %v12935_v9, %v12935_v9 }
0x1e7c   :  { %v6870_v35 = vpop.xlane.xlu1 %6869 }
0x1e7d   :  { %v6883_v37 = vmul.f32 0.0078125, %v6870_v35  ;;  %6907 = vadd.xlane.f32.xlu0 %v6898_v1 }
0x1e7e   :  { %v6872_v43 = vpop.xlane.xlu0 %6871 }
0x1e7f   :  { %v12941_v0 = vsub.f32 %v6857_v59, %v6883_v37  ;;  %v6884_v52 = vmul.f32 0.0078125, %v6872_v43 }
0x1e81   :  { %v12943_v10 = vsub.f32 %v6858_v13, %v6884_v52  ;;  %v6899_v29 = vmul.f32 %v12941_v0, %v12941_v0  ;;  %v7180_v13 = vld [vmem:[%s13529_s17 + $0x10] sm:$0xff] }
0x1e83   :  { %6909 = vadd.xlane.f32.xlu1 %v6899_v29  ;;  %v6900_v44 = vmul.f32 %v12943_v10, %v12943_v10 }
0x1e84   :  { %v6874_v58 = vpop.xlane.xlu1 %6873 }
0x1e85   :  { %v6885_v30 = vmul.f32 0.0078125, %v6874_v58  ;;  %6911 = vadd.xlane.f32.xlu0 %v6900_v44 }
0x1e86   :  { %v6876_v39 = vpop.xlane.xlu0 %6875 }
0x1e87   :  { %v12949_v32 = vsub.f32 %v6859_v40, %v6885_v30  ;;  %v6886_v45 = vmul.f32 0.0078125, %v6876_v39 }
0x1e89   :  { %v12951_v18 = vsub.f32 %v6860_v17, %v6886_v45  ;;  %v6901_v15 = vmul.f32 %v12949_v32, %v12949_v32 }
0x1e8b   :  { %6913 = vadd.xlane.f32.xlu1 %v6901_v15  ;;  %v6902_v61 = vmul.f32 %v12951_v18, %v12951_v18 }
0x1e8c   :  { %v6878_v56 = vpop.xlane.xlu1 %6877 }
0x1e8d   :  { %v6887_v54 = vmul.f32 0.0078125, %v6878_v56  ;;  %6915 = vadd.xlane.f32.xlu0 %v6902_v61 }
0x1e8e   :  { %v6880_v22 = vpop.xlane.xlu0 %6879 }
0x1e8f   :  { %v12957_v41 = vsub.f32 %v6861_v8, %v6887_v54  ;;  %v6888_v59 = vmul.f32 0.0078125, %v6880_v22 }
0x1e91   :  { %v12959_v4 = vsub.f32 %v6862_v19, %v6888_v59  ;;  %v6903_v2 = vmul.f32 %v12957_v41, %v12957_v41 }
0x1e93   :  { %6917 = vadd.xlane.f32.xlu1 %v6903_v2  ;;  %v6904_v21 = vmul.f32 %v12959_v4, %v12959_v4 }
0x1e95   :  { %6919 = vadd.xlane.f32.xlu0 %v6904_v21 }
0x1ea4   :  { %7187 = vperm.xlu1 %8626, %v7178_v63  }
0x1ea8   :  { %7193 = vperm.xlu1 %8626, %v7180_v13  }
0x1eab   :  { %7190 = vperm.xlu0 %8625, %v7179_v11  }
0x1eac   :  { %7196 = vperm.xlu1 %8626, %v7181_v50  }
0x1eaf   :  { %7199 = vperm.xlu0 %8625, %v7182_v31  }
0x1eb0   :  { %7202 = vperm.xlu1 %8626, %v7183_v38  }
0x1f08   :  { %v6906_v27 = vpop.xlane.xlu1 %6905 }
0x1f09   :  { %v6921_v57 = vmul.f32 0.0078125, %v6906_v27 }
0x1f0a   :  { %v6908_v46 = vpop.xlane.xlu0 %6907 }
0x1f0b   :  { %v6929_v53 = vadd.f32 1e-05, %v6921_v57  ;;  %v6922_v33 = vmul.f32 0.0078125, %v6908_v46  ;;  %v13530_v46 = vld [vmem:[#allocation30_spill] sm:$0xff] }
0x1f0d   :  { %9451 = vrsqrt.f32 %v6929_v53  ;;  %v6930_v5 = vadd.f32 1e-05, %v6922_v33  ;;  %v13531_v53 = vld [vmem:[#allocation31_spill] sm:$0xff] }
0x1f0f   :  { %9453 = vrsqrt.f32 %v6930_v5 }
0x1f10   :  { %v6910_v48 = vpop.xlane.xlu1 %6909 }
0x1f11   :  { %v6923_v25 = vmul.f32 0.0078125, %v6910_v48 }
0x1f12   :  { %v6912_v24 = vpop.xlane.xlu0 %6911 }
0x1f13   :  { %v6931_v62 = vadd.f32 1e-05, %v6923_v25  ;;  %v6924_v40 = vmul.f32 0.0078125, %v6912_v24 }
0x1f15   :  { %9455 = vrsqrt.f32 %v6931_v62  ;;  %v6932_v14 = vadd.f32 1e-05, %v6924_v40 }
0x1f17   :  { %v9452_v3 = vpop.eup %9451  ;;  %9457 = vrsqrt.f32 %v6932_v14 }
0x1f18   :  { %v6914_v26 = vpop.xlane.xlu1 %6913  ;;  %v6945_v17 = vmul.f32 %v9452_v3, %v12933_v28 }
0x1f19   :  { %v9454_v7 = vpop.eup %9453  ;;  %v6925_v55 = vmul.f32 0.0078125, %v6914_v26 }
0x1f1a   :  { %v6916_v20 = vpop.xlane.xlu0 %6915  ;;  %v6946_v49 = vmul.f32 %v9454_v7, %v12935_v9  ;;  %v6959_v16 = vmul.f32 %v7773_v47, %v6945_v17 }
0x1f1b   :  { %v6933_v51 = vadd.f32 1e-05, %v6925_v55  ;;  %v6926_v36 = vmul.f32 0.0078125, %v6916_v20 }
0x1f1c   :  { %v6960_v8 = vmul.f32 %v7773_v47, %v6946_v49  ;;  %v6973_v60 = vadd.f32 %v7774_v12, %v6959_v16 }
0x1f1d   :  { %9459 = vrsqrt.f32 %v6933_v51  ;;  %v6934_v19 = vadd.f32 1e-05, %v6926_v36 }
0x1f1e   :  { %v6974_v6 = vadd.f32 %v7774_v12, %v6960_v8 }
0x1f1f   :  { %v9456_v34 = vpop.eup %9455  ;;  %9461 = vrsqrt.f32 %v6934_v19 }
0x1f20   :  { %v6918_v42 = vpop.xlane.xlu1 %6917  ;;  %v6981_v23 = vpack.c.bf16 %v6974_v6, %v6973_v60  ;;  %v6947_v28 = vmul.f32 %v9456_v34, %v12941_v0 }
0x1f21   :  { %v9458_v1 = vpop.eup %9457  ;;  %v6927_v35 = vmul.f32 0.0078125, %v6918_v42 }
0x1f22   :  { %v6920_v37 = vpop.xlane.xlu0 %6919  ;;  %8202 = vmatprep.mubr.bf16.mxu1 %v6981_v23  ;;  %v6948_v9 = vmul.f32 %v9458_v1, %v12943_v10  ;;  %v6961_v43 = vmul.f32 %v7773_v47, %v6947_v28 }
0x1f23   :  { %v6935_v52 = vadd.f32 1e-05, %v6927_v35  ;;  %v6928_v29 = vmul.f32 0.0078125, %v6920_v37  ;;  %8203 = vmatmul.mubr.bf16.vlgmr.msra.gmra.mrb[152].mxu1 %v6981_v23 }
0x1f24   :  { %v6962_v44 = vmul.f32 %v7773_v47, %v6948_v9  ;;  %v6975_v30 = vadd.f32 %v7774_v12, %v6961_v43 }
0x1f25   :  { %9463 = vrsqrt.f32 %v6935_v52  ;;  %v6936_v58 = vadd.f32 1e-05, %v6928_v29 }
0x1f26   :  { %v6976_v39 = vadd.f32 %v7774_v12, %v6962_v44 }
0x1f27   :  { %v9460_v45 = vpop.eup %9459  ;;  %9465 = vrsqrt.f32 %v6936_v58 }
0x1f28   :  { %v6982_v15 = vpack.c.bf16 %v6976_v39, %v6975_v30  ;;  %v6949_v0 = vmul.f32 %v9460_v45, %v12949_v32 }
0x1f29   :  { %v9462_v61 = vpop.eup %9461 }
0x1f2a   :  { %8204 = vmatprep.mubr.bf16.mxu1 %v6982_v15  ;;  %v6950_v56 = vmul.f32 %v9462_v61, %v12951_v18  ;;  %v6963_v54 = vmul.f32 %v7773_v47, %v6949_v0  ;;  %v7188_v18 = vpop.permute.xlu1 %7187  ;;  %v7191_v57 = vpop.permute.xlu0 %7190 }
0x1f2b   :  { %8205 = vmatmul.mubr.bf16.gmra.mrb[156].mxu1 %v6982_v15  ;;  %vm7210_vm8 = vcmp.eq.s32.totalorder %v13530_v46, %v7188_v18  ;;  %vm7211_vm1 = vcmp.eq.s32.totalorder %v13531_v53, %v7188_v18  ;;  %vm7212_vm6 = vcmp.eq.s32.totalorder %v13530_v46, %v7191_v57  ;;  %vm7213_vm7 = vcmp.eq.s32.totalorder %v13531_v53, %v7191_v57  ;;  %v7184_v18 = vld [vmem:[%s13529_s17 + $0x30] sm:$0xff] }
0x1f2c   :  { %v6964_v10 = vmul.f32 %v7773_v47, %v6950_v56  ;;  %v6977_v22 = vadd.f32 %v7774_v12, %v6963_v54 }
0x1f2e   :  { %v6978_v59 = vadd.f32 %v7774_v12, %v6964_v10  ;;  %v7194_v33 = vpop.permute.xlu1 %7193  ;;  %v7200_v6 = vpop.permute.xlu0 %7199 }
0x1f2f   :  { %v9464_v2 = vpop.eup %9463  ;;  %vm7214_vm13 = vcmp.eq.s32.totalorder %v13530_v46, %v7194_v33  ;;  %vm7215_vm15 = vcmp.eq.s32.totalorder %v13531_v53, %v7194_v33  ;;  %vm7218_vm4 = vcmp.eq.s32.totalorder %v13530_v46, %v7200_v6  ;;  %vm7219_vm5 = vcmp.eq.s32.totalorder %v13531_v53, %v7200_v6 }
0x1f30   :  { %v6983_v21 = vpack.c.bf16 %v6978_v59, %v6977_v22  ;;  %v6951_v63 = vmul.f32 %v9464_v2, %v12957_v41  ;;  %v9834_v41 = vmov 0.0  }
0x1f31   :  { %v9466_v13 = vpop.eup %9465  ;;  %v7776_v48 = vsel %vm7211_vm1, 1.0, %v9834_v41  ;;  %v7777_v62 = vsel %vm7212_vm6, 1.0, %v9834_v41  ;;  %v7779_v51 = vsel %vm7214_vm13, 1.0, %v9834_v41  ;;  %v7783_v44 = vsel %vm7218_vm4, 1.0, %v9834_v41 }
0x1f32   :  { %8206 = vmatprep.mubr.bf16.mxu1 %v6983_v21  ;;  %v6952_v11 = vmul.f32 %v9466_v13, %v12959_v4  ;;  %v6965_v50 = vmul.f32 %v7773_v47, %v6951_v63  ;;  %v7775_v4 = vsel %vm7210_vm8, 1.0, %v9834_v41  ;;  %v7197_v7 = vpop.permute.xlu1 %7196  ;;  %v7784_v30 = vsel %vm7219_vm5, 1.0, %v9834_v41 }
0x1f33   :  { %8207 = vmatmul.mubr.bf16.gmra.mrb[160].mxu1 %v6983_v21  ;;  %vm7216_vm2 = vcmp.eq.s32.totalorder %v13530_v46, %v7197_v7  ;;  %vm7217_vm3 = vcmp.eq.s32.totalorder %v13531_v53, %v7197_v7  ;;  %vm7330_vm8 = vcmask 7168  }
0x1f34   :  { %v6966_v32 = vmul.f32 %v7773_v47, %v6952_v11  ;;  %v6979_v31 = vadd.f32 %v7774_v12, %v6965_v50  ;;  %v7778_v47 = vsel %vm7213_vm7, 1.0, %v9834_v41  ;;  %v7781_v60 = vsel %vm7216_vm2, 1.0, %v9834_v41 }
0x1f35   :  { %v7782_v28 = vsel %vm7217_vm3, 1.0, %v9834_v41 }
0x1f36   :  { %v6980_v38 = vadd.f32 %v7774_v12, %v6966_v32  ;;  %v7780_v12 = vsel %vm7215_vm15, 1.0, %v9834_v41  ;;  %v7203_v37 = vpop.permute.xlu1 %7202 }
0x1f37   :  { %vm7220_vm9 = vcmp.eq.s32.totalorder %v13530_v46, %v7203_v37  ;;  %vm7221_vm12 = vcmp.eq.s32.totalorder %v13531_v53, %v7203_v37 }
0x1f38   :  { %v6984_v27 = vpack.c.bf16 %v6980_v38, %v6979_v31  ;;  %v7785_v15 = vsel %vm7220_vm9, 1.0, %v9834_v41  ;;  %v7786_v54 = vsel %vm7221_vm12, 1.0, %v9834_v41 }
0x1f3a   :  { %8208 = vmatprep.mubr.bf16.mxu1 %v6984_v27 }
0x1f3b   :  { %8209 = vmatmul.mubr.bf16.gmra.mrb[164].mxu1 %v6984_v27  ;;  %v7185_v27 = vld [vmem:[%s13529_s17 + $0x38] sm:$0xff] }
0x1ff6   :  { %v12999_v5 = vpop.f32.mrb[152].mxu1 }
0x1ff7   :  { %v7258_v25 = vmul.f32 %v7775_v4, %v12999_v5  ;;  %7387 = vst [vmem:[#allocation19] sm:$0xff] %v12999_v5  ;;  %v13004_v24 = vpop.f32.mrb[153].mxu1 }
0x1ff8   :  { %v7259_v40 = vmul.f32 %v7776_v48, %v13004_v24  ;;  %7388 = vst [vmem:[#allocation19 + $0x8] sm:$0xff] %v13004_v24  ;;  %v13009_v14 = vpop.f32.mrb[154].mxu1  ;;  %v7058_v3 = vmax.f32 %v12999_v5, %v13004_v24 }
0x1ff9   :  { %v7260_v26 = vmul.f32 %v7777_v62, %v13009_v14  ;;  %7389 = vst [vmem:[#allocation19 + $0x10] sm:$0xff] %v13009_v14  ;;  %v13016_v17 = vpop.f32.mrb[155].mxu1 }
0x1ffa   :  { %v7261_v55 = vmul.f32 %v7778_v47, %v13016_v17  ;;  %7390 = vst [vmem:[#allocation19 + $0x18] sm:$0xff] %v13016_v17  ;;  %7059 = vmax.xlane.f32.xlu1 %v7058_v3  ;;  %v7061_v20 = vmax.f32 %v13009_v14, %v13016_v17  ;;  %v13022_v49 = vadd.f32 %v7259_v40, %v7258_v25 }
0x1ffc   :  { %7062 = vmax.xlane.f32.xlu0 %v7061_v20  ;;  %v13026_v16 = vadd.f32 %v7261_v55, %v7260_v26 }
0x1ffe   :  { %v13031_v36 = vpop.f32.mrb[156].mxu1 }
0x1fff   :  { %v7262_v8 = vmul.f32 %v7779_v51, %v13031_v36  ;;  %7391 = vst [vmem:[#allocation19 + $0x20] sm:$0xff] %v13031_v36  ;;  %v13036_v19 = vpop.f32.mrb[157].mxu1 }
0x2000   :  { %v7263_v34 = vmul.f32 %v7780_v12, %v13036_v19  ;;  %7392 = vst [vmem:[#allocation19 + $0x28] sm:$0xff] %v13036_v19  ;;  %v13041_v42 = vpop.f32.mrb[158].mxu1  ;;  %v7064_v23 = vmax.f32 %v13031_v36, %v13036_v19 }
0x2001   :  { %v7264_v1 = vmul.f32 %v7781_v60, %v13041_v42  ;;  %7393 = vst [vmem:[#allocation19 + $0x30] sm:$0xff] %v13041_v42  ;;  %v13048_v35 = vpop.f32.mrb[159].mxu1 }
0x2002   :  { %v7265_v9 = vmul.f32 %v7782_v28, %v13048_v35  ;;  %7394 = vst [vmem:[#allocation19 + $0x38] sm:$0xff] %v13048_v35  ;;  %7065 = vmax.xlane.f32.xlu1 %v7064_v23  ;;  %v7067_v43 = vmax.f32 %v13041_v42, %v13048_v35  ;;  %v13054_v52 = vadd.f32 %v7263_v34, %v7262_v8 }
0x2004   :  { %7068 = vmax.xlane.f32.xlu0 %v7067_v43  ;;  %v13058_v29 = vadd.f32 %v7265_v9, %v7264_v1 }
0x2006   :  { %v13063_v58 = vpop.f32.mrb[160].mxu1 }
0x2007   :  { %v7266_v39 = vmul.f32 %v7783_v44, %v13063_v58  ;;  %7395 = vst [vmem:[#allocation19 + $0x40] sm:$0xff] %v13063_v58  ;;  %v13068_v45 = vpop.f32.mrb[161].mxu1 }
0x2008   :  { %v7267_v0 = vmul.f32 %v7784_v30, %v13068_v45  ;;  %7396 = vst [vmem:[#allocation19 + $0x48] sm:$0xff] %v13068_v45  ;;  %v13073_v61 = vpop.f32.mrb[162].mxu1  ;;  %v7070_v56 = vmax.f32 %v13063_v58, %v13068_v45 }
0x2009   :  { %v7268_v10 = vmul.f32 %v7785_v15, %v13073_v61  ;;  %7397 = vst [vmem:[#allocation19 + $0x50] sm:$0xff] %v13073_v61  ;;  %v13080_v22 = vpop.f32.mrb[163].mxu1 }
0x200a   :  { %v7269_v59 = vmul.f32 %v7786_v54, %v13080_v22  ;;  %7398 = vst [vmem:[#allocation19 + $0x58] sm:$0xff] %v13080_v22  ;;  %7071 = vmax.xlane.f32.xlu1 %v7070_v56  ;;  %v7073_v2 = vmax.f32 %v13073_v61, %v13080_v22  ;;  %v13086_v21 = vadd.f32 %v7267_v0, %v7266_v39 }
0x200c   :  { %7074 = vmax.xlane.f32.xlu0 %v7073_v2  ;;  %v13088_v63 = vadd.f32 %v7269_v59, %v7268_v10 }
0x200e   :  { %v13090_v13 = vpop.f32.mrb[164].mxu1 }
0x200f   :  { %7399 = vst [vmem:[#allocation19 + $0x60] sm:$0xff] %v13090_v13  ;;  %v13093_v11 = vpop.f32.mrb[165].mxu1 }
0x2010   :  { %7400 = vst [vmem:[#allocation19 + $0x68] sm:$0xff] %v13093_v11  ;;  %v13096_v50 = vpop.f32.mrb[166].mxu1  ;;  %v7076_v32 = vmax.f32 %v13090_v13, %v13093_v11 }
0x2011   :  { %7401 = vst [vmem:[#allocation19 + $0x70] sm:$0xff] %v13096_v50  ;;  %v13101_v31 = vpop.f32.mrb[167].mxu1 }
0x2012   :  { %v7079_v38 = vmax.f32 %v13096_v50, %v13101_v31  ;;  %7402 = vst [vmem:[#allocation19 + $0x78] sm:$0xff] %v13101_v31  ;;  %7077 = vmax.xlane.f32.xlu1 %v7076_v32 }
0x2014   :  { %7080 = vmax.xlane.f32.xlu0 %v7079_v38 }
0x2023   :  { %7208 = vperm.xlu1 %8626, %v7185_v27  }
0x202a   :  { %7205 = vperm.xlu0 %8625, %v7184_v18  }
0x2087   :  { %v13112_v57 = vpop.xlane.xlu1 %7059 }
0x2088   :  { %v7082_v33 = vsub.f32 %v12999_v5, %v13112_v57  ;;  %v7083_v4 = vsub.f32 %v13004_v24, %v13112_v57 }
0x2089   :  { %v13118_v48 = vpop.xlane.xlu0 %7062 }
0x208a   :  { %v7098_v25 = vmul.f32 1.442695, %v7082_v33  ;;  %v7100_v62 = vmul.f32 1.442695, %v7083_v4  ;;  %v7084_v40 = vsub.f32 %v13009_v14, %v13118_v48  ;;  %v7085_v3 = vsub.f32 %v13016_v17, %v13118_v48 }
0x208c   :  { %9467 = vpow2.f32 %v7098_v25  ;;  %v7102_v47 = vmul.f32 1.442695, %v7084_v40  ;;  %v7104_v26 = vmul.f32 1.442695, %v7085_v3 }
0x208d   :  { %9469 = vpow2.f32 %v7100_v62 }
0x208e   :  { %9471 = vpow2.f32 %v7102_v47 }
0x208f   :  { %9473 = vpow2.f32 %v7104_v26  ;;  %v13124_v5 = vpop.xlane.xlu1 %7065 }
0x2090   :  { %v7086_v24 = vsub.f32 %v13031_v36, %v13124_v5  ;;  %v7087_v7 = vsub.f32 %v13036_v19, %v13124_v5 }
0x2091   :  { %v13130_v55 = vpop.xlane.xlu0 %7068 }
0x2092   :  { %v7106_v14 = vmul.f32 1.442695, %v7086_v24  ;;  %v7108_v20 = vmul.f32 1.442695, %v7087_v7  ;;  %v7088_v17 = vsub.f32 %v13041_v42, %v13130_v55  ;;  %v7089_v51 = vsub.f32 %v13048_v35, %v13130_v55 }
0x2094   :  { %9475 = vpow2.f32 %v7106_v14  ;;  %v7110_v12 = vmul.f32 1.442695, %v7088_v17  ;;  %v7112_v8 = vmul.f32 1.442695, %v7089_v51 }
0x2095   :  { %9477 = vpow2.f32 %v7108_v20 }
0x2096   :  { %v9468_v60 = vpop.eup %9467  ;;  %9479 = vpow2.f32 %v7110_v12 }
0x2097   :  { %v9470_v36 = vpop.eup %9469  ;;  %9481 = vpow2.f32 %v7112_v8  ;;  %v13136_v6 = vpop.xlane.xlu1 %7071 }
0x2098   :  { %v9472_v19 = vpop.eup %9471  ;;  %v7090_v34 = vsub.f32 %v13063_v58, %v13136_v6  ;;  %v7091_v42 = vsub.f32 %v13068_v45, %v13136_v6  ;;  %v7130_v23 = vadd.f32 %v9470_v36, %v9468_v60 }
0x2099   :  { %v9474_v28 = vpop.eup %9473  ;;  %v13142_v1 = vpop.xlane.xlu0 %7074 }
0x209a   :  { %v7114_v35 = vmul.f32 1.442695, %v7090_v34  ;;  %v7116_v37 = vmul.f32 1.442695, %v7091_v42  ;;  %v7092_v9 = vsub.f32 %v13073_v61, %v13142_v1  ;;  %v7093_v43 = vsub.f32 %v13080_v22, %v13142_v1  ;;  %7131 = vadd.xlane.f32.xlu0 %v7130_v23 }
0x209b   :  { %v7133_v44 = vadd.f32 %v9474_v28, %v9472_v19 }
0x209c   :  { %9483 = vpow2.f32 %v7114_v35  ;;  %v7118_v30 = vmul.f32 1.442695, %v7092_v9  ;;  %v7120_v58 = vmul.f32 1.442695, %v7093_v43  ;;  %v13214_v9 = vld [vmem:[%s13532_s30 + $0x20] sm:$0xff] }
0x209d   :  { %9485 = vpow2.f32 %v7116_v37  ;;  %7134 = vadd.xlane.f32.xlu1 %v7133_v44  ;;  %v7318_v44 = vcvt.s32.f32 %v13214_v9 }
0x209e   :  { %v9476_v39 = vpop.eup %9475  ;;  %9487 = vpow2.f32 %v7118_v30 }
0x209f   :  { %v9478_v45 = vpop.eup %9477  ;;  %9489 = vpow2.f32 %v7120_v58  ;;  %v13148_v15 = vpop.xlane.xlu1 %7077  ;;  %v13223_v58 = vld [vmem:[%s13532_s30 + $0x28] sm:$0xff] }
0x20a0   :  { %v9480_v0 = vpop.eup %9479  ;;  %v7094_v61 = vsub.f32 %v13090_v13, %v13148_v15  ;;  %v7095_v56 = vsub.f32 %v13093_v11, %v13148_v15  ;;  %v7136_v54 = vadd.f32 %v9478_v45, %v9476_v39  ;;  %v7362_v39 = vsel %vm7330_vm8, %v7318_v44, 0.0 }
0x20a1   :  { %v9482_v10 = vpop.eup %9481  ;;  %v13154_v22 = vpop.xlane.xlu0 %7080  ;;  %v7319_v45 = vcvt.s32.f32 %v13223_v58 }
0x20a2   :  { %v7122_v59 = vmul.f32 1.442695, %v7094_v61  ;;  %v7124_v2 = vmul.f32 1.442695, %v7095_v56  ;;  %v7096_v32 = vsub.f32 %v13096_v50, %v13154_v22  ;;  %v7097_v38 = vsub.f32 %v13101_v31, %v13154_v22  ;;  %7137 = vadd.xlane.f32.xlu0 %v7136_v54  ;;  %v13232_v61 = vld [vmem:[%s13532_s30 + $0x30] sm:$0xff] }
0x20a3   :  { %v7209_v27 = vpop.permute.xlu1 %7208  ;;  %v7139_v18 = vadd.f32 %v9482_v10, %v9480_v0  ;;  %v7364_v56 = vsel %vm7330_vm8, %v7319_v45, 0.0  ;;  %v7320_v54 = vcvt.s32.f32 %v13232_v61 }
0x20a4   :  { %9491 = vpow2.f32 %v7122_v59  ;;  %v7126_v33 = vmul.f32 1.442695, %v7096_v32  ;;  %v7128_v4 = vmul.f32 1.442695, %v7097_v38  ;;  %vm7224_vm10 = vcmp.eq.s32.totalorder %v13530_v46, %v7209_v27  ;;  %v13241_v59 = vld [vmem:[%s13532_s30 + $0x38] sm:$0xff] }
0x20a5   :  { %9493 = vpow2.f32 %v7124_v2  ;;  %vm7225_vm0 = vcmp.eq.s32.totalorder %v13531_v53, %v7209_v27  ;;  %v7789_v25 = vsel %vm7224_vm10, 1.0, %v9834_v41  ;;  %v7366_v2 = vsel %vm7330_vm8, %v7320_v54, 0.0 }
0x20a6   :  { %v9484_v62 = vpop.eup %9483  ;;  %9495 = vpow2.f32 %v7126_v33  ;;  %v7790_v40 = vsel %vm7225_vm0, 1.0, %v9834_v41  ;;  %v7272_v3 = vmul.f32 %v7789_v25, %v13096_v50  ;;  %7140 = vadd.xlane.f32.xlu0 %v7139_v18  ;;  %v7321_v32 = vcvt.s32.f32 %v13241_v59 }
0x20a7   :  { %v9486_v47 = vpop.eup %9485  ;;  %9497 = vpow2.f32 %v7128_v4  ;;  %v7273_v26 = vmul.f32 %v7790_v40, %v13101_v31 }
0x20a8   :  { %v9488_v24 = vpop.eup %9487  ;;  %v7142_v7 = vadd.f32 %v9486_v47, %v9484_v62  ;;  %v7368_v27 = vsel %vm7330_vm8, %v7321_v32, 0.0 }
0x20a9   :  { %v9490_v14 = vpop.eup %9489  ;;  %v7206_v20 = vpop.permute.xlu0 %7205  ;;  %v7295_v17 = vadd.f32 %v7273_v26, %v7272_v3 }
0x20aa   :  { %vm7222_vm11 = vcmp.eq.s32.totalorder %v13530_v46, %v7206_v20  ;;  %vm7223_vm14 = vcmp.eq.s32.totalorder %v13531_v53, %v7206_v20  ;;  %7143 = vadd.xlane.f32.xlu1 %v7142_v7  ;;  %v7145_v51 = vadd.f32 %v9490_v14, %v9488_v24  ;;  %v13181_v53 = vld [vmem:[%s13532_s30] sm:$0xff] }
0x20ab   :  { %v7787_v12 = vsel %vm7222_vm11, 1.0, %v9834_v41  ;;  %v7788_v50 = vsel %vm7223_vm14, 1.0, %v9834_v41  ;;  %v13186_v41 = vld [vmem:[%s13532_s30 + $0x8] sm:$0xff] }
0x20ac   :  { %v7270_v8 = vmul.f32 %v7787_v12, %v13090_v13  ;;  %v7271_v60 = vmul.f32 %v7788_v50, %v13093_v11  ;;  %7146 = vadd.xlane.f32.xlu0 %v7145_v51  ;;  %v13205_v11 = vld [vmem:[%s13532_s30 + $0x18] sm:$0xff] }
0x20ad   :  { %v7317_v35 = vcvt.s32.f32 %v13205_v11 }
0x20ae   :  { %v9492_v31 = vpop.eup %9491  ;;  %v7292_v36 = vadd.f32 %v7271_v60, %v7270_v8 }
0x20af   :  { %v9494_v19 = vpop.eup %9493  ;;  %v7360_v43 = vsel %vm7330_vm8, %v7317_v35, 0.0 }
0x20b0   :  { %v9496_v34 = vpop.eup %9495  ;;  %v7148_v42 = vadd.f32 %v9494_v19, %v9492_v31 }
0x20b1   :  { %v9498_v23 = vpop.eup %9497 }
0x20b2   :  { %7149 = vadd.xlane.f32.xlu1 %v7148_v42  ;;  %v7151_v46 = vadd.f32 %v9498_v23, %v9496_v34 }
0x20b4   :  { %7152 = vadd.xlane.f32.xlu0 %v7151_v46 }
0x20b6   :  { %7275 = vadd.xlane.f32.xlu1 %v13022_v49  ;;  %v7314_v49 = vcvt.s32.f32 %v13181_v53 }
0x20b8   :  { %7278 = vadd.xlane.f32.xlu0 %v13026_v16  ;;  %v7315_v16 = vcvt.s32.f32 %v13186_v41 }
0x20ba   :  { %7281 = vadd.xlane.f32.xlu1 %v13054_v52  ;;  %v13193_v52 = vld [vmem:[%s13532_s30 + $0x10] sm:$0xff] }
0x20bc   :  { %7284 = vadd.xlane.f32.xlu0 %v13058_v29  ;;  %v7355_v29 = vsel %vm7330_vm8, %v7314_v49, 0.0 }
0x20be   :  { %7287 = vadd.xlane.f32.xlu1 %v13086_v21  ;;  %v7356_v21 = vsel %vm7330_vm8, %v7315_v16, 0.0 }
0x20bf   :  { %v7357_v13 = vadd.f32 %v7356_v21, %v7355_v29 }
0x20c0   :  { %7290 = vadd.xlane.f32.xlu0 %v13088_v63  ;;  %v7316_v63 = vcvt.s32.f32 %v13193_v52 }
0x20c2   :  { %7293 = vadd.xlane.f32.xlu1 %v7292_v36  ;;  %v7358_v28 = vsel %vm7330_vm8, %v7316_v63, 0.0 }
0x20c3   :  { %v7359_v37 = vadd.f32 %v7358_v28, %v7357_v13 }
0x20c4   :  { %7296 = vadd.xlane.f32.xlu0 %v7295_v17 }
0x20c5   :  { %v7361_v30 = vadd.f32 %v7360_v43, %v7359_v37 }
0x20c7   :  { %v7363_v0 = vadd.f32 %v7362_v39, %v7361_v30 }
0x20c9   :  { %v7365_v10 = vadd.f32 %v7364_v56, %v7363_v0 }
0x20cb   :  { %v7367_v38 = vadd.f32 %v7366_v2, %v7365_v10 }
0x20cd   :  { %v7369_v18 = vadd.f32 %v7368_v27, %v7367_v38 }
0x20cf   :  { %7370 = vadd.xlane.f32.xlu0 %v7369_v18 }
0x2127   :  { %v7132_v33 = vpop.xlane.xlu0 %7131 }
0x2128   :  { %9499 = vlog2.f32 %v7132_v33 }
0x212a   :  { %v7135_v25 = vpop.xlane.xlu1 %7134 }
0x212b   :  { %9501 = vlog2.f32 %v7135_v25 }
0x212f   :  { %v7138_v4 = vpop.xlane.xlu0 %7137 }
0x2130   :  { %9503 = vlog2.f32 %v7138_v4 }
0x2132   :  { %v9500_v47 = vpop.eup %9499 }
0x2133   :  { %v7141_v62 = vpop.xlane.xlu0 %7140  ;;  %v7155_v24 = vmul.f32 0.6931472, %v9500_v47 }
0x2134   :  { %9505 = vlog2.f32 %v7141_v62 }
0x2135   :  { %v9502_v26 = vpop.eup %9501  ;;  %v7170_v8 = vadd.f32 %v7155_v24, %v13112_v57 }
0x2136   :  { %v7157_v20 = vmul.f32 0.6931472, %v9502_v26 }
0x2137   :  { %v7144_v40 = vpop.xlane.xlu1 %7143 }
0x2138   :  { %9507 = vlog2.f32 %v7144_v40  ;;  %v7171_v19 = vadd.f32 %v7157_v20, %v13118_v48 }
0x2139   :  { %v7147_v3 = vpop.xlane.xlu0 %7146 }
0x213a   :  { %9509 = vlog2.f32 %v7147_v3  ;;  %v9504_v7 = vpop.eup %9503 }
0x213b   :  { %v7159_v50 = vmul.f32 0.6931472, %v9504_v7 }
0x213d   :  { %v7172_v21 = vadd.f32 %v7159_v50, %v13124_v5 }
0x213e   :  { %v9506_v17 = vpop.eup %9505 }
0x213f   :  { %v7150_v14 = vpop.xlane.xlu1 %7149  ;;  %v7161_v31 = vmul.f32 0.6931472, %v9506_v17 }
0x2140   :  { %9511 = vlog2.f32 %v7150_v14 }
0x2141   :  { %v7153_v51 = vpop.xlane.xlu0 %7152  ;;  %v7173_v43 = vadd.f32 %v7161_v31, %v13130_v55 }
0x2142   :  { %v9508_v12 = vpop.eup %9507  ;;  %9513 = vlog2.f32 %v7153_v51 }
0x2143   :  { %v7276_v60 = vpop.xlane.xlu1 %7275  ;;  %v7163_v42 = vmul.f32 0.6931472, %v9508_v12 }
0x2144   :  { %v7298_v36 = vsub.f32 %v7170_v8, %v7276_v60  ;;  %v9510_v34 = vpop.eup %9509 }
0x2145   :  { %v7279_v23 = vpop.xlane.xlu0 %7278  ;;  %v7165_v28 = vmul.f32 0.6931472, %v9510_v34  ;;  %v7174_v48 = vadd.f32 %v7163_v42, %v13136_v6 }
0x2146   :  { %v7322_v46 = vmul.f32 %v7314_v49, %v7298_v36  ;;  %v7299_v29 = vsub.f32 %v7171_v19, %v7279_v23 }
0x2147   :  { %v7282_v13 = vpop.xlane.xlu1 %7281  ;;  %v7175_v6 = vadd.f32 %v7165_v28, %v13142_v1 }
0x2148   :  { %v7323_v37 = vmul.f32 %v7315_v16, %v7299_v29  ;;  %v7300_v57 = vsub.f32 %v7172_v21, %v7282_v13  ;;  %v7331_v0 = vsel %vm7330_vm8, %v7322_v46, 0.0 }
0x2149   :  { %v7285_v30 = vpop.xlane.xlu0 %7284 }
0x214a   :  { %v9512_v39 = vpop.eup %9511  ;;  %v7332_v53 = vsel %vm7330_vm8, %v7323_v37, 0.0  ;;  %v7324_v49 = vmul.f32 %v7316_v63, %v7300_v57  ;;  %v7301_v5 = vsub.f32 %v7173_v43, %v7285_v30 }
0x214b   :  { %v7167_v56 = vmul.f32 0.6931472, %v9512_v39  ;;  %v7333_v10 = vadd.f32 %v7332_v53, %v7331_v0  ;;  %v7288_v2 = vpop.xlane.xlu1 %7287 }
0x214c   :  { %v9514_v41 = vpop.eup %9513  ;;  %v7334_v16 = vsel %vm7330_vm8, %v7324_v49, 0.0  ;;  %v7325_v55 = vmul.f32 %v7317_v35, %v7301_v5  ;;  %v7302_v38 = vsub.f32 %v7174_v48, %v7288_v2 }
0x214d   :  { %v7169_v27 = vmul.f32 0.6931472, %v9514_v41  ;;  %v7335_v18 = vadd.f32 %v7334_v16, %v7333_v10  ;;  %v7291_v33 = vpop.xlane.xlu0 %7290  ;;  %v7176_v4 = vadd.f32 %v7167_v56, %v13148_v15 }
0x214e   :  { %v7336_v52 = vsel %vm7330_vm8, %v7325_v55, 0.0  ;;  %v7326_v63 = vmul.f32 %v7318_v44, %v7302_v38  ;;  %v7303_v25 = vsub.f32 %v7175_v6, %v7291_v33 }
0x214f   :  { %v7337_v62 = vadd.f32 %v7336_v52, %v7335_v18  ;;  %v7294_v40 = vpop.xlane.xlu1 %7293  ;;  %v7177_v3 = vadd.f32 %v7169_v27, %v13154_v22 }
0x2150   :  { %v7338_v11 = vsel %vm7330_vm8, %v7326_v63, 0.0  ;;  %v7327_v1 = vmul.f32 %v7319_v45, %v7303_v25  ;;  %v7304_v35 = vsub.f32 %v7176_v4, %v7294_v40 }
0x2151   :  { %v7339_v47 = vadd.f32 %v7338_v11, %v7337_v62  ;;  %v7297_v26 = vpop.xlane.xlu0 %7296 }
0x2152   :  { %v7340_v15 = vsel %vm7330_vm8, %v7327_v1, 0.0  ;;  %v7328_v24 = vmul.f32 %v7320_v54, %v7304_v35  ;;  %v7305_v9 = vsub.f32 %v7177_v3, %v7297_v26 }
0x2153   :  { %v7341_v44 = vadd.f32 %v7340_v15, %v7339_v47 }
0x2154   :  { %v7342_v7 = vsel %vm7330_vm8, %v7328_v24, 0.0  ;;  %v7329_v22 = vmul.f32 %v7321_v32, %v7305_v9 }
0x2155   :  { %v7343_v14 = vadd.f32 %v7342_v7, %v7341_v44 }
0x2156   :  { %v7344_v20 = vsel %vm7330_vm8, %v7329_v22, 0.0 }
0x2157   :  { %v7345_v58 = vadd.f32 %v7344_v20, %v7343_v14 }
0x2159   :  { %7346 = vadd.xlane.f32.xlu1 %v7345_v58 }
0x215c   :  { %v7371_v45 = vpop.xlane.xlu0 %7370 }
0x215d   :  { %v7372_v17 = vrot.slane %v7371_v45, 4 }
0x215f   :  { %v7373_v51 = vadd.f32 %v7372_v17, %v7371_v45 }
0x2161   :  { %v7374_v12 = vrot.slane %v7373_v51, 2 }
0x21e6   :  { %v7347_v50 = vpop.xlane.xlu1 %7346 }
0x21e7   :  { %v7348_v8 = vrot.slane %v7347_v50, 4 }
0x21e9   :  { %v7349_v61 = vadd.f32 %v7348_v8, %v7347_v50 }
0x21ea   :  { %9764 = shalt.err (!%p9761_p0)
}
0x21eb   :  { %s9765_s15 = scalar_lea.hbm %s13329_s20, 2048 }
0x21ec   :  { %p9766_p1 = scmp.ne.s32.totalorder %s13329_s20, %s9765_s15  ;;  %p9769_p2 = scmp.lt.u32.totalorder %s9765_s15, %s13329_s20 }
0x21ee   :  { %p9771_p3 = pnand %p9769_p2, %p9766_p1 }
0x21f0   :  { %9774 = shalt.err (!%p9771_p3)
}
0x21f1   :  { %7414 = dma.vmem_to_hbm [thread:$0]  %s7409_s24, 2048, %s13329_s20, [#allocation4], %s9820_s12, %s9820_s12, %s9818_s25   ;;  %v7375_v54 = vadd.f32 %v7374_v12, %v7373_v51  ;;  %v7350_v59 = vrot.slane %v7349_v61, 2  ;;  %vm7385_vm1 = vcmask 0  }
0x21f2   :  { %s9836_s10 = smov 1.0   ;;  %s9837_s21 = smov [#allocation20]  }
0x21f3   :  { %v7351_v32 = vadd.f32 %v7350_v59, %v7349_v61  ;;  %v7376_v60 = vrot.slane %v7375_v54, 1  ;;  %s7421_s19 = sshll.u32 %s9837_s21, 4  ;;  %s7422_s19 = int_to_ptr.vmem [resolvable:$true] %s7421_s19 }
0x21f4   :  { %s9775_s12 = scalar_lea.vmem %s7422_s19, 16  ;;  %s9779_s13 = scalar_lea.vmem %s7422_s19, 32 }
0x21f5   :  { %v7352_v31 = vrot.slane %v7351_v32, 1  ;;  %v7377_v19 = vadd.f32 %v7376_v60, %v7375_v54  ;;  %p9776_p4 = scmp.ne.s32.totalorder %s7422_s19, %s9775_s12  ;;  %p9780_p5 = scmp.lt.s32.totalorder %s7422_s19, %s7422_s19 }
0x21f6   :  { %p9781_p6 = scmp.lt.s32.totalorder %s9779_s13, %s9775_s12 }
0x21f7   :  { %v7353_v36 = vadd.f32 %v7352_v31, %v7351_v32 }
0x21f8   :  { %p9782_p7 = por %p9781_p6, %p9780_p5 }
0x21f9   :  { %8594 = vpush %v7353_v36 }
0x21fa   :  { %8596 = vpush %v7377_v19  ;;  %p9783_p8 = pnand %p9782_p7, %p9776_p4 }
0x222a   :  { %s8595_s2 = spop %8594 }
0x222b   :  { %s8597_s30 = spop %8596 }
0x222c   :  { %s7379_s27 = smax.f32 %s9836_s10, %s8597_s30 }
0x222d   :  { %v7380_v34 = vstv %s7379_s27 }
0x222e   :  { %9515 = vrcp.f32 %v7380_v34 }
0x2238   :  { %v9516_v42 = vpop.eup %9515 }
0x2239   :  { %8598 = vpush %v9516_v42 }
0x226a   :  { %s8599_s20 = spop %8598 }
0x226b   :  { %s7383_s25 = smul.f32 %s8599_s20, %s8595_s2 }
0x226d   :  { %v7384_v23 = vstv %s7383_s25 }
0x226e   :  { %7386 = vst.msk [vmem:[#allocation20] sm:$0x1] %vm7385_vm1, %v7384_v23 }
0x226f   :  { %9786 = shalt.err (!%p9783_p8)
}
0x2270   :  { %s13533_s22 = sld [smem:[#allocation61_spill]] }
0x2276   :  { %s9787_s17 = scalar_lea.hbm %s13533_s22, 16 }
0x2277   :  { %p9788_p9 = scmp.ne.s32.totalorder %s13533_s22, %s9787_s17  ;;  %p9791_p10 = scmp.lt.u32.totalorder %s9787_s17, %s13533_s22 }
0x2279   :  { %p9793_p11 = pnand %p9791_p10, %p9788_p9 }
0x227b   :  { %9796 = shalt.err (!%p9793_p11)
}
0x227c   :  { %7424 = dma.vmem_to_hbm [thread:$0]  %s7422_s19, 16, %s13533_s22, [#allocation21]  }
0x227d   :  { %9809 = dma.done.wait [#allocation4], 2048  }
0x227e   :  { %9810 = vsyncadd [#allocation4], 4294965248 }
0x227f   :  { %9811 = dma.done.wait [#allocation21], 16  }
0x2280   :  { %9812 = vsyncadd [#allocation21], 4294967280 }
0x2281   :  { %7431 = vsyncpa [#allocation3], 1 }
0x2282   :  { %7432 = vsyncpa [#allocation6], 1 }
0x2283   :  { %7433 = vsyncpa [#allocation9], 1 }
0x2284   :  { %7434 = vsyncpa [#allocation12], 1 }
0x2285   :  { %7435 = vsyncpa [#allocation15], 1 }
0x2286   :  { %7436 = vsyncpa [#allocation18], 1 }
0x2287   :  { %7437 = vsyncpa [#allocation4], 1 }
0x2288   :  { %7438 = vsyncpa [#allocation21], 1 }

</bundles_post_ra>
